<compile_context>
chip_gen: v6e
topology: v6e:2x2x1
jax: 0.10.0
libtpu: 0.0.40
codegen_flags: <defaults>
</compile_context>

<pallas_src>
import jax
import jax.numpy as jnp
from jax.experimental import pallas as pl
from jax.experimental.pallas import tpu as pltpu


# ----------------------------------------------------------------------------
# Pallas kernels
# ----------------------------------------------------------------------------
def _conv_relu_pool_kernel(p_ref, w_ref, b_ref, o_ref):
    """Fused conv (as im2col matmul) + bias + ReLU + 2x2 max-pool.

    p_ref: (1, 4, S, K)  quadrant-grouped patches for one batch element
    w_ref: (K, C), b_ref: (1, C), o_ref: (1, S, C)  with S = pooled H*W
    """
    w = w_ref[...]

    def qmat(q):
        return jnp.dot(p_ref[0, q], w, preferred_element_type=jnp.float32)

    # Bias is identical across the 4 window taps and ReLU is monotone, so
    # pool(relu(conv + b)) == relu(max_q(conv_q) + b).
    m = jnp.maximum(jnp.maximum(qmat(0), qmat(1)), jnp.maximum(qmat(2), qmat(3)))
    o_ref[0] = jnp.maximum(m + b_ref[...], 0.0).astype(o_ref.dtype)


def conv_relu_pool(patches, w, b):
    """patches: (B, 4, S, K) -> (B, S, C). One grid step per batch element."""
    B, Q, S, K = patches.shape
    C = w.shape[1]
    return pl.pallas_call(
        _conv_relu_pool_kernel,
        out_shape=jax.ShapeDtypeStruct((B, S, C), jnp.float32),
        grid=(B,),
        in_specs=[
            pl.BlockSpec((1, Q, S, K), lambda i: (i, 0, 0, 0)),
            pl.BlockSpec((K, C), lambda i: (0, 0)),
            pl.BlockSpec((1, C), lambda i: (0, 0)),
        ],
        out_specs=pl.BlockSpec((1, S, C), lambda i: (i, 0, 0)),
        compiler_params=pltpu.CompilerParams(dimension_semantics=("parallel",)),
    )(patches, w, b.reshape(1, C))


def _mlp_kernel(x_ref, w1_ref, b1_ref, w2_ref, b2_ref, o_ref):
    """Fused fc1 + ReLU + fc2 with bf16 weights, f32 accumulation."""
    h = jnp.dot(x_ref[...].astype(jnp.bfloat16), w1_ref[...],
                preferred_element_type=jnp.float32)
    h = jnp.maximum(h + b1_ref[...], 0.0)
    # TODO(synk): dropout(0.5) is eval-mode identity here (no stochastic drop).
    o = jnp.dot(h.astype(jnp.bfloat16), w2_ref[...],
                preferred_element_type=jnp.float32)
    o_ref[...] = (o + b2_ref[...]).astype(o_ref.dtype)


def mlp_head(x, w1, b1, w2, b2):
    B, K = x.shape
    H = w1.shape[1]
    N = w2.shape[1]
    return pl.pallas_call(
        _mlp_kernel,
        out_shape=jax.ShapeDtypeStruct((B, N), jnp.float32),
        grid=(1,),
        in_specs=[
            pl.BlockSpec((B, K), lambda i: (0, 0)),
            pl.BlockSpec((K, H), lambda i: (0, 0)),
            pl.BlockSpec((1, H), lambda i: (0, 0)),
            pl.BlockSpec((H, N), lambda i: (0, 0)),
            pl.BlockSpec((1, N), lambda i: (0, 0)),
        ],
        out_specs=pl.BlockSpec((B, N), lambda i: (0, 0)),
    )(x, w1, b1.reshape(1, H), w2, b2.reshape(1, N))


# ----------------------------------------------------------------------------
# JAX glue
# ----------------------------------------------------------------------------
def _pooled_conv_patches(x, kh=3, kw=3, conv_stride=2, pool=2):
    """Quadrant-grouped im2col for conv(stride 2) followed by a 2x2 max-pool.

    x: (B, H, W) or (B, H, W, C).  Returns (B, pool*pool, Hp*Wp, kh*kw*C)
    where patches[b, a*pool+b2, p*Wp+q, :] is the receptive field of conv
    output (pool*p + a, pool*q + b2): the 4 conv positions of each pooling
    window sit on axis 1, so the kernel fuses the pool as a 4-way max.
    Patch feature order is (kh, kw, C_in), matching the permuted conv weights.
    """
    if x.ndim == 3:
        x = x[..., None]
    B, H, W, C = x.shape
    Ho = (H - kh) // conv_stride + 1
    Wo = (W - kw) // conv_stride + 1
    Hp, Wp = Ho // pool, Wo // pool
    step = conv_stride * pool
    quads = []
    for a in range(pool):
        for b in range(pool):
            taps = []
            for di in range(kh):
                for dj in range(kw):
                    sr = conv_stride * a + di
                    sc = conv_stride * b + dj
                    taps.append(x[:, sr: sr + step * (Hp - 1) + 1: step,
                                     sc: sc + step * (Wp - 1) + 1: step, :])
            quads.append(jnp.stack(taps, axis=3))          # (B, Hp, Wp, kh*kw, C)
    p = jnp.stack(quads, axis=1)                           # (B, 4, Hp, Wp, kh*kw, C)
    return p.reshape(B, pool * pool, Hp * Wp, kh * kw * C)


def init_params(key, num_classes=13):
    """Deterministic synthetic params in PyTorch layouts, converted for the kernels."""
    ks = jax.random.split(key, 8)
    conv1_w = 0.1 * jax.random.normal(ks[0], (32, 1, 3, 3), jnp.float32)
    conv1_b = 0.1 * jax.random.normal(ks[1], (32,), jnp.float32)
    conv2_w = 0.05 * jax.random.normal(ks[2], (64, 32, 3, 3), jnp.float32)
    conv2_b = 0.05 * jax.random.normal(ks[3], (64,), jnp.float32)
    fc1_w = 0.02 * jax.random.normal(ks[4], (512, 3072), jnp.float32)
    fc1_b = 0.02 * jax.random.normal(ks[5], (512,), jnp.float32)
    fc2_w = 0.05 * jax.random.normal(ks[6], (num_classes, 512), jnp.float32)
    fc2_b = 0.05 * jax.random.normal(ks[7], (num_classes,), jnp.float32)

    # conv weights: (Cout, Cin, kh, kw) -> (kh, kw, Cin, Cout) -> (kh*kw*Cin, Cout)
    w1 = jnp.transpose(conv1_w, (2, 3, 1, 0)).reshape(9, 32)
    w2 = jnp.transpose(conv2_w, (2, 3, 1, 0)).reshape(9 * 32, 64)

    # fc1: permute input features once so the kernel consumes the NHWC flatten
    # (spatial-major, channel-minor) directly.  PyTorch flatten index is
    # c*48 + s; the kernel's flatten index is s*64 + c.
    wfc1 = jnp.transpose(fc1_w.reshape(512, 64, 48), (0, 2, 1)).reshape(512, 3072).T

    return {
        "w1": w1, "b1": conv1_b,
        "w2": w2, "b2": conv2_b,
        "wfc1": wfc1.astype(jnp.bfloat16),        # (3072, 512) bf16
        "bfc1": fc1_b,
        "wfc2": fc2_w.T.astype(jnp.bfloat16),     # (512, num_classes) bf16
        "bfc2": fc2_b,
    }


@jax.jit
def motion_classifier_forward(x, params):
    """x: (B, H, W) float32 — same as the PyTorch input before .unsqueeze(1)."""
    B = x.shape[0]

    # conv1 (3x3, stride 2) + ReLU + 2x2 max-pool, fused in one kernel
    p1 = _pooled_conv_patches(x)                              # (B, 4, 825, 9)
    y1 = conv_relu_pool(p1, params["w1"], params["b1"])       # (B, 825, 32)
    y1 = y1.reshape(B, 25, 33, 32)

    # conv2 (3x3, stride 2) + ReLU + 2x2 max-pool, fused in one kernel
    p2 = _pooled_conv_patches(y1)                             # (B, 4, 48, 288)
    y2 = conv_relu_pool(p2, params["w2"], params["b2"])       # (B, 48, 64)

    # NHWC flatten is free; wfc1's rows were pre-permuted to match this order.
    flat = y2.reshape(B, 3072)

    # fc1 + ReLU + fc2 fused (dropout is eval-mode identity)
    return mlp_head(flat, params["wfc1"], params["bfc1"],
                    params["wfc2"], params["bfc2"])


@jax.jit
def _reference_forward(x, params):
    """Pure-XLA reference (f32) with the same parameters, for a sanity check."""
    B = x.shape[0]
    xi = x[..., None]
    w1 = params["w1"].reshape(3, 3, 1, 32)
    y = jax.lax.conv_general_dilated(xi, w1, (2, 2), "VALID",
                                     dimension_numbers=("NHWC", "HWIO", "NHWC"))
    y = jax.nn.relu(y + params["b1"])
    y = jax.lax.reduce_window(y, -jnp.inf, jax.lax.max,
                              (1, 2, 2, 1), (1, 2, 2, 1), "VALID")
    w2 = params["w2"].reshape(3, 3, 32, 64)
    y = jax.lax.conv_general_dilated(y, w2, (2, 2), "VALID",
                                     dimension_numbers=("NHWC", "HWIO", "NHWC"))
    y = jax.nn.relu(y + params["b2"])
    y = jax.lax.reduce_window(y, -jnp.inf, jax.lax.max,
                              (1, 2, 2, 1), (1, 2, 2, 1), "VALID")
    flat = y.reshape(B, 3072)                                 # NHWC flatten
    h = jax.nn.relu(flat @ params["wfc1"].astype(jnp.float32) + params["bfc1"])
    return h @ params["wfc2"].astype(jnp.float32) + params["bfc2"]


if __name__ == "__main__":
    key = jax.random.PRNGKey(0)
    k_x, k_p = jax.random.split(key)
    # smallest spatial size consistent with .view(-1, 3072) in the module
    x = jax.random.normal(k_x, (2, 101, 135), jnp.float32)
    params = init_params(k_p, num_classes=13)

    logits = motion_classifier_forward(x, params)
    logits = jax.block_until_ready(logits)
    assert logits.shape == (2, 13) and logits.dtype == jnp.float32
    assert bool(jnp.all(jnp.isfinite(logits)))

    ref = jax.block_until_ready(_reference_forward(x, params))
    assert bool(jnp.allclose(logits, ref, rtol=5e-2, atol=5e-2))

    print("KERNEL_OK")
</pallas_src>

<mosaic_0001>
module attributes {stable_mosaic.version = 11 : i64} {
  func.func @_conv_relu_pool_kernel(%arg0: i32, %arg1: memref<1x4x825x9xf32, #tpu.memory_space<vmem>>, %arg2: memref<9x32xf32, #tpu.memory_space<vmem>>, %arg3: memref<1x32xf32, #tpu.memory_space<vmem>>, %arg4: memref<1x825x32xf32, #tpu.memory_space<vmem>>) attributes {dimension_semantics = [#tpu.dimension_semantics<parallel>], iteration_bounds = array<i64: 2>, scalar_prefetch = 0 : i64, scratch_operands = 0 : i64, tpu.core_type = #tpu.core_type<tc>, window_params = [{transform_indices = @transform_0, window_bounds = array<i64: 1, 4, 825, 9>}, {pipeline_mode = #tpu.pipeline_mode<synchronous>, transform_indices = @transform_1, window_bounds = array<i64: 9, 32>}, {pipeline_mode = #tpu.pipeline_mode<synchronous>, transform_indices = @transform_2, window_bounds = array<i64: 1, 32>}, {transform_indices = @transform_3, window_bounds = array<i64: 1, 825, 32>}]} {
    %c0 = arith.constant 0 : index
    %c0_0 = arith.constant 0 : index
    %0 = vector.load %arg2[%c0, %c0_0] : memref<9x32xf32, #tpu.memory_space<vmem>>, vector<9x32xf32>
    %c0_1 = arith.constant 0 : index
    %c0_2 = arith.constant 0 : index
    %c0_3 = arith.constant 0 : index
    %c0_4 = arith.constant 0 : index
    %1 = vector.load %arg1[%c0_1, %c0_2, %c0_3, %c0_4] : memref<1x4x825x9xf32, #tpu.memory_space<vmem>>, vector<1x1x825x9xf32>
    %2 = vector.shape_cast %1 : vector<1x1x825x9xf32> to vector<825x9xf32>
    %cst = arith.constant dense<0.000000e+00> : vector<825x32xf32>
    %3 = tpu.matmul %2, %0, %cst {dimension_numbers = #tpu.dot_dimension_numbers<[1], [0], [0], [1], [0, 0, 1, 1], [], []>} : vector<825x9xf32>, vector<9x32xf32>, vector<825x32xf32> -> vector<825x32xf32>
    %c0_5 = arith.constant 0 : index
    %c1 = arith.constant 1 : index
    %c0_6 = arith.constant 0 : index
    %c0_7 = arith.constant 0 : index
    %4 = vector.load %arg1[%c0_5, %c1, %c0_6, %c0_7] : memref<1x4x825x9xf32, #tpu.memory_space<vmem>>, vector<1x1x825x9xf32>
    %5 = vector.shape_cast %4 : vector<1x1x825x9xf32> to vector<825x9xf32>
    %cst_8 = arith.constant dense<0.000000e+00> : vector<825x32xf32>
    %6 = tpu.matmul %5, %0, %cst_8 {dimension_numbers = #tpu.dot_dimension_numbers<[1], [0], [0], [1], [0, 0, 1, 1], [], []>} : vector<825x9xf32>, vector<9x32xf32>, vector<825x32xf32> -> vector<825x32xf32>
    %7 = arith.maximumf %3, %6 : vector<825x32xf32>
    %c0_9 = arith.constant 0 : index
    %c2 = arith.constant 2 : index
    %c0_10 = arith.constant 0 : index
    %c0_11 = arith.constant 0 : index
    %8 = vector.load %arg1[%c0_9, %c2, %c0_10, %c0_11] : memref<1x4x825x9xf32, #tpu.memory_space<vmem>>, vector<1x1x825x9xf32>
    %9 = vector.shape_cast %8 : vector<1x1x825x9xf32> to vector<825x9xf32>
    %cst_12 = arith.constant dense<0.000000e+00> : vector<825x32xf32>
    %10 = tpu.matmul %9, %0, %cst_12 {dimension_numbers = #tpu.dot_dimension_numbers<[1], [0], [0], [1], [0, 0, 1, 1], [], []>} : vector<825x9xf32>, vector<9x32xf32>, vector<825x32xf32> -> vector<825x32xf32>
    %c0_13 = arith.constant 0 : index
    %c3 = arith.constant 3 : index
    %c0_14 = arith.constant 0 : index
    %c0_15 = arith.constant 0 : index
    %11 = vector.load %arg1[%c0_13, %c3, %c0_14, %c0_15] : memref<1x4x825x9xf32, #tpu.memory_space<vmem>>, vector<1x1x825x9xf32>
    %12 = vector.shape_cast %11 : vector<1x1x825x9xf32> to vector<825x9xf32>
    %cst_16 = arith.constant dense<0.000000e+00> : vector<825x32xf32>
    %13 = tpu.matmul %12, %0, %cst_16 {dimension_numbers = #tpu.dot_dimension_numbers<[1], [0], [0], [1], [0, 0, 1, 1], [], []>} : vector<825x9xf32>, vector<9x32xf32>, vector<825x32xf32> -> vector<825x32xf32>
    %14 = arith.maximumf %10, %13 : vector<825x32xf32>
    %15 = arith.maximumf %7, %14 : vector<825x32xf32>
    %c0_17 = arith.constant 0 : index
    %c0_18 = arith.constant 0 : index
    %16 = vector.load %arg3[%c0_17, %c0_18] : memref<1x32xf32, #tpu.memory_space<vmem>>, vector<1x32xf32>
    %17 = vector.broadcast %16 : vector<1x32xf32> to vector<825x32xf32>
    %18 = arith.addf %15, %17 : vector<825x32xf32>
    %cst_19 = arith.constant 0.000000e+00 : f32
    %19 = vector.broadcast %cst_19 : f32 to vector<825x32xf32>
    %20 = arith.maximumf %18, %19 : vector<825x32xf32>
    %c0_20 = arith.constant 0 : index
    %c0_21 = arith.constant 0 : index
    %c0_22 = arith.constant 0 : index
    %21 = vector.load %arg4[%c0_20, %c0_21, %c0_22] : memref<1x825x32xf32, #tpu.memory_space<vmem>>, vector<1x825x32xf32>
    %22 = vector.shape_cast %21 : vector<1x825x32xf32> to vector<825x32xf32>
    %23 = vector.shape_cast %20 : vector<825x32xf32> to vector<1x825x32xf32>
    tpu.vector_store %arg4[%c0_20, %c0_21, %c0_22], %23 {strides = array<i32>} : memref<1x825x32xf32, #tpu.memory_space<vmem>>, vector<1x825x32xf32>,
    return
  }
  func.func @transform_0(%arg0: i32) -> (i32, i32, i32, i32) {
    %c0_i32 = arith.constant 0 : i32
    %c0_i32_0 = arith.constant 0 : i32
    %c0_i32_1 = arith.constant 0 : i32
    %c0_i32_2 = arith.constant 0 : i32
    return %arg0, %c0_i32, %c0_i32_0, %c0_i32_1 : i32, i32, i32, i32
  }
  func.func @transform_1(%arg0: i32) -> (i32, i32) {
    %c0_i32 = arith.constant 0 : i32
    %c0_i32_0 = arith.constant 0 : i32
    %c0_i32_1 = arith.constant 0 : i32
    return %c0_i32, %c0_i32_0 : i32, i32
  }
  func.func @transform_2(%arg0: i32) -> (i32, i32) {
    %c0_i32 = arith.constant 0 : i32
    %c0_i32_0 = arith.constant 0 : i32
    %c0_i32_1 = arith.constant 0 : i32
    return %c0_i32, %c0_i32_0 : i32, i32
  }
  func.func @transform_3(%arg0: i32) -> (i32, i32, i32) {
    %c0_i32 = arith.constant 0 : i32
    %c0_i32_0 = arith.constant 0 : i32
    %c0_i32_1 = arith.constant 0 : i32
    return %arg0, %c0_i32, %c0_i32_0 : i32, i32, i32
  }
}

module attributes {stable_mosaic.version = 11 : i64} {
  func.func @_conv_relu_pool_kernel(%arg0: i32, %arg1: memref<1x4x48x288xf32, #tpu.memory_space<vmem>>, %arg2: memref<288x64xf32, #tpu.memory_space<vmem>>, %arg3: memref<1x64xf32, #tpu.memory_space<vmem>>, %arg4: memref<1x48x64xf32, #tpu.memory_space<vmem>>) attributes {dimension_semantics = [#tpu.dimension_semantics<parallel>], iteration_bounds = array<i64: 2>, scalar_prefetch = 0 : i64, scratch_operands = 0 : i64, tpu.core_type = #tpu.core_type<tc>, window_params = [{transform_indices = @transform_0, window_bounds = array<i64: 1, 4, 48, 288>}, {pipeline_mode = #tpu.pipeline_mode<synchronous>, transform_indices = @transform_1, window_bounds = array<i64: 288, 64>}, {pipeline_mode = #tpu.pipeline_mode<synchronous>, transform_indices = @transform_2, window_bounds = array<i64: 1, 64>}, {transform_indices = @transform_3, window_bounds = array<i64: 1, 48, 64>}]} {
    %c0 = arith.constant 0 : index
    %c0_0 = arith.constant 0 : index
    %0 = vector.load %arg2[%c0, %c0_0] : memref<288x64xf32, #tpu.memory_space<vmem>>, vector<288x64xf32>
    %c0_1 = arith.constant 0 : index
    %c0_2 = arith.constant 0 : index
    %c0_3 = arith.constant 0 : index
    %c0_4 = arith.constant 0 : index
    %1 = vector.load %arg1[%c0_1, %c0_2, %c0_3, %c0_4] : memref<1x4x48x288xf32, #tpu.memory_space<vmem>>, vector<1x1x48x288xf32>
    %2 = vector.shape_cast %1 : vector<1x1x48x288xf32> to vector<48x288xf32>
    %cst = arith.constant dense<0.000000e+00> : vector<48x64xf32>
    %3 = tpu.matmul %2, %0, %cst {dimension_numbers = #tpu.dot_dimension_numbers<[1], [0], [0], [1], [0, 0, 1, 1], [], []>} : vector<48x288xf32>, vector<288x64xf32>, vector<48x64xf32> -> vector<48x64xf32>
    %c0_5 = arith.constant 0 : index
    %c1 = arith.constant 1 : index
    %c0_6 = arith.constant 0 : index
    %c0_7 = arith.constant 0 : index
    %4 = vector.load %arg1[%c0_5, %c1, %c0_6, %c0_7] : memref<1x4x48x288xf32, #tpu.memory_space<vmem>>, vector<1x1x48x288xf32>
    %5 = vector.shape_cast %4 : vector<1x1x48x288xf32> to vector<48x288xf32>
    %cst_8 = arith.constant dense<0.000000e+00> : vector<48x64xf32>
    %6 = tpu.matmul %5, %0, %cst_8 {dimension_numbers = #tpu.dot_dimension_numbers<[1], [0], [0], [1], [0, 0, 1, 1], [], []>} : vector<48x288xf32>, vector<288x64xf32>, vector<48x64xf32> -> vector<48x64xf32>
    %7 = arith.maximumf %3, %6 : vector<48x64xf32>
    %c0_9 = arith.constant 0 : index
    %c2 = arith.constant 2 : index
    %c0_10 = arith.constant 0 : index
    %c0_11 = arith.constant 0 : index
    %8 = vector.load %arg1[%c0_9, %c2, %c0_10, %c0_11] : memref<1x4x48x288xf32, #tpu.memory_space<vmem>>, vector<1x1x48x288xf32>
    %9 = vector.shape_cast %8 : vector<1x1x48x288xf32> to vector<48x288xf32>
    %cst_12 = arith.constant dense<0.000000e+00> : vector<48x64xf32>
    %10 = tpu.matmul %9, %0, %cst_12 {dimension_numbers = #tpu.dot_dimension_numbers<[1], [0], [0], [1], [0, 0, 1, 1], [], []>} : vector<48x288xf32>, vector<288x64xf32>, vector<48x64xf32> -> vector<48x64xf32>
    %c0_13 = arith.constant 0 : index
    %c3 = arith.constant 3 : index
    %c0_14 = arith.constant 0 : index
    %c0_15 = arith.constant 0 : index
    %11 = vector.load %arg1[%c0_13, %c3, %c0_14, %c0_15] : memref<1x4x48x288xf32, #tpu.memory_space<vmem>>, vector<1x1x48x288xf32>
    %12 = vector.shape_cast %11 : vector<1x1x48x288xf32> to vector<48x288xf32>
    %cst_16 = arith.constant dense<0.000000e+00> : vector<48x64xf32>
    %13 = tpu.matmul %12, %0, %cst_16 {dimension_numbers = #tpu.dot_dimension_numbers<[1], [0], [0], [1], [0, 0, 1, 1], [], []>} : vector<48x288xf32>, vector<288x64xf32>, vector<48x64xf32> -> vector<48x64xf32>
    %14 = arith.maximumf %10, %13 : vector<48x64xf32>
    %15 = arith.maximumf %7, %14 : vector<48x64xf32>
    %c0_17 = arith.constant 0 : index
    %c0_18 = arith.constant 0 : index
    %16 = vector.load %arg3[%c0_17, %c0_18] : memref<1x64xf32, #tpu.memory_space<vmem>>, vector<1x64xf32>
    %17 = vector.broadcast %16 : vector<1x64xf32> to vector<48x64xf32>
    %18 = arith.addf %15, %17 : vector<48x64xf32>
    %cst_19 = arith.constant 0.000000e+00 : f32
    %19 = vector.broadcast %cst_19 : f32 to vector<48x64xf32>
    %20 = arith.maximumf %18, %19 : vector<48x64xf32>
    %c0_20 = arith.constant 0 : index
    %c0_21 = arith.constant 0 : index
    %c0_22 = arith.constant 0 : index
    %21 = vector.load %arg4[%c0_20, %c0_21, %c0_22] : memref<1x48x64xf32, #tpu.memory_space<vmem>>, vector<1x48x64xf32>
    %22 = vector.shape_cast %21 : vector<1x48x64xf32> to vector<48x64xf32>
    %23 = vector.shape_cast %20 : vector<48x64xf32> to vector<1x48x64xf32>
    tpu.vector_store %arg4[%c0_20, %c0_21, %c0_22], %23 {strides = array<i32>} : memref<1x48x64xf32, #tpu.memory_space<vmem>>, vector<1x48x64xf32>,
    return
  }
  func.func @transform_0(%arg0: i32) -> (i32, i32, i32, i32) {
    %c0_i32 = arith.constant 0 : i32
    %c0_i32_0 = arith.constant 0 : i32
    %c0_i32_1 = arith.constant 0 : i32
    %c0_i32_2 = arith.constant 0 : i32
    return %arg0, %c0_i32, %c0_i32_0, %c0_i32_1 : i32, i32, i32, i32
  }
  func.func @transform_1(%arg0: i32) -> (i32, i32) {
    %c0_i32 = arith.constant 0 : i32
    %c0_i32_0 = arith.constant 0 : i32
    %c0_i32_1 = arith.constant 0 : i32
    return %c0_i32, %c0_i32_0 : i32, i32
  }
  func.func @transform_2(%arg0: i32) -> (i32, i32) {
    %c0_i32 = arith.constant 0 : i32
    %c0_i32_0 = arith.constant 0 : i32
    %c0_i32_1 = arith.constant 0 : i32
    return %c0_i32, %c0_i32_0 : i32, i32
  }
  func.func @transform_3(%arg0: i32) -> (i32, i32, i32) {
    %c0_i32 = arith.constant 0 : i32
    %c0_i32_0 = arith.constant 0 : i32
    %c0_i32_1 = arith.constant 0 : i32
    return %arg0, %c0_i32, %c0_i32_0 : i32, i32, i32
  }
}

module attributes {stable_mosaic.version = 11 : i64} {
  func.func @_mlp_kernel(%arg0: i32, %arg1: memref<2x3072xf32, #tpu.memory_space<vmem>>, %arg2: memref<3072x512xbf16, #tpu.memory_space<vmem>>, %arg3: memref<1x512xf32, #tpu.memory_space<vmem>>, %arg4: memref<512x13xbf16, #tpu.memory_space<vmem>>, %arg5: memref<1x13xf32, #tpu.memory_space<vmem>>, %arg6: memref<2x13xf32, #tpu.memory_space<vmem>>) attributes {dimension_semantics = [#tpu.dimension_semantics<arbitrary>], iteration_bounds = array<i64: 1>, scalar_prefetch = 0 : i64, scratch_operands = 0 : i64, tpu.core_type = #tpu.core_type<tc>, window_params = [{pipeline_mode = #tpu.pipeline_mode<synchronous>, transform_indices = @transform_0, window_bounds = array<i64: 2, 3072>}, {pipeline_mode = #tpu.pipeline_mode<synchronous>, transform_indices = @transform_1, window_bounds = array<i64: 3072, 512>}, {pipeline_mode = #tpu.pipeline_mode<synchronous>, transform_indices = @transform_2, window_bounds = array<i64: 1, 512>}, {pipeline_mode = #tpu.pipeline_mode<synchronous>, transform_indices = @transform_3, window_bounds = array<i64: 512, 13>}, {pipeline_mode = #tpu.pipeline_mode<synchronous>, transform_indices = @transform_4, window_bounds = array<i64: 1, 13>}, {pipeline_mode = #tpu.pipeline_mode<synchronous>, transform_indices = @transform_5, window_bounds = array<i64: 2, 13>}]} {
    %c0 = arith.constant 0 : index
    %c0_0 = arith.constant 0 : index
    %0 = vector.load %arg1[%c0, %c0_0] : memref<2x3072xf32, #tpu.memory_space<vmem>>, vector<2x3072xf32>
    %1 = arith.truncf %0 : vector<2x3072xf32> to vector<2x3072xbf16>
    %c0_1 = arith.constant 0 : index
    %c0_2 = arith.constant 0 : index
    %2 = vector.load %arg2[%c0_1, %c0_2] : memref<3072x512xbf16, #tpu.memory_space<vmem>>, vector<3072x512xbf16>
    %cst = arith.constant dense<0.000000e+00> : vector<2x512xf32>
    %3 = tpu.matmul %1, %2, %cst {dimension_numbers = #tpu.dot_dimension_numbers<[1], [0], [0], [1], [0, 0, 1, 1], [], []>} : vector<2x3072xbf16>, vector<3072x512xbf16>, vector<2x512xf32> -> vector<2x512xf32>
    %c0_3 = arith.constant 0 : index
    %c0_4 = arith.constant 0 : index
    %4 = vector.load %arg3[%c0_3, %c0_4] : memref<1x512xf32, #tpu.memory_space<vmem>>, vector<1x512xf32>
    %5 = vector.broadcast %4 : vector<1x512xf32> to vector<2x512xf32>
    %6 = arith.addf %3, %5 : vector<2x512xf32>
    %cst_5 = arith.constant 0.000000e+00 : f32
    %7 = vector.broadcast %cst_5 : f32 to vector<2x512xf32>
    %8 = arith.maximumf %6, %7 : vector<2x512xf32>
    %9 = arith.truncf %8 : vector<2x512xf32> to vector<2x512xbf16>
    %c0_6 = arith.constant 0 : index
    %c0_7 = arith.constant 0 : index
    %10 = vector.load %arg4[%c0_6, %c0_7] : memref<512x13xbf16, #tpu.memory_space<vmem>>, vector<512x13xbf16>
    %cst_8 = arith.constant dense<0.000000e+00> : vector<2x13xf32>
    %11 = tpu.matmul %9, %10, %cst_8 {dimension_numbers = #tpu.dot_dimension_numbers<[1], [0], [0], [1], [0, 0, 1, 1], [], []>} : vector<2x512xbf16>, vector<512x13xbf16>, vector<2x13xf32> -> vector<2x13xf32>
    %c0_9 = arith.constant 0 : index
    %c0_10 = arith.constant 0 : index
    %12 = vector.load %arg5[%c0_9, %c0_10] : memref<1x13xf32, #tpu.memory_space<vmem>>, vector<1x13xf32>
    %13 = vector.broadcast %12 : vector<1x13xf32> to vector<2x13xf32>
    %14 = arith.addf %11, %13 : vector<2x13xf32>
    %c0_11 = arith.constant 0 : index
    %c0_12 = arith.constant 0 : index
    %15 = vector.load %arg6[%c0_11, %c0_12] : memref<2x13xf32, #tpu.memory_space<vmem>>, vector<2x13xf32>
    tpu.vector_store %arg6[%c0_11, %c0_12], %14 {strides = array<i32>} : memref<2x13xf32, #tpu.memory_space<vmem>>, vector<2x13xf32>,
    return
  }
  func.func @transform_0(%arg0: i32) -> (i32, i32) {
    %c0_i32 = arith.constant 0 : i32
    %c0_i32_0 = arith.constant 0 : i32
    %c0_i32_1 = arith.constant 0 : i32
    return %c0_i32, %c0_i32_0 : i32, i32
  }
  func.func @transform_1(%arg0: i32) -> (i32, i32) {
    %c0_i32 = arith.constant 0 : i32
    %c0_i32_0 = arith.constant 0 : i32
    %c0_i32_1 = arith.constant 0 : i32
    return %c0_i32, %c0_i32_0 : i32, i32
  }
  func.func @transform_2(%arg0: i32) -> (i32, i32) {
    %c0_i32 = arith.constant 0 : i32
    %c0_i32_0 = arith.constant 0 : i32
    %c0_i32_1 = arith.constant 0 : i32
    return %c0_i32, %c0_i32_0 : i32, i32
  }
  func.func @transform_3(%arg0: i32) -> (i32, i32) {
    %c0_i32 = arith.constant 0 : i32
    %c0_i32_0 = arith.constant 0 : i32
    %c0_i32_1 = arith.constant 0 : i32
    return %c0_i32, %c0_i32_0 : i32, i32
  }
  func.func @transform_4(%arg0: i32) -> (i32, i32) {
    %c0_i32 = arith.constant 0 : i32
    %c0_i32_0 = arith.constant 0 : i32
    %c0_i32_1 = arith.constant 0 : i32
    return %c0_i32, %c0_i32_0 : i32, i32
  }
  func.func @transform_5(%arg0: i32) -> (i32, i32) {
    %c0_i32 = arith.constant 0 : i32
    %c0_i32_0 = arith.constant 0 : i32
    %c0_i32_1 = arith.constant 0 : i32
    return %c0_i32, %c0_i32_0 : i32, i32
  }
}

</mosaic_0001>

<bundles_post_ra>
// kernel: motion_classifier_forward.3
= control target key start
LH: loop header
LB: loop body
LE: loop exit
PB: predicated region body
PF: predicated region fallthrough
CT: control target
= control target key end

     0   :  { %s6718_s12 = smov 0   ;;  %s8846_s0 = inlined_call_operand.vmem [shape: f32[2,4,825,9], index: 0, kind: input, shape index: {}]   ;;  %s8847_s1 = inlined_call_operand.vmem [shape: f32[9,32], index: 1, kind: input, shape index: {}]   ;;  %s8848_s2 = inlined_call_operand.vmem [shape: f32[1,32], index: 2, kind: input, shape index: {}]   ;;  %s8849_s3 = inlined_call_operand.vmem [shape: f32[2,825,32], index: 3, kind: output, shape index: {}]  }
   0x1 LB: > { %s4873_s13 = sadd.s32 4294967295, %s6696_s12   ;;  %p4877_p0 = scmp.ge.s32.totalorder %s6696_s12, 1  ;;  %s6696_s12 = sphi %s6718_s12, %s13_s12  }
   0x2   : > { %p137_p1 = scmp.lt.s32.totalorder %s6696_s12, 3 }
   0x4   : > { %p138_p2 = pnand %p4877_p0, %p137_p1 }
   0x6   : > { %141 = sbr.rel (%p138_p2) target bundleno = 636 (0x27c), region = 32 }
   0xb   : > { %v172_v0 = vld [vmem:[%s8847_s1 + $0x8] sm:$0x1]  ;;  %vm590_vm0 = vcmask 1040384   ;;  %v171_v1 = vld [vmem:[%s8847_s1] sm:$0xff]  ;;  %p161_p3 = scmp.lt.s32.totalorder %s4873_s13, 1  ;;  %vm277_vm1 = vcmask 72704  }
   0xc   : > { %6039 = vmatprep.subr.msk.mxu0 %vm590_vm0, %v172_v0  ;;  %6199 = vmatprep.subr.msk.mxu1 %vm590_vm0, %v172_v0  ;;  %vm4712_vm2 = vcmask 261120   ;;  %vm4816_vm3 = vcmask 253952  }
   0xd   : > { %6040 = vmatpush3.msk.msra.mxu0 %vm590_vm0, %v172_v0  ;;  %6200 = vmatpush3.msk.msra.mxu1 %vm590_vm0, %v172_v0  ;;  %s9438_s13 = smov (!%p161_p3, %s4873_s13), 1 }
   0xe   : > { %6041 = vmatprep.subr.mxu0 %v171_v1  ;;  %6201 = vmatprep.subr.mxu1 %v171_v1  ;;  %s6679_s18 = smul.u32 3328, %s9438_s13 }
   0xf   : > { %6042 = vmatpush3.msra.mxu0 %v171_v1  ;;  %6202 = vmatpush3.msra.mxu1 %v171_v1  ;;  %s6680_s22 = smul.u32 832, %s9438_s13 }
  0x10   : > { %6359 = vmatprep.subr.msk.mxu0 %vm590_vm0, %v172_v0  ;;  %6519 = vmatprep.subr.msk.mxu1 %vm590_vm0, %v172_v0  ;;  %s6744_s21 = scalar_lea.vmem %s8846_s0, %s6679_s18 }
  0x11   : > { %v173_v2 = vld [vmem:[%s6744_s21] sm:$0xff]  ;;  %v174_v4 = vld [vmem:[%s6744_s21 + $0x8] sm:$0xff]  ;;  %v175_v6 = vld [vmem:[%s6744_s21 + $0x10] sm:$0xff]  ;;  %s8210_s27 = scalar_lea.vmem %s8849_s3, %s6680_s22 }
  0x12   : > { %v4985_v3 = vld [vmem:[%s6744_s21 + $0x340] sm:$0xff]  ;;  %6043 = vmatprep.mubr.msk.f32.mxu0 %vm277_vm1, %v173_v2  ;;  %v4986_v5 = vld [vmem:[%s6744_s21 + $0x348] sm:$0xff]  ;;  %v4987_v7 = vld [vmem:[%s6744_s21 + $0x350] sm:$0xff] }
  0x13   : > { %6203 = vmatprep.mubr.msk.f32.mxu1 %vm277_vm1, %v4985_v3  ;;  %6044 = vmatmul.mubr.msk.f32.vlgmr.msra.gmra.mxu0 %vm277_vm1, %v174_v4  ;;  %v176_v8 = vld [vmem:[%s6744_s21 + $0x18] sm:$0xff]  ;;  %v177_v10 = vld [vmem:[%s6744_s21 + $0x20] sm:$0xff]  ;;  %v178_v12 = vld [vmem:[%s6744_s21 + $0x28] sm:$0xff] }
  0x14   : > { %6204 = vmatmul.mubr.msk.f32.vlgmr.msra.gmra.mxu1 %vm277_vm1, %v4986_v5  ;;  %6360 = vmatpush3.msk.msra.mxu0 %vm590_vm0, %v172_v0  ;;  %v4988_v9 = vld [vmem:[%s6744_s21 + $0x358] sm:$0xff]  ;;  %v4989_v11 = vld [vmem:[%s6744_s21 + $0x360] sm:$0xff]  ;;  %v4990_v13 = vld [vmem:[%s6744_s21 + $0x368] sm:$0xff] }
  0x15   : > { %6520 = vmatpush3.msk.msra.mxu1 %vm590_vm0, %v172_v0  ;;  %6046 = vmatprep.mubr.msk.f32.mxu0 %vm277_vm1, %v175_v6  ;;  %v179_v14 = vld [vmem:[%s6744_s21 + $0x30] sm:$0xff]  ;;  %v180_v16 = vld [vmem:[%s6744_s21 + $0x38] sm:$0xff]  ;;  %v181_v18 = vld [vmem:[%s6744_s21 + $0x40] sm:$0xff] }
  0x16   : > { %6206 = vmatprep.mubr.msk.f32.mxu1 %vm277_vm1, %v4987_v7  ;;  %6361 = vmatprep.subr.mxu0 %v171_v1  ;;  %v4991_v15 = vld [vmem:[%s6744_s21 + $0x370] sm:$0xff]  ;;  %v4992_v17 = vld [vmem:[%s6744_s21 + $0x378] sm:$0xff]  ;;  %v4993_v19 = vld [vmem:[%s6744_s21 + $0x380] sm:$0xff] }
  0x17   : > { %6521 = vmatprep.subr.mxu1 %v171_v1  ;;  %6047 = vmatmul.mubr.msk.f32.gmra.mxu0 %vm277_vm1, %v176_v8  ;;  %v182_v20 = vld [vmem:[%s6744_s21 + $0x48] sm:$0xff]  ;;  %v183_v22 = vld [vmem:[%s6744_s21 + $0x50] sm:$0xff]  ;;  %v184_v24 = vld [vmem:[%s6744_s21 + $0x58] sm:$0xff] }
  0x18   : > { %6207 = vmatmul.mubr.msk.f32.gmra.mxu1 %vm277_vm1, %v4988_v9  ;;  %6049 = vmatprep.mubr.msk.f32.mxu0 %vm277_vm1, %v177_v10  ;;  %v4994_v21 = vld [vmem:[%s6744_s21 + $0x388] sm:$0xff]  ;;  %v4995_v23 = vld [vmem:[%s6744_s21 + $0x390] sm:$0xff]  ;;  %v4996_v25 = vld [vmem:[%s6744_s21 + $0x398] sm:$0xff] }
  0x19   : > { %6209 = vmatprep.mubr.msk.f32.mxu1 %vm277_vm1, %v4989_v11  ;;  %6362 = vmatpush3.msra.mxu0 %v171_v1  ;;  %v185_v26 = vld [vmem:[%s6744_s21 + $0x60] sm:$0xff]  ;;  %v186_v28 = vld [vmem:[%s6744_s21 + $0x68] sm:$0xff]  ;;  %v187_v30 = vld [vmem:[%s6744_s21 + $0x70] sm:$0xff] }
  0x1a   : > { %6522 = vmatpush3.msra.mxu1 %v171_v1  ;;  %v4997_v27 = vld [vmem:[%s6744_s21 + $0x3a0] sm:$0xff]  ;;  %v4998_v29 = vld [vmem:[%s6744_s21 + $0x3a8] sm:$0xff]  ;;  %v4999_v31 = vld [vmem:[%s6744_s21 + $0x3b0] sm:$0xff] }
  0x1b   : > { %6050 = vmatmul.mubr.msk.f32.gmra.mxu0 %vm277_vm1, %v178_v12  ;;  %v188_v32 = vld [vmem:[%s6744_s21 + $0x78] sm:$0xff]  ;;  %v189_v34 = vld [vmem:[%s6744_s21 + $0x80] sm:$0xff]  ;;  %v190_v36 = vld [vmem:[%s6744_s21 + $0x88] sm:$0xff] }
  0x1c   : > { %6210 = vmatmul.mubr.msk.f32.gmra.mxu1 %vm277_vm1, %v4990_v13  ;;  %6052 = vmatprep.mubr.msk.f32.mxu0 %vm277_vm1, %v179_v14  ;;  %v5000_v33 = vld [vmem:[%s6744_s21 + $0x3b8] sm:$0xff]  ;;  %v5001_v35 = vld [vmem:[%s6744_s21 + $0x3c0] sm:$0xff]  ;;  %v5002_v37 = vld [vmem:[%s6744_s21 + $0x3c8] sm:$0xff] }
  0x1d   : > { %6212 = vmatprep.mubr.msk.f32.mxu1 %vm277_vm1, %v4991_v15  ;;  %v191_v38 = vld [vmem:[%s6744_s21 + $0x90] sm:$0xff]  ;;  %v192_v40 = vld [vmem:[%s6744_s21 + $0x98] sm:$0xff]  ;;  %v193_v42 = vld [vmem:[%s6744_s21 + $0xa0] sm:$0xff] }
  0x1e   : > { %v5003_v39 = vld [vmem:[%s6744_s21 + $0x3d0] sm:$0xff]  ;;  %v5004_v41 = vld [vmem:[%s6744_s21 + $0x3d8] sm:$0xff]  ;;  %v5005_v43 = vld [vmem:[%s6744_s21 + $0x3e0] sm:$0xff] }
  0x1f   : > { %6053 = vmatmul.mubr.msk.f32.gmra.mxu0 %vm277_vm1, %v180_v16  ;;  %v194_v44 = vld [vmem:[%s6744_s21 + $0xa8] sm:$0xff]  ;;  %v195_v46 = vld [vmem:[%s6744_s21 + $0xb0] sm:$0xff]  ;;  %v196_v48 = vld [vmem:[%s6744_s21 + $0xb8] sm:$0xff] }
  0x20   : > { %6213 = vmatmul.mubr.msk.f32.gmra.mxu1 %vm277_vm1, %v4992_v17  ;;  %6055 = vmatprep.mubr.msk.f32.mxu0 %vm277_vm1, %v181_v18  ;;  %v5006_v45 = vld [vmem:[%s6744_s21 + $0x3e8] sm:$0xff]  ;;  %v5007_v47 = vld [vmem:[%s6744_s21 + $0x3f0] sm:$0xff]  ;;  %v5008_v49 = vld [vmem:[%s6744_s21 + $0x3f8] sm:$0xff] }
  0x21   : > { %6215 = vmatprep.mubr.msk.f32.mxu1 %vm277_vm1, %v4993_v19  ;;  %v197_v50 = vld [vmem:[%s6744_s21 + $0xc0] sm:$0xff]  ;;  %v198_v52 = vld [vmem:[%s6744_s21 + $0xc8] sm:$0xff]  ;;  %v199_v54 = vld [vmem:[%s6744_s21 + $0xd0] sm:$0xff] }
  0x22   : > { %v5009_v51 = vld [vmem:[%s6744_s21 + $0x400] sm:$0xff]  ;;  %v5010_v53 = vld [vmem:[%s6744_s21 + $0x408] sm:$0xff]  ;;  %v5011_v55 = vld [vmem:[%s6744_s21 + $0x410] sm:$0xff] }
  0x23   : > { %6056 = vmatmul.mubr.msk.f32.gmra.mxu0 %vm277_vm1, %v182_v20  ;;  %v200_v56 = vld [vmem:[%s6744_s21 + $0xd8] sm:$0xff]  ;;  %v201_v58 = vld [vmem:[%s6744_s21 + $0xe0] sm:$0xff]  ;;  %v202_v60 = vld [vmem:[%s6744_s21 + $0xe8] sm:$0xff] }
  0x24   : > { %6216 = vmatmul.mubr.msk.f32.gmra.mxu1 %vm277_vm1, %v4994_v21  ;;  %6058 = vmatprep.mubr.msk.f32.mxu0 %vm277_vm1, %v183_v22  ;;  %v5012_v57 = vld [vmem:[%s6744_s21 + $0x418] sm:$0xff]  ;;  %v5013_v59 = vld [vmem:[%s6744_s21 + $0x420] sm:$0xff]  ;;  %v5014_v61 = vld [vmem:[%s6744_s21 + $0x428] sm:$0xff] }
  0x25   : > { %6218 = vmatprep.mubr.msk.f32.mxu1 %vm277_vm1, %v4995_v23  ;;  %v203_v62 = vld [vmem:[%s6744_s21 + $0xf0] sm:$0xff]  ;;  %v204_v0 = vld [vmem:[%s6744_s21 + $0xf8] sm:$0xff]  ;;  %v205_v2 = vld [vmem:[%s6744_s21 + $0x100] sm:$0xff] }
  0x26   : > { %v5015_v63 = vld [vmem:[%s6744_s21 + $0x430] sm:$0xff]  ;;  %v5016_v1 = vld [vmem:[%s6744_s21 + $0x438] sm:$0xff]  ;;  %v5017_v3 = vld [vmem:[%s6744_s21 + $0x440] sm:$0xff] }
  0x27   : > { %6059 = vmatmul.mubr.msk.f32.gmra.mxu0 %vm277_vm1, %v184_v24  ;;  %v206_v4 = vld [vmem:[%s6744_s21 + $0x108] sm:$0xff]  ;;  %v207_v6 = vld [vmem:[%s6744_s21 + $0x110] sm:$0xff]  ;;  %v208_v8 = vld [vmem:[%s6744_s21 + $0x118] sm:$0xff] }
  0x28   : > { %6219 = vmatmul.mubr.msk.f32.gmra.mxu1 %vm277_vm1, %v4996_v25  ;;  %6061 = vmatprep.mubr.msk.f32.mxu0 %vm277_vm1, %v185_v26  ;;  %v5018_v5 = vld [vmem:[%s6744_s21 + $0x448] sm:$0xff]  ;;  %v5019_v7 = vld [vmem:[%s6744_s21 + $0x450] sm:$0xff]  ;;  %v5020_v9 = vld [vmem:[%s6744_s21 + $0x458] sm:$0xff] }
  0x29   : > { %6221 = vmatprep.mubr.msk.f32.mxu1 %vm277_vm1, %v4997_v27  ;;  %v209_v10 = vld [vmem:[%s6744_s21 + $0x120] sm:$0xff]  ;;  %v210_v12 = vld [vmem:[%s6744_s21 + $0x128] sm:$0xff]  ;;  %v211_v14 = vld [vmem:[%s6744_s21 + $0x130] sm:$0xff] }
  0x2a   : > { %v5021_v11 = vld [vmem:[%s6744_s21 + $0x460] sm:$0xff]  ;;  %v5022_v13 = vld [vmem:[%s6744_s21 + $0x468] sm:$0xff]  ;;  %v5023_v15 = vld [vmem:[%s6744_s21 + $0x470] sm:$0xff] }
  0x2b   : > { %6062 = vmatmul.mubr.msk.f32.gmra.mxu0 %vm277_vm1, %v186_v28  ;;  %v212_v16 = vld [vmem:[%s6744_s21 + $0x138] sm:$0xff]  ;;  %v213_v18 = vld [vmem:[%s6744_s21 + $0x140] sm:$0xff]  ;;  %v214_v20 = vld [vmem:[%s6744_s21 + $0x148] sm:$0xff] }
  0x2c   : > { %6222 = vmatmul.mubr.msk.f32.gmra.mxu1 %vm277_vm1, %v4998_v29  ;;  %6064 = vmatprep.mubr.msk.f32.mxu0 %vm277_vm1, %v187_v30  ;;  %v5024_v17 = vld [vmem:[%s6744_s21 + $0x478] sm:$0xff]  ;;  %v5025_v19 = vld [vmem:[%s6744_s21 + $0x480] sm:$0xff]  ;;  %v5026_v21 = vld [vmem:[%s6744_s21 + $0x488] sm:$0xff] }
  0x2d   : > { %6224 = vmatprep.mubr.msk.f32.mxu1 %vm277_vm1, %v4999_v31  ;;  %v215_v22 = vld [vmem:[%s6744_s21 + $0x150] sm:$0xff]  ;;  %v216_v24 = vld [vmem:[%s6744_s21 + $0x158] sm:$0xff]  ;;  %v217_v26 = vld [vmem:[%s6744_s21 + $0x160] sm:$0xff] }
  0x2e   : > { %v5027_v23 = vld [vmem:[%s6744_s21 + $0x490] sm:$0xff]  ;;  %v5028_v25 = vld [vmem:[%s6744_s21 + $0x498] sm:$0xff]  ;;  %v5029_v27 = vld [vmem:[%s6744_s21 + $0x4a0] sm:$0xff] }
  0x2f   : > { %6065 = vmatmul.mubr.msk.f32.gmra.mxu0 %vm277_vm1, %v188_v32  ;;  %v218_v28 = vld [vmem:[%s6744_s21 + $0x168] sm:$0xff]  ;;  %v219_v30 = vld [vmem:[%s6744_s21 + $0x170] sm:$0xff]  ;;  %v220_v32 = vld [vmem:[%s6744_s21 + $0x178] sm:$0xff] }
  0x30   : > { %6225 = vmatmul.mubr.msk.f32.gmra.mxu1 %vm277_vm1, %v5000_v33  ;;  %6067 = vmatprep.mubr.msk.f32.mxu0 %vm277_vm1, %v189_v34  ;;  %v5030_v29 = vld [vmem:[%s6744_s21 + $0x4a8] sm:$0xff]  ;;  %v5031_v31 = vld [vmem:[%s6744_s21 + $0x4b0] sm:$0xff]  ;;  %v5032_v33 = vld [vmem:[%s6744_s21 + $0x4b8] sm:$0xff] }
  0x31   : > { %6227 = vmatprep.mubr.msk.f32.mxu1 %vm277_vm1, %v5001_v35  ;;  %v221_v34 = vld [vmem:[%s6744_s21 + $0x180] sm:$0xff] }
  0x32   : > { %v5033_v35 = vld [vmem:[%s6744_s21 + $0x4c0] sm:$0xff] }
  0x33   : > { %6068 = vmatmul.mubr.msk.f32.gmra.mxu0 %vm277_vm1, %v190_v36  ;;  %v222_v36 = vld [vmem:[%s6744_s21 + $0x188] sm:$0xff] }
  0x34   : > { %6228 = vmatmul.mubr.msk.f32.gmra.mxu1 %vm277_vm1, %v5002_v37  ;;  %6070 = vmatprep.mubr.msk.f32.mxu0 %vm277_vm1, %v191_v38  ;;  %v5034_v37 = vld [vmem:[%s6744_s21 + $0x4c8] sm:$0xff]  ;;  %v223_v38 = vld [vmem:[%s6744_s21 + $0x190] sm:$0xff] }
  0x35   : > { %6230 = vmatprep.mubr.msk.f32.mxu1 %vm277_vm1, %v5003_v39  ;;  %v5035_v39 = vld [vmem:[%s6744_s21 + $0x4d0] sm:$0xff] }
  0x37   : > { %6071 = vmatmul.mubr.msk.f32.gmra.mxu0 %vm277_vm1, %v192_v40  ;;  %v224_v40 = vld [vmem:[%s6744_s21 + $0x198] sm:$0xff] }
  0x38   : > { %6231 = vmatmul.mubr.msk.f32.gmra.mxu1 %vm277_vm1, %v5004_v41  ;;  %6073 = vmatprep.mubr.msk.f32.mxu0 %vm277_vm1, %v193_v42  ;;  %v5036_v41 = vld [vmem:[%s6744_s21 + $0x4d8] sm:$0xff]  ;;  %v225_v42 = vld [vmem:[%s6744_s21 + $0x1a0] sm:$0xff] }
  0x39   : > { %6233 = vmatprep.mubr.msk.f32.mxu1 %vm277_vm1, %v5005_v43  ;;  %v5037_v43 = vld [vmem:[%s6744_s21 + $0x4e0] sm:$0xff] }
  0x3b   : > { %6074 = vmatmul.mubr.msk.f32.gmra.mxu0 %vm277_vm1, %v194_v44  ;;  %v226_v44 = vld [vmem:[%s6744_s21 + $0x1a8] sm:$0xff] }
  0x3c   : > { %6234 = vmatmul.mubr.msk.f32.gmra.mxu1 %vm277_vm1, %v5006_v45  ;;  %6076 = vmatprep.mubr.msk.f32.mxu0 %vm277_vm1, %v195_v46  ;;  %v5038_v45 = vld [vmem:[%s6744_s21 + $0x4e8] sm:$0xff]  ;;  %v227_v46 = vld [vmem:[%s6744_s21 + $0x1b0] sm:$0xff] }
  0x3d   : > { %6236 = vmatprep.mubr.msk.f32.mxu1 %vm277_vm1, %v5007_v47  ;;  %v5039_v47 = vld [vmem:[%s6744_s21 + $0x4f0] sm:$0xff] }
  0x3f   : > { %6077 = vmatmul.mubr.msk.f32.gmra.mxu0 %vm277_vm1, %v196_v48  ;;  %v228_v48 = vld [vmem:[%s6744_s21 + $0x1b8] sm:$0xff] }
  0x40   : > { %6237 = vmatmul.mubr.msk.f32.gmra.mxu1 %vm277_vm1, %v5008_v49  ;;  %6079 = vmatprep.mubr.msk.f32.mxu0 %vm277_vm1, %v197_v50  ;;  %v5040_v49 = vld [vmem:[%s6744_s21 + $0x4f8] sm:$0xff]  ;;  %v229_v50 = vld [vmem:[%s6744_s21 + $0x1c0] sm:$0xff] }
  0x41   : > { %6239 = vmatprep.mubr.msk.f32.mxu1 %vm277_vm1, %v5009_v51  ;;  %v5041_v51 = vld [vmem:[%s6744_s21 + $0x500] sm:$0xff] }
  0x43   : > { %6080 = vmatmul.mubr.msk.f32.gmra.mxu0 %vm277_vm1, %v198_v52  ;;  %v230_v52 = vld [vmem:[%s6744_s21 + $0x1c8] sm:$0xff] }
  0x44   : > { %6240 = vmatmul.mubr.msk.f32.gmra.mxu1 %vm277_vm1, %v5010_v53  ;;  %6082 = vmatprep.mubr.msk.f32.mxu0 %vm277_vm1, %v199_v54  ;;  %v5042_v53 = vld [vmem:[%s6744_s21 + $0x508] sm:$0xff]  ;;  %v231_v54 = vld [vmem:[%s6744_s21 + $0x1d0] sm:$0xff] }
  0x45   : > { %6242 = vmatprep.mubr.msk.f32.mxu1 %vm277_vm1, %v5011_v55  ;;  %v5043_v55 = vld [vmem:[%s6744_s21 + $0x510] sm:$0xff] }
  0x47   : > { %6083 = vmatmul.mubr.msk.f32.gmra.mxu0 %vm277_vm1, %v200_v56  ;;  %v232_v56 = vld [vmem:[%s6744_s21 + $0x1d8] sm:$0xff] }
  0x48   : > { %6243 = vmatmul.mubr.msk.f32.gmra.mxu1 %vm277_vm1, %v5012_v57  ;;  %6085 = vmatprep.mubr.msk.f32.mxu0 %vm277_vm1, %v201_v58  ;;  %v5044_v57 = vld [vmem:[%s6744_s21 + $0x518] sm:$0xff]  ;;  %v233_v58 = vld [vmem:[%s6744_s21 + $0x1e0] sm:$0xff] }
  0x49   : > { %6245 = vmatprep.mubr.msk.f32.mxu1 %vm277_vm1, %v5013_v59  ;;  %v5045_v59 = vld [vmem:[%s6744_s21 + $0x520] sm:$0xff] }
  0x4b   : > { %6086 = vmatmul.mubr.msk.f32.gmra.mxu0 %vm277_vm1, %v202_v60  ;;  %v234_v60 = vld [vmem:[%s6744_s21 + $0x1e8] sm:$0xff] }
  0x4c   : > { %6246 = vmatmul.mubr.msk.f32.gmra.mxu1 %vm277_vm1, %v5014_v61  ;;  %6088 = vmatprep.mubr.msk.f32.mxu0 %vm277_vm1, %v203_v62  ;;  %v5046_v61 = vld [vmem:[%s6744_s21 + $0x528] sm:$0xff]  ;;  %v235_v62 = vld [vmem:[%s6744_s21 + $0x1f0] sm:$0xff] }
  0x4d   : > { %6248 = vmatprep.mubr.msk.f32.mxu1 %vm277_vm1, %v5015_v63  ;;  %v5047_v63 = vld [vmem:[%s6744_s21 + $0x530] sm:$0xff] }
  0x4f   : > { %6089 = vmatmul.mubr.msk.f32.gmra.mxu0 %vm277_vm1, %v204_v0  ;;  %v236_v0 = vld [vmem:[%s6744_s21 + $0x1f8] sm:$0xff] }
  0x50   : > { %6249 = vmatmul.mubr.msk.f32.gmra.mxu1 %vm277_vm1, %v5016_v1  ;;  %6091 = vmatprep.mubr.msk.f32.mxu0 %vm277_vm1, %v205_v2  ;;  %v5048_v1 = vld [vmem:[%s6744_s21 + $0x538] sm:$0xff]  ;;  %v237_v2 = vld [vmem:[%s6744_s21 + $0x200] sm:$0xff] }
  0x51   : > { %6251 = vmatprep.mubr.msk.f32.mxu1 %vm277_vm1, %v5017_v3  ;;  %v5049_v3 = vld [vmem:[%s6744_s21 + $0x540] sm:$0xff] }
  0x53   : > { %6092 = vmatmul.mubr.msk.f32.gmra.mxu0 %vm277_vm1, %v206_v4  ;;  %v238_v4 = vld [vmem:[%s6744_s21 + $0x208] sm:$0xff] }
  0x54   : > { %6252 = vmatmul.mubr.msk.f32.gmra.mxu1 %vm277_vm1, %v5018_v5  ;;  %6094 = vmatprep.mubr.msk.f32.mxu0 %vm277_vm1, %v207_v6  ;;  %v5050_v5 = vld [vmem:[%s6744_s21 + $0x548] sm:$0xff]  ;;  %v239_v6 = vld [vmem:[%s6744_s21 + $0x210] sm:$0xff] }
  0x55   : > { %6254 = vmatprep.mubr.msk.f32.mxu1 %vm277_vm1, %v5019_v7  ;;  %v5051_v7 = vld [vmem:[%s6744_s21 + $0x550] sm:$0xff] }
  0x57   : > { %6095 = vmatmul.mubr.msk.f32.gmra.mxu0 %vm277_vm1, %v208_v8  ;;  %v240_v8 = vld [vmem:[%s6744_s21 + $0x218] sm:$0xff] }
  0x58   : > { %6255 = vmatmul.mubr.msk.f32.gmra.mxu1 %vm277_vm1, %v5020_v9  ;;  %6097 = vmatprep.mubr.msk.f32.mxu0 %vm277_vm1, %v209_v10  ;;  %v5052_v9 = vld [vmem:[%s6744_s21 + $0x558] sm:$0xff]  ;;  %v241_v10 = vld [vmem:[%s6744_s21 + $0x220] sm:$0xff] }
  0x59   : > { %6257 = vmatprep.mubr.msk.f32.mxu1 %vm277_vm1, %v5021_v11  ;;  %v5053_v11 = vld [vmem:[%s6744_s21 + $0x560] sm:$0xff] }
  0x5b   : > { %6098 = vmatmul.mubr.msk.f32.gmra.mxu0 %vm277_vm1, %v210_v12  ;;  %v242_v12 = vld [vmem:[%s6744_s21 + $0x228] sm:$0xff] }
  0x5c   : > { %6258 = vmatmul.mubr.msk.f32.gmra.mxu1 %vm277_vm1, %v5022_v13  ;;  %6100 = vmatprep.mubr.msk.f32.mxu0 %vm277_vm1, %v211_v14  ;;  %v5054_v13 = vld [vmem:[%s6744_s21 + $0x568] sm:$0xff]  ;;  %v243_v14 = vld [vmem:[%s6744_s21 + $0x230] sm:$0xff] }
  0x5d   : > { %6260 = vmatprep.mubr.msk.f32.mxu1 %vm277_vm1, %v5023_v15  ;;  %v5055_v15 = vld [vmem:[%s6744_s21 + $0x570] sm:$0xff] }
  0x5f   : > { %6101 = vmatmul.mubr.msk.f32.gmra.mxu0 %vm277_vm1, %v212_v16  ;;  %v244_v16 = vld [vmem:[%s6744_s21 + $0x238] sm:$0xff] }
  0x60   : > { %6261 = vmatmul.mubr.msk.f32.gmra.mxu1 %vm277_vm1, %v5024_v17  ;;  %6103 = vmatprep.mubr.msk.f32.mxu0 %vm277_vm1, %v213_v18  ;;  %v5056_v17 = vld [vmem:[%s6744_s21 + $0x578] sm:$0xff]  ;;  %v245_v18 = vld [vmem:[%s6744_s21 + $0x240] sm:$0xff] }
  0x61   : > { %6263 = vmatprep.mubr.msk.f32.mxu1 %vm277_vm1, %v5025_v19  ;;  %v5057_v19 = vld [vmem:[%s6744_s21 + $0x580] sm:$0xff] }
  0x63   : > { %6104 = vmatmul.mubr.msk.f32.gmra.mxu0 %vm277_vm1, %v214_v20  ;;  %v246_v20 = vld [vmem:[%s6744_s21 + $0x248] sm:$0xff] }
  0x64   : > { %6264 = vmatmul.mubr.msk.f32.gmra.mxu1 %vm277_vm1, %v5026_v21  ;;  %6106 = vmatprep.mubr.msk.f32.mxu0 %vm277_vm1, %v215_v22  ;;  %v5058_v21 = vld [vmem:[%s6744_s21 + $0x588] sm:$0xff]  ;;  %v247_v22 = vld [vmem:[%s6744_s21 + $0x250] sm:$0xff] }
  0x65   : > { %6266 = vmatprep.mubr.msk.f32.mxu1 %vm277_vm1, %v5027_v23  ;;  %v5059_v23 = vld [vmem:[%s6744_s21 + $0x590] sm:$0xff] }
  0x67   : > { %6107 = vmatmul.mubr.msk.f32.gmra.mxu0 %vm277_vm1, %v216_v24  ;;  %v248_v24 = vld [vmem:[%s6744_s21 + $0x258] sm:$0xff] }
  0x68   : > { %6267 = vmatmul.mubr.msk.f32.gmra.mxu1 %vm277_vm1, %v5028_v25  ;;  %6109 = vmatprep.mubr.msk.f32.mxu0 %vm277_vm1, %v217_v26  ;;  %v5060_v25 = vld [vmem:[%s6744_s21 + $0x598] sm:$0xff]  ;;  %v249_v26 = vld [vmem:[%s6744_s21 + $0x260] sm:$0xff] }
  0x69   : > { %6269 = vmatprep.mubr.msk.f32.mxu1 %vm277_vm1, %v5029_v27  ;;  %v5061_v27 = vld [vmem:[%s6744_s21 + $0x5a0] sm:$0xff] }
  0x6b   : > { %6110 = vmatmul.mubr.msk.f32.gmra.mxu0 %vm277_vm1, %v218_v28  ;;  %v250_v28 = vld [vmem:[%s6744_s21 + $0x268] sm:$0xff] }
  0x6c   : > { %6270 = vmatmul.mubr.msk.f32.gmra.mxu1 %vm277_vm1, %v5030_v29  ;;  %6112 = vmatprep.mubr.msk.f32.mxu0 %vm277_vm1, %v219_v30  ;;  %v5062_v29 = vld [vmem:[%s6744_s21 + $0x5a8] sm:$0xff]  ;;  %v251_v30 = vld [vmem:[%s6744_s21 + $0x270] sm:$0xff] }
  0x6d   : > { %6272 = vmatprep.mubr.msk.f32.mxu1 %vm277_vm1, %v5031_v31  ;;  %v5063_v31 = vld [vmem:[%s6744_s21 + $0x5b0] sm:$0xff] }
  0x6f   : > { %6113 = vmatmul.mubr.msk.f32.gmra.mxu0 %vm277_vm1, %v220_v32  ;;  %v252_v32 = vld [vmem:[%s6744_s21 + $0x278] sm:$0xff] }
  0x70   : > { %6273 = vmatmul.mubr.msk.f32.gmra.mxu1 %vm277_vm1, %v5032_v33  ;;  %6115 = vmatprep.mubr.msk.f32.mxu0 %vm277_vm1, %v221_v34  ;;  %v5064_v33 = vld [vmem:[%s6744_s21 + $0x5b8] sm:$0xff]  ;;  %v253_v34 = vld [vmem:[%s6744_s21 + $0x280] sm:$0xff] }
  0x71   : > { %6275 = vmatprep.mubr.msk.f32.mxu1 %vm277_vm1, %v5033_v35  ;;  %v5065_v35 = vld [vmem:[%s6744_s21 + $0x5c0] sm:$0xff] }
  0x73   : > { %6116 = vmatmul.mubr.msk.f32.gmra.mxu0 %vm277_vm1, %v222_v36  ;;  %v254_v36 = vld [vmem:[%s6744_s21 + $0x288] sm:$0xff] }
  0x74   : > { %6276 = vmatmul.mubr.msk.f32.gmra.mxu1 %vm277_vm1, %v5034_v37  ;;  %6118 = vmatprep.mubr.msk.f32.mxu0 %vm277_vm1, %v223_v38  ;;  %v5066_v37 = vld [vmem:[%s6744_s21 + $0x5c8] sm:$0xff]  ;;  %v255_v38 = vld [vmem:[%s6744_s21 + $0x290] sm:$0xff] }
  0x75   : > { %6278 = vmatprep.mubr.msk.f32.mxu1 %vm277_vm1, %v5035_v39  ;;  %v5067_v39 = vld [vmem:[%s6744_s21 + $0x5d0] sm:$0xff] }
  0x77   : > { %6119 = vmatmul.mubr.msk.f32.gmra.mxu0 %vm277_vm1, %v224_v40  ;;  %v256_v40 = vld [vmem:[%s6744_s21 + $0x298] sm:$0xff] }
  0x78   : > { %6279 = vmatmul.mubr.msk.f32.gmra.mxu1 %vm277_vm1, %v5036_v41  ;;  %6121 = vmatprep.mubr.msk.f32.mxu0 %vm277_vm1, %v225_v42  ;;  %v5068_v41 = vld [vmem:[%s6744_s21 + $0x5d8] sm:$0xff]  ;;  %v257_v42 = vld [vmem:[%s6744_s21 + $0x2a0] sm:$0xff] }
  0x79   : > { %6281 = vmatprep.mubr.msk.f32.mxu1 %vm277_vm1, %v5037_v43  ;;  %v5069_v43 = vld [vmem:[%s6744_s21 + $0x5e0] sm:$0xff] }
  0x7b   : > { %6122 = vmatmul.mubr.msk.f32.gmra.mxu0 %vm277_vm1, %v226_v44  ;;  %v258_v44 = vld [vmem:[%s6744_s21 + $0x2a8] sm:$0xff] }
  0x7c   : > { %6282 = vmatmul.mubr.msk.f32.gmra.mxu1 %vm277_vm1, %v5038_v45  ;;  %6124 = vmatprep.mubr.msk.f32.mxu0 %vm277_vm1, %v227_v46  ;;  %v5070_v45 = vld [vmem:[%s6744_s21 + $0x5e8] sm:$0xff]  ;;  %v259_v46 = vld [vmem:[%s6744_s21 + $0x2b0] sm:$0xff] }
  0x7d   : > { %6284 = vmatprep.mubr.msk.f32.mxu1 %vm277_vm1, %v5039_v47  ;;  %v5071_v47 = vld [vmem:[%s6744_s21 + $0x5f0] sm:$0xff] }
  0x7f   : > { %6125 = vmatmul.mubr.msk.f32.gmra.mxu0 %vm277_vm1, %v228_v48  ;;  %v260_v48 = vld [vmem:[%s6744_s21 + $0x2b8] sm:$0xff] }
  0x80   : > { %6285 = vmatmul.mubr.msk.f32.gmra.mxu1 %vm277_vm1, %v5040_v49  ;;  %6127 = vmatprep.mubr.msk.f32.mxu0 %vm277_vm1, %v229_v50  ;;  %v5072_v49 = vld [vmem:[%s6744_s21 + $0x5f8] sm:$0xff]  ;;  %v261_v50 = vld [vmem:[%s6744_s21 + $0x2c0] sm:$0xff] }
  0x81   : > { %6287 = vmatprep.mubr.msk.f32.mxu1 %vm277_vm1, %v5041_v51  ;;  %v5073_v51 = vld [vmem:[%s6744_s21 + $0x600] sm:$0xff] }
  0x83   : > { %6128 = vmatmul.mubr.msk.f32.gmra.mxu0 %vm277_vm1, %v230_v52  ;;  %v262_v52 = vld [vmem:[%s6744_s21 + $0x2c8] sm:$0xff] }
  0x84   : > { %6288 = vmatmul.mubr.msk.f32.gmra.mxu1 %vm277_vm1, %v5042_v53  ;;  %6130 = vmatprep.mubr.msk.f32.mxu0 %vm277_vm1, %v231_v54  ;;  %v5074_v53 = vld [vmem:[%s6744_s21 + $0x608] sm:$0xff]  ;;  %v263_v54 = vld [vmem:[%s6744_s21 + $0x2d0] sm:$0xff] }
  0x85   : > { %6290 = vmatprep.mubr.msk.f32.mxu1 %vm277_vm1, %v5043_v55  ;;  %v5075_v55 = vld [vmem:[%s6744_s21 + $0x610] sm:$0xff] }
  0x87   : > { %6131 = vmatmul.mubr.msk.f32.gmra.mxu0 %vm277_vm1, %v232_v56  ;;  %v264_v56 = vld [vmem:[%s6744_s21 + $0x2d8] sm:$0xff] }
  0x88   : > { %6291 = vmatmul.mubr.msk.f32.gmra.mxu1 %vm277_vm1, %v5044_v57  ;;  %6133 = vmatprep.mubr.msk.f32.mxu0 %vm277_vm1, %v233_v58  ;;  %v5076_v57 = vld [vmem:[%s6744_s21 + $0x618] sm:$0xff]  ;;  %v265_v58 = vld [vmem:[%s6744_s21 + $0x2e0] sm:$0xff] }
  0x89   : > { %6293 = vmatprep.mubr.msk.f32.mxu1 %vm277_vm1, %v5045_v59  ;;  %v5077_v59 = vld [vmem:[%s6744_s21 + $0x620] sm:$0xff] }
  0x8b   : > { %6134 = vmatmul.mubr.msk.f32.gmra.mxu0 %vm277_vm1, %v234_v60  ;;  %v266_v60 = vld [vmem:[%s6744_s21 + $0x2e8] sm:$0xff] }
  0x8c   : > { %6294 = vmatmul.mubr.msk.f32.gmra.mxu1 %vm277_vm1, %v5046_v61  ;;  %6136 = vmatprep.mubr.msk.f32.mxu0 %vm277_vm1, %v235_v62  ;;  %v5078_v61 = vld [vmem:[%s6744_s21 + $0x628] sm:$0xff]  ;;  %v267_v62 = vld [vmem:[%s6744_s21 + $0x2f0] sm:$0xff] }
  0x8d   : > { %6296 = vmatprep.mubr.msk.f32.mxu1 %vm277_vm1, %v5047_v63  ;;  %v5079_v63 = vld [vmem:[%s6744_s21 + $0x630] sm:$0xff] }
  0x8f   : > { %6137 = vmatmul.mubr.msk.f32.gmra.mxu0 %vm277_vm1, %v236_v0  ;;  %v268_v0 = vld [vmem:[%s6744_s21 + $0x2f8] sm:$0xff] }
  0x90   : > { %6297 = vmatmul.mubr.msk.f32.gmra.mxu1 %vm277_vm1, %v5048_v1  ;;  %6139 = vmatprep.mubr.msk.f32.mxu0 %vm277_vm1, %v237_v2  ;;  %v5080_v1 = vld [vmem:[%s6744_s21 + $0x638] sm:$0xff]  ;;  %v269_v2 = vld [vmem:[%s6744_s21 + $0x300] sm:$0xff] }
  0x91   : > { %6299 = vmatprep.mubr.msk.f32.mxu1 %vm277_vm1, %v5049_v3  ;;  %v5081_v3 = vld [vmem:[%s6744_s21 + $0x640] sm:$0xff] }
  0x93   : > { %6140 = vmatmul.mubr.msk.f32.gmra.mxu0 %vm277_vm1, %v238_v4  ;;  %v270_v4 = vld [vmem:[%s6744_s21 + $0x308] sm:$0xff] }
  0x94   : > { %6300 = vmatmul.mubr.msk.f32.gmra.mxu1 %vm277_vm1, %v5050_v5  ;;  %6142 = vmatprep.mubr.msk.f32.mxu0 %vm277_vm1, %v239_v6  ;;  %v5082_v5 = vld [vmem:[%s6744_s21 + $0x648] sm:$0xff]  ;;  %v271_v6 = vld [vmem:[%s6744_s21 + $0x310] sm:$0xff] }
  0x95   : > { %6302 = vmatprep.mubr.msk.f32.mxu1 %vm277_vm1, %v5051_v7  ;;  %v5083_v7 = vld [vmem:[%s6744_s21 + $0x650] sm:$0xff] }
  0x97   : > { %6143 = vmatmul.mubr.msk.f32.gmra.mxu0 %vm277_vm1, %v240_v8 }
  0x98   : > { %6303 = vmatmul.mubr.msk.f32.gmra.mxu1 %vm277_vm1, %v5052_v9  ;;  %6145 = vmatprep.mubr.msk.f32.mxu0 %vm277_vm1, %v241_v10  ;;  %v5425_v10 = vld [vmem:[%s6744_s21 + $0xa70] sm:$0xff] }
  0x99   : > { %6305 = vmatprep.mubr.msk.f32.mxu1 %vm277_vm1, %v5053_v11  ;;  %v272_v11 = vld [vmem:[%s6744_s21 + $0x318] sm:$0xff] }
  0x9b   : > { %6146 = vmatmul.mubr.msk.f32.gmra.mxu0 %vm277_vm1, %v242_v12  ;;  %v5084_v12 = vld [vmem:[%s6744_s21 + $0x658] sm:$0xff] }
  0x9c   : > { %6306 = vmatmul.mubr.msk.f32.gmra.mxu1 %vm277_vm1, %v5054_v13  ;;  %6148 = vmatprep.mubr.msk.f32.mxu0 %vm277_vm1, %v243_v14 }
  0x9d   : > { %6308 = vmatprep.mubr.msk.f32.mxu1 %vm277_vm1, %v5055_v15  ;;  %v273_v15 = vld [vmem:[%s6744_s21 + $0x320] sm:$0xff] }
  0x9f   : > { %6149 = vmatmul.mubr.msk.f32.gmra.mxu0 %vm277_vm1, %v244_v16  ;;  %v5085_v16 = vld [vmem:[%s6744_s21 + $0x660] sm:$0xff] }
  0xa0   : > { %6309 = vmatmul.mubr.msk.f32.gmra.mxu1 %vm277_vm1, %v5056_v17  ;;  %6151 = vmatprep.mubr.msk.f32.mxu0 %vm277_vm1, %v245_v18 }
  0xa1   : > { %6311 = vmatprep.mubr.msk.f32.mxu1 %vm277_vm1, %v5057_v19 }
  0xa3   : > { %6152 = vmatmul.mubr.msk.f32.gmra.mxu0 %vm277_vm1, %v246_v20  ;;  %v5424_v20 = vld [vmem:[%s6744_s21 + $0xa68] sm:$0xff] }
  0xa4   : > { %6312 = vmatmul.mubr.msk.f32.gmra.mxu1 %vm277_vm1, %v5058_v21  ;;  %6154 = vmatprep.mubr.msk.f32.mxu0 %vm277_vm1, %v247_v22  ;;  %v274_v21 = vld [vmem:[%s6744_s21 + $0x328] sm:$0xff] }
  0xa5   : > { %6314 = vmatprep.mubr.msk.f32.mxu1 %vm277_vm1, %v5059_v23  ;;  %v5086_v22 = vld [vmem:[%s6744_s21 + $0x668] sm:$0xff] }
  0xa7   : > { %6155 = vmatmul.mubr.msk.f32.gmra.mxu0 %vm277_vm1, %v248_v24 }
  0xa8   : > { %6315 = vmatmul.mubr.msk.f32.gmra.mxu1 %vm277_vm1, %v5060_v25  ;;  %6157 = vmatprep.mubr.msk.f32.mxu0 %vm277_vm1, %v249_v26  ;;  %v275_v25 = vld [vmem:[%s6744_s21 + $0x330] sm:$0xff] }
  0xa9   : > { %6317 = vmatprep.mubr.msk.f32.mxu1 %vm277_vm1, %v5061_v27  ;;  %v5087_v26 = vld [vmem:[%s6744_s21 + $0x670] sm:$0xff]  ;;  %v5215_v27 = vld [vmem:[%s6744_s21 + $0x728] sm:$0xff] }
  0xab   : > { %6158 = vmatmul.mubr.msk.f32.gmra.mxu0 %vm277_vm1, %v250_v28 }
  0xac   : > { %6318 = vmatmul.mubr.msk.f32.gmra.mxu1 %vm277_vm1, %v5062_v29  ;;  %6160 = vmatprep.mubr.msk.f32.mxu0 %vm277_vm1, %v251_v30  ;;  %v5423_v30 = vld [vmem:[%s6744_s21 + $0xa60] sm:$0xff] }
  0xad   : > { %6320 = vmatprep.mubr.msk.f32.mxu1 %vm277_vm1, %v5063_v31  ;;  %v276_v31 = vld [vmem:[%s6744_s21 + $0x338] sm:$0x1] }
  0xaf   : > { %6161 = vmatmul.mubr.msk.f32.gmra.mxu0 %vm277_vm1, %v252_v32  ;;  %v5088_v32 = vld [vmem:[%s6744_s21 + $0x678] sm:$0x1] }
  0xb0   : > { %6321 = vmatmul.mubr.msk.f32.gmra.mxu1 %vm277_vm1, %v5064_v33  ;;  %6163 = vmatprep.mubr.msk.f32.mxu0 %vm277_vm1, %v253_v34 }
  0xb1   : > { %6323 = vmatprep.mubr.msk.f32.mxu1 %vm277_vm1, %v5065_v35  ;;  %v5194_v35 = vld [vmem:[%s6744_s21 + $0x680] sm:$0xff] }
  0xb3   : > { %6164 = vmatmul.mubr.msk.f32.gmra.mxu0 %vm277_vm1, %v254_v36  ;;  %v5403_v36 = vld [vmem:[%s6744_s21 + $0x9c0] sm:$0xff] }
  0xb4   : > { %6324 = vmatmul.mubr.msk.f32.gmra.mxu1 %vm277_vm1, %v5066_v37  ;;  %6166 = vmatprep.mubr.msk.f32.mxu0 %vm277_vm1, %v255_v38 }
  0xb5   : > { %6326 = vmatprep.mubr.msk.f32.mxu1 %vm277_vm1, %v5067_v39 }
  0xb7   : > { %6167 = vmatmul.mubr.msk.f32.gmra.mxu0 %vm277_vm1, %v256_v40  ;;  %v5422_v40 = vld [vmem:[%s6744_s21 + $0xa58] sm:$0xff] }
  0xb8   : > { %6327 = vmatmul.mubr.msk.f32.gmra.mxu1 %vm277_vm1, %v5068_v41  ;;  %6169 = vmatprep.mubr.msk.f32.mxu0 %vm277_vm1, %v257_v42  ;;  %v5195_v41 = vld [vmem:[%s6744_s21 + $0x688] sm:$0xff] }
  0xb9   : > { %6329 = vmatprep.mubr.msk.f32.mxu1 %vm277_vm1, %v5069_v43  ;;  %v5404_v42 = vld [vmem:[%s6744_s21 + $0x9c8] sm:$0xff] }
  0xbb   : > { %6170 = vmatmul.mubr.msk.f32.gmra.mxu0 %vm277_vm1, %v258_v44 }
  0xbc   : > { %6330 = vmatmul.mubr.msk.f32.gmra.mxu1 %vm277_vm1, %v5070_v45  ;;  %6172 = vmatprep.mubr.msk.f32.mxu0 %vm277_vm1, %v259_v46  ;;  %v5196_v45 = vld [vmem:[%s6744_s21 + $0x690] sm:$0xff] }
  0xbd   : > { %6332 = vmatprep.mubr.msk.f32.mxu1 %vm277_vm1, %v5071_v47  ;;  %v5405_v46 = vld [vmem:[%s6744_s21 + $0x9d0] sm:$0xff]  ;;  %v5213_v47 = vld [vmem:[%s6744_s21 + $0x718] sm:$0xff] }
  0xbf   : > { %6173 = vmatmul.mubr.msk.f32.gmra.mxu0 %vm277_vm1, %v260_v48 }
  0xc0   : > { %6333 = vmatmul.mubr.msk.f32.gmra.mxu1 %vm277_vm1, %v5072_v49  ;;  %6175 = vmatprep.mubr.msk.f32.mxu0 %vm277_vm1, %v261_v50  ;;  %v5421_v50 = vld [vmem:[%s6744_s21 + $0xa50] sm:$0xff] }
  0xc1   : > { %6335 = vmatprep.mubr.msk.f32.mxu1 %vm277_vm1, %v5073_v51  ;;  %v5197_v51 = vld [vmem:[%s6744_s21 + $0x698] sm:$0xff] }
  0xc3   : > { %6176 = vmatmul.mubr.msk.f32.gmra.mxu0 %vm277_vm1, %v262_v52  ;;  %v5406_v52 = vld [vmem:[%s6744_s21 + $0x9d8] sm:$0xff] }
  0xc4   : > { %6336 = vmatmul.mubr.msk.f32.gmra.mxu1 %vm277_vm1, %v5074_v53  ;;  %6178 = vmatprep.mubr.msk.f32.mxu0 %vm277_vm1, %v263_v54 }
  0xc5   : > { %6338 = vmatprep.mubr.msk.f32.mxu1 %vm277_vm1, %v5075_v55  ;;  %v5198_v55 = vld [vmem:[%s6744_s21 + $0x6a0] sm:$0xff] }
  0xc7   : > { %6179 = vmatmul.mubr.msk.f32.gmra.mxu0 %vm277_vm1, %v264_v56  ;;  %v5407_v56 = vld [vmem:[%s6744_s21 + $0x9e0] sm:$0xff] }
  0xc8   : > { %6339 = vmatmul.mubr.msk.f32.gmra.mxu1 %vm277_vm1, %v5076_v57  ;;  %6181 = vmatprep.mubr.msk.f32.mxu0 %vm277_vm1, %v265_v58 }
  0xc9   : > { %6341 = vmatprep.mubr.msk.f32.mxu1 %vm277_vm1, %v5077_v59 }
  0xcb   : > { %6182 = vmatmul.mubr.msk.f32.gmra.mxu0 %vm277_vm1, %v266_v60  ;;  %v5420_v60 = vld [vmem:[%s6744_s21 + $0xa48] sm:$0xff] }
  0xcc   : > { %6342 = vmatmul.mubr.msk.f32.gmra.mxu1 %vm277_vm1, %v5078_v61  ;;  %6184 = vmatprep.mubr.msk.f32.mxu0 %vm277_vm1, %v267_v62  ;;  %v5199_v61 = vld [vmem:[%s6744_s21 + $0x6a8] sm:$0xff] }
  0xcd   : > { %6344 = vmatprep.mubr.msk.f32.mxu1 %vm277_vm1, %v5079_v63  ;;  %v5408_v62 = vld [vmem:[%s6744_s21 + $0x9e8] sm:$0xff] }
  0xcf   : > { %6185 = vmatmul.mubr.msk.f32.gmra.mxu0 %vm277_vm1, %v268_v0 }
  0xd0   : > { %6345 = vmatmul.mubr.msk.f32.gmra.mxu1 %vm277_vm1, %v5080_v1  ;;  %6187 = vmatprep.mubr.msk.f32.mxu0 %vm277_vm1, %v269_v2  ;;  %v5200_v1 = vld [vmem:[%s6744_s21 + $0x6b0] sm:$0xff] }
  0xd1   : > { %6347 = vmatprep.mubr.msk.f32.mxu1 %vm277_vm1, %v5081_v3  ;;  %v5409_v2 = vld [vmem:[%s6744_s21 + $0x9f0] sm:$0xff]  ;;  %v5211_v3 = vld [vmem:[%s6744_s21 + $0x708] sm:$0xff] }
  0xd3   : > { %v7140_v8 = vpop.f32.mrf.mxu0  ;;  %6188 = vmatmul.mubr.msk.f32.gmra.mxu0 %vm277_vm1, %v270_v4 }
  0xd4   : > { %v7143_v9 = vpop.f32.mrf.mxu1  ;;  %6348 = vmatmul.mubr.msk.f32.gmra.mxu1 %vm277_vm1, %v5082_v5  ;;  %6190 = vmatprep.mubr.msk.f32.mxu0 %vm277_vm1, %v271_v6  ;;  %v5419_v6 = vld [vmem:[%s6744_s21 + $0xa40] sm:$0xff] }
  0xd5   : > { %6350 = vmatprep.mubr.msk.f32.mxu1 %vm277_vm1, %v5083_v7  ;;  %v7152_v13 = vpop.f32.mrf.mxu0  ;;  %v5201_v7 = vld [vmem:[%s6744_s21 + $0x6b8] sm:$0xff] }
  0xd6   : > { %v7154_v14 = vpop.f32.mrf.mxu1 }
  0xd7   : > { %v7160_v18 = vpop.f32.mrf.mxu0  ;;  %6191 = vmatmul.mubr.msk.f32.gmra.mxu0 %vm277_vm1, %v272_v11  ;;  %v5410_v11 = vld [vmem:[%s6744_s21 + $0x9f8] sm:$0xff] }
  0xd8   : > { %v7163_v19 = vpop.f32.mrf.mxu1  ;;  %6351 = vmatmul.mubr.msk.f32.gmra.mxu1 %vm277_vm1, %v5084_v12  ;;  %6193 = vmatprep.mubr.msk.f32.mxu0 %vm277_vm1, %v273_v15 }
  0xd9   : > { %6353 = vmatprep.mubr.msk.f32.mxu1 %vm277_vm1, %v5085_v16  ;;  %v7172_v23 = vpop.f32.mrf.mxu0  ;;  %v5202_v16 = vld [vmem:[%s6744_s21 + $0x6c0] sm:$0xff] }
  0xda   : > { %v7174_v24 = vpop.f32.mrf.mxu1 }
  0xdb   : > { %v7180_v28 = vpop.f32.mrf.mxu0  ;;  %6194 = vmatmul.mubr.msk.f32.gmra.mxu0 %vm277_vm1, %v274_v21  ;;  %v5411_v21 = vld [vmem:[%s6744_s21 + $0xa00] sm:$0xff] }
  0xdc   : > { %v7183_v29 = vpop.f32.mrf.mxu1  ;;  %6354 = vmatmul.mubr.msk.f32.gmra.mxu1 %vm277_vm1, %v5086_v22  ;;  %6196 = vmatprep.mubr.msk.f32.mxu0 %vm277_vm1, %v275_v25 }
  0xdd   : > { %6356 = vmatprep.mubr.msk.f32.mxu1 %vm277_vm1, %v5087_v26  ;;  %v7192_v33 = vpop.f32.mrf.mxu0 }
  0xde   : > { %v7194_v34 = vpop.f32.mrf.mxu1 }
  0xdf   : > { %v7200_v38 = vpop.f32.mrf.mxu0  ;;  %6197 = vmatmul.mubr.msk.f32.gmra.mxu0 %vm277_vm1, %v276_v31  ;;  %v5418_v31 = vld [vmem:[%s6744_s21 + $0xa38] sm:$0xff] }
  0xe0   : > { %v7203_v39 = vpop.f32.mrf.mxu1  ;;  %6357 = vmatmul.mubr.msk.f32.gmra.mxu1 %vm277_vm1, %v5088_v32  ;;  %6363 = vmatprep.mubr.msk.f32.mxu0 %vm277_vm1, %v5194_v35  ;;  %v5203_v32 = vld [vmem:[%s6744_s21 + $0x6c8] sm:$0xff] }
  0xe1   : > { %6523 = vmatprep.mubr.msk.f32.mxu1 %vm277_vm1, %v5403_v36  ;;  %v7212_v43 = vpop.f32.mrf.mxu0  ;;  %v5412_v35 = vld [vmem:[%s6744_s21 + $0xa08] sm:$0xff] }
  0xe2   : > { %v7214_v44 = vpop.f32.mrf.mxu1 }
  0xe3   : > { %v7220_v48 = vpop.f32.mrf.mxu0  ;;  %6364 = vmatmul.mubr.msk.f32.vlgmr.msra.gmra.mxu0 %vm277_vm1, %v5195_v41 }
  0xe4   : > { %v7222_v49 = vpop.f32.mrf.mxu1  ;;  %6524 = vmatmul.mubr.msk.f32.vlgmr.msra.gmra.mxu1 %vm277_vm1, %v5404_v42  ;;  %6366 = vmatprep.mubr.msk.f32.mxu0 %vm277_vm1, %v5196_v45  ;;  %v5204_v42 = vld [vmem:[%s6744_s21 + $0x6d0] sm:$0xff] }
  0xe5   : > { %6526 = vmatprep.mubr.msk.f32.mxu1 %vm277_vm1, %v5405_v46  ;;  %v7232_v53 = vpop.f32.mrf.mxu0  ;;  %v5413_v45 = vld [vmem:[%s6744_s21 + $0xa10] sm:$0xff]  ;;  %v5209_v46 = vld [vmem:[%s6744_s21 + $0x6f8] sm:$0xff] }
  0xe6   : > { %v7234_v54 = vpop.f32.mrf.mxu1 }
  0xe7   : > { %v7240_v58 = vpop.f32.mrf.mxu0  ;;  %6367 = vmatmul.mubr.msk.f32.gmra.mxu0 %vm277_vm1, %v5197_v51 }
  0xe8   : > { %v7242_v59 = vpop.f32.mrf.mxu1  ;;  %6527 = vmatmul.mubr.msk.f32.gmra.mxu1 %vm277_vm1, %v5406_v52  ;;  %6369 = vmatprep.mubr.msk.f32.mxu0 %vm277_vm1, %v5198_v55  ;;  %v5417_v55 = vld [vmem:[%s6744_s21 + $0xa30] sm:$0xff] }
  0xe9   : > { %6529 = vmatprep.mubr.msk.f32.mxu1 %vm277_vm1, %v5407_v56  ;;  %v7252_v63 = vpop.f32.mrf.mxu0  ;;  %v5205_v56 = vld [vmem:[%s6744_s21 + $0x6d8] sm:$0xff] }
  0xea   : > { %v7254_v0 = vpop.f32.mrf.mxu1 }
  0xeb   : > { %v7260_v4 = vpop.f32.mrf.mxu0  ;;  %6370 = vmatmul.mubr.msk.f32.gmra.mxu0 %vm277_vm1, %v5199_v61  ;;  %v5414_v61 = vld [vmem:[%s6744_s21 + $0xa18] sm:$0xff] }
  0xec   : > { %v7262_v5 = vpop.f32.mrf.mxu1  ;;  %6530 = vmatmul.mubr.msk.f32.gmra.mxu1 %vm277_vm1, %v5408_v62  ;;  %6372 = vmatprep.mubr.msk.f32.mxu0 %vm277_vm1, %v5200_v1 }
  0xed   : > { %6532 = vmatprep.mubr.msk.f32.mxu1 %vm277_vm1, %v5409_v2  ;;  %v7272_v12 = vpop.f32.mrf.mxu0  ;;  %v5206_v2 = vld [vmem:[%s6744_s21 + $0x6e0] sm:$0xff] }
  0xee   : > { %v7274_v15 = vpop.f32.mrf.mxu1 }
  0xef   : > { %v7280_v25 = vpop.f32.mrf.mxu0  ;;  %6373 = vmatmul.mubr.msk.f32.gmra.mxu0 %vm277_vm1, %v5201_v7  ;;  %v5415_v7 = vld [vmem:[%s6744_s21 + $0xa20] sm:$0xff] }
  0xf0   : > { %v7282_v26 = vpop.f32.mrf.mxu1  ;;  %6533 = vmatmul.mubr.msk.f32.gmra.mxu1 %vm277_vm1, %v5410_v11  ;;  %6375 = vmatprep.mubr.msk.f32.mxu0 %vm277_vm1, %v5202_v16 }
  0xf1   : > { %6535 = vmatprep.mubr.msk.f32.mxu1 %vm277_vm1, %v5411_v21  ;;  %v7292_v36 = vpop.f32.mrf.mxu0 }
  0xf2   : > { %v7294_v41 = vpop.f32.mrf.mxu1 }
  0xf3   : > { %v7300_v51 = vpop.f32.mrf.mxu0  ;;  %6376 = vmatmul.mubr.msk.f32.gmra.mxu0 %vm277_vm1, %v5203_v32 }
  0xf4   : > { %v7302_v52 = vpop.f32.mrf.mxu1  ;;  %6536 = vmatmul.mubr.msk.f32.gmra.mxu1 %vm277_vm1, %v5412_v35  ;;  %6378 = vmatprep.mubr.msk.f32.mxu0 %vm277_vm1, %v5204_v42  ;;  %v5207_v35 = vld [vmem:[%s6744_s21 + $0x6e8] sm:$0xff] }
  0xf5   : > { %6538 = vmatprep.mubr.msk.f32.mxu1 %vm277_vm1, %v5413_v45  ;;  %v7312_v62 = vpop.f32.mrf.mxu0  ;;  %v5416_v42 = vld [vmem:[%s6744_s21 + $0xa28] sm:$0xff] }
  0xf6   : > { %v7314_v1 = vpop.f32.mrf.mxu1 }
  0xf7   : > { %v7320_v16 = vpop.f32.mrf.mxu0  ;;  %6379 = vmatmul.mubr.msk.f32.gmra.mxu0 %vm277_vm1, %v5205_v56  ;;  %v5208_v56 = vld [vmem:[%s6744_s21 + $0x6f0] sm:$0xff] }
  0xf8   : > { %v7322_v21 = vpop.f32.mrf.mxu1  ;;  %6539 = vmatmul.mubr.msk.f32.gmra.mxu1 %vm277_vm1, %v5414_v61  ;;  %6381 = vmatprep.mubr.msk.f32.mxu0 %vm277_vm1, %v5206_v2 }
  0xf9   : > { %6541 = vmatprep.mubr.msk.f32.mxu1 %vm277_vm1, %v5415_v7  ;;  %v7332_v45 = vpop.f32.mrf.mxu0 }
  0xfa   : > { %v7334_v11 = vpop.f32.mrf.mxu1 }
  0xfb   : > { %v7340_v32 = vpop.f32.mrf.mxu0  ;;  %6382 = vmatmul.mubr.msk.f32.gmra.mxu0 %vm277_vm1, %v5207_v35  ;;  %v5210_v35 = vld [vmem:[%s6744_s21 + $0x700] sm:$0xff] }
  0xfc   : > { %v7342_v2 = vpop.f32.mrf.mxu1  ;;  %6542 = vmatmul.mubr.msk.f32.gmra.mxu1 %vm277_vm1, %v5416_v42  ;;  %6384 = vmatprep.mubr.msk.f32.mxu0 %vm277_vm1, %v5208_v56 }
  0xfd   : > { %6544 = vmatprep.mubr.msk.f32.mxu1 %vm277_vm1, %v5417_v55  ;;  %v7352_v61 = vpop.f32.mrf.mxu0 }
  0xfe   : > { %v7354_v22 = vpop.f32.mrf.mxu1 }
  0xff   : > { %v7360_v7 = vpop.f32.mrf.mxu0  ;;  %6385 = vmatmul.mubr.msk.f32.gmra.mxu0 %vm277_vm1, %v5209_v46  ;;  %v5212_v46 = vld [vmem:[%s6744_s21 + $0x710] sm:$0xff] }
 0x100   : > { %v7362_v56 = vpop.f32.mrf.mxu1  ;;  %6545 = vmatmul.mubr.msk.f32.gmra.mxu1 %vm277_vm1, %v5418_v31  ;;  %6387 = vmatprep.mubr.msk.f32.mxu0 %vm277_vm1, %v5210_v35 }
 0x101   : > { %6547 = vmatprep.mubr.msk.f32.mxu1 %vm277_vm1, %v5419_v6  ;;  %v7372_v42 = vpop.f32.mrf.mxu0 }
 0x102   : > { %v7374_v57 = vpop.f32.mrf.mxu1 }
 0x103   : > { %9011 = vst [vmem:[#allocation2_spill] sm:$0xff] %v7374_v57  ;;  %v7380_v55 = vpop.f32.mrf.mxu0  ;;  %6388 = vmatmul.mubr.msk.f32.gmra.mxu0 %vm277_vm1, %v5211_v3  ;;  %v5214_v3 = vld [vmem:[%s6744_s21 + $0x720] sm:$0xff] }
 0x104   : > { %9012 = vst [vmem:[#allocation3_spill] sm:$0xff] %v7380_v55  ;;  %v7382_v35 = vpop.f32.mrf.mxu1  ;;  %6548 = vmatmul.mubr.msk.f32.gmra.mxu1 %vm277_vm1, %v5420_v60  ;;  %6390 = vmatprep.mubr.msk.f32.mxu0 %vm277_vm1, %v5212_v46 }
 0x105   : > { %9013 = vst [vmem:[#allocation4_spill] sm:$0xff] %v7382_v35  ;;  %6550 = vmatprep.mubr.msk.f32.mxu1 %vm277_vm1, %v5421_v50  ;;  %v7392_v31 = vpop.f32.mrf.mxu0  ;;  %v9173_v35 = vmax.f32 %v7152_v13, %v7154_v14 }
 0x106   : > { %9014 = vst [vmem:[#allocation5_spill] sm:$0xff] %v7392_v31  ;;  %v7394_v37 = vpop.f32.mrf.mxu1 }
 0x107   : > { %9015 = vst [vmem:[#allocation6_spill] sm:$0xff] %v7394_v37  ;;  %v7400_v6 = vpop.f32.mrf.mxu0  ;;  %6391 = vmatmul.mubr.msk.f32.gmra.mxu0 %vm277_vm1, %v5213_v47  ;;  %v5216_v47 = vld [vmem:[%s6744_s21 + $0x730] sm:$0xff]  ;;  %v8190_v37 = vld [vmem:[%s8848_s2] ss:$0 sm:$0xff] }
 0x108   : > { %9016 = vst [vmem:[#allocation7_spill] sm:$0xff] %v7400_v6  ;;  %v7402_v46 = vpop.f32.mrf.mxu1  ;;  %6551 = vmatmul.mubr.msk.f32.gmra.mxu1 %vm277_vm1, %v5422_v40  ;;  %6393 = vmatprep.mubr.msk.f32.mxu0 %vm277_vm1, %v5214_v3  ;;  %v5426_v6 = vld [vmem:[%s6744_s21 + $0xa78] sm:$0xff] }
 0x109   : > { %9017 = vst [vmem:[#allocation8_spill] sm:$0xff] %v7402_v46  ;;  %6553 = vmatprep.mubr.msk.f32.mxu1 %vm277_vm1, %v5423_v30  ;;  %v7412_v60 = vpop.f32.mrf.mxu0  ;;  %v5217_v46 = vld [vmem:[%s6744_s21 + $0x738] sm:$0xff] }
 0x10a   : > { %9018 = vst [vmem:[#allocation9_spill] sm:$0xff] %v7412_v60  ;;  %v7414_v17 = vpop.f32.mrf.mxu1  ;;  %v5427_v60 = vld [vmem:[%s6744_s21 + $0xa80] sm:$0xff] }
 0x10b   : > { %9019 = vst [vmem:[#allocation10_spill] sm:$0xff] %v7414_v17  ;;  %v7420_v50 = vpop.f32.mrf.mxu0  ;;  %6394 = vmatmul.mubr.msk.f32.gmra.mxu0 %vm277_vm1, %v5215_v27  ;;  %v5218_v27 = vld [vmem:[%s6744_s21 + $0x740] sm:$0xff] }
 0x10c   : > { %9020 = vst [vmem:[#allocation11_spill] sm:$0xff] %v7420_v50  ;;  %v7422_v3 = vpop.f32.mrf.mxu1  ;;  %6554 = vmatmul.mubr.msk.f32.gmra.mxu1 %vm277_vm1, %v5424_v20  ;;  %6396 = vmatprep.mubr.msk.f32.mxu0 %vm277_vm1, %v5216_v47  ;;  %v5428_v50 = vld [vmem:[%s6744_s21 + $0xa88] sm:$0xff] }
 0x10d   : > { %9021 = vst [vmem:[#allocation12_spill] sm:$0xff] %v7422_v3  ;;  %6556 = vmatprep.mubr.msk.f32.mxu1 %vm277_vm1, %v5425_v10  ;;  %v7432_v40 = vpop.f32.mrf.mxu0  ;;  %v5219_v3 = vld [vmem:[%s6744_s21 + $0x748] sm:$0xff] }
 0x10e   : > { %9022 = vst [vmem:[#allocation13_spill] sm:$0xff] %v7432_v40  ;;  %v7434_v17 = vpop.f32.mrf.mxu1  ;;  %v5429_v40 = vld [vmem:[%s6744_s21 + $0xa90] sm:$0xff] }
 0x10f   : > { %9023 = vst [vmem:[#allocation14_spill] sm:$0xff] %v7434_v17  ;;  %v7440_v30 = vpop.f32.mrf.mxu0  ;;  %6397 = vmatmul.mubr.msk.f32.gmra.mxu0 %vm277_vm1, %v5217_v46  ;;  %v5220_v46 = vld [vmem:[%s6744_s21 + $0x750] sm:$0xff] }
 0x110   : > { %9024 = vst [vmem:[#allocation15_spill] sm:$0xff] %v7440_v30  ;;  %v7442_v47 = vpop.f32.mrf.mxu1  ;;  %6557 = vmatmul.mubr.msk.f32.gmra.mxu1 %vm277_vm1, %v5426_v6  ;;  %6399 = vmatprep.mubr.msk.f32.mxu0 %vm277_vm1, %v5218_v27  ;;  %v5430_v30 = vld [vmem:[%s6744_s21 + $0xa98] sm:$0xff] }
 0x111   : > { %9025 = vst [vmem:[#allocation16_spill] sm:$0xff] %v7442_v47  ;;  %6559 = vmatprep.mubr.msk.f32.mxu1 %vm277_vm1, %v5427_v60  ;;  %v7452_v20 = vpop.f32.mrf.mxu0  ;;  %v5221_v47 = vld [vmem:[%s6744_s21 + $0x758] sm:$0xff] }
 0x112   : > { %9026 = vst [vmem:[#allocation17_spill] sm:$0xff] %v7452_v20  ;;  %v7454_v17 = vpop.f32.mrf.mxu1  ;;  %v5431_v20 = vld [vmem:[%s6744_s21 + $0xaa0] sm:$0xff] }
 0x113   : > { %9027 = vst [vmem:[#allocation18_spill] sm:$0xff] %v7454_v17  ;;  %v7460_v10 = vpop.f32.mrf.mxu0  ;;  %6400 = vmatmul.mubr.msk.f32.gmra.mxu0 %vm277_vm1, %v5219_v3  ;;  %v5222_v3 = vld [vmem:[%s6744_s21 + $0x760] sm:$0xff] }
 0x114   : > { %9028 = vst [vmem:[#allocation19_spill] sm:$0xff] %v7460_v10  ;;  %v7462_v27 = vpop.f32.mrf.mxu1  ;;  %6560 = vmatmul.mubr.msk.f32.gmra.mxu1 %vm277_vm1, %v5428_v50  ;;  %6402 = vmatprep.mubr.msk.f32.mxu0 %vm277_vm1, %v5220_v46  ;;  %v5432_v10 = vld [vmem:[%s6744_s21 + $0xaa8] sm:$0xff] }
 0x115   : > { %9029 = vst [vmem:[#allocation20_spill] sm:$0xff] %v7462_v27  ;;  %6562 = vmatprep.mubr.msk.f32.mxu1 %vm277_vm1, %v5429_v40  ;;  %v7472_v6 = vpop.f32.mrf.mxu0  ;;  %v5223_v27 = vld [vmem:[%s6744_s21 + $0x768] sm:$0xff] }
 0x116   : > { %9030 = vst [vmem:[#allocation21_spill] sm:$0xff] %v7472_v6  ;;  %v7474_v17 = vpop.f32.mrf.mxu1  ;;  %v5433_v6 = vld [vmem:[%s6744_s21 + $0xab0] sm:$0xff] }
 0x117   : > { %9031 = vst [vmem:[#allocation22_spill] sm:$0xff] %v7474_v17  ;;  %v7480_v60 = vpop.f32.mrf.mxu0  ;;  %6403 = vmatmul.mubr.msk.f32.gmra.mxu0 %vm277_vm1, %v5221_v47  ;;  %v5224_v47 = vld [vmem:[%s6744_s21 + $0x770] sm:$0xff] }
 0x118   : > { %9032 = vst [vmem:[#allocation23_spill] sm:$0xff] %v7480_v60  ;;  %v7482_v46 = vpop.f32.mrf.mxu1  ;;  %6563 = vmatmul.mubr.msk.f32.gmra.mxu1 %vm277_vm1, %v5430_v30  ;;  %6405 = vmatprep.mubr.msk.f32.mxu0 %vm277_vm1, %v5222_v3  ;;  %v5434_v60 = vld [vmem:[%s6744_s21 + $0xab8] sm:$0xff] }
 0x119   : > { %9033 = vst [vmem:[#allocation24_spill] sm:$0xff] %v7482_v46  ;;  %6565 = vmatprep.mubr.msk.f32.mxu1 %vm277_vm1, %v5431_v20  ;;  %v7492_v50 = vpop.f32.mrf.mxu0  ;;  %v5225_v46 = vld [vmem:[%s6744_s21 + $0x778] sm:$0xff] }
 0x11a   : > { %9034 = vst [vmem:[#allocation25_spill] sm:$0xff] %v7492_v50  ;;  %v7494_v17 = vpop.f32.mrf.mxu1  ;;  %v5435_v50 = vld [vmem:[%s6744_s21 + $0xac0] sm:$0xff] }
 0x11b   : > { %9035 = vst [vmem:[#allocation26_spill] sm:$0xff] %v7494_v17  ;;  %v7500_v40 = vpop.f32.mrf.mxu0  ;;  %6406 = vmatmul.mubr.msk.f32.gmra.mxu0 %vm277_vm1, %v5223_v27  ;;  %v5226_v27 = vld [vmem:[%s6744_s21 + $0x780] sm:$0xff] }
 0x11c   : > { %9036 = vst [vmem:[#allocation27_spill] sm:$0xff] %v7500_v40  ;;  %v7502_v3 = vpop.f32.mrf.mxu1  ;;  %6566 = vmatmul.mubr.msk.f32.gmra.mxu1 %vm277_vm1, %v5432_v10  ;;  %6408 = vmatprep.mubr.msk.f32.mxu0 %vm277_vm1, %v5224_v47  ;;  %v5436_v40 = vld [vmem:[%s6744_s21 + $0xac8] sm:$0xff] }
 0x11d   : > { %9037 = vst [vmem:[#allocation28_spill] sm:$0xff] %v7502_v3  ;;  %6568 = vmatprep.mubr.msk.f32.mxu1 %vm277_vm1, %v5433_v6  ;;  %v7512_v30 = vpop.f32.mrf.mxu0  ;;  %v5227_v3 = vld [vmem:[%s6744_s21 + $0x788] sm:$0xff] }
 0x11e   : > { %9038 = vst [vmem:[#allocation29_spill] sm:$0xff] %v7512_v30  ;;  %v7514_v17 = vpop.f32.mrf.mxu1  ;;  %v5437_v30 = vld [vmem:[%s6744_s21 + $0xad0] sm:$0xff] }
 0x11f   : > { %9039 = vst [vmem:[#allocation30_spill] sm:$0xff] %v7514_v17  ;;  %v7520_v20 = vpop.f32.mrf.mxu0  ;;  %6409 = vmatmul.mubr.msk.f32.gmra.mxu0 %vm277_vm1, %v5225_v46  ;;  %v5228_v46 = vld [vmem:[%s6744_s21 + $0x790] sm:$0xff] }
 0x120   : > { %9040 = vst [vmem:[#allocation31_spill] sm:$0xff] %v7520_v20  ;;  %v7522_v47 = vpop.f32.mrf.mxu1  ;;  %6569 = vmatmul.mubr.msk.f32.gmra.mxu1 %vm277_vm1, %v5434_v60  ;;  %6411 = vmatprep.mubr.msk.f32.mxu0 %vm277_vm1, %v5226_v27  ;;  %v5438_v20 = vld [vmem:[%s6744_s21 + $0xad8] sm:$0xff] }
 0x121   : > { %9041 = vst [vmem:[#allocation32_spill] sm:$0xff] %v7522_v47  ;;  %6571 = vmatprep.mubr.msk.f32.mxu1 %vm277_vm1, %v5435_v50  ;;  %v7532_v10 = vpop.f32.mrf.mxu0  ;;  %v5229_v47 = vld [vmem:[%s6744_s21 + $0x798] sm:$0xff] }
 0x122   : > { %9042 = vst [vmem:[#allocation33_spill] sm:$0xff] %v7532_v10  ;;  %v7534_v17 = vpop.f32.mrf.mxu1  ;;  %v5439_v10 = vld [vmem:[%s6744_s21 + $0xae0] sm:$0xff] }
 0x123   : > { %9043 = vst [vmem:[#allocation34_spill] sm:$0xff] %v7534_v17  ;;  %v7540_v6 = vpop.f32.mrf.mxu0  ;;  %6412 = vmatmul.mubr.msk.f32.gmra.mxu0 %vm277_vm1, %v5227_v3  ;;  %v5230_v3 = vld [vmem:[%s6744_s21 + $0x7a0] sm:$0xff] }
 0x124   : > { %9044 = vst [vmem:[#allocation35_spill] sm:$0xff] %v7540_v6  ;;  %v7542_v27 = vpop.f32.mrf.mxu1  ;;  %6572 = vmatmul.mubr.msk.f32.gmra.mxu1 %vm277_vm1, %v5436_v40  ;;  %6414 = vmatprep.mubr.msk.f32.mxu0 %vm277_vm1, %v5228_v46  ;;  %v5440_v6 = vld [vmem:[%s6744_s21 + $0xae8] sm:$0xff] }
 0x125   : > { %9045 = vst [vmem:[#allocation36_spill] sm:$0xff] %v7542_v27  ;;  %6574 = vmatprep.mubr.msk.f32.mxu1 %vm277_vm1, %v5437_v30  ;;  %v7552_v60 = vpop.f32.mrf.mxu0  ;;  %v5231_v27 = vld [vmem:[%s6744_s21 + $0x7a8] sm:$0xff] }
 0x126   : > { %9046 = vst [vmem:[#allocation37_spill] sm:$0xff] %v7552_v60  ;;  %v7554_v17 = vpop.f32.mrf.mxu1  ;;  %v5441_v60 = vld [vmem:[%s6744_s21 + $0xaf0] sm:$0xff] }
 0x127   : > { %9047 = vst [vmem:[#allocation38_spill] sm:$0xff] %v7554_v17  ;;  %v7560_v50 = vpop.f32.mrf.mxu0  ;;  %6415 = vmatmul.mubr.msk.f32.gmra.mxu0 %vm277_vm1, %v5229_v47  ;;  %v5232_v47 = vld [vmem:[%s6744_s21 + $0x7b0] sm:$0xff] }
 0x128   : > { %9048 = vst [vmem:[#allocation39_spill] sm:$0xff] %v7560_v50  ;;  %v7562_v46 = vpop.f32.mrf.mxu1  ;;  %6575 = vmatmul.mubr.msk.f32.gmra.mxu1 %vm277_vm1, %v5438_v20  ;;  %6417 = vmatprep.mubr.msk.f32.mxu0 %vm277_vm1, %v5230_v3  ;;  %v5442_v50 = vld [vmem:[%s6744_s21 + $0xaf8] sm:$0xff] }
 0x129   : > { %9049 = vst [vmem:[#allocation40_spill] sm:$0xff] %v7562_v46  ;;  %6577 = vmatprep.mubr.msk.f32.mxu1 %vm277_vm1, %v5439_v10  ;;  %v7572_v40 = vpop.f32.mrf.mxu0  ;;  %v5233_v46 = vld [vmem:[%s6744_s21 + $0x7b8] sm:$0xff] }
 0x12a   : > { %9050 = vst [vmem:[#allocation41_spill] sm:$0xff] %v7572_v40  ;;  %v7574_v17 = vpop.f32.mrf.mxu1  ;;  %v5443_v40 = vld [vmem:[%s6744_s21 + $0xb00] sm:$0xff] }
 0x12b   : > { %9051 = vst [vmem:[#allocation42_spill] sm:$0xff] %v7574_v17  ;;  %v7580_v30 = vpop.f32.mrf.mxu0  ;;  %6418 = vmatmul.mubr.msk.f32.gmra.mxu0 %vm277_vm1, %v5231_v27  ;;  %v5234_v27 = vld [vmem:[%s6744_s21 + $0x7c0] sm:$0xff] }
 0x12c   : > { %9052 = vst [vmem:[#allocation43_spill] sm:$0xff] %v7580_v30  ;;  %v7582_v3 = vpop.f32.mrf.mxu1  ;;  %6578 = vmatmul.mubr.msk.f32.gmra.mxu1 %vm277_vm1, %v5440_v6  ;;  %6420 = vmatprep.mubr.msk.f32.mxu0 %vm277_vm1, %v5232_v47  ;;  %v5444_v30 = vld [vmem:[%s6744_s21 + $0xb08] sm:$0xff] }
 0x12d   : > { %9053 = vst [vmem:[#allocation44_spill] sm:$0xff] %v7582_v3  ;;  %6580 = vmatprep.mubr.msk.f32.mxu1 %vm277_vm1, %v5441_v60  ;;  %v7592_v20 = vpop.f32.mrf.mxu0  ;;  %v5235_v3 = vld [vmem:[%s6744_s21 + $0x7c8] sm:$0xff] }
 0x12e   : > { %9054 = vst [vmem:[#allocation45_spill] sm:$0xff] %v7592_v20  ;;  %v7594_v17 = vpop.f32.mrf.mxu1  ;;  %v5445_v20 = vld [vmem:[%s6744_s21 + $0xb10] sm:$0xff] }
 0x12f   : > { %9055 = vst [vmem:[#allocation46_spill] sm:$0xff] %v7594_v17  ;;  %v7600_v10 = vpop.f32.mrf.mxu0  ;;  %6421 = vmatmul.mubr.msk.f32.gmra.mxu0 %vm277_vm1, %v5233_v46  ;;  %v5236_v46 = vld [vmem:[%s6744_s21 + $0x7d0] sm:$0xff] }
 0x130   : > { %9056 = vst [vmem:[#allocation47_spill] sm:$0xff] %v7600_v10  ;;  %v7602_v47 = vpop.f32.mrf.mxu1  ;;  %6581 = vmatmul.mubr.msk.f32.gmra.mxu1 %vm277_vm1, %v5442_v50  ;;  %6423 = vmatprep.mubr.msk.f32.mxu0 %vm277_vm1, %v5234_v27  ;;  %v5446_v10 = vld [vmem:[%s6744_s21 + $0xb18] sm:$0xff] }
 0x131   : > { %9057 = vst [vmem:[#allocation48_spill] sm:$0xff] %v7602_v47  ;;  %6583 = vmatprep.mubr.msk.f32.mxu1 %vm277_vm1, %v5443_v40  ;;  %v7612_v6 = vpop.f32.mrf.mxu0  ;;  %v5237_v47 = vld [vmem:[%s6744_s21 + $0x7d8] sm:$0xff] }
 0x132   : > { %9058 = vst [vmem:[#allocation49_spill] sm:$0xff] %v7612_v6  ;;  %v7614_v17 = vpop.f32.mrf.mxu1  ;;  %v5447_v6 = vld [vmem:[%s6744_s21 + $0xb20] sm:$0xff] }
 0x133   : > { %9059 = vst [vmem:[#allocation50_spill] sm:$0xff] %v7614_v17  ;;  %v7620_v60 = vpop.f32.mrf.mxu0  ;;  %6424 = vmatmul.mubr.msk.f32.gmra.mxu0 %vm277_vm1, %v5235_v3  ;;  %v5238_v3 = vld [vmem:[%s6744_s21 + $0x7e0] sm:$0xff] }
 0x134   : > { %9060 = vst [vmem:[#allocation51_spill] sm:$0xff] %v7620_v60  ;;  %v7622_v27 = vpop.f32.mrf.mxu1  ;;  %6584 = vmatmul.mubr.msk.f32.gmra.mxu1 %vm277_vm1, %v5444_v30  ;;  %6426 = vmatprep.mubr.msk.f32.mxu0 %vm277_vm1, %v5236_v46  ;;  %v5448_v60 = vld [vmem:[%s6744_s21 + $0xb28] sm:$0xff] }
 0x135   : > { %9061 = vst [vmem:[#allocation52_spill] sm:$0xff] %v7622_v27  ;;  %6586 = vmatprep.mubr.msk.f32.mxu1 %vm277_vm1, %v5445_v20  ;;  %v7632_v50 = vpop.f32.mrf.mxu0  ;;  %v5239_v27 = vld [vmem:[%s6744_s21 + $0x7e8] sm:$0xff] }
 0x136   : > { %9062 = vst [vmem:[#allocation53_spill] sm:$0xff] %v7632_v50  ;;  %v7634_v17 = vpop.f32.mrf.mxu1  ;;  %v5449_v50 = vld [vmem:[%s6744_s21 + $0xb30] sm:$0xff] }
 0x137   : > { %9063 = vst [vmem:[#allocation54_spill] sm:$0xff] %v7634_v17  ;;  %v7640_v40 = vpop.f32.mrf.mxu0  ;;  %6427 = vmatmul.mubr.msk.f32.gmra.mxu0 %vm277_vm1, %v5237_v47  ;;  %v5240_v47 = vld [vmem:[%s6744_s21 + $0x7f0] sm:$0xff] }
 0x138   : > { %9064 = vst [vmem:[#allocation55_spill] sm:$0xff] %v7640_v40  ;;  %v7642_v46 = vpop.f32.mrf.mxu1  ;;  %6587 = vmatmul.mubr.msk.f32.gmra.mxu1 %vm277_vm1, %v5446_v10  ;;  %6429 = vmatprep.mubr.msk.f32.mxu0 %vm277_vm1, %v5238_v3  ;;  %v5450_v40 = vld [vmem:[%s6744_s21 + $0xb38] sm:$0xff] }
 0x139   : > { %9065 = vst [vmem:[#allocation56_spill] sm:$0xff] %v7642_v46  ;;  %6589 = vmatprep.mubr.msk.f32.mxu1 %vm277_vm1, %v5447_v6  ;;  %v7652_v30 = vpop.f32.mrf.mxu0  ;;  %v5241_v46 = vld [vmem:[%s6744_s21 + $0x7f8] sm:$0xff] }
 0x13a   : > { %9066 = vst [vmem:[#allocation57_spill] sm:$0xff] %v7652_v30  ;;  %v7654_v17 = vpop.f32.mrf.mxu1  ;;  %v5451_v30 = vld [vmem:[%s6744_s21 + $0xb40] sm:$0xff] }
 0x13b   : > { %9067 = vst [vmem:[#allocation58_spill] sm:$0xff] %v7654_v17  ;;  %v7660_v20 = vpop.f32.mrf.mxu0  ;;  %6430 = vmatmul.mubr.msk.f32.gmra.mxu0 %vm277_vm1, %v5239_v27  ;;  %v5242_v27 = vld [vmem:[%s6744_s21 + $0x800] sm:$0xff] }
 0x13c   : > { %9068 = vst [vmem:[#allocation59_spill] sm:$0xff] %v7660_v20  ;;  %v7662_v3 = vpop.f32.mrf.mxu1  ;;  %6590 = vmatmul.mubr.msk.f32.gmra.mxu1 %vm277_vm1, %v5448_v60  ;;  %6432 = vmatprep.mubr.msk.f32.mxu0 %vm277_vm1, %v5240_v47  ;;  %v5452_v20 = vld [vmem:[%s6744_s21 + $0xb48] sm:$0xff] }
 0x13d   : > { %9069 = vst [vmem:[#allocation60_spill] sm:$0xff] %v7662_v3  ;;  %6592 = vmatprep.mubr.msk.f32.mxu1 %vm277_vm1, %v5449_v50  ;;  %v7672_v10 = vpop.f32.mrf.mxu0  ;;  %v5243_v3 = vld [vmem:[%s6744_s21 + $0x808] sm:$0xff] }
 0x13e   : > { %9070 = vst [vmem:[#allocation61_spill] sm:$0xff] %v7672_v10  ;;  %v7674_v17 = vpop.f32.mrf.mxu1  ;;  %v5453_v10 = vld [vmem:[%s6744_s21 + $0xb50] sm:$0xff] }
 0x13f   : > { %9071 = vst [vmem:[#allocation62_spill] sm:$0xff] %v7674_v17  ;;  %v7680_v6 = vpop.f32.mrf.mxu0  ;;  %6433 = vmatmul.mubr.msk.f32.gmra.mxu0 %vm277_vm1, %v5241_v46  ;;  %v5244_v46 = vld [vmem:[%s6744_s21 + $0x810] sm:$0xff] }
 0x140   : > { %9072 = vst [vmem:[#allocation63_spill] sm:$0xff] %v7680_v6  ;;  %v7682_v47 = vpop.f32.mrf.mxu1  ;;  %6593 = vmatmul.mubr.msk.f32.gmra.mxu1 %vm277_vm1, %v5450_v40  ;;  %6435 = vmatprep.mubr.msk.f32.mxu0 %vm277_vm1, %v5242_v27  ;;  %v5454_v6 = vld [vmem:[%s6744_s21 + $0xb58] sm:$0xff] }
 0x141   : > { %9073 = vst [vmem:[#allocation64_spill] sm:$0xff] %v7682_v47  ;;  %6595 = vmatprep.mubr.msk.f32.mxu1 %vm277_vm1, %v5451_v30  ;;  %v7692_v60 = vpop.f32.mrf.mxu0  ;;  %v5245_v47 = vld [vmem:[%s6744_s21 + $0x818] sm:$0xff] }
 0x142   : > { %9074 = vst [vmem:[#allocation65_spill] sm:$0xff] %v7692_v60  ;;  %v7694_v17 = vpop.f32.mrf.mxu1  ;;  %v5455_v60 = vld [vmem:[%s6744_s21 + $0xb60] sm:$0xff] }
 0x143   : > { %9075 = vst [vmem:[#allocation66_spill] sm:$0xff] %v7694_v17  ;;  %v7700_v50 = vpop.f32.mrf.mxu0  ;;  %6436 = vmatmul.mubr.msk.f32.gmra.mxu0 %vm277_vm1, %v5243_v3  ;;  %v5246_v3 = vld [vmem:[%s6744_s21 + $0x820] sm:$0xff] }
 0x144   : > { %9076 = vst [vmem:[#allocation67_spill] sm:$0xff] %v7700_v50  ;;  %v7702_v27 = vpop.f32.mrf.mxu1  ;;  %6596 = vmatmul.mubr.msk.f32.gmra.mxu1 %vm277_vm1, %v5452_v20  ;;  %6438 = vmatprep.mubr.msk.f32.mxu0 %vm277_vm1, %v5244_v46  ;;  %v5456_v50 = vld [vmem:[%s6744_s21 + $0xb68] sm:$0xff] }
 0x145   : > { %9077 = vst [vmem:[#allocation68_spill] sm:$0xff] %v7702_v27  ;;  %6598 = vmatprep.mubr.msk.f32.mxu1 %vm277_vm1, %v5453_v10  ;;  %v7712_v40 = vpop.f32.mrf.mxu0  ;;  %v5247_v27 = vld [vmem:[%s6744_s21 + $0x828] sm:$0xff] }
 0x146   : > { %9078 = vst [vmem:[#allocation69_spill] sm:$0xff] %v7712_v40  ;;  %v7714_v17 = vpop.f32.mrf.mxu1  ;;  %v5457_v40 = vld [vmem:[%s6744_s21 + $0xb70] sm:$0xff] }
 0x147   : > { %9079 = vst [vmem:[#allocation70_spill] sm:$0xff] %v7714_v17  ;;  %v7720_v30 = vpop.f32.mrf.mxu0  ;;  %6439 = vmatmul.mubr.msk.f32.gmra.mxu0 %vm277_vm1, %v5245_v47  ;;  %v5248_v47 = vld [vmem:[%s6744_s21 + $0x830] sm:$0xff] }
 0x148   : > { %9080 = vst [vmem:[#allocation71_spill] sm:$0xff] %v7720_v30  ;;  %v7722_v46 = vpop.f32.mrf.mxu1  ;;  %6599 = vmatmul.mubr.msk.f32.gmra.mxu1 %vm277_vm1, %v5454_v6  ;;  %6441 = vmatprep.mubr.msk.f32.mxu0 %vm277_vm1, %v5246_v3  ;;  %v5458_v30 = vld [vmem:[%s6744_s21 + $0xb78] sm:$0xff] }
 0x149   : > { %9081 = vst [vmem:[#allocation72_spill] sm:$0xff] %v7722_v46  ;;  %6601 = vmatprep.mubr.msk.f32.mxu1 %vm277_vm1, %v5455_v60  ;;  %v7732_v20 = vpop.f32.mrf.mxu0  ;;  %v5249_v46 = vld [vmem:[%s6744_s21 + $0x838] sm:$0xff] }
 0x14a   : > { %9082 = vst [vmem:[#allocation73_spill] sm:$0xff] %v7732_v20  ;;  %v7734_v17 = vpop.f32.mrf.mxu1  ;;  %v5459_v20 = vld [vmem:[%s6744_s21 + $0xb80] sm:$0xff] }
 0x14b   : > { %9083 = vst [vmem:[#allocation74_spill] sm:$0xff] %v7734_v17  ;;  %v7740_v10 = vpop.f32.mrf.mxu0  ;;  %6442 = vmatmul.mubr.msk.f32.gmra.mxu0 %vm277_vm1, %v5247_v27  ;;  %v5250_v27 = vld [vmem:[%s6744_s21 + $0x840] sm:$0xff] }
 0x14c   : > { %9084 = vst [vmem:[#allocation75_spill] sm:$0xff] %v7740_v10  ;;  %v7742_v3 = vpop.f32.mrf.mxu1  ;;  %6602 = vmatmul.mubr.msk.f32.gmra.mxu1 %vm277_vm1, %v5456_v50  ;;  %6444 = vmatprep.mubr.msk.f32.mxu0 %vm277_vm1, %v5248_v47  ;;  %v5460_v10 = vld [vmem:[%s6744_s21 + $0xb88] sm:$0xff] }
 0x14d   : > { %9085 = vst [vmem:[#allocation76_spill] sm:$0xff] %v7742_v3  ;;  %6604 = vmatprep.mubr.msk.f32.mxu1 %vm277_vm1, %v5457_v40  ;;  %v7752_v6 = vpop.f32.mrf.mxu0  ;;  %v5251_v3 = vld [vmem:[%s6744_s21 + $0x848] sm:$0xff] }
 0x14e   : > { %9086 = vst [vmem:[#allocation77_spill] sm:$0xff] %v7752_v6  ;;  %v7754_v17 = vpop.f32.mrf.mxu1  ;;  %v5461_v6 = vld [vmem:[%s6744_s21 + $0xb90] sm:$0xff] }
 0x14f   : > { %9087 = vst [vmem:[#allocation78_spill] sm:$0xff] %v7754_v17  ;;  %v7760_v60 = vpop.f32.mrf.mxu0  ;;  %6445 = vmatmul.mubr.msk.f32.gmra.mxu0 %vm277_vm1, %v5249_v46  ;;  %v5252_v46 = vld [vmem:[%s6744_s21 + $0x850] sm:$0xff] }
 0x150   : > { %9088 = vst [vmem:[#allocation79_spill] sm:$0xff] %v7760_v60  ;;  %v7762_v47 = vpop.f32.mrf.mxu1  ;;  %6605 = vmatmul.mubr.msk.f32.gmra.mxu1 %vm277_vm1, %v5458_v30  ;;  %6447 = vmatprep.mubr.msk.f32.mxu0 %vm277_vm1, %v5250_v27  ;;  %v5462_v60 = vld [vmem:[%s6744_s21 + $0xb98] sm:$0xff] }
 0x151   : > { %9089 = vst [vmem:[#allocation80_spill] sm:$0xff] %v7762_v47  ;;  %6607 = vmatprep.mubr.msk.f32.mxu1 %vm277_vm1, %v5459_v20  ;;  %v7772_v50 = vpop.f32.mrf.mxu0  ;;  %v5253_v47 = vld [vmem:[%s6744_s21 + $0x858] sm:$0xff] }
 0x152   : > { %9090 = vst [vmem:[#allocation81_spill] sm:$0xff] %v7772_v50  ;;  %v7774_v17 = vpop.f32.mrf.mxu1  ;;  %v5463_v50 = vld [vmem:[%s6744_s21 + $0xba0] sm:$0xff] }
 0x153   : > { %9091 = vst [vmem:[#allocation82_spill] sm:$0xff] %v7774_v17  ;;  %v7780_v40 = vpop.f32.mrf.mxu0  ;;  %6448 = vmatmul.mubr.msk.f32.gmra.mxu0 %vm277_vm1, %v5251_v3  ;;  %v5254_v3 = vld [vmem:[%s6744_s21 + $0x860] sm:$0xff] }
 0x154   : > { %9092 = vst [vmem:[#allocation83_spill] sm:$0xff] %v7780_v40  ;;  %v7782_v27 = vpop.f32.mrf.mxu1  ;;  %6608 = vmatmul.mubr.msk.f32.gmra.mxu1 %vm277_vm1, %v5460_v10  ;;  %6450 = vmatprep.mubr.msk.f32.mxu0 %vm277_vm1, %v5252_v46  ;;  %v5464_v40 = vld [vmem:[%s6744_s21 + $0xba8] sm:$0xff] }
 0x155   : > { %9093 = vst [vmem:[#allocation84_spill] sm:$0xff] %v7782_v27  ;;  %6610 = vmatprep.mubr.msk.f32.mxu1 %vm277_vm1, %v5461_v6  ;;  %v7792_v30 = vpop.f32.mrf.mxu0  ;;  %v5255_v27 = vld [vmem:[%s6744_s21 + $0x868] sm:$0xff] }
 0x156   : > { %9094 = vst [vmem:[#allocation85_spill] sm:$0xff] %v7792_v30  ;;  %v7794_v17 = vpop.f32.mrf.mxu1  ;;  %v5465_v30 = vld [vmem:[%s6744_s21 + $0xbb0] sm:$0xff] }
 0x157   : > { %9095 = vst [vmem:[#allocation86_spill] sm:$0xff] %v7794_v17  ;;  %v7800_v20 = vpop.f32.mrf.mxu0  ;;  %6451 = vmatmul.mubr.msk.f32.gmra.mxu0 %vm277_vm1, %v5253_v47  ;;  %v5256_v47 = vld [vmem:[%s6744_s21 + $0x870] sm:$0xff] }
 0x158   : > { %9096 = vst [vmem:[#allocation87_spill] sm:$0xff] %v7800_v20  ;;  %v7802_v46 = vpop.f32.mrf.mxu1  ;;  %6611 = vmatmul.mubr.msk.f32.gmra.mxu1 %vm277_vm1, %v5462_v60  ;;  %6453 = vmatprep.mubr.msk.f32.mxu0 %vm277_vm1, %v5254_v3  ;;  %v5466_v20 = vld [vmem:[%s6744_s21 + $0xbb8] sm:$0xff] }
 0x159   : > { %9097 = vst [vmem:[#allocation88_spill] sm:$0xff] %v7802_v46  ;;  %6613 = vmatprep.mubr.msk.f32.mxu1 %vm277_vm1, %v5463_v50  ;;  %v7812_v10 = vpop.f32.mrf.mxu0  ;;  %v5257_v46 = vld [vmem:[%s6744_s21 + $0x878] sm:$0xff] }
 0x15a   : > { %9098 = vst [vmem:[#allocation89_spill] sm:$0xff] %v7812_v10  ;;  %v7814_v17 = vpop.f32.mrf.mxu1  ;;  %v5467_v10 = vld [vmem:[%s6744_s21 + $0xbc0] sm:$0xff] }
 0x15b   : > { %9099 = vst [vmem:[#allocation90_spill] sm:$0xff] %v7814_v17  ;;  %v7820_v6 = vpop.f32.mrf.mxu0  ;;  %6454 = vmatmul.mubr.msk.f32.gmra.mxu0 %vm277_vm1, %v5255_v27  ;;  %v5258_v27 = vld [vmem:[%s6744_s21 + $0x880] sm:$0xff] }
 0x15c   : > { %9100 = vst [vmem:[#allocation91_spill] sm:$0xff] %v7820_v6  ;;  %v7822_v3 = vpop.f32.mrf.mxu1  ;;  %6614 = vmatmul.mubr.msk.f32.gmra.mxu1 %vm277_vm1, %v5464_v40  ;;  %6456 = vmatprep.mubr.msk.f32.mxu0 %vm277_vm1, %v5256_v47  ;;  %v5468_v6 = vld [vmem:[%s6744_s21 + $0xbc8] sm:$0xff] }
 0x15d   : > { %9101 = vst [vmem:[#allocation92_spill] sm:$0xff] %v7822_v3  ;;  %6616 = vmatprep.mubr.msk.f32.mxu1 %vm277_vm1, %v5465_v30  ;;  %v7832_v60 = vpop.f32.mrf.mxu0  ;;  %v5259_v3 = vld [vmem:[%s6744_s21 + $0x888] sm:$0xff] }
 0x15e   : > { %9102 = vst [vmem:[#allocation93_spill] sm:$0xff] %v7832_v60  ;;  %v7834_v17 = vpop.f32.mrf.mxu1  ;;  %v5469_v60 = vld [vmem:[%s6744_s21 + $0xbd0] sm:$0xff] }
 0x15f   : > { %9103 = vst [vmem:[#allocation94_spill] sm:$0xff] %v7834_v17  ;;  %v7840_v50 = vpop.f32.mrf.mxu0  ;;  %6457 = vmatmul.mubr.msk.f32.gmra.mxu0 %vm277_vm1, %v5257_v46  ;;  %v5260_v46 = vld [vmem:[%s6744_s21 + $0x890] sm:$0xff] }
 0x160   : > { %9104 = vst [vmem:[#allocation95_spill] sm:$0xff] %v7840_v50  ;;  %v7842_v47 = vpop.f32.mrf.mxu1  ;;  %6617 = vmatmul.mubr.msk.f32.gmra.mxu1 %vm277_vm1, %v5466_v20  ;;  %6459 = vmatprep.mubr.msk.f32.mxu0 %vm277_vm1, %v5258_v27  ;;  %v5470_v50 = vld [vmem:[%s6744_s21 + $0xbd8] sm:$0xff] }
 0x161   : > { %9105 = vst [vmem:[#allocation96_spill] sm:$0xff] %v7842_v47  ;;  %6619 = vmatprep.mubr.msk.f32.mxu1 %vm277_vm1, %v5467_v10  ;;  %v7852_v40 = vpop.f32.mrf.mxu0  ;;  %v5261_v47 = vld [vmem:[%s6744_s21 + $0x898] sm:$0xff] }
 0x162   : > { %9106 = vst [vmem:[#allocation97_spill] sm:$0xff] %v7852_v40  ;;  %v7854_v17 = vpop.f32.mrf.mxu1  ;;  %v5471_v40 = vld [vmem:[%s6744_s21 + $0xbe0] sm:$0xff] }
 0x163   : > { %9107 = vst [vmem:[#allocation98_spill] sm:$0xff] %v7854_v17  ;;  %v7860_v30 = vpop.f32.mrf.mxu0  ;;  %6460 = vmatmul.mubr.msk.f32.gmra.mxu0 %vm277_vm1, %v5259_v3  ;;  %v5262_v3 = vld [vmem:[%s6744_s21 + $0x8a0] sm:$0xff] }
 0x164   : > { %9108 = vst [vmem:[#allocation99_spill] sm:$0xff] %v7860_v30  ;;  %v7862_v27 = vpop.f32.mrf.mxu1  ;;  %6620 = vmatmul.mubr.msk.f32.gmra.mxu1 %vm277_vm1, %v5468_v6  ;;  %6462 = vmatprep.mubr.msk.f32.mxu0 %vm277_vm1, %v5260_v46  ;;  %v5472_v30 = vld [vmem:[%s6744_s21 + $0xbe8] sm:$0xff] }
 0x165   : > { %9109 = vst [vmem:[#allocation100_spill] sm:$0xff] %v7862_v27  ;;  %6622 = vmatprep.mubr.msk.f32.mxu1 %vm277_vm1, %v5469_v60  ;;  %v7872_v20 = vpop.f32.mrf.mxu0  ;;  %v5263_v27 = vld [vmem:[%s6744_s21 + $0x8a8] sm:$0xff] }
 0x166   : > { %9110 = vst [vmem:[#allocation101_spill] sm:$0xff] %v7872_v20  ;;  %v7874_v17 = vpop.f32.mrf.mxu1  ;;  %v5473_v20 = vld [vmem:[%s6744_s21 + $0xbf0] sm:$0xff] }
 0x167   : > { %9111 = vst [vmem:[#allocation102_spill] sm:$0xff] %v7874_v17  ;;  %v7880_v10 = vpop.f32.mrf.mxu0  ;;  %6463 = vmatmul.mubr.msk.f32.gmra.mxu0 %vm277_vm1, %v5261_v47  ;;  %v5264_v47 = vld [vmem:[%s6744_s21 + $0x8b0] sm:$0xff] }
 0x168   : > { %9112 = vst [vmem:[#allocation103_spill] sm:$0xff] %v7880_v10  ;;  %v7882_v46 = vpop.f32.mrf.mxu1  ;;  %6623 = vmatmul.mubr.msk.f32.gmra.mxu1 %vm277_vm1, %v5470_v50  ;;  %6465 = vmatprep.mubr.msk.f32.mxu0 %vm277_vm1, %v5262_v3  ;;  %v5474_v10 = vld [vmem:[%s6744_s21 + $0xbf8] sm:$0xff] }
 0x169   : > { %9113 = vst [vmem:[#allocation104_spill] sm:$0xff] %v7882_v46  ;;  %6625 = vmatprep.mubr.msk.f32.mxu1 %vm277_vm1, %v5471_v40  ;;  %v7892_v6 = vpop.f32.mrf.mxu0  ;;  %v5265_v46 = vld [vmem:[%s6744_s21 + $0x8b8] sm:$0xff] }
 0x16a   : > { %9114 = vst [vmem:[#allocation105_spill] sm:$0xff] %v7892_v6  ;;  %v7894_v17 = vpop.f32.mrf.mxu1  ;;  %v5475_v6 = vld [vmem:[%s6744_s21 + $0xc00] sm:$0xff] }
 0x16b   : > { %9115 = vst [vmem:[#allocation106_spill] sm:$0xff] %v7894_v17  ;;  %v7900_v60 = vpop.f32.mrf.mxu0  ;;  %6466 = vmatmul.mubr.msk.f32.gmra.mxu0 %vm277_vm1, %v5263_v27  ;;  %v5266_v27 = vld [vmem:[%s6744_s21 + $0x8c0] sm:$0xff] }
 0x16c   : > { %9116 = vst [vmem:[#allocation107_spill] sm:$0xff] %v7900_v60  ;;  %v7902_v3 = vpop.f32.mrf.mxu1  ;;  %6626 = vmatmul.mubr.msk.f32.gmra.mxu1 %vm277_vm1, %v5472_v30  ;;  %6468 = vmatprep.mubr.msk.f32.mxu0 %vm277_vm1, %v5264_v47  ;;  %v5476_v60 = vld [vmem:[%s6744_s21 + $0xc08] sm:$0xff] }
 0x16d   : > { %9117 = vst [vmem:[#allocation108_spill] sm:$0xff] %v7902_v3  ;;  %6628 = vmatprep.mubr.msk.f32.mxu1 %vm277_vm1, %v5473_v20  ;;  %v7912_v50 = vpop.f32.mrf.mxu0  ;;  %v5267_v3 = vld [vmem:[%s6744_s21 + $0x8c8] sm:$0xff] }
 0x16e   : > { %9118 = vst [vmem:[#allocation109_spill] sm:$0xff] %v7912_v50  ;;  %v7914_v17 = vpop.f32.mrf.mxu1  ;;  %v5477_v50 = vld [vmem:[%s6744_s21 + $0xc10] sm:$0xff] }
 0x16f   : > { %9119 = vst [vmem:[#allocation110_spill] sm:$0xff] %v7914_v17  ;;  %v7920_v40 = vpop.f32.mrf.mxu0  ;;  %6469 = vmatmul.mubr.msk.f32.gmra.mxu0 %vm277_vm1, %v5265_v46  ;;  %v5268_v46 = vld [vmem:[%s6744_s21 + $0x8d0] sm:$0xff] }
 0x170   : > { %9120 = vst [vmem:[#allocation111_spill] sm:$0xff] %v7920_v40  ;;  %v7922_v47 = vpop.f32.mrf.mxu1  ;;  %6629 = vmatmul.mubr.msk.f32.gmra.mxu1 %vm277_vm1, %v5474_v10  ;;  %6471 = vmatprep.mubr.msk.f32.mxu0 %vm277_vm1, %v5266_v27  ;;  %v5478_v40 = vld [vmem:[%s6744_s21 + $0xc18] sm:$0xff] }
 0x171   : > { %9121 = vst [vmem:[#allocation112_spill] sm:$0xff] %v7922_v47  ;;  %6631 = vmatprep.mubr.msk.f32.mxu1 %vm277_vm1, %v5475_v6  ;;  %v7932_v30 = vpop.f32.mrf.mxu0  ;;  %v5269_v47 = vld [vmem:[%s6744_s21 + $0x8d8] sm:$0xff] }
 0x172   : > { %9122 = vst [vmem:[#allocation113_spill] sm:$0xff] %v7932_v30  ;;  %v7934_v17 = vpop.f32.mrf.mxu1  ;;  %v5479_v30 = vld [vmem:[%s6744_s21 + $0xc20] sm:$0xff] }
 0x173   : > { %9123 = vst [vmem:[#allocation114_spill] sm:$0xff] %v7934_v17  ;;  %v7940_v20 = vpop.f32.mrf.mxu0  ;;  %6472 = vmatmul.mubr.msk.f32.gmra.mxu0 %vm277_vm1, %v5267_v3  ;;  %v5270_v3 = vld [vmem:[%s6744_s21 + $0x8e0] sm:$0xff] }
 0x174   : > { %9124 = vst [vmem:[#allocation115_spill] sm:$0xff] %v7940_v20  ;;  %v7942_v27 = vpop.f32.mrf.mxu1  ;;  %6632 = vmatmul.mubr.msk.f32.gmra.mxu1 %vm277_vm1, %v5476_v60  ;;  %6474 = vmatprep.mubr.msk.f32.mxu0 %vm277_vm1, %v5268_v46  ;;  %v5480_v20 = vld [vmem:[%s6744_s21 + $0xc28] sm:$0xff] }
 0x175   : > { %9125 = vst [vmem:[#allocation116_spill] sm:$0xff] %v7942_v27  ;;  %6634 = vmatprep.mubr.msk.f32.mxu1 %vm277_vm1, %v5477_v50  ;;  %v7952_v10 = vpop.f32.mrf.mxu0  ;;  %v5271_v27 = vld [vmem:[%s6744_s21 + $0x8e8] sm:$0xff] }
 0x176   : > { %9126 = vst [vmem:[#allocation117_spill] sm:$0xff] %v7952_v10  ;;  %v7954_v17 = vpop.f32.mrf.mxu1  ;;  %v5481_v10 = vld [vmem:[%s6744_s21 + $0xc30] sm:$0xff] }
 0x177   : > { %9127 = vst [vmem:[#allocation118_spill] sm:$0xff] %v7954_v17  ;;  %v7960_v6 = vpop.f32.mrf.mxu0  ;;  %6475 = vmatmul.mubr.msk.f32.gmra.mxu0 %vm277_vm1, %v5269_v47  ;;  %v5272_v47 = vld [vmem:[%s6744_s21 + $0x8f0] sm:$0xff] }
 0x178   : > { %9128 = vst [vmem:[#allocation119_spill] sm:$0xff] %v7960_v6  ;;  %v7962_v46 = vpop.f32.mrf.mxu1  ;;  %6635 = vmatmul.mubr.msk.f32.gmra.mxu1 %vm277_vm1, %v5478_v40  ;;  %6477 = vmatprep.mubr.msk.f32.mxu0 %vm277_vm1, %v5270_v3  ;;  %v5482_v6 = vld [vmem:[%s6744_s21 + $0xc38] sm:$0xff] }
 0x179   : > { %9129 = vst [vmem:[#allocation120_spill] sm:$0xff] %v7962_v46  ;;  %6637 = vmatprep.mubr.msk.f32.mxu1 %vm277_vm1, %v5479_v30  ;;  %v7972_v60 = vpop.f32.mrf.mxu0  ;;  %v5273_v46 = vld [vmem:[%s6744_s21 + $0x8f8] sm:$0xff] }
 0x17a   : > { %9130 = vst [vmem:[#allocation121_spill] sm:$0xff] %v7972_v60  ;;  %v7974_v17 = vpop.f32.mrf.mxu1  ;;  %v5483_v60 = vld [vmem:[%s6744_s21 + $0xc40] sm:$0xff] }
 0x17b   : > { %9131 = vst [vmem:[#allocation122_spill] sm:$0xff] %v7974_v17  ;;  %v7980_v50 = vpop.f32.mrf.mxu0  ;;  %6478 = vmatmul.mubr.msk.f32.gmra.mxu0 %vm277_vm1, %v5271_v27  ;;  %v5274_v27 = vld [vmem:[%s6744_s21 + $0x900] sm:$0xff] }
 0x17c   : > { %9132 = vst [vmem:[#allocation123_spill] sm:$0xff] %v7980_v50  ;;  %v7982_v3 = vpop.f32.mrf.mxu1  ;;  %6638 = vmatmul.mubr.msk.f32.gmra.mxu1 %vm277_vm1, %v5480_v20  ;;  %6480 = vmatprep.mubr.msk.f32.mxu0 %vm277_vm1, %v5272_v47  ;;  %v5484_v50 = vld [vmem:[%s6744_s21 + $0xc48] sm:$0xff] }
 0x17d   : > { %9133 = vst [vmem:[#allocation124_spill] sm:$0xff] %v7982_v3  ;;  %6640 = vmatprep.mubr.msk.f32.mxu1 %vm277_vm1, %v5481_v10  ;;  %v7992_v40 = vpop.f32.mrf.mxu0  ;;  %v5275_v3 = vld [vmem:[%s6744_s21 + $0x908] sm:$0xff] }
 0x17e   : > { %9134 = vst [vmem:[#allocation125_spill] sm:$0xff] %v7992_v40  ;;  %v7994_v17 = vpop.f32.mrf.mxu1  ;;  %v5485_v40 = vld [vmem:[%s6744_s21 + $0xc50] sm:$0xff] }
 0x17f   : > { %9135 = vst [vmem:[#allocation126_spill] sm:$0xff] %v7994_v17  ;;  %v8000_v30 = vpop.f32.mrf.mxu0  ;;  %6481 = vmatmul.mubr.msk.f32.gmra.mxu0 %vm277_vm1, %v5273_v46  ;;  %v5276_v46 = vld [vmem:[%s6744_s21 + $0x910] sm:$0xff] }
 0x180   : > { %9136 = vst [vmem:[#allocation127_spill] sm:$0xff] %v8000_v30  ;;  %v8002_v47 = vpop.f32.mrf.mxu1  ;;  %6641 = vmatmul.mubr.msk.f32.gmra.mxu1 %vm277_vm1, %v5482_v6  ;;  %6483 = vmatprep.mubr.msk.f32.mxu0 %vm277_vm1, %v5274_v27  ;;  %v5486_v30 = vld [vmem:[%s6744_s21 + $0xc58] sm:$0xff] }
 0x181   : > { %9137 = vst [vmem:[#allocation128_spill] sm:$0xff] %v8002_v47  ;;  %6643 = vmatprep.mubr.msk.f32.mxu1 %vm277_vm1, %v5483_v60  ;;  %v8012_v20 = vpop.f32.mrf.mxu0  ;;  %v5277_v47 = vld [vmem:[%s6744_s21 + $0x918] sm:$0xff] }
 0x182   : > { %9138 = vst [vmem:[#allocation129_spill] sm:$0xff] %v8012_v20  ;;  %v8014_v17 = vpop.f32.mrf.mxu1  ;;  %v5487_v20 = vld [vmem:[%s6744_s21 + $0xc60] sm:$0xff] }
 0x183   : > { %9139 = vst [vmem:[#allocation130_spill] sm:$0xff] %v8014_v17  ;;  %v8020_v10 = vpop.f32.mrf.mxu0  ;;  %6484 = vmatmul.mubr.msk.f32.gmra.mxu0 %vm277_vm1, %v5275_v3  ;;  %v5278_v3 = vld [vmem:[%s6744_s21 + $0x920] sm:$0xff] }
 0x184   : > { %9140 = vst [vmem:[#allocation131_spill] sm:$0xff] %v8020_v10  ;;  %v8022_v27 = vpop.f32.mrf.mxu1  ;;  %6644 = vmatmul.mubr.msk.f32.gmra.mxu1 %vm277_vm1, %v5484_v50  ;;  %6486 = vmatprep.mubr.msk.f32.mxu0 %vm277_vm1, %v5276_v46  ;;  %v5488_v10 = vld [vmem:[%s6744_s21 + $0xc68] sm:$0xff] }
 0x185   : > { %9141 = vst [vmem:[#allocation132_spill] sm:$0xff] %v8022_v27  ;;  %6646 = vmatprep.mubr.msk.f32.mxu1 %vm277_vm1, %v5485_v40  ;;  %v8032_v6 = vpop.f32.mrf.mxu0  ;;  %v5279_v27 = vld [vmem:[%s6744_s21 + $0x928] sm:$0xff] }
 0x186   : > { %9142 = vst [vmem:[#allocation133_spill] sm:$0xff] %v8032_v6  ;;  %v8034_v17 = vpop.f32.mrf.mxu1  ;;  %v5489_v6 = vld [vmem:[%s6744_s21 + $0xc70] sm:$0xff] }
 0x187   : > { %9143 = vst [vmem:[#allocation134_spill] sm:$0xff] %v8034_v17  ;;  %v8040_v60 = vpop.f32.mrf.mxu0  ;;  %6487 = vmatmul.mubr.msk.f32.gmra.mxu0 %vm277_vm1, %v5277_v47  ;;  %v5280_v47 = vld [vmem:[%s6744_s21 + $0x930] sm:$0xff] }
 0x188   : > { %9144 = vst [vmem:[#allocation135_spill] sm:$0xff] %v8040_v60  ;;  %v8042_v46 = vpop.f32.mrf.mxu1  ;;  %6647 = vmatmul.mubr.msk.f32.gmra.mxu1 %vm277_vm1, %v5486_v30  ;;  %6489 = vmatprep.mubr.msk.f32.mxu0 %vm277_vm1, %v5278_v3  ;;  %v5490_v60 = vld [vmem:[%s6744_s21 + $0xc78] sm:$0xff] }
 0x189   : > { %9145 = vst [vmem:[#allocation136_spill] sm:$0xff] %v8042_v46  ;;  %6649 = vmatprep.mubr.msk.f32.mxu1 %vm277_vm1, %v5487_v20  ;;  %v8052_v50 = vpop.f32.mrf.mxu0  ;;  %v5281_v46 = vld [vmem:[%s6744_s21 + $0x938] sm:$0xff] }
 0x18a   : > { %9146 = vst [vmem:[#allocation137_spill] sm:$0xff] %v8052_v50  ;;  %v8054_v17 = vpop.f32.mrf.mxu1  ;;  %v5491_v50 = vld [vmem:[%s6744_s21 + $0xc80] sm:$0xff] }
 0x18b   : > { %9147 = vst [vmem:[#allocation138_spill] sm:$0xff] %v8054_v17  ;;  %v8060_v40 = vpop.f32.mrf.mxu0  ;;  %6490 = vmatmul.mubr.msk.f32.gmra.mxu0 %vm277_vm1, %v5279_v27  ;;  %v5282_v27 = vld [vmem:[%s6744_s21 + $0x940] sm:$0xff] }
 0x18c   : > { %9148 = vst [vmem:[#allocation139_spill] sm:$0xff] %v8060_v40  ;;  %v8062_v3 = vpop.f32.mrf.mxu1  ;;  %6650 = vmatmul.mubr.msk.f32.gmra.mxu1 %vm277_vm1, %v5488_v10  ;;  %6492 = vmatprep.mubr.msk.f32.mxu0 %vm277_vm1, %v5280_v47  ;;  %v5492_v40 = vld [vmem:[%s6744_s21 + $0xc88] sm:$0xff] }
 0x18d   : > { %9149 = vst [vmem:[#allocation140_spill] sm:$0xff] %v8062_v3  ;;  %6652 = vmatprep.mubr.msk.f32.mxu1 %vm277_vm1, %v5489_v6  ;;  %v8072_v30 = vpop.f32.mrf.mxu0  ;;  %v5283_v3 = vld [vmem:[%s6744_s21 + $0x948] sm:$0xff] }
 0x18e   : > { %9150 = vst [vmem:[#allocation141_spill] sm:$0xff] %v8072_v30  ;;  %v8074_v17 = vpop.f32.mrf.mxu1  ;;  %v5493_v30 = vld [vmem:[%s6744_s21 + $0xc90] sm:$0xff] }
 0x18f   : > { %9151 = vst [vmem:[#allocation142_spill] sm:$0xff] %v8074_v17  ;;  %v8080_v20 = vpop.f32.mrf.mxu0  ;;  %6493 = vmatmul.mubr.msk.f32.gmra.mxu0 %vm277_vm1, %v5281_v46  ;;  %v5284_v46 = vld [vmem:[%s6744_s21 + $0x950] sm:$0xff] }
 0x190   : > { %9152 = vst [vmem:[#allocation143_spill] sm:$0xff] %v8080_v20  ;;  %v8082_v47 = vpop.f32.mrf.mxu1  ;;  %6653 = vmatmul.mubr.msk.f32.gmra.mxu1 %vm277_vm1, %v5490_v60  ;;  %6495 = vmatprep.mubr.msk.f32.mxu0 %vm277_vm1, %v5282_v27  ;;  %v5494_v20 = vld [vmem:[%s6744_s21 + $0xc98] sm:$0xff] }
 0x191   : > { %9153 = vst [vmem:[#allocation144_spill] sm:$0xff] %v8082_v47  ;;  %6655 = vmatprep.mubr.msk.f32.mxu1 %vm277_vm1, %v5491_v50  ;;  %v8092_v10 = vpop.f32.mrf.mxu0  ;;  %v5285_v47 = vld [vmem:[%s6744_s21 + $0x958] sm:$0xff] }
 0x192   : > { %9154 = vst [vmem:[#allocation145_spill] sm:$0xff] %v8092_v10  ;;  %v8094_v17 = vpop.f32.mrf.mxu1  ;;  %v5495_v10 = vld [vmem:[%s6744_s21 + $0xca0] sm:$0xff] }
 0x193   : > { %9155 = vst [vmem:[#allocation146_spill] sm:$0xff] %v8094_v17  ;;  %v8100_v6 = vpop.f32.mrf.mxu0  ;;  %6496 = vmatmul.mubr.msk.f32.gmra.mxu0 %vm277_vm1, %v5283_v3  ;;  %v5286_v3 = vld [vmem:[%s6744_s21 + $0x960] sm:$0xff] }
 0x194   : > { %9156 = vst [vmem:[#allocation147_spill] sm:$0xff] %v8100_v6  ;;  %v8102_v27 = vpop.f32.mrf.mxu1  ;;  %6656 = vmatmul.mubr.msk.f32.gmra.mxu1 %vm277_vm1, %v5492_v40  ;;  %6498 = vmatprep.mubr.msk.f32.mxu0 %vm277_vm1, %v5284_v46  ;;  %v5496_v6 = vld [vmem:[%s6744_s21 + $0xca8] sm:$0xff] }
 0x195   : > { %9157 = vst [vmem:[#allocation148_spill] sm:$0xff] %v8102_v27  ;;  %6658 = vmatprep.mubr.msk.f32.mxu1 %vm277_vm1, %v5493_v30  ;;  %v8112_v60 = vpop.f32.mrf.mxu0  ;;  %v5287_v27 = vld [vmem:[%s6744_s21 + $0x968] sm:$0xff] }
 0x196   : > { %9158 = vst [vmem:[#allocation149_spill] sm:$0xff] %v8112_v60  ;;  %v8114_v17 = vpop.f32.mrf.mxu1  ;;  %v5497_v60 = vld [vmem:[%s6744_s21 + $0xcb0] sm:$0xff] }
 0x197   : > { %9159 = vst [vmem:[#allocation150_spill] sm:$0xff] %v8114_v17  ;;  %v8120_v50 = vpop.f32.mrf.mxu0  ;;  %6499 = vmatmul.mubr.msk.f32.gmra.mxu0 %vm277_vm1, %v5285_v47  ;;  %v5288_v47 = vld [vmem:[%s6744_s21 + $0x970] sm:$0xff] }
 0x198   : > { %9160 = vst [vmem:[#allocation151_spill] sm:$0xff] %v8120_v50  ;;  %v8122_v46 = vpop.f32.mrf.mxu1  ;;  %6659 = vmatmul.mubr.msk.f32.gmra.mxu1 %vm277_vm1, %v5494_v20  ;;  %6501 = vmatprep.mubr.msk.f32.mxu0 %vm277_vm1, %v5286_v3  ;;  %v5498_v50 = vld [vmem:[%s6744_s21 + $0xcb8] sm:$0xff] }
 0x199   : > { %9161 = vst [vmem:[#allocation152_spill] sm:$0xff] %v8122_v46  ;;  %6661 = vmatprep.mubr.msk.f32.mxu1 %vm277_vm1, %v5495_v10  ;;  %v8132_v40 = vpop.f32.mrf.mxu0  ;;  %v5289_v46 = vld [vmem:[%s6744_s21 + $0x978] sm:$0xff] }
 0x19a   : > { %9162 = vst [vmem:[#allocation153_spill] sm:$0xff] %v8132_v40  ;;  %v8134_v17 = vpop.f32.mrf.mxu1  ;;  %v5499_v40 = vld [vmem:[%s6744_s21 + $0xcc0] sm:$0xff] }
 0x19b   : > { %9163 = vst [vmem:[#allocation154_spill] sm:$0xff] %v8134_v17  ;;  %v8140_v30 = vpop.f32.mrf.mxu0  ;;  %6502 = vmatmul.mubr.msk.f32.gmra.mxu0 %vm277_vm1, %v5287_v27  ;;  %v5290_v27 = vld [vmem:[%s6744_s21 + $0x980] sm:$0xff] }
 0x19c   : > { %9164 = vst [vmem:[#allocation155_spill] sm:$0xff] %v8140_v30  ;;  %v8142_v3 = vpop.f32.mrf.mxu1  ;;  %6662 = vmatmul.mubr.msk.f32.gmra.mxu1 %vm277_vm1, %v5496_v6  ;;  %6504 = vmatprep.mubr.msk.f32.mxu0 %vm277_vm1, %v5288_v47  ;;  %v5500_v6 = vld [vmem:[%s6744_s21 + $0xcc8] sm:$0xff]  ;;  %v5292_v30 = vld [vmem:[%s6744_s21 + $0x990] sm:$0xff] }
 0x19d   : > { %9165 = vst [vmem:[#allocation156_spill] sm:$0xff] %v8142_v3  ;;  %6664 = vmatprep.mubr.msk.f32.mxu1 %vm277_vm1, %v5497_v60  ;;  %v8152_v20 = vpop.f32.mrf.mxu0  ;;  %v5291_v3 = vld [vmem:[%s6744_s21 + $0x988] sm:$0xff] }
 0x19e   : > { %9166 = vst [vmem:[#allocation157_spill] sm:$0xff] %v8152_v20  ;;  %v8154_v17 = vpop.f32.mrf.mxu1 }
 0x19f   : > { %9167 = vst [vmem:[#allocation158_spill] sm:$0xff] %v8154_v17  ;;  %v8160_v10 = vpop.f32.mrf.mxu0  ;;  %6505 = vmatmul.mubr.msk.f32.gmra.mxu0 %vm277_vm1, %v5289_v46  ;;  %v5501_v46 = vld [vmem:[%s6744_s21 + $0xcd0] sm:$0xff] }
 0x1a0   : > { %9168 = vst [vmem:[#allocation159_spill] sm:$0xff] %v8160_v10  ;;  %v8162_v47 = vpop.f32.mrf.mxu1  ;;  %6665 = vmatmul.mubr.msk.f32.gmra.mxu1 %vm277_vm1, %v5498_v50  ;;  %6507 = vmatprep.mubr.msk.f32.mxu0 %vm277_vm1, %v5290_v27  ;;  %v5502_v10 = vld [vmem:[%s6744_s21 + $0xcd8] sm:$0xff] }
 0x1a1   : > { %9169 = vst [vmem:[#allocation160_spill] sm:$0xff] %v8162_v47  ;;  %6667 = vmatprep.mubr.msk.f32.mxu1 %vm277_vm1, %v5499_v40  ;;  %v8172_v17 = vpop.f32.mrf.mxu0  ;;  %v5293_v47 = vld [vmem:[%s6744_s21 + $0x998] sm:$0xff] }
 0x1a2   : > { %9170 = vst [vmem:[#allocation161_spill] sm:$0xff] %v8172_v17  ;;  %v8174_v20 = vpop.f32.mrf.mxu1  ;;  %v5503_v17 = vld [vmem:[%s6744_s21 + $0xce0] sm:$0xff] }
 0x1a3   : > { %9171 = vst [vmem:[#allocation162_spill] sm:$0xff] %v8174_v20  ;;  %v6365_v60 = vpop.f32.mrf.mxu0  ;;  %6508 = vmatmul.mubr.msk.f32.gmra.mxu0 %vm277_vm1, %v5291_v3  ;;  %v5294_v20 = vld [vmem:[%s6744_s21 + $0x9a0] sm:$0xff] }
 0x1a4   : > { %v6525_v27 = vpop.f32.mrf.mxu1  ;;  %6668 = vmatmul.mubr.msk.f32.gmra.mxu1 %vm277_vm1, %v5500_v6  ;;  %6510 = vmatprep.mubr.msk.f32.mxu0 %vm277_vm1, %v5292_v30  ;;  %v9172_v6 = vmax.f32 %v7140_v8, %v7143_v9  ;;  %v5295_v8 = vld [vmem:[%s6744_s21 + $0x9a8] sm:$0xff] }
 0x1a5   : > { %v4290_v40 = vmax.f32 %v6365_v60, %v6525_v27  ;;  %6670 = vmatprep.mubr.msk.f32.mxu1 %vm277_vm1, %v5501_v46  ;;  %v2768_v50 = vpop.f32.mrf.mxu0  ;;  %v5504_v9 = vld [vmem:[%s6744_s21 + $0xce8] sm:$0xff] }
 0x1a6   : > { %v3770_v3 = vpop.f32.mrf.mxu1 }
 0x1a7   : > { %v4394_v30 = vmax.f32 %v9172_v6, %v4290_v40  ;;  %v4289_v60 = vmax.f32 %v2768_v50, %v3770_v3  ;;  %v6368_v46 = vpop.f32.mrf.mxu0  ;;  %6511 = vmatmul.mubr.msk.f32.gmra.mxu0 %vm277_vm1, %v5293_v47  ;;  %v5296_v50 = vld [vmem:[%s6744_s21 + $0x9b0] sm:$0xff] }
 0x1a8   : > { %v6528_v27 = vpop.f32.mrf.mxu1  ;;  %6671 = vmatmul.mubr.msk.f32.gmra.mxu1 %vm277_vm1, %v5502_v10  ;;  %6513 = vmatprep.mubr.msk.f32.mxu0 %vm277_vm1, %v5294_v20  ;;  %v5505_v40 = vld [vmem:[%s6744_s21 + $0xcf0] sm:$0xff] }
 0x1a9   : > { %v4505_v31 = vadd.f32 %v8190_v37, %v4394_v30  ;;  %v4393_v55 = vmax.f32 %v9173_v35, %v4289_v60  ;;  %v4292_v57 = vmax.f32 %v6368_v46, %v6528_v27  ;;  %6673 = vmatprep.mubr.msk.f32.mxu1 %vm277_vm1, %v5503_v17  ;;  %v2778_v10 = vpop.f32.mrf.mxu0  ;;  %v9174_v17 = vmax.f32 %v7160_v18, %v7163_v19  ;;  %v5297_v18 = vld [vmem:[%s6744_s21 + $0x9b8] sm:$0x1] }
 0x1aa   : > { %v3780_v47 = vpop.f32.mrf.mxu1  ;;  %v5506_v19 = vld [vmem:[%s6744_s21 + $0xcf8] sm:$0x1] }
 0x1ab   : > { %v4609_v13 = vmax.f32 %v4505_v31, 0.0  ;;  %v4504_v14 = vadd.f32 %v8190_v37, %v4393_v55  ;;  %v4396_v35 = vmax.f32 %v9174_v17, %v4292_v57  ;;  %v4291_v20 = vmax.f32 %v2778_v10, %v3780_v47  ;;  %v6371_v3 = vpop.f32.mrf.mxu0  ;;  %6514 = vmatmul.mubr.msk.f32.gmra.mxu0 %vm277_vm1, %v5295_v8 }
 0x1ac   : > { %v6531_v6 = vpop.f32.mrf.mxu1  ;;  %6674 = vmatmul.mubr.msk.f32.gmra.mxu1 %vm277_vm1, %v5504_v9  ;;  %v9175_v55 = vmax.f32 %v7172_v23, %v7174_v24  ;;  %6516 = vmatprep.mubr.msk.f32.mxu0 %vm277_vm1, %v5296_v50  ;;  %v9176_v23 = vmax.f32 %v7180_v28, %v7183_v29 }
 0x1ad   : > { %4714 = vst.msk [vmem:[%s8210_s27 + $0x8] sm:$0xff] %vm4712_vm2, %v4609_v13  ;;  %v4608_v30 = vmax.f32 %v4504_v14, 0.0  ;;  %v4507_v31 = vadd.f32 %v8190_v37, %v4396_v35  ;;  %v4294_v46 = vmax.f32 %v6371_v3, %v6531_v6  ;;  %6676 = vmatprep.mubr.msk.f32.mxu1 %vm277_vm1, %v5505_v40  ;;  %v2788_v57 = vpop.f32.mrf.mxu0  ;;  %v9177_v14 = vmax.f32 %v7192_v33, %v7194_v34 }
 0x1ae   : > { %v4395_v60 = vmax.f32 %v9175_v55, %v4291_v20  ;;  %v3790_v27 = vpop.f32.mrf.mxu1  ;;  %v9178_v6 = vmax.f32 %v7200_v38, %v7203_v39 }
 0x1af   : > { %4713 = vst.msk [vmem:[%s8210_s27] sm:$0xff] %vm4712_vm2, %v4608_v30  ;;  %v4611_v8 = vmax.f32 %v4507_v31, 0.0  ;;  %v4398_v24 = vmax.f32 %v9176_v23, %v4294_v46  ;;  %v4293_v10 = vmax.f32 %v2788_v57, %v3790_v27  ;;  %v6374_v47 = vpop.f32.mrf.mxu0  ;;  %6517 = vmatmul.mubr.msk.f32.gmra.mxu0 %vm277_vm1, %v5297_v18  ;;  %v9179_v46 = vmax.f32 %v7212_v43, %v7214_v44 }
 0x1b0   : > { %v4506_v9 = vadd.f32 %v8190_v37, %v4395_v60  ;;  %v6534_v50 = vpop.f32.mrf.mxu1  ;;  %6677 = vmatmul.mubr.msk.f32.gmra.mxu1 %vm277_vm1, %v5506_v19 }
 0x1b1   : > { %4716 = vst.msk [vmem:[%s8210_s27 + $0x18] sm:$0xff] %vm4712_vm2, %v4611_v8  ;;  %v4509_v13 = vadd.f32 %v8190_v37, %v4398_v24  ;;  %v4397_v17 = vmax.f32 %v9177_v14, %v4293_v10  ;;  %v4296_v35 = vmax.f32 %v6374_v47, %v6534_v50  ;;  %v2798_v28 = vpop.f32.mrf.mxu0  ;;  %v9180_v8 = vmax.f32 %v7220_v48, %v7222_v49 }
 0x1b2   : > { %v4610_v40 = vmax.f32 %v4506_v9, 0.0  ;;  %v3800_v29 = vpop.f32.mrf.mxu1  ;;  %v9181_v47 = vmax.f32 %v7232_v53, %v7234_v54 }
 0x1b3   : > { %v4613_v20 = vmax.f32 %v4509_v13, 0.0  ;;  %v4508_v3 = vadd.f32 %v8190_v37, %v4397_v17  ;;  %v4400_v30 = vmax.f32 %v9178_v6, %v4296_v35  ;;  %v4295_v31 = vmax.f32 %v2798_v28, %v3800_v29  ;;  %v6377_v55 = vpop.f32.mrf.mxu0 }
 0x1b4   : > { %4715 = vst.msk [vmem:[%s8210_s27 + $0x10] sm:$0xff] %vm4712_vm2, %v4610_v40  ;;  %v6537_v60 = vpop.f32.mrf.mxu1  ;;  %v9182_v17 = vmax.f32 %v7240_v58, %v7242_v59 }
 0x1b5   : > { %4718 = vst.msk [vmem:[%s8210_s27 + $0x28] sm:$0xff] %vm4712_vm2, %v4613_v20  ;;  %v4612_v33 = vmax.f32 %v4508_v3, 0.0  ;;  %v4511_v34 = vadd.f32 %v8190_v37, %v4400_v30  ;;  %v4399_v18 = vmax.f32 %v9179_v46, %v4295_v31  ;;  %v4298_v19 = vmax.f32 %v6377_v55, %v6537_v60  ;;  %v2808_v57 = vpop.f32.mrf.mxu0 }
 0x1b6   : > { %v3810_v27 = vpop.f32.mrf.mxu1  ;;  %v9183_v3 = vmax.f32 %v7252_v63, %v7254_v0  ;;  %v9184_v60 = vmax.f32 %v7260_v4, %v7262_v5 }
 0x1b7   : > { %4717 = vst.msk [vmem:[%s8210_s27 + $0x20] sm:$0xff] %vm4712_vm2, %v4612_v33  ;;  %v4615_v38 = vmax.f32 %v4511_v34, 0.0  ;;  %v4510_v39 = vadd.f32 %v8190_v37, %v4399_v18  ;;  %v4402_v9 = vmax.f32 %v9180_v8, %v4298_v19  ;;  %v4297_v23 = vmax.f32 %v2808_v57, %v3810_v27  ;;  %v6380_v24 = vpop.f32.mrf.mxu0 }
 0x1b8   : > { %v6540_v10 = vpop.f32.mrf.mxu1  ;;  %v9185_v19 = vmax.f32 %v7272_v12, %v7274_v15  ;;  %v9186_v8 = vmax.f32 %v7280_v25, %v7282_v26 }
 0x1b9   : > { %4720 = vst.msk [vmem:[%s8210_s27 + $0x38] sm:$0xff] %vm4712_vm2, %v4615_v38  ;;  %v4614_v43 = vmax.f32 %v4510_v39, 0.0  ;;  %v4513_v44 = vadd.f32 %v8190_v37, %v4402_v9  ;;  %v4401_v50 = vmax.f32 %v9181_v47, %v4297_v23  ;;  %v4300_v40 = vmax.f32 %v6380_v24, %v6540_v10  ;;  %v2818_v13 = vpop.f32.mrf.mxu0 }
 0x1ba   : > { %v3820_v14 = vpop.f32.mrf.mxu1 }
 0x1bb   : > { %4719 = vst.msk [vmem:[%s8210_s27 + $0x30] sm:$0xff] %vm4712_vm2, %v4614_v43  ;;  %v4617_v48 = vmax.f32 %v4513_v44, 0.0  ;;  %v4512_v49 = vadd.f32 %v8190_v37, %v4401_v50  ;;  %v4404_v35 = vmax.f32 %v9182_v17, %v4300_v40  ;;  %v4299_v28 = vmax.f32 %v2818_v13, %v3820_v14  ;;  %v6383_v29 = vpop.f32.mrf.mxu0 }
 0x1bc   : > { %v6543_v20 = vpop.f32.mrf.mxu1  ;;  %v9187_v43 = vmax.f32 %v7292_v36, %v7294_v41  ;;  %v9188_v13 = vmax.f32 %v7300_v51, %v7302_v52 }
 0x1bd   : > { %4722 = vst.msk [vmem:[%s8210_s27 + $0x48] sm:$0xff] %vm4712_vm2, %v4617_v48  ;;  %v4616_v53 = vmax.f32 %v4512_v49, 0.0  ;;  %v4515_v54 = vadd.f32 %v8190_v37, %v4404_v35  ;;  %v4403_v6 = vmax.f32 %v9183_v3, %v4299_v28  ;;  %v4302_v30 = vmax.f32 %v6383_v29, %v6543_v20  ;;  %v2828_v31 = vpop.f32.mrf.mxu0 }
 0x1be   : > { %v3830_v55 = vpop.f32.mrf.mxu1  ;;  %v9189_v35 = vmax.f32 %v7312_v62, %v7314_v1 }
 0x1bf   : > { %4721 = vst.msk [vmem:[%s8210_s27 + $0x40] sm:$0xff] %vm4712_vm2, %v4616_v53  ;;  %v4619_v58 = vmax.f32 %v4515_v54, 0.0  ;;  %v4514_v59 = vadd.f32 %v8190_v37, %v4403_v6  ;;  %v4406_v33 = vmax.f32 %v9184_v60, %v4302_v30  ;;  %v4301_v34 = vmax.f32 %v2828_v31, %v3830_v55  ;;  %v6386_v46 = vpop.f32.mrf.mxu0 }
 0x1c0   : > { %v6546_v18 = vpop.f32.mrf.mxu1  ;;  %v9190_v54 = vmax.f32 %v7320_v16, %v7322_v21  ;;  %v9191_v55 = vmax.f32 %v7332_v45, %v7334_v11 }
 0x1c1   : > { %4724 = vst.msk [vmem:[%s8210_s27 + $0x58] sm:$0xff] %vm4712_vm2, %v4619_v58  ;;  %v4618_v63 = vmax.f32 %v4514_v59, 0.0  ;;  %v4517_v0 = vadd.f32 %v8190_v37, %v4406_v33  ;;  %v4405_v57 = vmax.f32 %v9185_v19, %v4301_v34  ;;  %v4304_v27 = vmax.f32 %v6386_v46, %v6546_v18  ;;  %v2838_v38 = vpop.f32.mrf.mxu0 }
 0x1c2   : > { %v3840_v39 = vpop.f32.mrf.mxu1  ;;  %v9192_v34 = vmax.f32 %v7340_v32, %v7342_v2  ;;  %v9193_v19 = vmax.f32 %v7352_v61, %v7354_v22 }
 0x1c3   : > { %4723 = vst.msk [vmem:[%s8210_s27 + $0x50] sm:$0xff] %vm4712_vm2, %v4618_v63  ;;  %v4621_v4 = vmax.f32 %v4517_v0, 0.0  ;;  %v4516_v5 = vadd.f32 %v8190_v37, %v4405_v57  ;;  %v4408_v9 = vmax.f32 %v9186_v8, %v4304_v27  ;;  %v4303_v23 = vmax.f32 %v2838_v38, %v3840_v39  ;;  %v6389_v24 = vpop.f32.mrf.mxu0 }
 0x1c4   : > { %v6549_v10 = vpop.f32.mrf.mxu1 }
 0x1c5   : > { %4726 = vst.msk [vmem:[%s8210_s27 + $0x68] sm:$0xff] %vm4712_vm2, %v4621_v4  ;;  %v4620_v12 = vmax.f32 %v4516_v5, 0.0  ;;  %v4519_v15 = vadd.f32 %v8190_v37, %v4408_v9  ;;  %v4407_v44 = vmax.f32 %v9187_v43, %v4303_v23  ;;  %v4306_v47 = vmax.f32 %v6389_v24, %v6549_v10  ;;  %v2848_v50 = vpop.f32.mrf.mxu0  ;;  %v9195_v24 = vld [vmem:[#allocation2_spill] sm:$0xff] }
 0x1c6   : > { %v3850_v40 = vpop.f32.mrf.mxu1  ;;  %v9194_v4 = vmax.f32 %v7360_v7, %v7362_v56  ;;  %v9196_v10 = vmax.f32 %v7372_v42, %v9195_v24  ;;  %v9216_v24 = vld [vmem:[#allocation16_spill] sm:$0xff] }
 0x1c7   : > { %4725 = vst.msk [vmem:[%s8210_s27 + $0x60] sm:$0xff] %vm4712_vm2, %v4620_v12  ;;  %v4623_v25 = vmax.f32 %v4519_v15, 0.0  ;;  %v4518_v26 = vadd.f32 %v8190_v37, %v4407_v44  ;;  %v4410_v14 = vmax.f32 %v9188_v13, %v4306_v47  ;;  %v4305_v48 = vmax.f32 %v2848_v50, %v3850_v40  ;;  %v6392_v49 = vpop.f32.mrf.mxu0  ;;  %v9197_v47 = vld [vmem:[#allocation3_spill] sm:$0xff]  ;;  %v9198_v50 = vld [vmem:[#allocation4_spill] sm:$0xff] }
 0x1c8   : > { %v6552_v17 = vpop.f32.mrf.mxu1  ;;  %v9199_v40 = vmax.f32 %v9197_v47, %v9198_v50  ;;  %v9218_v47 = vld [vmem:[#allocation17_spill] sm:$0xff]  ;;  %v9219_v50 = vld [vmem:[#allocation18_spill] sm:$0xff] }
 0x1c9   : > { %4728 = vst.msk [vmem:[%s8210_s27 + $0x78] sm:$0xff] %vm4712_vm2, %v4623_v25  ;;  %v4622_v36 = vmax.f32 %v4518_v26, 0.0  ;;  %v4521_v41 = vadd.f32 %v8190_v37, %v4410_v14  ;;  %v4409_v28 = vmax.f32 %v9189_v35, %v4305_v48  ;;  %v4308_v29 = vmax.f32 %v6392_v49, %v6552_v17  ;;  %v2858_v20 = vpop.f32.mrf.mxu0  ;;  %v9200_v49 = vld [vmem:[#allocation5_spill] sm:$0xff]  ;;  %v9201_v17 = vld [vmem:[#allocation6_spill] sm:$0xff] }
 0x1ca   : > { %v3860_v53 = vpop.f32.mrf.mxu1 }
 0x1cb   : > { %4727 = vst.msk [vmem:[%s8210_s27 + $0x70] sm:$0xff] %vm4712_vm2, %v4622_v36  ;;  %v4625_v51 = vmax.f32 %v4521_v41, 0.0  ;;  %v4520_v52 = vadd.f32 %v8190_v37, %v4409_v28  ;;  %v4412_v3 = vmax.f32 %v9190_v54, %v4308_v29  ;;  %v4307_v6 = vmax.f32 %v2858_v20, %v3860_v53  ;;  %v6395_v30 = vpop.f32.mrf.mxu0 }
 0x1cc   : > { %v6555_v31 = vpop.f32.mrf.mxu1  ;;  %v9202_v36 = vmax.f32 %v9200_v49, %v9201_v17  ;;  %v9221_v49 = vld [vmem:[#allocation19_spill] sm:$0xff]  ;;  %v9222_v17 = vld [vmem:[#allocation20_spill] sm:$0xff] }
 0x1cd   : > { %4730 = vst.msk [vmem:[%s8210_s27 + $0x88] sm:$0xff] %vm4712_vm2, %v4625_v51  ;;  %v4624_v62 = vmax.f32 %v4520_v52, 0.0  ;;  %v4523_v1 = vadd.f32 %v8190_v37, %v4412_v3  ;;  %v4411_v58 = vmax.f32 %v9191_v55, %v4307_v6  ;;  %v4310_v59 = vmax.f32 %v6395_v30, %v6555_v31  ;;  %v2868_v60 = vpop.f32.mrf.mxu0  ;;  %v9203_v51 = vld [vmem:[#allocation7_spill] sm:$0xff]  ;;  %v9204_v52 = vld [vmem:[#allocation8_spill] sm:$0xff]  ;;  %v9206_v55 = vld [vmem:[#allocation9_spill] sm:$0xff] }
 0x1ce   : > { %v3870_v33 = vpop.f32.mrf.mxu1  ;;  %v9205_v54 = vmax.f32 %v9203_v51, %v9204_v52  ;;  %v9224_v51 = vld [vmem:[#allocation21_spill] sm:$0xff]  ;;  %v9225_v52 = vld [vmem:[#allocation22_spill] sm:$0xff] }
 0x1cf   : > { %4729 = vst.msk [vmem:[%s8210_s27 + $0x80] sm:$0xff] %vm4712_vm2, %v4624_v62  ;;  %v4627_v16 = vmax.f32 %v4523_v1, 0.0  ;;  %v4522_v21 = vadd.f32 %v8190_v37, %v4411_v58  ;;  %v4414_v46 = vmax.f32 %v9192_v34, %v4310_v59  ;;  %v4309_v18 = vmax.f32 %v2868_v60, %v3870_v33  ;;  %v6398_v63 = vpop.f32.mrf.mxu0  ;;  %v9207_v58 = vld [vmem:[#allocation10_spill] sm:$0xff] }
 0x1d0   : > { %v6558_v0 = vpop.f32.mrf.mxu1  ;;  %v9208_v59 = vmax.f32 %v9206_v55, %v9207_v58  ;;  %v9227_v55 = vld [vmem:[#allocation23_spill] sm:$0xff]  ;;  %v9228_v58 = vld [vmem:[#allocation24_spill] sm:$0xff] }
 0x1d1   : > { %4732 = vst.msk [vmem:[%s8210_s27 + $0x98] sm:$0xff] %vm4712_vm2, %v4627_v16  ;;  %v4626_v11 = vmax.f32 %v4522_v21, 0.0  ;;  %v4525_v45 = vadd.f32 %v8190_v37, %v4414_v46  ;;  %v4413_v57 = vmax.f32 %v9193_v19, %v4309_v18  ;;  %v4312_v27 = vmax.f32 %v6398_v63, %v6558_v0  ;;  %v2878_v38 = vpop.f32.mrf.mxu0  ;;  %v9209_v18 = vld [vmem:[#allocation11_spill] sm:$0xff]  ;;  %v9210_v63 = vld [vmem:[#allocation12_spill] sm:$0xff] }
 0x1d2   : > { %v3880_v39 = vpop.f32.mrf.mxu1  ;;  %v9211_v0 = vmax.f32 %v9209_v18, %v9210_v63  ;;  %v9230_v18 = vld [vmem:[#allocation25_spill] sm:$0xff]  ;;  %v9231_v63 = vld [vmem:[#allocation26_spill] sm:$0xff] }
 0x1d3   : > { %4731 = vst.msk [vmem:[%s8210_s27 + $0x90] sm:$0xff] %vm4712_vm2, %v4626_v11  ;;  %v4629_v32 = vmax.f32 %v4525_v45, 0.0  ;;  %v4524_v2 = vadd.f32 %v8190_v37, %v4413_v57  ;;  %v4416_v5 = vmax.f32 %v9194_v4, %v4312_v27  ;;  %v4311_v8 = vmax.f32 %v2878_v38, %v3880_v39  ;;  %v6401_v9 = vpop.f32.mrf.mxu0  ;;  %v9212_v39 = vld [vmem:[#allocation13_spill] sm:$0xff] }
 0x1d4   : > { %v6561_v23 = vpop.f32.mrf.mxu1 }
 0x1d5   : > { %4734 = vst.msk [vmem:[%s8210_s27 + $0xa8] sm:$0xff] %vm4712_vm2, %v4629_v32  ;;  %v4628_v22 = vmax.f32 %v4524_v2, 0.0  ;;  %v4527_v61 = vadd.f32 %v8190_v37, %v4416_v5  ;;  %v4415_v12 = vmax.f32 %v9196_v10, %v4311_v8  ;;  %v4314_v15 = vmax.f32 %v6401_v9, %v6561_v23  ;;  %v2888_v43 = vpop.f32.mrf.mxu0  ;;  %v9213_v32 = vld [vmem:[#allocation14_spill] sm:$0xff] }
 0x1d6   : > { %v3890_v44 = vpop.f32.mrf.mxu1  ;;  %v9214_v2 = vmax.f32 %v9212_v39, %v9213_v32  ;;  %v9233_v39 = vld [vmem:[#allocation27_spill] sm:$0xff]  ;;  %v9234_v32 = vld [vmem:[#allocation28_spill] sm:$0xff] }
 0x1d7   : > { %4733 = vst.msk [vmem:[%s8210_s27 + $0xa0] sm:$0xff] %vm4712_vm2, %v4628_v22  ;;  %v4631_v7 = vmax.f32 %v4527_v61, 0.0  ;;  %v4526_v56 = vadd.f32 %v8190_v37, %v4415_v12  ;;  %v4418_v25 = vmax.f32 %v9199_v40, %v4314_v15  ;;  %v4313_v26 = vmax.f32 %v2888_v43, %v3890_v44  ;;  %v6404_v13 = vpop.f32.mrf.mxu0  ;;  %v9215_v61 = vld [vmem:[#allocation15_spill] sm:$0xff] }
 0x1d8   : > { %v6564_v14 = vpop.f32.mrf.mxu1  ;;  %v9217_v10 = vmax.f32 %v9215_v61, %v9216_v24  ;;  %v9220_v40 = vmax.f32 %v9218_v47, %v9219_v50  ;;  %v9236_v61 = vld [vmem:[#allocation29_spill] sm:$0xff]  ;;  %v9237_v24 = vld [vmem:[#allocation30_spill] sm:$0xff]  ;;  %v9239_v47 = vld [vmem:[#allocation31_spill] sm:$0xff] }
 0x1d9   : > { %4736 = vst.msk [vmem:[%s8210_s27 + $0xb8] sm:$0xff] %vm4712_vm2, %v4631_v7  ;;  %v4630_v42 = vmax.f32 %v4526_v56, 0.0  ;;  %v4529_v48 = vadd.f32 %v8190_v37, %v4418_v25  ;;  %v4417_v41 = vmax.f32 %v9202_v36, %v4313_v26  ;;  %v4316_v35 = vmax.f32 %v6404_v13, %v6564_v14  ;;  %v2898_v28 = vpop.f32.mrf.mxu0  ;;  %v9240_v50 = vld [vmem:[#allocation32_spill] sm:$0xff] }
 0x1da   : > { %v3900_v29 = vpop.f32.mrf.mxu1  ;;  %v9223_v36 = vmax.f32 %v9221_v49, %v9222_v17  ;;  %v9242_v49 = vld [vmem:[#allocation33_spill] sm:$0xff]  ;;  %v9243_v17 = vld [vmem:[#allocation34_spill] sm:$0xff] }
 0x1db   : > { %4735 = vst.msk [vmem:[%s8210_s27 + $0xb0] sm:$0xff] %vm4712_vm2, %v4630_v42  ;;  %v4633_v20 = vmax.f32 %v4529_v48, 0.0  ;;  %v4528_v53 = vadd.f32 %v8190_v37, %v4417_v41  ;;  %v4420_v3 = vmax.f32 %v9205_v54, %v4316_v35  ;;  %v4315_v6 = vmax.f32 %v2898_v28, %v3900_v29  ;;  %v6407_v30 = vpop.f32.mrf.mxu0 }
 0x1dc   : > { %v6567_v31 = vpop.f32.mrf.mxu1  ;;  %v9226_v54 = vmax.f32 %v9224_v51, %v9225_v52  ;;  %v9245_v51 = vld [vmem:[#allocation35_spill] sm:$0xff]  ;;  %v9246_v52 = vld [vmem:[#allocation36_spill] sm:$0xff] }
 0x1dd   : > { %4738 = vst.msk [vmem:[%s8210_s27 + $0xc8] sm:$0xff] %vm4712_vm2, %v4633_v20  ;;  %v4632_v62 = vmax.f32 %v4528_v53, 0.0  ;;  %v4531_v1 = vadd.f32 %v8190_v37, %v4420_v3  ;;  %v4419_v60 = vmax.f32 %v9208_v59, %v4315_v6  ;;  %v4318_v33 = vmax.f32 %v6407_v30, %v6567_v31  ;;  %v2908_v16 = vpop.f32.mrf.mxu0 }
 0x1de   : > { %v3910_v21 = vpop.f32.mrf.mxu1  ;;  %v9229_v59 = vmax.f32 %v9227_v55, %v9228_v58  ;;  %v9248_v55 = vld [vmem:[#allocation37_spill] sm:$0xff]  ;;  %v9249_v58 = vld [vmem:[#allocation38_spill] sm:$0xff] }
 0x1df   : > { %4737 = vst.msk [vmem:[%s8210_s27 + $0xc0] sm:$0xff] %vm4712_vm2, %v4632_v62  ;;  %v4635_v34 = vmax.f32 %v4531_v1, 0.0  ;;  %v4530_v46 = vadd.f32 %v8190_v37, %v4419_v60  ;;  %v4422_v11 = vmax.f32 %v9211_v0, %v4318_v33  ;;  %v4317_v45 = vmax.f32 %v2908_v16, %v3910_v21  ;;  %v6410_v19 = vpop.f32.mrf.mxu0 }
 0x1e0   : > { %v6570_v57 = vpop.f32.mrf.mxu1  ;;  %v9232_v0 = vmax.f32 %v9230_v18, %v9231_v63  ;;  %v9251_v18 = vld [vmem:[#allocation39_spill] sm:$0xff]  ;;  %v9252_v63 = vld [vmem:[#allocation40_spill] sm:$0xff] }
 0x1e1   : > { %4740 = vst.msk [vmem:[%s8210_s27 + $0xd8] sm:$0xff] %vm4712_vm2, %v4635_v34  ;;  %v4634_v27 = vmax.f32 %v4530_v46, 0.0  ;;  %v4533_v38 = vadd.f32 %v8190_v37, %v4422_v11  ;;  %v4421_v4 = vmax.f32 %v9214_v2, %v4317_v45  ;;  %v4320_v5 = vmax.f32 %v6410_v19, %v6570_v57  ;;  %v2918_v8 = vpop.f32.mrf.mxu0 }
 0x1e2   : > { %v3920_v9 = vpop.f32.mrf.mxu1  ;;  %v9235_v2 = vmax.f32 %v9233_v39, %v9234_v32  ;;  %v9254_v39 = vld [vmem:[#allocation41_spill] sm:$0xff]  ;;  %v9255_v32 = vld [vmem:[#allocation42_spill] sm:$0xff] }
 0x1e3   : > { %4739 = vst.msk [vmem:[%s8210_s27 + $0xd0] sm:$0xff] %vm4712_vm2, %v4634_v27  ;;  %v4637_v23 = vmax.f32 %v4533_v38, 0.0  ;;  %v4532_v22 = vadd.f32 %v8190_v37, %v4421_v4  ;;  %v4424_v12 = vmax.f32 %v9217_v10, %v4320_v5  ;;  %v4319_v15 = vmax.f32 %v2918_v8, %v3920_v9  ;;  %v6413_v43 = vpop.f32.mrf.mxu0 }
 0x1e4   : > { %v6573_v44 = vpop.f32.mrf.mxu1  ;;  %v9238_v10 = vmax.f32 %v9236_v61, %v9237_v24  ;;  %v9257_v61 = vld [vmem:[#allocation43_spill] sm:$0xff]  ;;  %v9258_v24 = vld [vmem:[#allocation44_spill] sm:$0xff] }
 0x1e5   : > { %4742 = vst.msk [vmem:[%s8210_s27 + $0xe8] sm:$0xff] %vm4712_vm2, %v4637_v23  ;;  %v4636_v7 = vmax.f32 %v4532_v22, 0.0  ;;  %v4535_v56 = vadd.f32 %v8190_v37, %v4424_v12  ;;  %v4423_v25 = vmax.f32 %v9220_v40, %v4319_v15  ;;  %v4322_v26 = vmax.f32 %v6413_v43, %v6573_v44  ;;  %v2928_v13 = vpop.f32.mrf.mxu0 }
 0x1e6   : > { %v3930_v14 = vpop.f32.mrf.mxu1  ;;  %v9241_v40 = vmax.f32 %v9239_v47, %v9240_v50  ;;  %v9260_v47 = vld [vmem:[#allocation45_spill] sm:$0xff]  ;;  %v9261_v50 = vld [vmem:[#allocation46_spill] sm:$0xff] }
 0x1e7   : > { %4741 = vst.msk [vmem:[%s8210_s27 + $0xe0] sm:$0xff] %vm4712_vm2, %v4636_v7  ;;  %v4639_v42 = vmax.f32 %v4535_v56, 0.0  ;;  %v4534_v48 = vadd.f32 %v8190_v37, %v4423_v25  ;;  %v4426_v41 = vmax.f32 %v9223_v36, %v4322_v26  ;;  %v4321_v35 = vmax.f32 %v2928_v13, %v3930_v14  ;;  %v6416_v28 = vpop.f32.mrf.mxu0 }
 0x1e8   : > { %v6576_v29 = vpop.f32.mrf.mxu1  ;;  %v9244_v36 = vmax.f32 %v9242_v49, %v9243_v17  ;;  %v9263_v49 = vld [vmem:[#allocation47_spill] sm:$0xff]  ;;  %v9264_v17 = vld [vmem:[#allocation48_spill] sm:$0xff] }
 0x1e9   : > { %4744 = vst.msk [vmem:[%s8210_s27 + $0xf8] sm:$0xff] %vm4712_vm2, %v4639_v42  ;;  %v4638_v20 = vmax.f32 %v4534_v48, 0.0  ;;  %v4537_v53 = vadd.f32 %v8190_v37, %v4426_v41  ;;  %v4425_v3 = vmax.f32 %v9226_v54, %v4321_v35  ;;  %v4324_v6 = vmax.f32 %v6416_v28, %v6576_v29  ;;  %v2938_v30 = vpop.f32.mrf.mxu0 }
 0x1ea   : > { %v3940_v31 = vpop.f32.mrf.mxu1  ;;  %v9247_v54 = vmax.f32 %v9245_v51, %v9246_v52  ;;  %v9266_v51 = vld [vmem:[#allocation49_spill] sm:$0xff]  ;;  %v9267_v52 = vld [vmem:[#allocation50_spill] sm:$0xff] }
 0x1eb   : > { %4743 = vst.msk [vmem:[%s8210_s27 + $0xf0] sm:$0xff] %vm4712_vm2, %v4638_v20  ;;  %v4641_v62 = vmax.f32 %v4537_v53, 0.0  ;;  %v4536_v1 = vadd.f32 %v8190_v37, %v4425_v3  ;;  %v4428_v60 = vmax.f32 %v9229_v59, %v4324_v6  ;;  %v4323_v33 = vmax.f32 %v2938_v30, %v3940_v31  ;;  %v6419_v16 = vpop.f32.mrf.mxu0 }
 0x1ec   : > { %v6579_v21 = vpop.f32.mrf.mxu1  ;;  %v9250_v59 = vmax.f32 %v9248_v55, %v9249_v58  ;;  %v9269_v55 = vld [vmem:[#allocation51_spill] sm:$0xff]  ;;  %v9270_v58 = vld [vmem:[#allocation52_spill] sm:$0xff] }
 0x1ed   : > { %4746 = vst.msk [vmem:[%s8210_s27 + $0x108] sm:$0xff] %vm4712_vm2, %v4641_v62  ;;  %v4640_v34 = vmax.f32 %v4536_v1, 0.0  ;;  %v4539_v46 = vadd.f32 %v8190_v37, %v4428_v60  ;;  %v4427_v11 = vmax.f32 %v9232_v0, %v4323_v33  ;;  %v4326_v45 = vmax.f32 %v6419_v16, %v6579_v21  ;;  %v2948_v19 = vpop.f32.mrf.mxu0 }
 0x1ee   : > { %v3950_v57 = vpop.f32.mrf.mxu1  ;;  %v9253_v0 = vmax.f32 %v9251_v18, %v9252_v63  ;;  %v9272_v18 = vld [vmem:[#allocation53_spill] sm:$0xff]  ;;  %v9273_v63 = vld [vmem:[#allocation54_spill] sm:$0xff] }
 0x1ef   : > { %4745 = vst.msk [vmem:[%s8210_s27 + $0x100] sm:$0xff] %vm4712_vm2, %v4640_v34  ;;  %v4643_v27 = vmax.f32 %v4539_v46, 0.0  ;;  %v4538_v38 = vadd.f32 %v8190_v37, %v4427_v11  ;;  %v4430_v4 = vmax.f32 %v9235_v2, %v4326_v45  ;;  %v4325_v5 = vmax.f32 %v2948_v19, %v3950_v57  ;;  %v6422_v8 = vpop.f32.mrf.mxu0 }
 0x1f0   : > { %v6582_v9 = vpop.f32.mrf.mxu1  ;;  %v9256_v2 = vmax.f32 %v9254_v39, %v9255_v32  ;;  %v9275_v39 = vld [vmem:[#allocation55_spill] sm:$0xff]  ;;  %v9276_v32 = vld [vmem:[#allocation56_spill] sm:$0xff] }
 0x1f1   : > { %4748 = vst.msk [vmem:[%s8210_s27 + $0x118] sm:$0xff] %vm4712_vm2, %v4643_v27  ;;  %v4642_v23 = vmax.f32 %v4538_v38, 0.0  ;;  %v4541_v22 = vadd.f32 %v8190_v37, %v4430_v4  ;;  %v4429_v12 = vmax.f32 %v9238_v10, %v4325_v5  ;;  %v4328_v15 = vmax.f32 %v6422_v8, %v6582_v9  ;;  %v2958_v43 = vpop.f32.mrf.mxu0 }
 0x1f2   : > { %v3960_v44 = vpop.f32.mrf.mxu1  ;;  %v9259_v10 = vmax.f32 %v9257_v61, %v9258_v24  ;;  %v9278_v61 = vld [vmem:[#allocation57_spill] sm:$0xff]  ;;  %v9279_v24 = vld [vmem:[#allocation58_spill] sm:$0xff] }
 0x1f3   : > { %4747 = vst.msk [vmem:[%s8210_s27 + $0x110] sm:$0xff] %vm4712_vm2, %v4642_v23  ;;  %v4645_v7 = vmax.f32 %v4541_v22, 0.0  ;;  %v4540_v56 = vadd.f32 %v8190_v37, %v4429_v12  ;;  %v4432_v25 = vmax.f32 %v9241_v40, %v4328_v15  ;;  %v4327_v26 = vmax.f32 %v2958_v43, %v3960_v44  ;;  %v6425_v13 = vpop.f32.mrf.mxu0 }
 0x1f4   : > { %v6585_v14 = vpop.f32.mrf.mxu1  ;;  %v9262_v40 = vmax.f32 %v9260_v47, %v9261_v50  ;;  %v9281_v47 = vld [vmem:[#allocation59_spill] sm:$0xff]  ;;  %v9282_v50 = vld [vmem:[#allocation60_spill] sm:$0xff] }
 0x1f5   : > { %4750 = vst.msk [vmem:[%s8210_s27 + $0x128] sm:$0xff] %vm4712_vm2, %v4645_v7  ;;  %v4644_v42 = vmax.f32 %v4540_v56, 0.0  ;;  %v4543_v48 = vadd.f32 %v8190_v37, %v4432_v25  ;;  %v4431_v41 = vmax.f32 %v9244_v36, %v4327_v26  ;;  %v4330_v35 = vmax.f32 %v6425_v13, %v6585_v14  ;;  %v2968_v28 = vpop.f32.mrf.mxu0 }
 0x1f6   : > { %v3970_v29 = vpop.f32.mrf.mxu1  ;;  %v9265_v36 = vmax.f32 %v9263_v49, %v9264_v17  ;;  %v9284_v49 = vld [vmem:[#allocation61_spill] sm:$0xff]  ;;  %v9285_v17 = vld [vmem:[#allocation62_spill] sm:$0xff] }
 0x1f7   : > { %4749 = vst.msk [vmem:[%s8210_s27 + $0x120] sm:$0xff] %vm4712_vm2, %v4644_v42  ;;  %v4647_v20 = vmax.f32 %v4543_v48, 0.0  ;;  %v4542_v53 = vadd.f32 %v8190_v37, %v4431_v41  ;;  %v4434_v3 = vmax.f32 %v9247_v54, %v4330_v35  ;;  %v4329_v6 = vmax.f32 %v2968_v28, %v3970_v29  ;;  %v6428_v30 = vpop.f32.mrf.mxu0 }
 0x1f8   : > { %v6588_v31 = vpop.f32.mrf.mxu1  ;;  %v9268_v54 = vmax.f32 %v9266_v51, %v9267_v52  ;;  %v9287_v51 = vld [vmem:[#allocation63_spill] sm:$0xff]  ;;  %v9288_v52 = vld [vmem:[#allocation64_spill] sm:$0xff] }
 0x1f9   : > { %4752 = vst.msk [vmem:[%s8210_s27 + $0x138] sm:$0xff] %vm4712_vm2, %v4647_v20  ;;  %v4646_v62 = vmax.f32 %v4542_v53, 0.0  ;;  %v4545_v1 = vadd.f32 %v8190_v37, %v4434_v3  ;;  %v4433_v60 = vmax.f32 %v9250_v59, %v4329_v6  ;;  %v4332_v33 = vmax.f32 %v6428_v30, %v6588_v31  ;;  %v2978_v16 = vpop.f32.mrf.mxu0 }
 0x1fa   : > { %v3980_v21 = vpop.f32.mrf.mxu1  ;;  %v9271_v59 = vmax.f32 %v9269_v55, %v9270_v58  ;;  %v9290_v55 = vld [vmem:[#allocation65_spill] sm:$0xff]  ;;  %v9291_v58 = vld [vmem:[#allocation66_spill] sm:$0xff] }
 0x1fb   : > { %4751 = vst.msk [vmem:[%s8210_s27 + $0x130] sm:$0xff] %vm4712_vm2, %v4646_v62  ;;  %v4649_v34 = vmax.f32 %v4545_v1, 0.0  ;;  %v4544_v46 = vadd.f32 %v8190_v37, %v4433_v60  ;;  %v4436_v11 = vmax.f32 %v9253_v0, %v4332_v33  ;;  %v4331_v45 = vmax.f32 %v2978_v16, %v3980_v21  ;;  %v6431_v19 = vpop.f32.mrf.mxu0 }
 0x1fc   : > { %v6591_v57 = vpop.f32.mrf.mxu1  ;;  %v9274_v0 = vmax.f32 %v9272_v18, %v9273_v63  ;;  %v9293_v18 = vld [vmem:[#allocation67_spill] sm:$0xff]  ;;  %v9294_v63 = vld [vmem:[#allocation68_spill] sm:$0xff] }
 0x1fd   : > { %4754 = vst.msk [vmem:[%s8210_s27 + $0x148] sm:$0xff] %vm4712_vm2, %v4649_v34  ;;  %v4648_v27 = vmax.f32 %v4544_v46, 0.0  ;;  %v4547_v38 = vadd.f32 %v8190_v37, %v4436_v11  ;;  %v4435_v4 = vmax.f32 %v9256_v2, %v4331_v45  ;;  %v4334_v5 = vmax.f32 %v6431_v19, %v6591_v57  ;;  %v2988_v8 = vpop.f32.mrf.mxu0 }
 0x1fe   : > { %v3990_v9 = vpop.f32.mrf.mxu1  ;;  %v9277_v2 = vmax.f32 %v9275_v39, %v9276_v32  ;;  %v9296_v39 = vld [vmem:[#allocation69_spill] sm:$0xff]  ;;  %v9297_v32 = vld [vmem:[#allocation70_spill] sm:$0xff] }
 0x1ff   : > { %4753 = vst.msk [vmem:[%s8210_s27 + $0x140] sm:$0xff] %vm4712_vm2, %v4648_v27  ;;  %v4651_v23 = vmax.f32 %v4547_v38, 0.0  ;;  %v4546_v22 = vadd.f32 %v8190_v37, %v4435_v4  ;;  %v4438_v12 = vmax.f32 %v9259_v10, %v4334_v5  ;;  %v4333_v15 = vmax.f32 %v2988_v8, %v3990_v9  ;;  %v6434_v43 = vpop.f32.mrf.mxu0 }
 0x200   : > { %v6594_v44 = vpop.f32.mrf.mxu1  ;;  %v9280_v10 = vmax.f32 %v9278_v61, %v9279_v24  ;;  %v9299_v61 = vld [vmem:[#allocation71_spill] sm:$0xff]  ;;  %v9300_v24 = vld [vmem:[#allocation72_spill] sm:$0xff] }
 0x201   : > { %4756 = vst.msk [vmem:[%s8210_s27 + $0x158] sm:$0xff] %vm4712_vm2, %v4651_v23  ;;  %v4650_v7 = vmax.f32 %v4546_v22, 0.0  ;;  %v4549_v56 = vadd.f32 %v8190_v37, %v4438_v12  ;;  %v4437_v25 = vmax.f32 %v9262_v40, %v4333_v15  ;;  %v4336_v26 = vmax.f32 %v6434_v43, %v6594_v44  ;;  %v2998_v13 = vpop.f32.mrf.mxu0 }
 0x202   : > { %v4000_v14 = vpop.f32.mrf.mxu1  ;;  %v9283_v40 = vmax.f32 %v9281_v47, %v9282_v50  ;;  %v9302_v47 = vld [vmem:[#allocation73_spill] sm:$0xff]  ;;  %v9303_v50 = vld [vmem:[#allocation74_spill] sm:$0xff] }
 0x203   : > { %4755 = vst.msk [vmem:[%s8210_s27 + $0x150] sm:$0xff] %vm4712_vm2, %v4650_v7  ;;  %v4653_v42 = vmax.f32 %v4549_v56, 0.0  ;;  %v4548_v48 = vadd.f32 %v8190_v37, %v4437_v25  ;;  %v4440_v41 = vmax.f32 %v9265_v36, %v4336_v26  ;;  %v4335_v35 = vmax.f32 %v2998_v13, %v4000_v14  ;;  %v6437_v28 = vpop.f32.mrf.mxu0 }
 0x204   : > { %v6597_v29 = vpop.f32.mrf.mxu1  ;;  %v9286_v36 = vmax.f32 %v9284_v49, %v9285_v17  ;;  %v9305_v49 = vld [vmem:[#allocation75_spill] sm:$0xff]  ;;  %v9306_v17 = vld [vmem:[#allocation76_spill] sm:$0xff] }
 0x205   : > { %4758 = vst.msk [vmem:[%s8210_s27 + $0x168] sm:$0xff] %vm4712_vm2, %v4653_v42  ;;  %v4652_v20 = vmax.f32 %v4548_v48, 0.0  ;;  %v4551_v53 = vadd.f32 %v8190_v37, %v4440_v41  ;;  %v4439_v3 = vmax.f32 %v9268_v54, %v4335_v35  ;;  %v4338_v6 = vmax.f32 %v6437_v28, %v6597_v29  ;;  %v3008_v30 = vpop.f32.mrf.mxu0 }
 0x206   : > { %v4010_v31 = vpop.f32.mrf.mxu1  ;;  %v9289_v54 = vmax.f32 %v9287_v51, %v9288_v52  ;;  %v9308_v51 = vld [vmem:[#allocation77_spill] sm:$0xff]  ;;  %v9309_v52 = vld [vmem:[#allocation78_spill] sm:$0xff] }
 0x207   : > { %4757 = vst.msk [vmem:[%s8210_s27 + $0x160] sm:$0xff] %vm4712_vm2, %v4652_v20  ;;  %v4655_v62 = vmax.f32 %v4551_v53, 0.0  ;;  %v4550_v1 = vadd.f32 %v8190_v37, %v4439_v3  ;;  %v4442_v60 = vmax.f32 %v9271_v59, %v4338_v6  ;;  %v4337_v33 = vmax.f32 %v3008_v30, %v4010_v31  ;;  %v6440_v16 = vpop.f32.mrf.mxu0 }
 0x208   : > { %v6600_v21 = vpop.f32.mrf.mxu1  ;;  %v9292_v59 = vmax.f32 %v9290_v55, %v9291_v58  ;;  %v9311_v55 = vld [vmem:[#allocation79_spill] sm:$0xff]  ;;  %v9312_v58 = vld [vmem:[#allocation80_spill] sm:$0xff] }
 0x209   : > { %4760 = vst.msk [vmem:[%s8210_s27 + $0x178] sm:$0xff] %vm4712_vm2, %v4655_v62  ;;  %v4654_v34 = vmax.f32 %v4550_v1, 0.0  ;;  %v4553_v46 = vadd.f32 %v8190_v37, %v4442_v60  ;;  %v4441_v11 = vmax.f32 %v9274_v0, %v4337_v33  ;;  %v4340_v45 = vmax.f32 %v6440_v16, %v6600_v21  ;;  %v3018_v19 = vpop.f32.mrf.mxu0 }
 0x20a   : > { %v4020_v57 = vpop.f32.mrf.mxu1  ;;  %v9295_v0 = vmax.f32 %v9293_v18, %v9294_v63  ;;  %v9314_v18 = vld [vmem:[#allocation81_spill] sm:$0xff]  ;;  %v9315_v63 = vld [vmem:[#allocation82_spill] sm:$0xff] }
 0x20b   : > { %4759 = vst.msk [vmem:[%s8210_s27 + $0x170] sm:$0xff] %vm4712_vm2, %v4654_v34  ;;  %v4657_v27 = vmax.f32 %v4553_v46, 0.0  ;;  %v4552_v38 = vadd.f32 %v8190_v37, %v4441_v11  ;;  %v4444_v4 = vmax.f32 %v9277_v2, %v4340_v45  ;;  %v4339_v5 = vmax.f32 %v3018_v19, %v4020_v57  ;;  %v6443_v8 = vpop.f32.mrf.mxu0 }
 0x20c   : > { %v6603_v9 = vpop.f32.mrf.mxu1  ;;  %v9298_v2 = vmax.f32 %v9296_v39, %v9297_v32  ;;  %v9317_v39 = vld [vmem:[#allocation83_spill] sm:$0xff]  ;;  %v9318_v32 = vld [vmem:[#allocation84_spill] sm:$0xff] }
 0x20d   : > { %4762 = vst.msk [vmem:[%s8210_s27 + $0x188] sm:$0xff] %vm4712_vm2, %v4657_v27  ;;  %v4656_v23 = vmax.f32 %v4552_v38, 0.0  ;;  %v4555_v22 = vadd.f32 %v8190_v37, %v4444_v4  ;;  %v4443_v12 = vmax.f32 %v9280_v10, %v4339_v5  ;;  %v4342_v15 = vmax.f32 %v6443_v8, %v6603_v9  ;;  %v3028_v43 = vpop.f32.mrf.mxu0 }
 0x20e   : > { %v4030_v44 = vpop.f32.mrf.mxu1  ;;  %v9301_v10 = vmax.f32 %v9299_v61, %v9300_v24  ;;  %v9320_v61 = vld [vmem:[#allocation85_spill] sm:$0xff]  ;;  %v9321_v24 = vld [vmem:[#allocation86_spill] sm:$0xff] }
 0x20f   : > { %4761 = vst.msk [vmem:[%s8210_s27 + $0x180] sm:$0xff] %vm4712_vm2, %v4656_v23  ;;  %v4659_v7 = vmax.f32 %v4555_v22, 0.0  ;;  %v4554_v56 = vadd.f32 %v8190_v37, %v4443_v12  ;;  %v4446_v25 = vmax.f32 %v9283_v40, %v4342_v15  ;;  %v4341_v26 = vmax.f32 %v3028_v43, %v4030_v44  ;;  %v6446_v13 = vpop.f32.mrf.mxu0 }
 0x210   : > { %v6606_v14 = vpop.f32.mrf.mxu1  ;;  %v9304_v40 = vmax.f32 %v9302_v47, %v9303_v50  ;;  %v9323_v47 = vld [vmem:[#allocation87_spill] sm:$0xff]  ;;  %v9324_v50 = vld [vmem:[#allocation88_spill] sm:$0xff] }
 0x211   : > { %4764 = vst.msk [vmem:[%s8210_s27 + $0x198] sm:$0xff] %vm4712_vm2, %v4659_v7  ;;  %v4658_v42 = vmax.f32 %v4554_v56, 0.0  ;;  %v4557_v48 = vadd.f32 %v8190_v37, %v4446_v25  ;;  %v4445_v41 = vmax.f32 %v9286_v36, %v4341_v26  ;;  %v4344_v35 = vmax.f32 %v6446_v13, %v6606_v14  ;;  %v3038_v28 = vpop.f32.mrf.mxu0 }
 0x212   : > { %v4040_v29 = vpop.f32.mrf.mxu1  ;;  %v9307_v36 = vmax.f32 %v9305_v49, %v9306_v17  ;;  %v9326_v49 = vld [vmem:[#allocation89_spill] sm:$0xff]  ;;  %v9327_v17 = vld [vmem:[#allocation90_spill] sm:$0xff] }
 0x213   : > { %4763 = vst.msk [vmem:[%s8210_s27 + $0x190] sm:$0xff] %vm4712_vm2, %v4658_v42  ;;  %v4661_v20 = vmax.f32 %v4557_v48, 0.0  ;;  %v4556_v53 = vadd.f32 %v8190_v37, %v4445_v41  ;;  %v4448_v3 = vmax.f32 %v9289_v54, %v4344_v35  ;;  %v4343_v6 = vmax.f32 %v3038_v28, %v4040_v29  ;;  %v6449_v30 = vpop.f32.mrf.mxu0 }
 0x214   : > { %v6609_v31 = vpop.f32.mrf.mxu1  ;;  %v9310_v54 = vmax.f32 %v9308_v51, %v9309_v52  ;;  %v9329_v51 = vld [vmem:[#allocation91_spill] sm:$0xff]  ;;  %v9330_v52 = vld [vmem:[#allocation92_spill] sm:$0xff] }
 0x215   : > { %4766 = vst.msk [vmem:[%s8210_s27 + $0x1a8] sm:$0xff] %vm4712_vm2, %v4661_v20  ;;  %v4660_v62 = vmax.f32 %v4556_v53, 0.0  ;;  %v4559_v1 = vadd.f32 %v8190_v37, %v4448_v3  ;;  %v4447_v60 = vmax.f32 %v9292_v59, %v4343_v6  ;;  %v4346_v33 = vmax.f32 %v6449_v30, %v6609_v31  ;;  %v3048_v16 = vpop.f32.mrf.mxu0 }
 0x216   : > { %v4050_v21 = vpop.f32.mrf.mxu1  ;;  %v9313_v59 = vmax.f32 %v9311_v55, %v9312_v58  ;;  %v9332_v55 = vld [vmem:[#allocation93_spill] sm:$0xff]  ;;  %v9333_v58 = vld [vmem:[#allocation94_spill] sm:$0xff] }
 0x217   : > { %4765 = vst.msk [vmem:[%s8210_s27 + $0x1a0] sm:$0xff] %vm4712_vm2, %v4660_v62  ;;  %v4663_v34 = vmax.f32 %v4559_v1, 0.0  ;;  %v4558_v46 = vadd.f32 %v8190_v37, %v4447_v60  ;;  %v4450_v11 = vmax.f32 %v9295_v0, %v4346_v33  ;;  %v4345_v45 = vmax.f32 %v3048_v16, %v4050_v21  ;;  %v6452_v19 = vpop.f32.mrf.mxu0 }
 0x218   : > { %v6612_v57 = vpop.f32.mrf.mxu1  ;;  %v9316_v0 = vmax.f32 %v9314_v18, %v9315_v63  ;;  %v9335_v18 = vld [vmem:[#allocation95_spill] sm:$0xff]  ;;  %v9336_v63 = vld [vmem:[#allocation96_spill] sm:$0xff] }
 0x219   : > { %4768 = vst.msk [vmem:[%s8210_s27 + $0x1b8] sm:$0xff] %vm4712_vm2, %v4663_v34  ;;  %v4662_v27 = vmax.f32 %v4558_v46, 0.0  ;;  %v4561_v38 = vadd.f32 %v8190_v37, %v4450_v11  ;;  %v4449_v4 = vmax.f32 %v9298_v2, %v4345_v45  ;;  %v4348_v5 = vmax.f32 %v6452_v19, %v6612_v57  ;;  %v3058_v8 = vpop.f32.mrf.mxu0 }
 0x21a   : > { %v4060_v9 = vpop.f32.mrf.mxu1  ;;  %v9319_v2 = vmax.f32 %v9317_v39, %v9318_v32  ;;  %v9338_v32 = vld [vmem:[#allocation97_spill] sm:$0xff] }
 0x21b   : > { %4767 = vst.msk [vmem:[%s8210_s27 + $0x1b0] sm:$0xff] %vm4712_vm2, %v4662_v27  ;;  %v4665_v23 = vmax.f32 %v4561_v38, 0.0  ;;  %v4560_v22 = vadd.f32 %v8190_v37, %v4449_v4  ;;  %v4452_v12 = vmax.f32 %v9301_v10, %v4348_v5  ;;  %v4347_v15 = vmax.f32 %v3058_v8, %v4060_v9  ;;  %v6455_v43 = vpop.f32.mrf.mxu0 }
 0x21c   : > { %v6615_v44 = vpop.f32.mrf.mxu1  ;;  %v9322_v10 = vmax.f32 %v9320_v61, %v9321_v24  ;;  %v9341_v61 = vld [vmem:[#allocation99_spill] sm:$0xff]  ;;  %v9342_v24 = vld [vmem:[#allocation100_spill] sm:$0xff] }
 0x21d   : > { %4770 = vst.msk [vmem:[%s8210_s27 + $0x1c8] sm:$0xff] %vm4712_vm2, %v4665_v23  ;;  %v4664_v7 = vmax.f32 %v4560_v22, 0.0  ;;  %v4563_v56 = vadd.f32 %v8190_v37, %v4452_v12  ;;  %v4451_v25 = vmax.f32 %v9304_v40, %v4347_v15  ;;  %v4350_v26 = vmax.f32 %v6455_v43, %v6615_v44  ;;  %v3068_v13 = vpop.f32.mrf.mxu0 }
 0x21e   : > { %v4070_v14 = vpop.f32.mrf.mxu1  ;;  %v9325_v40 = vmax.f32 %v9323_v47, %v9324_v50  ;;  %v9344_v47 = vld [vmem:[#allocation101_spill] sm:$0xff]  ;;  %v9345_v50 = vld [vmem:[#allocation102_spill] sm:$0xff] }
 0x21f   : > { %4769 = vst.msk [vmem:[%s8210_s27 + $0x1c0] sm:$0xff] %vm4712_vm2, %v4664_v7  ;;  %v4667_v42 = vmax.f32 %v4563_v56, 0.0  ;;  %v4562_v48 = vadd.f32 %v8190_v37, %v4451_v25  ;;  %v4454_v41 = vmax.f32 %v9307_v36, %v4350_v26  ;;  %v4349_v35 = vmax.f32 %v3068_v13, %v4070_v14  ;;  %v6458_v28 = vpop.f32.mrf.mxu0 }
 0x220   : > { %v6618_v29 = vpop.f32.mrf.mxu1  ;;  %v9328_v36 = vmax.f32 %v9326_v49, %v9327_v17  ;;  %v9347_v49 = vld [vmem:[#allocation103_spill] sm:$0xff]  ;;  %v9348_v17 = vld [vmem:[#allocation104_spill] sm:$0xff] }
 0x221   : > { %4772 = vst.msk [vmem:[%s8210_s27 + $0x1d8] sm:$0xff] %vm4712_vm2, %v4667_v42  ;;  %v4666_v20 = vmax.f32 %v4562_v48, 0.0  ;;  %v4565_v53 = vadd.f32 %v8190_v37, %v4454_v41  ;;  %v4453_v3 = vmax.f32 %v9310_v54, %v4349_v35  ;;  %v4352_v6 = vmax.f32 %v6458_v28, %v6618_v29  ;;  %v3078_v30 = vpop.f32.mrf.mxu0 }
 0x222   : > { %v4080_v31 = vpop.f32.mrf.mxu1  ;;  %v9331_v54 = vmax.f32 %v9329_v51, %v9330_v52  ;;  %v9350_v51 = vld [vmem:[#allocation105_spill] sm:$0xff]  ;;  %v9351_v52 = vld [vmem:[#allocation106_spill] sm:$0xff] }
 0x223   : > { %4771 = vst.msk [vmem:[%s8210_s27 + $0x1d0] sm:$0xff] %vm4712_vm2, %v4666_v20  ;;  %v4669_v62 = vmax.f32 %v4565_v53, 0.0  ;;  %v4564_v1 = vadd.f32 %v8190_v37, %v4453_v3  ;;  %v4456_v60 = vmax.f32 %v9313_v59, %v4352_v6  ;;  %v4351_v33 = vmax.f32 %v3078_v30, %v4080_v31  ;;  %v6461_v16 = vpop.f32.mrf.mxu0 }
 0x224   : > { %v6621_v21 = vpop.f32.mrf.mxu1  ;;  %v9334_v59 = vmax.f32 %v9332_v55, %v9333_v58  ;;  %v9353_v55 = vld [vmem:[#allocation107_spill] sm:$0xff]  ;;  %v9354_v58 = vld [vmem:[#allocation108_spill] sm:$0xff] }
 0x225   : > { %4774 = vst.msk [vmem:[%s8210_s27 + $0x1e8] sm:$0xff] %vm4712_vm2, %v4669_v62  ;;  %v4668_v34 = vmax.f32 %v4564_v1, 0.0  ;;  %v4567_v46 = vadd.f32 %v8190_v37, %v4456_v60  ;;  %v4455_v11 = vmax.f32 %v9316_v0, %v4351_v33  ;;  %v4354_v45 = vmax.f32 %v6461_v16, %v6621_v21  ;;  %v3088_v19 = vpop.f32.mrf.mxu0 }
 0x226   : > { %v4090_v57 = vpop.f32.mrf.mxu1  ;;  %v9337_v0 = vmax.f32 %v9335_v18, %v9336_v63  ;;  %v9356_v18 = vld [vmem:[#allocation109_spill] sm:$0xff]  ;;  %v9357_v63 = vld [vmem:[#allocation110_spill] sm:$0xff] }
 0x227   : > { %4773 = vst.msk [vmem:[%s8210_s27 + $0x1e0] sm:$0xff] %vm4712_vm2, %v4668_v34  ;;  %v4671_v27 = vmax.f32 %v4567_v46, 0.0  ;;  %v4566_v38 = vadd.f32 %v8190_v37, %v4455_v11  ;;  %v4458_v4 = vmax.f32 %v9319_v2, %v4354_v45  ;;  %v4353_v5 = vmax.f32 %v3088_v19, %v4090_v57  ;;  %v6464_v8 = vpop.f32.mrf.mxu0 }
 0x228   : > { %v6624_v9 = vpop.f32.mrf.mxu1 }
 0x229   : > { %4776 = vst.msk [vmem:[%s8210_s27 + $0x1f8] sm:$0xff] %vm4712_vm2, %v4671_v27  ;;  %v4670_v23 = vmax.f32 %v4566_v38, 0.0  ;;  %v4569_v22 = vadd.f32 %v8190_v37, %v4458_v4  ;;  %v4457_v12 = vmax.f32 %v9322_v10, %v4353_v5  ;;  %v4356_v15 = vmax.f32 %v6464_v8, %v6624_v9  ;;  %v3098_v43 = vpop.f32.mrf.mxu0  ;;  %v8639_v38 = vld [vmem:[%s8848_s2] ss:$0 sm:$0xff] }
 0x22a   : > { %v4100_v44 = vpop.f32.mrf.mxu1  ;;  %v9343_v10 = vmax.f32 %v9341_v61, %v9342_v24  ;;  %v9362_v61 = vld [vmem:[#allocation113_spill] sm:$0xff]  ;;  %v9363_v24 = vld [vmem:[#allocation114_spill] sm:$0xff] }
 0x22b   : > { %4775 = vst.msk [vmem:[%s8210_s27 + $0x1f0] sm:$0xff] %vm4712_vm2, %v4670_v23  ;;  %v4673_v7 = vmax.f32 %v4569_v22, 0.0  ;;  %v4568_v56 = vadd.f32 %v8190_v37, %v4457_v12  ;;  %v4460_v25 = vmax.f32 %v9325_v40, %v4356_v15  ;;  %v4355_v26 = vmax.f32 %v3098_v43, %v4100_v44  ;;  %v6467_v13 = vpop.f32.mrf.mxu0 }
 0x22c   : > { %v6627_v14 = vpop.f32.mrf.mxu1  ;;  %v9346_v40 = vmax.f32 %v9344_v47, %v9345_v50  ;;  %v9365_v47 = vld [vmem:[#allocation115_spill] sm:$0xff]  ;;  %v9366_v50 = vld [vmem:[#allocation116_spill] sm:$0xff] }
 0x22d   : > { %4778 = vst.msk [vmem:[%s8210_s27 + $0x208] sm:$0xff] %vm4712_vm2, %v4673_v7  ;;  %v4672_v42 = vmax.f32 %v4568_v56, 0.0  ;;  %v4571_v48 = vadd.f32 %v8190_v37, %v4460_v25  ;;  %v4459_v41 = vmax.f32 %v9328_v36, %v4355_v26  ;;  %v4358_v35 = vmax.f32 %v6467_v13, %v6627_v14  ;;  %v3108_v28 = vpop.f32.mrf.mxu0 }
 0x22e   : > { %v4110_v29 = vpop.f32.mrf.mxu1  ;;  %v9349_v36 = vmax.f32 %v9347_v49, %v9348_v17  ;;  %v9368_v49 = vld [vmem:[#allocation117_spill] sm:$0xff]  ;;  %v9369_v17 = vld [vmem:[#allocation118_spill] sm:$0xff] }
 0x22f   : > { %4777 = vst.msk [vmem:[%s8210_s27 + $0x200] sm:$0xff] %vm4712_vm2, %v4672_v42  ;;  %v4675_v20 = vmax.f32 %v4571_v48, 0.0  ;;  %v4570_v53 = vadd.f32 %v8190_v37, %v4459_v41  ;;  %v4462_v3 = vmax.f32 %v9331_v54, %v4358_v35  ;;  %v4357_v6 = vmax.f32 %v3108_v28, %v4110_v29  ;;  %v6470_v30 = vpop.f32.mrf.mxu0 }
 0x230   : > { %v6630_v31 = vpop.f32.mrf.mxu1  ;;  %v9352_v54 = vmax.f32 %v9350_v51, %v9351_v52  ;;  %v9371_v51 = vld [vmem:[#allocation119_spill] sm:$0xff]  ;;  %v9372_v52 = vld [vmem:[#allocation120_spill] sm:$0xff] }
 0x231   : > { %4780 = vst.msk [vmem:[%s8210_s27 + $0x218] sm:$0xff] %vm4712_vm2, %v4675_v20  ;;  %v4674_v62 = vmax.f32 %v4570_v53, 0.0  ;;  %v4573_v1 = vadd.f32 %v8190_v37, %v4462_v3  ;;  %v4461_v60 = vmax.f32 %v9334_v59, %v4357_v6  ;;  %v4360_v33 = vmax.f32 %v6470_v30, %v6630_v31  ;;  %v3118_v16 = vpop.f32.mrf.mxu0 }
 0x232   : > { %v4120_v21 = vpop.f32.mrf.mxu1  ;;  %v9355_v59 = vmax.f32 %v9353_v55, %v9354_v58  ;;  %v9374_v55 = vld [vmem:[#allocation121_spill] sm:$0xff]  ;;  %v9375_v58 = vld [vmem:[#allocation122_spill] sm:$0xff] }
 0x233   : > { %4779 = vst.msk [vmem:[%s8210_s27 + $0x210] sm:$0xff] %vm4712_vm2, %v4674_v62  ;;  %v4677_v34 = vmax.f32 %v4573_v1, 0.0  ;;  %v4572_v46 = vadd.f32 %v8190_v37, %v4461_v60  ;;  %v4464_v11 = vmax.f32 %v9337_v0, %v4360_v33  ;;  %v4359_v45 = vmax.f32 %v3118_v16, %v4120_v21  ;;  %v6473_v19 = vpop.f32.mrf.mxu0  ;;  %v9339_v37 = vld [vmem:[#allocation98_spill] sm:$0xff] }
 0x234   : > { %v6633_v57 = vpop.f32.mrf.mxu1  ;;  %v9340_v2 = vmax.f32 %v9338_v32, %v9339_v37  ;;  %v9358_v0 = vmax.f32 %v9356_v18, %v9357_v63  ;;  %v9359_v32 = vld [vmem:[#allocation111_spill] sm:$0xff]  ;;  %v9360_v37 = vld [vmem:[#allocation112_spill] sm:$0xff] }
 0x235   : > { %4782 = vst.msk [vmem:[%s8210_s27 + $0x228] sm:$0xff] %vm4712_vm2, %v4677_v34  ;;  %v4676_v27 = vmax.f32 %v4572_v46, 0.0  ;;  %v4575_v39 = vadd.f32 %v8639_v38, %v4464_v11  ;;  %v4362_v5 = vmax.f32 %v6473_v19, %v6633_v57  ;;  %v3128_v8 = vpop.f32.mrf.mxu0  ;;  %v9377_v18 = vld [vmem:[#allocation123_spill] sm:$0xff]  ;;  %v9378_v63 = vld [vmem:[#allocation124_spill] sm:$0xff] }
 0x236   : > { %v4463_v4 = vmax.f32 %v9340_v2, %v4359_v45  ;;  %v4130_v9 = vpop.f32.mrf.mxu1  ;;  %v9361_v2 = vmax.f32 %v9359_v32, %v9360_v37  ;;  %v9380_v32 = vld [vmem:[#allocation125_spill] sm:$0xff]  ;;  %v9381_v37 = vld [vmem:[#allocation126_spill] sm:$0xff] }
 0x237   : > { %4781 = vst.msk [vmem:[%s8210_s27 + $0x220] sm:$0xff] %vm4712_vm2, %v4676_v27  ;;  %v4679_v23 = vmax.f32 %v4575_v39, 0.0  ;;  %v4466_v12 = vmax.f32 %v9343_v10, %v4362_v5  ;;  %v4361_v15 = vmax.f32 %v3128_v8, %v4130_v9  ;;  %v6476_v43 = vpop.f32.mrf.mxu0  ;;  %v9364_v10 = vmax.f32 %v9362_v61, %v9363_v24  ;;  %v9383_v61 = vld [vmem:[#allocation127_spill] sm:$0xff]  ;;  %v9384_v24 = vld [vmem:[#allocation128_spill] sm:$0xff] }
 0x238   : > { %v4574_v22 = vadd.f32 %v8639_v38, %v4463_v4  ;;  %v6636_v44 = vpop.f32.mrf.mxu1 }
 0x239   : > { %4784 = vst.msk [vmem:[%s8210_s27 + $0x238] sm:$0xff] %vm4712_vm2, %v4679_v23  ;;  %v4577_v56 = vadd.f32 %v8639_v38, %v4466_v12  ;;  %v4465_v25 = vmax.f32 %v9346_v40, %v4361_v15  ;;  %v4364_v26 = vmax.f32 %v6476_v43, %v6636_v44  ;;  %v3138_v13 = vpop.f32.mrf.mxu0  ;;  %v9367_v40 = vmax.f32 %v9365_v47, %v9366_v50  ;;  %v9386_v47 = vld [vmem:[#allocation129_spill] sm:$0xff]  ;;  %v9387_v50 = vld [vmem:[#allocation130_spill] sm:$0xff] }
 0x23a   : > { %v4678_v7 = vmax.f32 %v4574_v22, 0.0  ;;  %v4140_v14 = vpop.f32.mrf.mxu1 }
 0x23b   : > { %v4681_v42 = vmax.f32 %v4577_v56, 0.0  ;;  %v4576_v48 = vadd.f32 %v8639_v38, %v4465_v25  ;;  %v4468_v41 = vmax.f32 %v9349_v36, %v4364_v26  ;;  %v4363_v35 = vmax.f32 %v3138_v13, %v4140_v14  ;;  %v6479_v28 = vpop.f32.mrf.mxu0 }
 0x23c   : > { %4783 = vst.msk [vmem:[%s8210_s27 + $0x230] sm:$0xff] %vm4712_vm2, %v4678_v7  ;;  %v6639_v29 = vpop.f32.mrf.mxu1  ;;  %v9370_v36 = vmax.f32 %v9368_v49, %v9369_v17  ;;  %v9389_v49 = vld [vmem:[#allocation131_spill] sm:$0xff]  ;;  %v9390_v17 = vld [vmem:[#allocation132_spill] sm:$0xff] }
 0x23d   : > { %4786 = vst.msk [vmem:[%s8210_s27 + $0x248] sm:$0xff] %vm4712_vm2, %v4681_v42  ;;  %v4680_v20 = vmax.f32 %v4576_v48, 0.0  ;;  %v4579_v53 = vadd.f32 %v8639_v38, %v4468_v41  ;;  %v4467_v3 = vmax.f32 %v9352_v54, %v4363_v35  ;;  %v4366_v6 = vmax.f32 %v6479_v28, %v6639_v29  ;;  %v3148_v30 = vpop.f32.mrf.mxu0 }
 0x23e   : > { %v4150_v31 = vpop.f32.mrf.mxu1  ;;  %v9373_v54 = vmax.f32 %v9371_v51, %v9372_v52  ;;  %v9392_v51 = vld [vmem:[#allocation133_spill] sm:$0xff]  ;;  %v9393_v52 = vld [vmem:[#allocation134_spill] sm:$0xff] }
 0x23f   : > { %4785 = vst.msk [vmem:[%s8210_s27 + $0x240] sm:$0xff] %vm4712_vm2, %v4680_v20  ;;  %v4683_v62 = vmax.f32 %v4579_v53, 0.0  ;;  %v4578_v1 = vadd.f32 %v8639_v38, %v4467_v3  ;;  %v4470_v60 = vmax.f32 %v9355_v59, %v4366_v6  ;;  %v4365_v33 = vmax.f32 %v3148_v30, %v4150_v31  ;;  %v6482_v16 = vpop.f32.mrf.mxu0 }
 0x240   : > { %v6642_v21 = vpop.f32.mrf.mxu1  ;;  %v9376_v59 = vmax.f32 %v9374_v55, %v9375_v58  ;;  %v9395_v55 = vld [vmem:[#allocation135_spill] sm:$0xff]  ;;  %v9396_v58 = vld [vmem:[#allocation136_spill] sm:$0xff] }
 0x241   : > { %4788 = vst.msk [vmem:[%s8210_s27 + $0x258] sm:$0xff] %vm4712_vm2, %v4683_v62  ;;  %v4682_v34 = vmax.f32 %v4578_v1, 0.0  ;;  %v4581_v46 = vadd.f32 %v8639_v38, %v4470_v60  ;;  %v4469_v11 = vmax.f32 %v9358_v0, %v4365_v33  ;;  %v4368_v45 = vmax.f32 %v6482_v16, %v6642_v21  ;;  %v3158_v19 = vpop.f32.mrf.mxu0 }
 0x242   : > { %v4160_v57 = vpop.f32.mrf.mxu1  ;;  %v9379_v0 = vmax.f32 %v9377_v18, %v9378_v63  ;;  %v9398_v18 = vld [vmem:[#allocation137_spill] sm:$0xff]  ;;  %v9399_v63 = vld [vmem:[#allocation138_spill] sm:$0xff] }
 0x243   : > { %4787 = vst.msk [vmem:[%s8210_s27 + $0x250] sm:$0xff] %vm4712_vm2, %v4682_v34  ;;  %v4685_v27 = vmax.f32 %v4581_v46, 0.0  ;;  %v4580_v39 = vadd.f32 %v8639_v38, %v4469_v11  ;;  %v4472_v4 = vmax.f32 %v9361_v2, %v4368_v45  ;;  %v4367_v5 = vmax.f32 %v3158_v19, %v4160_v57  ;;  %v6485_v8 = vpop.f32.mrf.mxu0 }
 0x244   : > { %v6645_v9 = vpop.f32.mrf.mxu1  ;;  %v9382_v2 = vmax.f32 %v9380_v32, %v9381_v37  ;;  %v9401_v32 = vld [vmem:[#allocation139_spill] sm:$0xff]  ;;  %v9402_v37 = vld [vmem:[#allocation140_spill] sm:$0xff] }
 0x245   : > { %4790 = vst.msk [vmem:[%s8210_s27 + $0x268] sm:$0xff] %vm4712_vm2, %v4685_v27  ;;  %v4684_v23 = vmax.f32 %v4580_v39, 0.0  ;;  %v4583_v22 = vadd.f32 %v8639_v38, %v4472_v4  ;;  %v4471_v12 = vmax.f32 %v9364_v10, %v4367_v5  ;;  %v4370_v15 = vmax.f32 %v6485_v8, %v6645_v9  ;;  %v3168_v43 = vpop.f32.mrf.mxu0 }
 0x246   : > { %v4170_v44 = vpop.f32.mrf.mxu1  ;;  %v9385_v10 = vmax.f32 %v9383_v61, %v9384_v24  ;;  %v9404_v61 = vld [vmem:[#allocation141_spill] sm:$0xff]  ;;  %v9405_v24 = vld [vmem:[#allocation142_spill] sm:$0xff] }
 0x247   : > { %4789 = vst.msk [vmem:[%s8210_s27 + $0x260] sm:$0xff] %vm4712_vm2, %v4684_v23  ;;  %v4687_v7 = vmax.f32 %v4583_v22, 0.0  ;;  %v4582_v56 = vadd.f32 %v8639_v38, %v4471_v12  ;;  %v4474_v25 = vmax.f32 %v9367_v40, %v4370_v15  ;;  %v4369_v26 = vmax.f32 %v3168_v43, %v4170_v44  ;;  %v6488_v13 = vpop.f32.mrf.mxu0 }
 0x248   : > { %v6648_v14 = vpop.f32.mrf.mxu1  ;;  %v9388_v40 = vmax.f32 %v9386_v47, %v9387_v50  ;;  %v9407_v47 = vld [vmem:[#allocation143_spill] sm:$0xff]  ;;  %v9408_v50 = vld [vmem:[#allocation144_spill] sm:$0xff] }
 0x249   : > { %4792 = vst.msk [vmem:[%s8210_s27 + $0x278] sm:$0xff] %vm4712_vm2, %v4687_v7  ;;  %v4686_v42 = vmax.f32 %v4582_v56, 0.0  ;;  %v4585_v48 = vadd.f32 %v8639_v38, %v4474_v25  ;;  %v4473_v41 = vmax.f32 %v9370_v36, %v4369_v26  ;;  %v4372_v35 = vmax.f32 %v6488_v13, %v6648_v14  ;;  %v3178_v28 = vpop.f32.mrf.mxu0 }
 0x24a   : > { %v4180_v29 = vpop.f32.mrf.mxu1  ;;  %v9391_v36 = vmax.f32 %v9389_v49, %v9390_v17  ;;  %v9410_v49 = vld [vmem:[#allocation145_spill] sm:$0xff]  ;;  %v9411_v17 = vld [vmem:[#allocation146_spill] sm:$0xff] }
 0x24b   : > { %4791 = vst.msk [vmem:[%s8210_s27 + $0x270] sm:$0xff] %vm4712_vm2, %v4686_v42  ;;  %v4689_v20 = vmax.f32 %v4585_v48, 0.0  ;;  %v4584_v53 = vadd.f32 %v8639_v38, %v4473_v41  ;;  %v4476_v3 = vmax.f32 %v9373_v54, %v4372_v35  ;;  %v4371_v6 = vmax.f32 %v3178_v28, %v4180_v29  ;;  %v6491_v30 = vpop.f32.mrf.mxu0 }
 0x24c   : > { %v6651_v31 = vpop.f32.mrf.mxu1  ;;  %v9394_v54 = vmax.f32 %v9392_v51, %v9393_v52  ;;  %v9413_v51 = vld [vmem:[#allocation147_spill] sm:$0xff]  ;;  %v9414_v52 = vld [vmem:[#allocation148_spill] sm:$0xff] }
 0x24d   : > { %4794 = vst.msk [vmem:[%s8210_s27 + $0x288] sm:$0xff] %vm4712_vm2, %v4689_v20  ;;  %v4688_v62 = vmax.f32 %v4584_v53, 0.0  ;;  %v4587_v1 = vadd.f32 %v8639_v38, %v4476_v3  ;;  %v4475_v60 = vmax.f32 %v9376_v59, %v4371_v6  ;;  %v4374_v33 = vmax.f32 %v6491_v30, %v6651_v31  ;;  %v3188_v16 = vpop.f32.mrf.mxu0 }
 0x24e   : > { %v4190_v21 = vpop.f32.mrf.mxu1  ;;  %v9397_v59 = vmax.f32 %v9395_v55, %v9396_v58  ;;  %v9416_v55 = vld [vmem:[#allocation149_spill] sm:$0xff]  ;;  %v9417_v58 = vld [vmem:[#allocation150_spill] sm:$0xff] }
 0x24f   : > { %4793 = vst.msk [vmem:[%s8210_s27 + $0x280] sm:$0xff] %vm4712_vm2, %v4688_v62  ;;  %v4691_v34 = vmax.f32 %v4587_v1, 0.0  ;;  %v4586_v46 = vadd.f32 %v8639_v38, %v4475_v60  ;;  %v4478_v11 = vmax.f32 %v9379_v0, %v4374_v33  ;;  %v4373_v45 = vmax.f32 %v3188_v16, %v4190_v21  ;;  %v6494_v19 = vpop.f32.mrf.mxu0 }
 0x250   : > { %v6654_v57 = vpop.f32.mrf.mxu1  ;;  %v9400_v0 = vmax.f32 %v9398_v18, %v9399_v63  ;;  %v9419_v18 = vld [vmem:[#allocation151_spill] sm:$0xff]  ;;  %v9420_v63 = vld [vmem:[#allocation152_spill] sm:$0xff] }
 0x251   : > { %4796 = vst.msk [vmem:[%s8210_s27 + $0x298] sm:$0xff] %vm4712_vm2, %v4691_v34  ;;  %v4690_v27 = vmax.f32 %v4586_v46, 0.0  ;;  %v4589_v39 = vadd.f32 %v8639_v38, %v4478_v11  ;;  %v4477_v4 = vmax.f32 %v9382_v2, %v4373_v45  ;;  %v4376_v5 = vmax.f32 %v6494_v19, %v6654_v57  ;;  %v3198_v8 = vpop.f32.mrf.mxu0 }
 0x252   : > { %v4200_v9 = vpop.f32.mrf.mxu1  ;;  %v9403_v2 = vmax.f32 %v9401_v32, %v9402_v37  ;;  %v9422_v32 = vld [vmem:[#allocation153_spill] sm:$0xff]  ;;  %v9423_v37 = vld [vmem:[#allocation154_spill] sm:$0xff] }
 0x253   : > { %4795 = vst.msk [vmem:[%s8210_s27 + $0x290] sm:$0xff] %vm4712_vm2, %v4690_v27  ;;  %v4693_v23 = vmax.f32 %v4589_v39, 0.0  ;;  %v4588_v22 = vadd.f32 %v8639_v38, %v4477_v4  ;;  %v4480_v12 = vmax.f32 %v9385_v10, %v4376_v5  ;;  %v4375_v15 = vmax.f32 %v3198_v8, %v4200_v9  ;;  %v6497_v43 = vpop.f32.mrf.mxu0 }
 0x254   : > { %v6657_v44 = vpop.f32.mrf.mxu1  ;;  %v9406_v10 = vmax.f32 %v9404_v61, %v9405_v24  ;;  %v9425_v61 = vld [vmem:[#allocation155_spill] sm:$0xff]  ;;  %v9426_v24 = vld [vmem:[#allocation156_spill] sm:$0xff] }
 0x255   : > { %4798 = vst.msk [vmem:[%s8210_s27 + $0x2a8] sm:$0xff] %vm4712_vm2, %v4693_v23  ;;  %v4692_v7 = vmax.f32 %v4588_v22, 0.0  ;;  %v4591_v56 = vadd.f32 %v8639_v38, %v4480_v12  ;;  %v4479_v25 = vmax.f32 %v9388_v40, %v4375_v15  ;;  %v4378_v26 = vmax.f32 %v6497_v43, %v6657_v44  ;;  %v3208_v13 = vpop.f32.mrf.mxu0 }
 0x256   : > { %v4210_v14 = vpop.f32.mrf.mxu1  ;;  %v9409_v40 = vmax.f32 %v9407_v47, %v9408_v50  ;;  %v9428_v47 = vld [vmem:[#allocation157_spill] sm:$0xff]  ;;  %v9429_v50 = vld [vmem:[#allocation158_spill] sm:$0xff] }
 0x257   : > { %4797 = vst.msk [vmem:[%s8210_s27 + $0x2a0] sm:$0xff] %vm4712_vm2, %v4692_v7  ;;  %v4695_v42 = vmax.f32 %v4591_v56, 0.0  ;;  %v4590_v48 = vadd.f32 %v8639_v38, %v4479_v25  ;;  %v4482_v41 = vmax.f32 %v9391_v36, %v4378_v26  ;;  %v4377_v35 = vmax.f32 %v3208_v13, %v4210_v14  ;;  %v6500_v28 = vpop.f32.mrf.mxu0 }
 0x258   : > { %v6660_v29 = vpop.f32.mrf.mxu1  ;;  %v9412_v36 = vmax.f32 %v9410_v49, %v9411_v17  ;;  %v9431_v49 = vld [vmem:[#allocation159_spill] sm:$0xff]  ;;  %v9432_v17 = vld [vmem:[#allocation160_spill] sm:$0xff] }
 0x259   : > { %4800 = vst.msk [vmem:[%s8210_s27 + $0x2b8] sm:$0xff] %vm4712_vm2, %v4695_v42  ;;  %v4694_v20 = vmax.f32 %v4590_v48, 0.0  ;;  %v4593_v53 = vadd.f32 %v8639_v38, %v4482_v41  ;;  %v4481_v3 = vmax.f32 %v9394_v54, %v4377_v35  ;;  %v4380_v6 = vmax.f32 %v6500_v28, %v6660_v29  ;;  %v3218_v30 = vpop.f32.mrf.mxu0 }
 0x25a   : > { %v4220_v31 = vpop.f32.mrf.mxu1  ;;  %v9415_v54 = vmax.f32 %v9413_v51, %v9414_v52 }
 0x25b   : > { %4799 = vst.msk [vmem:[%s8210_s27 + $0x2b0] sm:$0xff] %vm4712_vm2, %v4694_v20  ;;  %v4697_v62 = vmax.f32 %v4593_v53, 0.0  ;;  %v4592_v1 = vadd.f32 %v8639_v38, %v4481_v3  ;;  %v4484_v60 = vmax.f32 %v9397_v59, %v4380_v6  ;;  %v4379_v33 = vmax.f32 %v3218_v30, %v4220_v31  ;;  %v6503_v16 = vpop.f32.mrf.mxu0 }
 0x25c   : > { %v6663_v21 = vpop.f32.mrf.mxu1  ;;  %v9418_v59 = vmax.f32 %v9416_v55, %v9417_v58 }
 0x25d   : > { %4802 = vst.msk [vmem:[%s8210_s27 + $0x2c8] sm:$0xff] %vm4712_vm2, %v4697_v62  ;;  %v4696_v34 = vmax.f32 %v4592_v1, 0.0  ;;  %v4595_v46 = vadd.f32 %v8639_v38, %v4484_v60  ;;  %v4483_v11 = vmax.f32 %v9400_v0, %v4379_v33  ;;  %v4382_v45 = vmax.f32 %v6503_v16, %v6663_v21  ;;  %v3228_v19 = vpop.f32.mrf.mxu0 }
 0x25e   : > { %v4230_v57 = vpop.f32.mrf.mxu1  ;;  %v9421_v0 = vmax.f32 %v9419_v18, %v9420_v63 }
 0x25f   : > { %4801 = vst.msk [vmem:[%s8210_s27 + $0x2c0] sm:$0xff] %vm4712_vm2, %v4696_v34  ;;  %v4699_v27 = vmax.f32 %v4595_v46, 0.0  ;;  %v4594_v39 = vadd.f32 %v8639_v38, %v4483_v11  ;;  %v4486_v4 = vmax.f32 %v9403_v2, %v4382_v45  ;;  %v4381_v5 = vmax.f32 %v3228_v19, %v4230_v57  ;;  %v6506_v8 = vpop.f32.mrf.mxu0 }
 0x260   : > { %v6666_v9 = vpop.f32.mrf.mxu1  ;;  %v9424_v2 = vmax.f32 %v9422_v32, %v9423_v37 }
 0x261   : > { %4804 = vst.msk [vmem:[%s8210_s27 + $0x2d8] sm:$0xff] %vm4712_vm2, %v4699_v27  ;;  %v4698_v23 = vmax.f32 %v4594_v39, 0.0  ;;  %v4597_v22 = vadd.f32 %v8639_v38, %v4486_v4  ;;  %v4485_v12 = vmax.f32 %v9406_v10, %v4381_v5  ;;  %v4384_v15 = vmax.f32 %v6506_v8, %v6666_v9  ;;  %v3238_v43 = vpop.f32.mrf.mxu0 }
 0x262   : > { %v4240_v44 = vpop.f32.mrf.mxu1  ;;  %v9427_v10 = vmax.f32 %v9425_v61, %v9426_v24 }
 0x263   : > { %4803 = vst.msk [vmem:[%s8210_s27 + $0x2d0] sm:$0xff] %vm4712_vm2, %v4698_v23  ;;  %v4701_v7 = vmax.f32 %v4597_v22, 0.0  ;;  %v4596_v56 = vadd.f32 %v8639_v38, %v4485_v12  ;;  %v4488_v25 = vmax.f32 %v9409_v40, %v4384_v15  ;;  %v4383_v26 = vmax.f32 %v3238_v43, %v4240_v44  ;;  %v6509_v13 = vpop.f32.mrf.mxu0 }
 0x264   : > { %v6669_v14 = vpop.f32.mrf.mxu1  ;;  %v9430_v40 = vmax.f32 %v9428_v47, %v9429_v50 }
 0x265   : > { %4806 = vst.msk [vmem:[%s8210_s27 + $0x2e8] sm:$0xff] %vm4712_vm2, %v4701_v7  ;;  %v4700_v42 = vmax.f32 %v4596_v56, 0.0  ;;  %v4599_v48 = vadd.f32 %v8639_v38, %v4488_v25  ;;  %v4487_v41 = vmax.f32 %v9412_v36, %v4383_v26  ;;  %v4386_v35 = vmax.f32 %v6509_v13, %v6669_v14  ;;  %v3248_v28 = vpop.f32.mrf.mxu0 }
 0x266   : > { %v4250_v29 = vpop.f32.mrf.mxu1  ;;  %v9433_v36 = vmax.f32 %v9431_v49, %v9432_v17 }
 0x267   : > { %4805 = vst.msk [vmem:[%s8210_s27 + $0x2e0] sm:$0xff] %vm4712_vm2, %v4700_v42  ;;  %v4703_v20 = vmax.f32 %v4599_v48, 0.0  ;;  %v4598_v53 = vadd.f32 %v8639_v38, %v4487_v41  ;;  %v4490_v3 = vmax.f32 %v9415_v54, %v4386_v35  ;;  %v4385_v6 = vmax.f32 %v3248_v28, %v4250_v29  ;;  %v6512_v30 = vpop.f32.mrf.mxu0 }
 0x268   : > { %v6672_v31 = vpop.f32.mrf.mxu1 }
 0x269   : > { %4808 = vst.msk [vmem:[%s8210_s27 + $0x2f8] sm:$0xff] %vm4712_vm2, %v4703_v20  ;;  %v4702_v62 = vmax.f32 %v4598_v53, 0.0  ;;  %v4601_v1 = vadd.f32 %v8639_v38, %v4490_v3  ;;  %v4489_v60 = vmax.f32 %v9418_v59, %v4385_v6  ;;  %v4388_v33 = vmax.f32 %v6512_v30, %v6672_v31  ;;  %v3258_v16 = vpop.f32.mrf.mxu0  ;;  %v9434_v20 = vld [vmem:[#allocation161_spill] sm:$0xff]  ;;  %v9435_v53 = vld [vmem:[#allocation162_spill] sm:$0xff] }
 0x26a   : > { %v4260_v21 = vpop.f32.mrf.mxu1  ;;  %v9436_v51 = vmax.f32 %v9434_v20, %v9435_v53 }
 0x26b   : > { %4807 = vst.msk [vmem:[%s8210_s27 + $0x2f0] sm:$0xff] %vm4712_vm2, %v4702_v62  ;;  %v4705_v34 = vmax.f32 %v4601_v1, 0.0  ;;  %v4600_v46 = vadd.f32 %v8639_v38, %v4489_v60  ;;  %v4492_v11 = vmax.f32 %v9421_v0, %v4388_v33  ;;  %v4387_v45 = vmax.f32 %v3258_v16, %v4260_v21  ;;  %v6515_v19 = vpop.f32.mrf.mxu0 }
 0x26c   : > { %v6675_v57 = vpop.f32.mrf.mxu1 }
 0x26d   : > { %4810 = vst.msk [vmem:[%s8210_s27 + $0x308] sm:$0xff] %vm4712_vm2, %v4705_v34  ;;  %v4704_v27 = vmax.f32 %v4600_v46, 0.0  ;;  %v4603_v39 = vadd.f32 %v8639_v38, %v4492_v11  ;;  %v4491_v4 = vmax.f32 %v9424_v2, %v4387_v45  ;;  %v4390_v5 = vmax.f32 %v6515_v19, %v6675_v57  ;;  %v3268_v8 = vpop.f32.mrf.mxu0 }
 0x26e   : > { %v4270_v9 = vpop.f32.mrf.mxu1 }
 0x26f   : > { %4809 = vst.msk [vmem:[%s8210_s27 + $0x300] sm:$0xff] %vm4712_vm2, %v4704_v27  ;;  %v4707_v23 = vmax.f32 %v4603_v39, 0.0  ;;  %v4602_v22 = vadd.f32 %v8639_v38, %v4491_v4  ;;  %v4494_v12 = vmax.f32 %v9427_v10, %v4390_v5  ;;  %v4389_v15 = vmax.f32 %v3268_v8, %v4270_v9  ;;  %v6518_v43 = vpop.f32.mrf.mxu0 }
 0x270   : > { %v6678_v44 = vpop.f32.mrf.mxu1 }
 0x271   : > { %4812 = vst.msk [vmem:[%s8210_s27 + $0x318] sm:$0xff] %vm4712_vm2, %v4707_v23  ;;  %v4706_v7 = vmax.f32 %v4602_v22, 0.0  ;;  %v4605_v56 = vadd.f32 %v8639_v38, %v4494_v12  ;;  %v4493_v25 = vmax.f32 %v9430_v40, %v4389_v15  ;;  %v4392_v26 = vmax.f32 %v6518_v43, %v6678_v44  ;;  %v3278_v13 = vpop.f32.mrf.mxu0 }
 0x272   : > { %v4280_v14 = vpop.f32.mrf.mxu1 }
 0x273   : > { %4811 = vst.msk [vmem:[%s8210_s27 + $0x310] sm:$0xff] %vm4712_vm2, %v4706_v7  ;;  %v4709_v42 = vmax.f32 %v4605_v56, 0.0  ;;  %v4604_v48 = vadd.f32 %v8639_v38, %v4493_v25  ;;  %v4496_v41 = vmax.f32 %v9433_v36, %v4392_v26  ;;  %v4391_v35 = vmax.f32 %v3278_v13, %v4280_v14 }
 0x275   : > { %4814 = vst.msk [vmem:[%s8210_s27 + $0x328] sm:$0xff] %vm4712_vm2, %v4709_v42  ;;  %v4708_v28 = vmax.f32 %v4604_v48, 0.0  ;;  %v4607_v29 = vadd.f32 %v8639_v38, %v4496_v41  ;;  %v4495_v52 = vmax.f32 %v9436_v51, %v4391_v35 }
 0x277   : > { %4813 = vst.msk [vmem:[%s8210_s27 + $0x320] sm:$0xff] %vm4712_vm2, %v4708_v28  ;;  %v4711_v54 = vmax.f32 %v4607_v29, 0.0  ;;  %v4606_v3 = vadd.f32 %v8639_v38, %v4495_v52 }
 0x279   : > { %4817 = vst.msk [vmem:[%s8210_s27 + $0x338] sm:$0x1] %vm4816_vm3, %v4711_v54  ;;  %v4710_v6 = vmax.f32 %v4606_v3, 0.0 }
 0x27b   : > { %4815 = vst.msk [vmem:[%s8210_s27 + $0x330] sm:$0xff] %vm4712_vm2, %v4710_v6 }
 0x27c PF: > { %s13_s12 = sadd.s32 1, %s6696_s12  }
 0x27d   : > { %p10_p4 = scmp.ge.s32.totalorder %s13_s12, 4  }
 0x27f   :  { %12 = sbr.rel (!%p10_p4) target bundleno = 1 (0x1), region = 65 }

// kernel: motion_classifier_forward.4
= control target key start
LH: loop header
LB: loop body
LE: loop exit
PB: predicated region body
PF: predicated region fallthrough
CT: control target
= control target key end

     0   :  { %s1656_s12 = smov 0   ;;  %s2186_s0 = inlined_call_operand.vmem [shape: f32[2,4,48,288], index: 0, kind: input, shape index: {}]   ;;  %s2187_s1 = inlined_call_operand.vmem [shape: f32[288,64], index: 1, kind: input, shape index: {}]   ;;  %s2188_s2 = inlined_call_operand.vmem [shape: f32[1,64], index: 2, kind: input, shape index: {}]   ;;  %s2189_s3 = inlined_call_operand.vmem [shape: f32[2,48,64], index: 3, kind: output, shape index: {}]  }
   0x1 LB: > { %s1214_s13 = sadd.s32 4294967295, %s1634_s12   ;;  %p1218_p0 = scmp.ge.s32.totalorder %s1634_s12, 1  ;;  %s1634_s12 = sphi %s1656_s12, %s13_s12  }
   0x2   : > { %p137_p1 = scmp.lt.s32.totalorder %s1634_s12, 3 }
   0x4   : > { %p138_p2 = pnand %p1218_p0, %p137_p1 }
   0x6   : > { %141 = sbr.rel (%p138_p2) target bundleno = 343 (0x157), region = 32 }
   0xb   : > { %v1667_v0 = vld [vmem:[%s2187_s1 + $0xf8] sm:$0xff]  ;;  %p161_p3 = scmp.lt.s32.totalorder %s1214_s13, 1  ;;  %v1684_v3 = vld [vmem:[%s2187_s1 + $0xf0] sm:$0xff]  ;;  %v1701_v6 = vld [vmem:[%s2187_s1 + $0xe8] sm:$0xff]  ;;  %vm225_vm0 = vcmask 261120   ;;  %vm1152_vm1 = vcmask 523264  }
   0xc   : > { %v1672_v1 = vld [vmem:[%s2187_s1 + $0x118] sm:$0xff]  ;;  %1302 = vmatprep.subr.mxu0 %v1667_v0  ;;  %v1689_v4 = vld [vmem:[%s2187_s1 + $0x110] sm:$0xff]  ;;  %v1706_v7 = vld [vmem:[%s2187_s1 + $0x108] sm:$0xff] }
   0xd   : > { %v1677_v2 = vld [vmem:[%s2187_s1 + $0x78] sm:$0xff]  ;;  %1542 = vmatprep.subr.mxu1 %v1672_v1  ;;  %v1694_v5 = vld [vmem:[%s2187_s1 + $0x70] sm:$0xff]  ;;  %s2206_s13 = smov (!%p161_p3, %s1214_s13), 1  ;;  %v1715_v8 = vld [vmem:[%s2187_s1 + $0x68] sm:$0xff] }
   0xe   : > { %1303 = vmatpush3.msra.mxu0 %v1677_v2  ;;  %1543 = vmatpush3.msra.mxu1 %v1672_v1  ;;  %v1722_v9 = vld [vmem:[%s2187_s1 + $0xe0] sm:$0xff]  ;;  %s1618_s9 = smul.u32 576, %s2206_s13  ;;  %v1747_v12 = vld [vmem:[%s2187_s1 + $0xd8] sm:$0xff]  ;;  %v1765_v16 = vld [vmem:[%s2187_s1 + $0xd0] sm:$0xff] }
   0xf   : > { %1304 = vmatprep.subr.mxu0 %v1684_v3  ;;  %1544 = vmatprep.subr.mxu1 %v1689_v4  ;;  %v1727_v10 = vld [vmem:[%s2187_s1 + $0x100] sm:$0xff]  ;;  %v1758_v15 = vld [vmem:[%s2187_s1 + $0x58] sm:$0xff]  ;;  %v1772_v17 = vld [vmem:[%s2187_s1 + $0x50] sm:$0xff] }
  0x10   : > { %1305 = vmatpush3.msra.mxu0 %v1694_v5  ;;  %1545 = vmatpush3.msra.mxu1 %v1689_v4  ;;  %v1735_v11 = vld [vmem:[%s2187_s1 + $0x60] sm:$0xff]  ;;  %s1742_s16 = scalar_lea.vmem %s2186_s0, %s1618_s9  ;;  %v1779_v18 = vld [vmem:[%s2187_s1 + $0xc8] sm:$0xff]  ;;  %v1807_v22 = vld [vmem:[%s2187_s1 + $0xb8] sm:$0xff] }
  0x11   : > { %1306 = vmatprep.subr.mxu0 %v1701_v6  ;;  %1546 = vmatprep.subr.mxu1 %v1706_v7  ;;  %v209_v13 = vld [vmem:[%s1742_s16 + $0x10] sm:$0xff]  ;;  %v212_v14 = vld [vmem:[%s1742_s16 + $0x28] sm:$0xff]  ;;  %v1793_v20 = vld [vmem:[%s2187_s1 + $0xc0] sm:$0xff] }
  0x12   : > { %1307 = vmatpush3.msra.mxu0 %v1715_v8  ;;  %1547 = vmatpush3.msra.mxu1 %v1706_v7  ;;  %v1786_v19 = vld [vmem:[%s2187_s1 + $0x48] sm:$0xff]  ;;  %v1800_v21 = vld [vmem:[%s2187_s1 + $0x40] sm:$0xff]  ;;  %v1814_v23 = vld [vmem:[%s2187_s1 + $0x38] sm:$0xff] }
  0x13   : > { %1308 = vmatprep.subr.mxu0 %v1722_v9  ;;  %1548 = vmatprep.subr.mxu1 %v1727_v10  ;;  %v1821_v24 = vld [vmem:[%s2187_s1 + $0xb0] sm:$0xff]  ;;  %v1835_v26 = vld [vmem:[%s2187_s1 + $0xa8] sm:$0xff]  ;;  %v1849_v28 = vld [vmem:[%s2187_s1 + $0xa0] sm:$0xff] }
  0x14   : > { %1309 = vmatpush3.msra.mxu0 %v1735_v11  ;;  %1549 = vmatpush3.msra.mxu1 %v1727_v10  ;;  %v1828_v25 = vld [vmem:[%s2187_s1 + $0x30] sm:$0xff]  ;;  %v1842_v27 = vld [vmem:[%s2187_s1 + $0x28] sm:$0xff]  ;;  %v1856_v29 = vld [vmem:[%s2187_s1 + $0x20] sm:$0xff] }
  0x15   : > { %1550 = vmatprep.mubr.msk.f32.mxu1 %vm225_vm0, %v209_v13  ;;  %1310 = vmatprep.subr.mxu0 %v1747_v12  ;;  %v1863_v30 = vld [vmem:[%s2187_s1 + $0x98] sm:$0xff]  ;;  %v1877_v32 = vld [vmem:[%s2187_s1 + $0x90] sm:$0xff]  ;;  %v1891_v34 = vld [vmem:[%s2187_s1 + $0x88] sm:$0xff] }
  0x16   : > { %1551 = vmatmul.mubr.msk.f32.vlgmr.msra.gmra.mxu1 %vm225_vm0, %v212_v14  ;;  %1362 = vmatprep.subr.mxu1 %v1667_v0  ;;  %v1870_v31 = vld [vmem:[%s2187_s1 + $0x18] sm:$0xff]  ;;  %v1884_v33 = vld [vmem:[%s2187_s1 + $0x10] sm:$0xff]  ;;  %v1898_v35 = vld [vmem:[%s2187_s1 + $0x8] sm:$0xff] }
  0x17   : > { %1311 = vmatpush3.msra.mxu0 %v1758_v15  ;;  %1363 = vmatpush3.msra.mxu1 %v1677_v2  ;;  %v1905_v36 = vld [vmem:[%s2187_s1 + $0x80] sm:$0xff]  ;;  %v208_v39 = vld [vmem:[%s1742_s16 + $0x8] sm:$0xff]  ;;  %v218_v40 = vld [vmem:[%s1742_s16 + $0x58] sm:$0xff] }
  0x18   : > { %1312 = vmatprep.subr.mxu0 %v1765_v16  ;;  %1364 = vmatprep.subr.mxu1 %v1684_v3  ;;  %v215_v37 = vld [vmem:[%s1742_s16 + $0x40] sm:$0xff]  ;;  %v221_v42 = vld [vmem:[%s1742_s16 + $0x70] sm:$0xff]  ;;  %v224_v44 = vld [vmem:[%s1742_s16 + $0x88] sm:$0xff] }
  0x19   : > { %1313 = vmatpush3.msra.mxu0 %v1772_v17  ;;  %1365 = vmatpush3.msra.mxu1 %v1694_v5  ;;  %v1913_v38 = vld [vmem:[%s2187_s1] sm:$0xff]  ;;  %v210_v45 = vld [vmem:[%s1742_s16 + $0x18] sm:$0xff]  ;;  %v213_v48 = vld [vmem:[%s1742_s16 + $0x30] sm:$0xff] }
  0x1a   : > { %1314 = vmatprep.subr.mxu0 %v1779_v18  ;;  %1366 = vmatprep.subr.mxu1 %v1701_v6  ;;  %v207_v41 = vld [vmem:[%s1742_s16] sm:$0xff]  ;;  %v214_v46 = vld [vmem:[%s1742_s16 + $0x38] sm:$0xff]  ;;  %v1227_v49 = vld [vmem:[%s1742_s16 + $0x90] sm:$0xff] }
  0x1b   : > { %1315 = vmatpush3.msra.mxu0 %v1786_v19  ;;  %1367 = vmatpush3.msra.mxu1 %v1715_v8  ;;  %v211_v43 = vld [vmem:[%s1742_s16 + $0x20] sm:$0xff]  ;;  %v1228_v47 = vld [vmem:[%s1742_s16 + $0x98] sm:$0xff]  ;;  %v217_v50 = vld [vmem:[%s1742_s16 + $0x50] sm:$0xff] }
  0x1c   : > { %1316 = vmatprep.subr.mxu0 %v1793_v20  ;;  %1368 = vmatprep.subr.mxu1 %v1722_v9  ;;  %v1231_v51 = vld [vmem:[%s1742_s16 + $0xb0] sm:$0xff]  ;;  %v216_v52 = vld [vmem:[%s1742_s16 + $0x48] sm:$0xff]  ;;  %v219_v56 = vld [vmem:[%s1742_s16 + $0x60] sm:$0xff] }
  0x1d   : > { %1317 = vmatpush3.msra.mxu0 %v1800_v21  ;;  %1369 = vmatpush3.msra.mxu1 %v1735_v11  ;;  %v1230_v53 = vld [vmem:[%s1742_s16 + $0xa8] sm:$0xff]  ;;  %v1233_v57 = vld [vmem:[%s1742_s16 + $0xc0] sm:$0xff]  ;;  %v222_v60 = vld [vmem:[%s1742_s16 + $0x78] sm:$0xff] }
  0x1e   : > { %1318 = vmatprep.subr.mxu0 %v1807_v22  ;;  %1370 = vmatprep.subr.mxu1 %v1747_v12  ;;  %v220_v54 = vld [vmem:[%s1742_s16 + $0x68] sm:$0xff]  ;;  %v223_v58 = vld [vmem:[%s1742_s16 + $0x80] sm:$0xff]  ;;  %v1236_v61 = vld [vmem:[%s1742_s16 + $0xd8] sm:$0xff] }
  0x1f   : > { %1319 = vmatpush3.msra.mxu0 %v1814_v23  ;;  %1371 = vmatpush3.msra.mxu1 %v1758_v15  ;;  %v1234_v55 = vld [vmem:[%s1742_s16 + $0xc8] sm:$0xff]  ;;  %v1237_v59 = vld [vmem:[%s1742_s16 + $0xe0] sm:$0xff]  ;;  %v1240_v62 = vld [vmem:[%s1742_s16 + $0xf8] sm:$0xff] }
  0x20   : > { %1320 = vmatprep.subr.mxu0 %v1821_v24  ;;  %1372 = vmatprep.subr.mxu1 %v1765_v16  ;;  %v1229_v63 = vld [vmem:[%s1742_s16 + $0xa0] sm:$0xff]  ;;  %v1232_v13 = vld [vmem:[%s1742_s16 + $0xb8] sm:$0xff]  ;;  %v1239_v14 = vld [vmem:[%s1742_s16 + $0xf0] sm:$0xff] }
  0x21   : > { %1321 = vmatpush3.msra.mxu0 %v1828_v25  ;;  %1373 = vmatpush3.msra.mxu1 %v1772_v17 }
  0x22   : > { %1322 = vmatprep.subr.mxu0 %v1835_v26  ;;  %1374 = vmatprep.subr.mxu1 %v1779_v18 }
  0x23   : > { %1323 = vmatpush3.msra.mxu0 %v1842_v27  ;;  %1375 = vmatpush3.msra.mxu1 %v1786_v19 }
  0x24   : > { %1324 = vmatprep.subr.mxu0 %v1849_v28  ;;  %1376 = vmatprep.subr.mxu1 %v1793_v20 }
  0x25   : > { %1325 = vmatpush3.msra.mxu0 %v1856_v29  ;;  %1377 = vmatpush3.msra.mxu1 %v1800_v21 }
  0x26   : > { %1326 = vmatprep.subr.mxu0 %v1863_v30  ;;  %1378 = vmatprep.subr.mxu1 %v1807_v22 }
  0x27   : > { %1327 = vmatpush3.msra.mxu0 %v1870_v31  ;;  %1379 = vmatpush3.msra.mxu1 %v1814_v23 }
  0x28   : > { %1328 = vmatprep.subr.mxu0 %v1877_v32  ;;  %1380 = vmatprep.subr.mxu1 %v1821_v24 }
  0x29   : > { %1329 = vmatpush3.msra.mxu0 %v1884_v33  ;;  %1381 = vmatpush3.msra.mxu1 %v1828_v25 }
  0x2a   : > { %1330 = vmatprep.subr.mxu0 %v1891_v34  ;;  %1382 = vmatprep.subr.mxu1 %v1835_v26 }
  0x2b   : > { %1331 = vmatpush3.msra.mxu0 %v1898_v35  ;;  %1383 = vmatpush3.msra.mxu1 %v1842_v27 }
  0x2c   : > { %1332 = vmatprep.subr.mxu0 %v1905_v36  ;;  %1553 = vmatprep.mubr.msk.f32.mxu1 %vm225_vm0, %v215_v37  ;;  %v1243_v37 = vld [vmem:[%s1742_s16 + $0x110] sm:$0xff] }
  0x2d   : > { %1384 = vmatprep.subr.mxu1 %v1849_v28  ;;  %1333 = vmatpush3.msra.mxu0 %v1913_v38 }
  0x2e   : > { %308 = vmatprep.mubr.f32.mxu0 %v208_v39  ;;  %1554 = vmatmul.mubr.msk.f32.gmra.mxu1 %vm225_vm0, %v218_v40  ;;  %v1235_v39 = vld [vmem:[%s1742_s16 + $0xd0] sm:$0xff]  ;;  %v1238_v40 = vld [vmem:[%s1742_s16 + $0xe8] sm:$0xff] }
  0x2f   : > { %1385 = vmatpush3.msra.mxu1 %v1856_v29  ;;  %309 = vmatmul.mubr.f32.vlgmr.msra.gmra.mxu0 %v207_v41  ;;  %v1286_v41 = vld [vmem:[%s1742_s16 + $0x208] sm:$0xff] }
  0x30   : > { %1386 = vmatprep.subr.mxu1 %v1863_v30  ;;  %1559 = vmatprep.subr.mxu0 %v1672_v1 }
  0x31   : > { %1387 = vmatpush3.msra.mxu1 %v1870_v31  ;;  %1556 = vmatprep.mubr.msk.f32.mxu1 %vm225_vm0, %v221_v42  ;;  %v1289_v42 = vld [vmem:[%s1742_s16 + $0x220] sm:$0xff] }
  0x32   : > { %1388 = vmatprep.subr.mxu1 %v1877_v32  ;;  %1560 = vmatpush3.msra.mxu0 %v1672_v1 }
  0x33   : > { %313 = vmatprep.mubr.f32.mxu0 %v211_v43  ;;  %1557 = vmatmul.mubr.msk.f32.gmra.mxu1 %vm225_vm0, %v224_v44  ;;  %v1280_v43 = vld [vmem:[%s1742_s16 + $0x1d8] sm:$0xff] }
  0x34   : > { %1389 = vmatpush3.msra.mxu1 %v1884_v33  ;;  %314 = vmatmul.mubr.f32.gmra.mxu0 %v210_v45  ;;  %v1292_v44 = vld [vmem:[%s1742_s16 + $0x238] sm:$0xff] }
  0x35   : > { %1390 = vmatprep.subr.mxu1 %v1891_v34  ;;  %318 = vmatprep.mubr.f32.mxu0 %v214_v46 }
  0x36   : > { %1391 = vmatpush3.msra.mxu1 %v1898_v35  ;;  %535 = vmatprep.mubr.f32.mxu1 %v1228_v47 }
  0x37   : > { %1392 = vmatprep.subr.mxu1 %v1905_v36  ;;  %1561 = vmatprep.subr.mxu0 %v1689_v4 }
  0x38   : > { %1393 = vmatpush3.msra.mxu1 %v1913_v38  ;;  %319 = vmatmul.mubr.f32.gmra.mxu0 %v213_v48 }
  0x39   : > { %536 = vmatmul.mubr.f32.vlgmr.msra.gmra.mxu1 %v1227_v49  ;;  %1562 = vmatpush3.msra.mxu0 %v1689_v4 }
  0x3a   : > { %1422 = vmatprep.subr.mxu1 %v1667_v0  ;;  %323 = vmatprep.mubr.f32.mxu0 %v217_v50 }
  0x3b   : > { %1423 = vmatpush3.msra.mxu1 %v1677_v2  ;;  %540 = vmatprep.mubr.f32.mxu1 %v1231_v51 }
  0x3c   : > { %1424 = vmatprep.subr.mxu1 %v1684_v3  ;;  %324 = vmatmul.mubr.f32.gmra.mxu0 %v216_v52 }
  0x3d   : > { %1425 = vmatpush3.msra.mxu1 %v1694_v5  ;;  %1563 = vmatprep.subr.mxu0 %v1706_v7 }
  0x3e   : > { %541 = vmatmul.mubr.f32.gmra.mxu1 %v1230_v53  ;;  %1426 = vmatprep.subr.mxu1 %v1701_v6 }
  0x3f   : > { %1427 = vmatpush3.msra.mxu1 %v1715_v8  ;;  %1564 = vmatpush3.msra.mxu0 %v1706_v7 }
  0x40   : > { %1428 = vmatprep.subr.mxu1 %v1722_v9  ;;  %328 = vmatprep.mubr.f32.mxu0 %v220_v54 }
  0x41   : > { %545 = vmatprep.mubr.f32.mxu1 %v1234_v55  ;;  %1429 = vmatpush3.msra.mxu1 %v1735_v11 }
  0x42   : > { %329 = vmatmul.mubr.f32.gmra.mxu0 %v219_v56  ;;  %546 = vmatmul.mubr.f32.gmra.mxu1 %v1233_v57 }
  0x43   : > { %1430 = vmatprep.subr.mxu1 %v1747_v12  ;;  %333 = vmatprep.mubr.f32.mxu0 %v223_v58 }
  0x44   : > { %1431 = vmatpush3.msra.mxu1 %v1758_v15  ;;  %550 = vmatprep.mubr.f32.mxu1 %v1237_v59 }
  0x45   : > { %1432 = vmatprep.subr.mxu1 %v1765_v16  ;;  %1565 = vmatprep.subr.mxu0 %v1727_v10 }
  0x46   : > { %1433 = vmatpush3.msra.mxu1 %v1772_v17  ;;  %334 = vmatmul.mubr.f32.gmra.mxu0 %v222_v60 }
  0x47   : > { %551 = vmatmul.mubr.f32.gmra.mxu1 %v1236_v61  ;;  %1566 = vmatpush3.msra.mxu0 %v1727_v10 }
  0x48   : > { %1434 = vmatprep.subr.mxu1 %v1779_v18  ;;  %555 = vmatprep.mubr.f32.mxu1 %v1240_v62 }
  0x49   : > { %1435 = vmatpush3.msra.mxu1 %v1786_v19  ;;  %1567 = vmatprep.mubr.msk.f32.mxu0 %vm225_vm0, %v1229_v63 }
  0x4a   : > { %1436 = vmatprep.subr.mxu1 %v1793_v20  ;;  %1482 = vmatprep.subr.mxu0 %v1667_v0  ;;  %v1242_v0 = vld [vmem:[%s1742_s16 + $0x108] sm:$0xff] }
  0x4b   : > { %1437 = vmatpush3.msra.mxu1 %v1800_v21  ;;  %1568 = vmatmul.mubr.msk.f32.vlgmr.msra.gmra.mxu0 %vm225_vm0, %v1232_v13 }
  0x4c   : > { %556 = vmatmul.mubr.f32.gmra.mxu1 %v1239_v14  ;;  %1438 = vmatprep.subr.mxu1 %v1807_v22 }
  0x4d   : > { %1483 = vmatpush3.msra.mxu0 %v1677_v2  ;;  %1439 = vmatpush3.msra.mxu1 %v1814_v23  ;;  %v1241_v2 = vld [vmem:[%s1742_s16 + $0x100] sm:$0xff] }
  0x4e   : > { %1484 = vmatprep.subr.mxu0 %v1684_v3  ;;  %1440 = vmatprep.subr.mxu1 %v1821_v24  ;;  %v1244_v3 = vld [vmem:[%s1742_s16 + $0x118] sm:$0xff] }
  0x4f   : > { %1485 = vmatpush3.msra.mxu0 %v1694_v5  ;;  %560 = vmatprep.mubr.f32.mxu1 %v1243_v37  ;;  %v1252_v5 = vld [vmem:[%s1742_s16 + $0x128] sm:$0xff] }
  0x50   : > { %1570 = vmatprep.mubr.msk.f32.mxu0 %vm225_vm0, %v1235_v39  ;;  %1441 = vmatpush3.msra.mxu1 %v1828_v25 }
  0x51   : > { %1486 = vmatprep.subr.mxu0 %v1701_v6  ;;  %561 = vmatmul.mubr.f32.gmra.mxu1 %v1242_v0  ;;  %v1251_v6 = vld [vmem:[%s1742_s16 + $0x120] sm:$0xff] }
  0x52   : > { %1571 = vmatmul.mubr.msk.f32.gmra.mxu0 %vm225_vm0, %v1238_v40  ;;  %1442 = vmatprep.subr.mxu1 %v1835_v26 }
  0x53   : > { %1487 = vmatpush3.msra.mxu0 %v1715_v8  ;;  %1443 = vmatpush3.msra.mxu1 %v1842_v27  ;;  %v1255_v8 = vld [vmem:[%s1742_s16 + $0x140] sm:$0xff] }
  0x54   : > { %1488 = vmatprep.subr.mxu0 %v1722_v9  ;;  %1444 = vmatprep.subr.mxu1 %v1849_v28  ;;  %v1254_v9 = vld [vmem:[%s1742_s16 + $0x138] sm:$0xff] }
  0x55   : > { %1489 = vmatpush3.msra.mxu0 %v1735_v11  ;;  %1573 = vmatprep.mubr.msk.f32.mxu0 %vm225_vm0, %v1241_v2  ;;  %v1258_v11 = vld [vmem:[%s1742_s16 + $0x158] sm:$0xff] }
  0x56   : > { %1445 = vmatpush3.msra.mxu1 %v1856_v29  ;;  %1490 = vmatprep.subr.mxu0 %v1747_v12  ;;  %v1257_v12 = vld [vmem:[%s1742_s16 + $0x150] sm:$0xff] }
  0x57   : > { %1574 = vmatmul.mubr.msk.f32.gmra.mxu0 %vm225_vm0, %v1244_v3  ;;  %1446 = vmatprep.subr.mxu1 %v1863_v30 }
  0x58   : > { %1491 = vmatpush3.msra.mxu0 %v1758_v15  ;;  %1447 = vmatpush3.msra.mxu1 %v1870_v31  ;;  %v1261_v15 = vld [vmem:[%s1742_s16 + $0x170] sm:$0xff] }
  0x59   : > { %1492 = vmatprep.subr.mxu0 %v1765_v16  ;;  %1448 = vmatprep.subr.mxu1 %v1877_v32  ;;  %v1276_v16 = vld [vmem:[%s1742_s16 + $0x1b8] sm:$0xff] }
  0x5a   : > { %1493 = vmatpush3.msra.mxu0 %v1772_v17  ;;  %1449 = vmatpush3.msra.mxu1 %v1884_v33  ;;  %v1260_v17 = vld [vmem:[%s1742_s16 + $0x168] sm:$0xff] }
  0x5b   : > { %1494 = vmatprep.subr.mxu0 %v1779_v18  ;;  %1450 = vmatprep.subr.mxu1 %v1891_v34  ;;  %v1264_v18 = vld [vmem:[%s1742_s16 + $0x188] sm:$0xff] }
  0x5c   : > { %1495 = vmatpush3.msra.mxu0 %v1786_v19  ;;  %1451 = vmatpush3.msra.mxu1 %v1898_v35  ;;  %v1275_v19 = vld [vmem:[%s1742_s16 + $0x1b0] sm:$0xff] }
  0x5d   : > { %1496 = vmatprep.subr.mxu0 %v1793_v20  ;;  %1452 = vmatprep.subr.mxu1 %v1905_v36  ;;  %v1263_v20 = vld [vmem:[%s1742_s16 + $0x180] sm:$0xff] }
  0x5e   : > { %1497 = vmatpush3.msra.mxu0 %v1800_v21  ;;  %1453 = vmatpush3.msra.mxu1 %v1913_v38  ;;  %v1279_v21 = vld [vmem:[%s1742_s16 + $0x1d0] sm:$0xff] }
  0x5f   : > { %768 = vmatprep.mubr.f32.mxu1 %v1252_v5  ;;  %1498 = vmatprep.subr.mxu0 %v1807_v22  ;;  %v1267_v22 = vld [vmem:[%s1742_s16 + $0x1a0] sm:$0xff] }
  0x60   : > { %769 = vmatmul.mubr.f32.vlgmr.msra.gmra.mxu1 %v1251_v6  ;;  %1576 = vmatprep.subr.mxu1 %v1672_v1 }
  0x61   : > { %1499 = vmatpush3.msra.mxu0 %v1814_v23  ;;  %1577 = vmatpush3.msra.mxu1 %v1672_v1  ;;  %v1278_v23 = vld [vmem:[%s1742_s16 + $0x1c8] sm:$0xff] }
  0x62   : > { %1500 = vmatprep.subr.mxu0 %v1821_v24  ;;  %773 = vmatprep.mubr.f32.mxu1 %v1255_v8  ;;  %v1266_v24 = vld [vmem:[%s1742_s16 + $0x198] sm:$0xff] }
  0x63   : > { %1501 = vmatpush3.msra.mxu0 %v1828_v25  ;;  %1578 = vmatprep.subr.mxu1 %v1689_v4  ;;  %v1282_v25 = vld [vmem:[%s1742_s16 + $0x1e8] sm:$0xff] }
  0x64   : > { %1502 = vmatprep.subr.mxu0 %v1835_v26  ;;  %774 = vmatmul.mubr.f32.gmra.mxu1 %v1254_v9  ;;  %v1253_v26 = vld [vmem:[%s1742_s16 + $0x130] sm:$0xff] }
  0x65   : > { %1503 = vmatpush3.msra.mxu0 %v1842_v27  ;;  %778 = vmatprep.mubr.f32.mxu1 %v1258_v11  ;;  %v1281_v27 = vld [vmem:[%s1742_s16 + $0x1e0] sm:$0xff] }
  0x66   : > { %1504 = vmatprep.subr.mxu0 %v1849_v28  ;;  %1579 = vmatpush3.msra.mxu1 %v1689_v4  ;;  %v1256_v28 = vld [vmem:[%s1742_s16 + $0x148] sm:$0xff] }
  0x67   : > { %1505 = vmatpush3.msra.mxu0 %v1856_v29  ;;  %1580 = vmatprep.subr.mxu1 %v1706_v7  ;;  %v1285_v29 = vld [vmem:[%s1742_s16 + $0x200] sm:$0xff] }
  0x68   : > { %1506 = vmatprep.subr.mxu0 %v1863_v30  ;;  %779 = vmatmul.mubr.f32.gmra.mxu1 %v1257_v12  ;;  %v1259_v30 = vld [vmem:[%s1742_s16 + $0x160] sm:$0xff] }
  0x69   : > { %1507 = vmatpush3.msra.mxu0 %v1870_v31  ;;  %783 = vmatprep.mubr.f32.mxu1 %v1261_v15  ;;  %v1284_v31 = vld [vmem:[%s1742_s16 + $0x1f8] sm:$0xff] }
  0x6a   : > { %1508 = vmatprep.subr.mxu0 %v1877_v32  ;;  %1581 = vmatpush3.msra.mxu1 %v1706_v7  ;;  %v1262_v32 = vld [vmem:[%s1742_s16 + $0x178] sm:$0xff] }
  0x6b   : > { %1509 = vmatpush3.msra.mxu0 %v1884_v33  ;;  %995 = vmatprep.mubr.f32.mxu0 %v1276_v16  ;;  %v1288_v33 = vld [vmem:[%s1742_s16 + $0x218] sm:$0xff] }
  0x6c   : > { %1510 = vmatprep.subr.mxu0 %v1891_v34  ;;  %784 = vmatmul.mubr.f32.gmra.mxu1 %v1260_v17  ;;  %v1265_v34 = vld [vmem:[%s1742_s16 + $0x190] sm:$0xff] }
  0x6d   : > { %1511 = vmatpush3.msra.mxu0 %v1898_v35  ;;  %788 = vmatprep.mubr.f32.mxu1 %v1264_v18  ;;  %v1268_v35 = vld [vmem:[%s1742_s16 + $0x1a8] sm:$0xff] }
  0x6e   : > { %1512 = vmatprep.subr.mxu0 %v1905_v36  ;;  %1582 = vmatprep.subr.mxu1 %v1727_v10  ;;  %v1283_v36 = vld [vmem:[%s1742_s16 + $0x1f0] sm:$0xff] }
  0x6f   : > { %1513 = vmatpush3.msra.mxu0 %v1913_v38  ;;  %1583 = vmatpush3.msra.mxu1 %v1727_v10  ;;  %v1290_v38 = vld [vmem:[%s1742_s16 + $0x228] sm:$0xff] }
  0x70   : > { %996 = vmatmul.mubr.f32.vlgmr.msra.gmra.mxu0 %v1275_v19  ;;  %789 = vmatmul.mubr.f32.gmra.mxu1 %v1263_v20 }
  0x71   : > { %1593 = vmatprep.subr.mxu0 %v1672_v1  ;;  %1000 = vmatprep.mubr.f32.mxu0 %v1279_v21 }
  0x72   : > { %1594 = vmatpush3.msra.mxu0 %v1672_v1  ;;  %793 = vmatprep.mubr.f32.mxu1 %v1267_v22 }
  0x73   : > { %1595 = vmatprep.subr.mxu0 %v1689_v4  ;;  %1610 = vmatprep.subr.mxu1 %v1672_v1 }
  0x74   : > { %1001 = vmatmul.mubr.f32.gmra.mxu0 %v1278_v23  ;;  %794 = vmatmul.mubr.f32.gmra.mxu1 %v1266_v24 }
  0x75   : > { %1005 = vmatprep.mubr.f32.mxu0 %v1282_v25  ;;  %1584 = vmatprep.mubr.msk.f32.mxu1 %vm225_vm0, %v1253_v26 }
  0x76   : > { %1596 = vmatpush3.msra.mxu0 %v1689_v4 }
  0x77   : > { %1597 = vmatprep.subr.mxu0 %v1706_v7 }
  0x78   : > { %1006 = vmatmul.mubr.f32.gmra.mxu0 %v1281_v27  ;;  %1585 = vmatmul.mubr.msk.f32.vlgmr.msra.gmra.mxu1 %vm225_vm0, %v1256_v28 }
  0x79   : > { %1614 = vmatpush3.msra.mxu1 %v1672_v1  ;;  %1010 = vmatprep.mubr.f32.mxu0 %v1285_v29  ;;  %v1287_v1 = vld [vmem:[%s1742_s16 + $0x210] sm:$0xff] }
  0x7a   : > { %1587 = vmatprep.mubr.msk.f32.mxu1 %vm225_vm0, %v1259_v30  ;;  %1611 = vmatprep.subr.mxu1 %v1689_v4 }
  0x7b   : > { %1615 = vmatpush3.msra.mxu1 %v1689_v4  ;;  %1598 = vmatpush3.msra.mxu0 %v1706_v7  ;;  %v1291_v4 = vld [vmem:[%s1742_s16 + $0x230] sm:$0xff] }
  0x7c   : > { %1011 = vmatmul.mubr.f32.gmra.mxu0 %v1284_v31  ;;  %1588 = vmatmul.mubr.msk.f32.gmra.mxu1 %vm225_vm0, %v1262_v32 }
  0x7d   : > { %1015 = vmatprep.mubr.f32.mxu0 %v1288_v33  ;;  %1612 = vmatprep.subr.mxu1 %v1706_v7 }
  0x7e   : > { %1590 = vmatprep.mubr.msk.f32.mxu1 %vm225_vm0, %v1265_v34  ;;  %1616 = vmatpush3.msra.mxu1 %v1706_v7  ;;  %v1277_v7 = vld [vmem:[%s1742_s16 + $0x1c0] sm:$0xff]  ;;  %s1619_s16 = smul.u32 48, %s2206_s13 }
  0x7f   : > { %1613 = vmatprep.subr.mxu1 %v1727_v10  ;;  %1599 = vmatprep.subr.mxu0 %v1727_v10 }
  0x80   : > { %1016 = vmatmul.mubr.f32.gmra.mxu0 %v1287_v1  ;;  %1591 = vmatmul.mubr.msk.f32.gmra.mxu1 %vm225_vm0, %v1268_v35  ;;  %s170_s20 = scalar_lea.vmem %s2189_s3, %s1619_s16 }
  0x81   : > { %1020 = vmatprep.mubr.f32.mxu0 %v1291_v4  ;;  %1617 = vmatpush3.msra.mxu1 %v1727_v10 }
  0x82   : > { %1600 = vmatpush3.msra.mxu0 %v1727_v10  ;;  %1604 = vmatprep.mubr.msk.f32.mxu1 %vm225_vm0, %v1283_v36 }
  0x84   : > { %1021 = vmatmul.mubr.f32.gmra.mxu0 %v1290_v38  ;;  %1605 = vmatmul.mubr.msk.f32.vlgmr.msra.gmra.mxu1 %vm225_vm0, %v1286_v41 }
  0x85   : > { %1601 = vmatprep.mubr.msk.f32.mxu0 %vm225_vm0, %v1277_v7  ;;  %1607 = vmatprep.mubr.msk.f32.mxu1 %vm225_vm0, %v1289_v42 }
  0x88   : > { %1602 = vmatmul.mubr.msk.f32.vlgmr.msra.gmra.mxu0 %vm225_vm0, %v1280_v43  ;;  %1608 = vmatmul.mubr.msk.f32.gmra.mxu1 %vm225_vm0, %v1292_v44 }
  0xd6   : > { %v2116_v45 = vpop.f32.mrf.mxu1 }
  0xd8   : > { %v405_v10 = vpop.f32.mrf.mxu1 }
  0xee   : > { %v2118_v46 = vpop.f32.mrf.mxu1 }
  0xef   : > { %v1334_v47 = vpop.f32.mrf.mxu0 }
  0xf0   : > { %v2120_v48 = vpop.f32.mrf.mxu1 }
  0xf1   : > { %v1335_v49 = vpop.f32.mrf.mxu0 }
  0xf2   : > { %v1336_v0 = vadd.f32 %v1335_v49, %v1334_v47 }
  0xf3   : > { %v2122_v50 = vpop.f32.mrf.mxu1 }
  0xf4   : > { %v1337_v51 = vpop.f32.mrf.mxu0  ;;  %v2126_v6 = vadd.f32 %v1336_v0, %v405_v10 }
  0xf5   : > { %v2124_v52 = vpop.f32.mrf.mxu1 }
  0xf6   : > { %v1338_v53 = vpop.f32.mrf.mxu0  ;;  %2192 = vst [vmem:[#allocation2_spill] sm:$0xff] %v2126_v6 }
  0xf7   : > { %v1339_v10 = vadd.f32 %v1338_v53, %v1337_v51 }
  0xf8   : > { %v1340_v54 = vpop.f32.mrf.mxu0 }
  0xf9   : > { %v1394_v55 = vpop.f32.mrf.mxu1 }
  0xfa   : > { %v1341_v56 = vpop.f32.mrf.mxu0 }
  0xfb   : > { %v1395_v57 = vpop.f32.mrf.mxu1  ;;  %v1342_v47 = vadd.f32 %v1341_v56, %v1340_v54 }
  0xfc   : > { %v1343_v58 = vpop.f32.mrf.mxu0  ;;  %v1396_v3 = vadd.f32 %v1395_v57, %v1394_v55 }
  0xfe   : > { %v1397_v59 = vpop.f32.mrf.mxu1  ;;  %v1344_v60 = vpop.f32.mrf.mxu0 }
  0xff   : > { %v1345_v49 = vadd.f32 %v1344_v60, %v1343_v58 }
 0x100   : > { %v1398_v61 = vpop.f32.mrf.mxu1 }
 0x101   : > { %v1399_v55 = vadd.f32 %v1398_v61, %v1397_v59  ;;  %v421_v51 = vadd.f32 %v2118_v46, %v1345_v49 }
 0x102   : > { %v1346_v62 = vpop.f32.mrf.mxu0  ;;  %v1400_v63 = vpop.f32.mrf.mxu1 }
 0x104   : > { %v1347_v13 = vpop.f32.mrf.mxu0  ;;  %v1401_v14 = vpop.f32.mrf.mxu1 }
 0x105   : > { %v1402_v11 = vadd.f32 %v1401_v14, %v1400_v63 }
 0x106   : > { %v1349_v37 = vpop.f32.mrf.mxu0 }
 0x107   : > { %v1403_v40 = vpop.f32.mrf.mxu1 }
 0x108   : > { %v1350_v39 = vpop.f32.mrf.mxu0 }
 0x109   : > { %v1404_v8 = vpop.f32.mrf.mxu1 }
 0x10a   : > { %v1405_v42 = vadd.f32 %v1404_v8, %v1403_v40  ;;  %v416_v40 = vadd.f32 %v1342_v47, %v2120_v48 }
 0x10b   : > { %v1569_v2 = vpop.f32.mrf.mxu0 }
 0x10c   : > { %v1406_v12 = vpop.f32.mrf.mxu1 }
 0x10d   : > { %v632_v5 = vpop.f32.mrf.mxu0 }
 0x10e   : > { %v2128_v9 = vadd.f32 %v1396_v3, %v632_v5  ;;  %v1407_v15 = vpop.f32.mrf.mxu1  ;;  %v1348_v3 = vadd.f32 %v1347_v13, %v1346_v62  ;;  %v1351_v5 = vadd.f32 %v1350_v39, %v1349_v37 }
 0x10f   : > { %v1408_v63 = vadd.f32 %v1407_v15, %v1406_v12 }
 0x110   : > { %2193 = vst [vmem:[#allocation3_spill] sm:$0xff] %v2128_v9  ;;  %v2148_v9 = vadd.f32 %v1569_v2, %v1399_v55  ;;  %v2154_v58 = vadd.f32 %v1348_v3, %v2124_v52  ;;  %v431_v59 = vadd.f32 %v2122_v50, %v1351_v5 }
 0x111   : > { %v1409_v16 = vpop.f32.mrf.mxu1 }
 0x112   : > { %v1572_v19 = vpop.f32.mrf.mxu0 }
 0x113   : > { %v1410_v17 = vpop.f32.mrf.mxu1  ;;  %v648_v6 = vadd.f32 %v1572_v19, %v1405_v42 }
 0x114   : > { %v642_v22 = vpop.f32.mrf.mxu0 }
 0x115   : > { %v643_v53 = vadd.f32 %v1402_v11, %v642_v22  ;;  %v664_v13 = vmax.f32 %v421_v51, %v648_v6 }
 0x117   : > { %v1575_v25 = vpop.f32.mrf.mxu0  ;;  %v663_v8 = vmax.f32 %v416_v40, %v643_v53 }
 0x119   : > { %v2136_v28 = vpop.f32.mrf.mxu0 }
 0x11a   : > { %v653_v15 = vadd.f32 %v1408_v63, %v2136_v28 }
 0x120   : > { %v2132_v18 = vpop.f32.mrf.mxu1 }
 0x122   : > { %v2134_v20 = vpop.f32.mrf.mxu1 }
 0x124   : > { %v1457_v21 = vpop.f32.mrf.mxu1 }
 0x126   : > { %v1458_v23 = vpop.f32.mrf.mxu1 }
 0x127   : > { %v1459_v52 = vadd.f32 %v1458_v23, %v1457_v21 }
 0x128   : > { %v1460_v24 = vpop.f32.mrf.mxu1 }
 0x12a   : > { %v1461_v26 = vpop.f32.mrf.mxu1 }
 0x12b   : > { %v1462_v48 = vadd.f32 %v1461_v26, %v1460_v24  ;;  %v1299_v24 = vld [vmem:[%s2188_s2] ss:$0 sm:$0xff] }
 0x12c   : > { %v1463_v27 = vpop.f32.mrf.mxu1 }
 0x12e   : > { %v1464_v29 = vpop.f32.mrf.mxu1 }
 0x12f   : > { %v1465_v60 = vadd.f32 %v1464_v29, %v1463_v27 }
 0x130   : > { %v2138_v30 = vpop.f32.mrf.mxu0  ;;  %v2140_v31 = vpop.f32.mrf.mxu1 }
 0x131   : > { %2194 = vst [vmem:[#allocation4_spill] sm:$0xff] %v2140_v31 }
 0x132   : > { %v2142_v32 = vpop.f32.mrf.mxu0  ;;  %v2144_v33 = vpop.f32.mrf.mxu1 }
 0x133   : > { %2195 = vst [vmem:[#allocation5_spill] sm:$0xff] %v2142_v32  ;;  %2196 = vst [vmem:[#allocation6_spill] sm:$0xff] %v2144_v33  ;;  %v1411_v33 = vadd.f32 %v1410_v17, %v1409_v16 }
 0x134   : > { %v1517_v34 = vpop.f32.mrf.mxu0  ;;  %v1469_v1 = vpop.f32.mrf.mxu1 }
 0x135   : > { %v658_v14 = vadd.f32 %v1575_v25, %v1411_v33 }
 0x136   : > { %v1518_v35 = vpop.f32.mrf.mxu0  ;;  %v1470_v4 = vpop.f32.mrf.mxu1 }
 0x137   : > { %v1519_v11 = vadd.f32 %v1518_v35, %v1517_v34  ;;  %v1471_v16 = vadd.f32 %v1470_v4, %v1469_v1  ;;  %v666_v6 = vmax.f32 %v431_v59, %v658_v14  ;;  %v1456_v1 = vadd.f32 %v2134_v20, %v2132_v18  ;;  %v2203_v59 = vld [vmem:[#allocation3_spill] sm:$0xff] }
 0x138   : > { %v1520_v36 = vpop.f32.mrf.mxu0  ;;  %v1586_v38 = vpop.f32.mrf.mxu1  ;;  %v2199_v28 = vld [vmem:[#allocation4_spill] sm:$0xff] }
 0x139   : > { %v871_v25 = vadd.f32 %v1586_v38, %v1459_v52 }
 0x13a   : > { %v1521_v41 = vpop.f32.mrf.mxu0  ;;  %v2146_v7 = vpop.f32.mrf.mxu1  ;;  %v2198_v35 = vld [vmem:[#allocation5_spill] sm:$0xff] }
 0x13b   : > { %2197 = vst [vmem:[#allocation7_spill] sm:$0xff] %v2146_v7  ;;  %v411_v7 = vadd.f32 %v2116_v45, %v1339_v10  ;;  %v1522_v46 = vadd.f32 %v1521_v41, %v1520_v36  ;;  %v1516_v4 = vadd.f32 %v2198_v35, %v2138_v30  ;;  %v2200_v36 = vld [vmem:[#allocation6_spill] sm:$0xff] }
 0x13c   : > { %v1523_v43 = vpop.f32.mrf.mxu0  ;;  %v1589_v44 = vpop.f32.mrf.mxu1 }
 0x13d   : > { %v662_v62 = vmax.f32 %v411_v7, %v2148_v9  ;;  %v881_v39 = vadd.f32 %v1589_v44, %v1465_v60 }
 0x13e   : > { %v1524_v57 = vpop.f32.mrf.mxu0  ;;  %v875_v0 = vpop.f32.mrf.mxu1 }
 0x13f   : > { %v1525_v61 = vadd.f32 %v1524_v57, %v1523_v43  ;;  %v876_v19 = vadd.f32 %v1462_v48, %v875_v0 }
 0x140   : > { %v1526_v31 = vpop.f32.mrf.mxu0  ;;  %v1592_v32 = vpop.f32.mrf.mxu1 }
 0x141   : > { %v891_v27 = vadd.f32 %v1592_v32, %v1471_v16  ;;  %v1468_v32 = vadd.f32 %v2200_v36, %v2199_v28 }
 0x142   : > { %v1527_v54 = vpop.f32.mrf.mxu0  ;;  %v885_v56 = vpop.f32.mrf.mxu1  ;;  %v2201_v47 = vld [vmem:[#allocation7_spill] sm:$0xff] }
 0x143   : > { %v1528_v38 = vadd.f32 %v1527_v54, %v1526_v31  ;;  %v866_v49 = vadd.f32 %v1456_v1, %v2201_v47  ;;  %v886_v55 = vadd.f32 %v1468_v32, %v885_v56  ;;  %v665_v31 = vmax.f32 %v2154_v58, %v653_v15  ;;  %v2202_v56 = vld [vmem:[#allocation2_spill] sm:$0xff] }
 0x144   : > { %v1529_v45 = vpop.f32.mrf.mxu0  ;;  %v1606_v37 = vpop.f32.mrf.mxu1  ;;  %v2204_v60 = vmax.f32 %v2202_v56, %v2203_v59 }
 0x145   : > { %v1108_v2 = vadd.f32 %v1606_v37, %v1525_v61 }
 0x146   : > { %v1530_v50 = vpop.f32.mrf.mxu0  ;;  %v1102_v17 = vpop.f32.mrf.mxu1 }
 0x147   : > { %v1124_v22 = vmax.f32 %v881_v39, %v1108_v2  ;;  %v1531_v9 = vadd.f32 %v1530_v50, %v1529_v45  ;;  %v1103_v12 = vadd.f32 %v1522_v46, %v1102_v17 }
 0x148   : > { %v1603_v26 = vpop.f32.mrf.mxu0  ;;  %v1609_v21 = vpop.f32.mrf.mxu1 }
 0x149   : > { %v1130_v23 = vmax.f32 %v664_v13, %v1124_v22  ;;  %v1123_v29 = vmax.f32 %v876_v19, %v1103_v12  ;;  %v1098_v33 = vadd.f32 %v1603_v26, %v1519_v11  ;;  %v1118_v34 = vadd.f32 %v1609_v21, %v1531_v9 }
 0x14a   : > { %v1092_v41 = vpop.f32.mrf.mxu0  ;;  %v1112_v7 = vpop.f32.mrf.mxu1 }
 0x14b   : > { %v1143_v42 = vadd.f32 %v1299_v24, %v1130_v23  ;;  %v1129_v43 = vmax.f32 %v663_v8, %v1123_v29  ;;  %v1122_v44 = vmax.f32 %v871_v25, %v1098_v33  ;;  %v1126_v10 = vmax.f32 %v891_v27, %v1118_v34 }
 0x14c   : > { %v1093_v18 = vadd.f32 %v1516_v4, %v1092_v41  ;;  %v1113_v20 = vadd.f32 %v1528_v38, %v1112_v7 }
 0x14d   : > { %v1149_v30 = vmax.f32 %v1143_v42, 0.0  ;;  %v1142_v57 = vadd.f32 %v1299_v24, %v1129_v43  ;;  %v1128_v0 = vmax.f32 %v662_v62, %v1122_v44  ;;  %v1132_v3 = vmax.f32 %v666_v6, %v1126_v10 }
 0x14e   : > { %v1121_v5 = vmax.f32 %v866_v49, %v1093_v18  ;;  %v1125_v40 = vmax.f32 %v886_v55, %v1113_v20 }
 0x14f   : > { %1156 = vst.msk [vmem:[%s170_s20 + $0x18] sm:$0xff] %vm1152_vm1, %v1149_v30  ;;  %v1148_v51 = vmax.f32 %v1142_v57, 0.0  ;;  %v1141_v53 = vadd.f32 %v1299_v24, %v1128_v0  ;;  %v1145_v54 = vadd.f32 %v1299_v24, %v1132_v3 }
 0x150   : > { %v1127_v61 = vmax.f32 %v2204_v60, %v1121_v5  ;;  %v1131_v63 = vmax.f32 %v665_v31, %v1125_v40 }
 0x151   : > { %1155 = vst.msk [vmem:[%s170_s20 + $0x10] sm:$0xff] %vm1152_vm1, %v1148_v51  ;;  %v1147_v13 = vmax.f32 %v1141_v53, 0.0  ;;  %v1151_v14 = vmax.f32 %v1145_v54, 0.0 }
 0x152   : > { %v1140_v62 = vadd.f32 %v1299_v24, %v1127_v61  ;;  %v1144_v45 = vadd.f32 %v1299_v24, %v1131_v63 }
 0x153   : > { %1154 = vst.msk [vmem:[%s170_s20 + $0x8] sm:$0xff] %vm1152_vm1, %v1147_v13  ;;  %1158 = vst.msk [vmem:[%s170_s20 + $0x28] sm:$0xff] %vm1152_vm1, %v1151_v14 }
 0x154   : > { %v1146_v58 = vmax.f32 %v1140_v62, 0.0  ;;  %v1150_v37 = vmax.f32 %v1144_v45, 0.0 }
 0x156   : > { %1153 = vst.msk [vmem:[%s170_s20] sm:$0xff] %vm1152_vm1, %v1146_v58  ;;  %1157 = vst.msk [vmem:[%s170_s20 + $0x20] sm:$0xff] %vm1152_vm1, %v1150_v37 }
 0x157 PF: > { %s13_s12 = sadd.s32 1, %s1634_s12  }
 0x158   : > { %p10_p4 = scmp.ge.s32.totalorder %s13_s12, 4  }
 0x15a   :  { %12 = sbr.rel (!%p10_p4) target bundleno = 1 (0x1), region = 65 }

// kernel: motion_classifier_forward.5
= control target key start
LH: loop header
LB: loop body
LE: loop exit
PB: predicated region body
PF: predicated region fallthrough
CT: control target
= control target key end

     0   :  { %v8225_v36 = vmov 1983009808   ;;  %v38_v38 = vlaneseq  ;;  %s10912_s0 = inlined_call_operand.vmem [shape: f32[2,3072], index: 0, kind: input, shape index: {}]   ;;  %s10913_s1 = inlined_call_operand.vmem [shape: bf16[3072,512], index: 1, kind: input, shape index: {}]   ;;  %s10914_s2 = inlined_call_operand.vmem [shape: f32[1,512], index: 2, kind: input, shape index: {}]   ;;  %s10915_s3 = inlined_call_operand.vmem [shape: bf16[512,13], index: 3, kind: input, shape index: {}]   ;;  %s10916_s4 = inlined_call_operand.vmem [shape: f32[1,13], index: 4, kind: input, shape index: {}]   ;;  %s10917_s5 = inlined_call_operand.hbm [shape: f32[2,13], index: 5, kind: output, shape index: {}]  }
   0x1   :  { %v7012_v0 = vld [vmem:[%s10913_s1 + $0xe4] ss:$16 sps:$4 sm:$0xff]   ;;  %v7016_v2 = vld [vmem:[%s10913_s1 + $0xe0] ss:$16 sps:$4 sm:$0xff]   ;;  %v36_v37 = vunpack.c.l.s4 %v8225_v36 }
   0x2   :  { %v7014_v1 = vld [vmem:[%s10913_s1 + $0x2e4] ss:$16 sps:$4 sm:$0xff]   ;;  %4814 = vmatprep.subr.bf16.mxu0 %v7012_v0  ;;  %v7017_v3 = vld [vmem:[%s10913_s1 + $0x2e0] ss:$16 sps:$4 sm:$0xff]   ;;  %v8374_v43 = vshrl.u32 %v38_v38, 7 }
   0x3   :  { %4855 = vmatprep.subr.bf16.mxu1 %v7014_v1  ;;  %v7018_v4 = vld [vmem:[%s10913_s1 + $0xc4] ss:$16 sps:$4 sm:$0xff]   ;;  %4815 = vmatpush1.bf16.msra.mxu0 %v7016_v2  ;;  %v7022_v6 = vld [vmem:[%s10913_s1 + $0xc0] ss:$16 sps:$4 sm:$0xff]   ;;  %v37_v42 = vunpack.c.0.s8 %v36_v37 }
   0x4   :  { %4856 = vmatpush1.bf16.msra.mxu1 %v7017_v3  ;;  %v7020_v5 = vld [vmem:[%s10913_s1 + $0x2c4] ss:$16 sps:$4 sm:$0xff]   ;;  %4816 = vmatprep.subr.bf16.mxu0 %v7018_v4  ;;  %v7023_v7 = vld [vmem:[%s10913_s1 + $0x2c0] ss:$16 sps:$4 sm:$0xff]  }
   0x5   :  { %4857 = vmatprep.subr.bf16.mxu1 %v7020_v5  ;;  %v7024_v8 = vld [vmem:[%s10913_s1 + $0xa4] ss:$16 sps:$4 sm:$0xff]   ;;  %v7028_v10 = vld [vmem:[%s10913_s1 + $0xa0] ss:$16 sps:$4 sm:$0xff]   ;;  %v8392_v49 = vsub.s32 %v37_v42, %v8374_v43  ;;  %v23_v42 = vld [vmem:[%s10912_s0 + $0x8] sm:$0xff] }
   0x6   :  { %v7026_v9 = vld [vmem:[%s10913_s1 + $0x2a4] ss:$16 sps:$4 sm:$0xff]   ;;  %v7029_v11 = vld [vmem:[%s10913_s1 + $0x2a0] ss:$16 sps:$4 sm:$0xff]  }
   0x7   :  { %4817 = vmatpush1.bf16.msra.mxu0 %v7022_v6  ;;  %v7030_v12 = vld [vmem:[%s10913_s1 + $0x84] ss:$16 sps:$4 sm:$0xff]   ;;  %v7034_v14 = vld [vmem:[%s10913_s1 + $0x80] ss:$16 sps:$4 sm:$0xff]  }
   0x8   :  { %4858 = vmatpush1.bf16.msra.mxu1 %v7023_v7  ;;  %4818 = vmatprep.subr.bf16.mxu0 %v7024_v8  ;;  %v7032_v13 = vld [vmem:[%s10913_s1 + $0x284] ss:$16 sps:$4 sm:$0xff]   ;;  %v7035_v15 = vld [vmem:[%s10913_s1 + $0x280] ss:$16 sps:$4 sm:$0xff]  }
   0x9   :  { %4859 = vmatprep.subr.bf16.mxu1 %v7026_v9  ;;  %v7036_v16 = vld [vmem:[%s10913_s1 + $0x64] ss:$16 sps:$4 sm:$0xff]   ;;  %v7040_v18 = vld [vmem:[%s10913_s1 + $0x60] ss:$16 sps:$4 sm:$0xff]  }
   0xa   :  { %v7038_v17 = vld [vmem:[%s10913_s1 + $0x264] ss:$16 sps:$4 sm:$0xff]   ;;  %v7041_v19 = vld [vmem:[%s10913_s1 + $0x260] ss:$16 sps:$4 sm:$0xff]  }
   0xb   :  { %4819 = vmatpush1.bf16.msra.mxu0 %v7028_v10  ;;  %v7042_v20 = vld [vmem:[%s10913_s1 + $0x44] ss:$16 sps:$4 sm:$0xff]   ;;  %v7046_v22 = vld [vmem:[%s10913_s1 + $0x40] ss:$16 sps:$4 sm:$0xff]  }
   0xc   :  { %4860 = vmatpush1.bf16.msra.mxu1 %v7029_v11  ;;  %4820 = vmatprep.subr.bf16.mxu0 %v7030_v12  ;;  %v7044_v21 = vld [vmem:[%s10913_s1 + $0x244] ss:$16 sps:$4 sm:$0xff]   ;;  %v7047_v23 = vld [vmem:[%s10913_s1 + $0x240] ss:$16 sps:$4 sm:$0xff]  }
   0xd   :  { %4861 = vmatprep.subr.bf16.mxu1 %v7032_v13  ;;  %v7048_v24 = vld [vmem:[%s10913_s1 + $0x24] ss:$16 sps:$4 sm:$0xff]   ;;  %v7052_v26 = vld [vmem:[%s10913_s1 + $0x20] ss:$16 sps:$4 sm:$0xff]  }
   0xe   :  { %v7050_v25 = vld [vmem:[%s10913_s1 + $0x224] ss:$16 sps:$4 sm:$0xff]   ;;  %v7053_v27 = vld [vmem:[%s10913_s1 + $0x220] ss:$16 sps:$4 sm:$0xff]  }
   0xf   :  { %4821 = vmatpush1.bf16.msra.mxu0 %v7034_v14  ;;  %v7054_v28 = vld [vmem:[%s10913_s1 + $0x4] ss:$16 sps:$4 sm:$0xff]   ;;  %v7058_v30 = vld [vmem:[%s10913_s1] ss:$16 sps:$4 sm:$0xff]  }
  0x10   :  { %4862 = vmatpush1.bf16.msra.mxu1 %v7035_v15  ;;  %4822 = vmatprep.subr.bf16.mxu0 %v7036_v16  ;;  %v7056_v29 = vld [vmem:[%s10913_s1 + $0x204] ss:$16 sps:$4 sm:$0xff]   ;;  %v7059_v31 = vld [vmem:[%s10913_s1 + $0x200] ss:$16 sps:$4 sm:$0xff]  }
  0x11   :  { %4863 = vmatprep.subr.bf16.mxu1 %v7038_v17  ;;  %v7060_v32 = vld [vmem:[%s10913_s1 + $0x1e4] ss:$16 sps:$4 sm:$0xff]   ;;  %v7064_v34 = vld [vmem:[%s10913_s1 + $0x1e0] ss:$16 sps:$4 sm:$0xff]  }
  0x12   :  { %v7062_v33 = vld [vmem:[%s10913_s1 + $0x3e4] ss:$16 sps:$4 sm:$0xff]   ;;  %v7065_v35 = vld [vmem:[%s10913_s1 + $0x3e0] ss:$16 sps:$4 sm:$0xff]  }
  0x13   :  { %4823 = vmatpush1.bf16.msra.mxu0 %v7040_v18  ;;  %v7066_v39 = vld [vmem:[%s10913_s1 + $0x1c4] ss:$16 sps:$4 sm:$0xff]   ;;  %v7070_v41 = vld [vmem:[%s10913_s1 + $0x1c0] ss:$16 sps:$4 sm:$0xff]  }
  0x14   :  { %4864 = vmatpush1.bf16.msra.mxu1 %v7041_v19  ;;  %4824 = vmatprep.subr.bf16.mxu0 %v7042_v20  ;;  %v7068_v40 = vld [vmem:[%s10913_s1 + $0x3c4] ss:$16 sps:$4 sm:$0xff]   ;;  %v7071_v44 = vld [vmem:[%s10913_s1 + $0x3c0] ss:$16 sps:$4 sm:$0xff]  }
  0x15   :  { %4865 = vmatprep.subr.bf16.mxu1 %v7044_v21  ;;  %v7072_v45 = vld [vmem:[%s10913_s1 + $0x1a4] ss:$16 sps:$4 sm:$0xff]   ;;  %v7076_v47 = vld [vmem:[%s10913_s1 + $0x1a0] ss:$16 sps:$4 sm:$0xff]  }
  0x16   :  { %v7074_v46 = vld [vmem:[%s10913_s1 + $0x3a4] ss:$16 sps:$4 sm:$0xff]   ;;  %v7077_v48 = vld [vmem:[%s10913_s1 + $0x3a0] ss:$16 sps:$4 sm:$0xff]  }
  0x17   :  { %4825 = vmatpush1.bf16.msra.mxu0 %v7046_v22  ;;  %v7078_v50 = vld [vmem:[%s10913_s1 + $0x184] ss:$16 sps:$4 sm:$0xff]   ;;  %v7082_v53 = vld [vmem:[%s10913_s1 + $0x180] ss:$16 sps:$4 sm:$0xff]  }
  0x18   :  { %4866 = vmatpush1.bf16.msra.mxu1 %v7047_v23  ;;  %4826 = vmatprep.subr.bf16.mxu0 %v7048_v24  ;;  %v7080_v51 = vld [vmem:[%s10913_s1 + $0x384] ss:$16 sps:$4 sm:$0xff]   ;;  %v7083_v56 = vld [vmem:[%s10913_s1 + $0x380] ss:$16 sps:$4 sm:$0xff]  }
  0x19   :  { %4867 = vmatprep.subr.bf16.mxu1 %v7050_v25  ;;  %v22_v52 = vld [vmem:[%s10912_s0] sm:$0xff] }
  0x1a   :  { %v41_v54 = vrot.slane %v22_v52, %v8392_v49  ;;  %v34_v55 = vcombine.high %v22_v52, %v22_v52  ;;  %v7084_v57 = vld [vmem:[%s10913_s1 + $0x164] ss:$16 sps:$4 sm:$0xff]   ;;  %v7088_v61 = vld [vmem:[%s10913_s1 + $0x160] ss:$16 sps:$4 sm:$0xff]  }
  0x1b   :  { %4827 = vmatpush1.bf16.msra.mxu0 %v7052_v26  ;;  %v7086_v58 = vld [vmem:[%s10913_s1 + $0x364] ss:$16 sps:$4 sm:$0xff]   ;;  %v7089_v0 = vld [vmem:[%s10913_s1 + $0x360] ss:$16 sps:$4 sm:$0xff]  }
  0x1c   :  { %4868 = vmatpush1.bf16.msra.mxu1 %v7053_v27  ;;  %4828 = vmatprep.subr.bf16.mxu0 %v7054_v28  ;;  %v49_v59 = vcombine.high %v41_v54, %v41_v54  ;;  %v48_v60 = vrot.slane %v34_v55, %v8392_v49  ;;  %v7090_v1 = vld [vmem:[%s10913_s1 + $0x144] ss:$16 sps:$4 sm:$0xff]   ;;  %v7094_v4 = vld [vmem:[%s10913_s1 + $0x140] ss:$16 sps:$4 sm:$0xff]   ;;  %v8471_v16 = vpack.c.bf16 %v41_v54, %v41_v54 }
  0x1d   :  { %4869 = vmatprep.subr.bf16.mxu1 %v7056_v29  ;;  %v7092_v2 = vld [vmem:[%s10913_s1 + $0x344] ss:$16 sps:$4 sm:$0xff]   ;;  %v7095_v5 = vld [vmem:[%s10913_s1 + $0x340] ss:$16 sps:$4 sm:$0xff]  }
  0x1e   :  { %v8420_v62 = vpack.c.bf16 %v49_v59, %v49_v59  ;;  %v50_v63 = vcombine.high %v48_v60, %v48_v60  ;;  %v7096_v6 = vld [vmem:[%s10913_s1 + $0x124] ss:$16 sps:$4 sm:$0xff]   ;;  %v7100_v8 = vld [vmem:[%s10913_s1 + $0x120] ss:$16 sps:$4 sm:$0xff]   ;;  %v8473_v17 = vpack.c.bf16 %v48_v60, %v48_v60 }
  0x1f   :  { %4829 = vmatpush1.bf16.msra.mxu0 %v7058_v30  ;;  %v7098_v7 = vld [vmem:[%s10913_s1 + $0x324] ss:$16 sps:$4 sm:$0xff]   ;;  %v7101_v9 = vld [vmem:[%s10913_s1 + $0x320] ss:$16 sps:$4 sm:$0xff]  }
  0x20   :  { %4870 = vmatpush1.bf16.msra.mxu1 %v7059_v31  ;;  %4830 = vmatprep.subr.bf16.mxu0 %v7060_v32  ;;  %v8431_v3 = vpack.c.bf16 %v50_v63, %v50_v63  ;;  %v7102_v10 = vld [vmem:[%s10913_s1 + $0x104] ss:$16 sps:$4 sm:$0xff]   ;;  %v7106_v12 = vld [vmem:[%s10913_s1 + $0x100] ss:$16 sps:$4 sm:$0xff]  }
  0x21   :  { %4871 = vmatprep.subr.bf16.mxu1 %v7062_v33  ;;  %4846 = vmatprep.mubr.bf16.mxu0 %v8420_v62  ;;  %v7104_v11 = vld [vmem:[%s10913_s1 + $0x304] ss:$16 sps:$4 sm:$0xff]   ;;  %v7107_v13 = vld [vmem:[%s10913_s1 + $0x300] ss:$16 sps:$4 sm:$0xff]  }
  0x22   :  { %4887 = vmatprep.mubr.bf16.mxu1 %v8431_v3  ;;  %v7111_v14 = vld [vmem:[%s10913_s1 + $0x4e4] ss:$16 sps:$4 sm:$0xff]   ;;  %v7109_v18 = vld [vmem:[%s10913_s1 + $0x4e0] ss:$16 sps:$4 sm:$0xff]  }
  0x23   :  { %4831 = vmatpush2.bf16.msra.mxu0 %v7064_v34  ;;  %v7114_v15 = vld [vmem:[%s10913_s1 + $0x6e4] ss:$16 sps:$4 sm:$0xff]   ;;  %v7112_v19 = vld [vmem:[%s10913_s1 + $0x6e0] ss:$16 sps:$4 sm:$0xff]  }
  0x24   :  { %4872 = vmatpush2.bf16.msra.mxu1 %v7065_v35  ;;  %4832 = vmatprep.subr.bf16.mxu0 %v7066_v39  ;;  %v7117_v20 = vld [vmem:[%s10913_s1 + $0x4c4] ss:$16 sps:$4 sm:$0xff]   ;;  %v7115_v22 = vld [vmem:[%s10913_s1 + $0x4c0] ss:$16 sps:$4 sm:$0xff]  }
  0x25   :  { %4873 = vmatprep.subr.bf16.mxu1 %v7068_v40  ;;  %v7120_v21 = vld [vmem:[%s10913_s1 + $0x6c4] ss:$16 sps:$4 sm:$0xff]   ;;  %v7118_v23 = vld [vmem:[%s10913_s1 + $0x6c0] ss:$16 sps:$4 sm:$0xff]  }
  0x26   :  { %v7123_v24 = vld [vmem:[%s10913_s1 + $0x4a4] ss:$16 sps:$4 sm:$0xff]   ;;  %v7121_v26 = vld [vmem:[%s10913_s1 + $0x4a0] ss:$16 sps:$4 sm:$0xff]  }
  0x27   :  { %4833 = vmatpush2.bf16.msra.mxu0 %v7070_v41  ;;  %v7126_v25 = vld [vmem:[%s10913_s1 + $0x6a4] ss:$16 sps:$4 sm:$0xff]   ;;  %v7124_v27 = vld [vmem:[%s10913_s1 + $0x6a0] ss:$16 sps:$4 sm:$0xff]  }
  0x28   :  { %4874 = vmatpush2.bf16.msra.mxu1 %v7071_v44  ;;  %4834 = vmatprep.subr.bf16.mxu0 %v7072_v45  ;;  %v7129_v28 = vld [vmem:[%s10913_s1 + $0x484] ss:$16 sps:$4 sm:$0xff]   ;;  %v7127_v30 = vld [vmem:[%s10913_s1 + $0x480] ss:$16 sps:$4 sm:$0xff]   ;;  %v8553_v44 = vrot.slane %v23_v42, %v8392_v49  ;;  %v51_v45 = vcombine.high %v23_v42, %v23_v42 }
  0x29   :  { %4875 = vmatprep.subr.bf16.mxu1 %v7074_v46  ;;  %v7132_v29 = vld [vmem:[%s10913_s1 + $0x684] ss:$16 sps:$4 sm:$0xff]   ;;  %v7130_v31 = vld [vmem:[%s10913_s1 + $0x680] ss:$16 sps:$4 sm:$0xff]  }
  0x2a   :  { %v7135_v32 = vld [vmem:[%s10913_s1 + $0x464] ss:$16 sps:$4 sm:$0xff]   ;;  %v7133_v34 = vld [vmem:[%s10913_s1 + $0x460] ss:$16 sps:$4 sm:$0xff]  }
  0x2b   :  { %4835 = vmatpush2.bf16.msra.mxu0 %v7076_v47  ;;  %v7138_v33 = vld [vmem:[%s10913_s1 + $0x664] ss:$16 sps:$4 sm:$0xff]   ;;  %v7136_v35 = vld [vmem:[%s10913_s1 + $0x660] ss:$16 sps:$4 sm:$0xff]  }
  0x2c   :  { %4876 = vmatpush2.bf16.msra.mxu1 %v7077_v48  ;;  %4836 = vmatprep.subr.bf16.mxu0 %v7078_v50  ;;  %v7141_v36 = vld [vmem:[%s10913_s1 + $0x444] ss:$16 sps:$4 sm:$0xff]   ;;  %v7139_v38 = vld [vmem:[%s10913_s1 + $0x440] ss:$16 sps:$4 sm:$0xff]   ;;  %v66_v48 = vcombine.high %v8553_v44, %v8553_v44  ;;  %v8564_v50 = vrot.slane %v51_v45, %v8392_v49 }
  0x2d   :  { %4877 = vmatprep.subr.bf16.mxu1 %v7080_v51  ;;  %v7144_v37 = vld [vmem:[%s10913_s1 + $0x644] ss:$16 sps:$4 sm:$0xff]   ;;  %v7142_v39 = vld [vmem:[%s10913_s1 + $0x640] ss:$16 sps:$4 sm:$0xff]  }
  0x2e   :  { %v7147_v40 = vld [vmem:[%s10913_s1 + $0x424] ss:$16 sps:$4 sm:$0xff]   ;;  %v7145_v46 = vld [vmem:[%s10913_s1 + $0x420] ss:$16 sps:$4 sm:$0xff]   ;;  %v67_v54 = vcombine.high %v8564_v50, %v8564_v50 }
  0x2f   :  { %4837 = vmatpush2.bf16.msra.mxu0 %v7082_v53  ;;  %v7150_v41 = vld [vmem:[%s10913_s1 + $0x624] ss:$16 sps:$4 sm:$0xff]   ;;  %v7148_v47 = vld [vmem:[%s10913_s1 + $0x620] ss:$16 sps:$4 sm:$0xff]   ;;  %v8572_v53 = vpack.c.bf16 %v66_v48, %v66_v48 }
  0x30   :  { %4878 = vmatpush2.bf16.msra.mxu1 %v7083_v56  ;;  %4838 = vmatprep.subr.bf16.mxu0 %v7084_v57  ;;  %v7153_v51 = vld [vmem:[%s10913_s1 + $0x404] ss:$16 sps:$4 sm:$0xff]   ;;  %v7151_v55 = vld [vmem:[%s10913_s1 + $0x400] ss:$16 sps:$4 sm:$0xff]   ;;  %v8582_v57 = vpack.c.bf16 %v67_v54, %v67_v54 }
  0x31   :  { %4879 = vmatprep.subr.bf16.mxu1 %v7086_v58  ;;  %v7156_v52 = vld [vmem:[%s10913_s1 + $0x604] ss:$16 sps:$4 sm:$0xff]   ;;  %v7154_v56 = vld [vmem:[%s10913_s1 + $0x600] ss:$16 sps:$4 sm:$0xff]  }
  0x32   :  { %v7159_v58 = vld [vmem:[%s10913_s1 + $0x5e4] ss:$16 sps:$4 sm:$0xff]   ;;  %v7157_v60 = vld [vmem:[%s10913_s1 + $0x5e0] ss:$16 sps:$4 sm:$0xff]  }
  0x33   :  { %4839 = vmatpush2.bf16.msra.mxu0 %v7088_v61  ;;  %v7162_v59 = vld [vmem:[%s10913_s1 + $0x7e4] ss:$16 sps:$4 sm:$0xff]   ;;  %v7160_v61 = vld [vmem:[%s10913_s1 + $0x7e0] ss:$16 sps:$4 sm:$0xff]  }
  0x34   :  { %4880 = vmatpush2.bf16.msra.mxu1 %v7089_v0  ;;  %4840 = vmatprep.subr.bf16.mxu0 %v7090_v1  ;;  %v7165_v63 = vld [vmem:[%s10913_s1 + $0x5c4] ss:$16 sps:$4 sm:$0xff]   ;;  %v7163_v1 = vld [vmem:[%s10913_s1 + $0x5c0] ss:$16 sps:$4 sm:$0xff]  }
  0x35   :  { %4881 = vmatprep.subr.bf16.mxu1 %v7092_v2  ;;  %v7168_v0 = vld [vmem:[%s10913_s1 + $0x7c4] ss:$16 sps:$4 sm:$0xff]   ;;  %v7166_v2 = vld [vmem:[%s10913_s1 + $0x7c0] ss:$16 sps:$4 sm:$0xff]  }
  0x36   :  { %v7215_v45 = vld [vmem:[%s10913_s1 + $0xac0] ss:$16 sps:$4 sm:$0xff]  }
  0x37   :  { %4841 = vmatpush2.bf16.msra.mxu0 %v7094_v4  ;;  %v7171_v4 = vld [vmem:[%s10913_s1 + $0x5a4] ss:$16 sps:$4 sm:$0xff]   ;;  %v7221_v54 = vld [vmem:[%s10913_s1 + $0xaa0] ss:$16 sps:$4 sm:$0xff]  }
  0x38   :  { %4882 = vmatpush2.bf16.msra.mxu1 %v7095_v5  ;;  %4842 = vmatprep.subr.bf16.mxu0 %v7096_v6  ;;  %v7174_v5 = vld [vmem:[%s10913_s1 + $0x7a4] ss:$16 sps:$4 sm:$0xff]   ;;  %v7169_v6 = vld [vmem:[%s10913_s1 + $0x5a0] ss:$16 sps:$4 sm:$0xff]  }
  0x39   :  { %4883 = vmatprep.subr.bf16.mxu1 %v7098_v7  ;;  %v7172_v7 = vld [vmem:[%s10913_s1 + $0x7a0] ss:$16 sps:$4 sm:$0xff]  }
  0x3b   :  { %4843 = vmatpush2.bf16.msra.mxu0 %v7100_v8  ;;  %v7177_v8 = vld [vmem:[%s10913_s1 + $0x584] ss:$16 sps:$4 sm:$0xff]  }
  0x3c   :  { %4884 = vmatpush2.bf16.msra.mxu1 %v7101_v9  ;;  %4844 = vmatprep.subr.bf16.mxu0 %v7102_v10  ;;  %v7180_v9 = vld [vmem:[%s10913_s1 + $0x784] ss:$16 sps:$4 sm:$0xff]   ;;  %v7175_v10 = vld [vmem:[%s10913_s1 + $0x580] ss:$16 sps:$4 sm:$0xff]  }
  0x3d   :  { %4885 = vmatprep.subr.bf16.mxu1 %v7104_v11  ;;  %v7178_v11 = vld [vmem:[%s10913_s1 + $0x780] ss:$16 sps:$4 sm:$0xff]  }
  0x3f   :  { %4845 = vmatpush2.bf16.msra.mxu0 %v7106_v12  ;;  %v7183_v12 = vld [vmem:[%s10913_s1 + $0x564] ss:$16 sps:$4 sm:$0xff]  }
  0x40   :  { %4886 = vmatpush2.bf16.msra.mxu1 %v7107_v13  ;;  %4896 = vmatprep.subr.bf16.mxu0 %v7111_v14  ;;  %v7186_v13 = vld [vmem:[%s10913_s1 + $0x764] ss:$16 sps:$4 sm:$0xff]   ;;  %v7181_v14 = vld [vmem:[%s10913_s1 + $0x560] ss:$16 sps:$4 sm:$0xff]  }
  0x41   :  { %4937 = vmatprep.subr.bf16.mxu1 %v7114_v15  ;;  %v7184_v15 = vld [vmem:[%s10913_s1 + $0x760] ss:$16 sps:$4 sm:$0xff]  }
  0x42   :  { %4847 = vmatmul.mubr.bf16.vlgmr.msra.gmra.mxu0 %v8471_v16 }
  0x43   :  { %4888 = vmatmul.mubr.bf16.vlgmr.msra.gmra.mxu1 %v8473_v17  ;;  %4897 = vmatpush1.bf16.msra.mxu0 %v7109_v18  ;;  %v7189_v18 = vld [vmem:[%s10913_s1 + $0x544] ss:$16 sps:$4 sm:$0xff]  }
  0x44   :  { %4938 = vmatpush1.bf16.msra.mxu1 %v7112_v19  ;;  %4898 = vmatprep.subr.bf16.mxu0 %v7117_v20  ;;  %v7192_v19 = vld [vmem:[%s10913_s1 + $0x744] ss:$16 sps:$4 sm:$0xff]   ;;  %v7187_v20 = vld [vmem:[%s10913_s1 + $0x540] ss:$16 sps:$4 sm:$0xff]  }
  0x45   :  { %4939 = vmatprep.subr.bf16.mxu1 %v7120_v21  ;;  %4928 = vmatprep.mubr.bf16.mxu0 %v8572_v53  ;;  %v7190_v21 = vld [vmem:[%s10913_s1 + $0x740] ss:$16 sps:$4 sm:$0xff]  }
  0x46   :  { %4969 = vmatprep.mubr.bf16.mxu1 %v8582_v57 }
  0x47   :  { %4899 = vmatpush1.bf16.msra.mxu0 %v7115_v22  ;;  %v7195_v22 = vld [vmem:[%s10913_s1 + $0x524] ss:$16 sps:$4 sm:$0xff]  }
  0x48   :  { %4940 = vmatpush1.bf16.msra.mxu1 %v7118_v23  ;;  %4900 = vmatprep.subr.bf16.mxu0 %v7123_v24  ;;  %v7198_v23 = vld [vmem:[%s10913_s1 + $0x724] ss:$16 sps:$4 sm:$0xff]   ;;  %v7193_v24 = vld [vmem:[%s10913_s1 + $0x520] ss:$16 sps:$4 sm:$0xff]  }
  0x49   :  { %4941 = vmatprep.subr.bf16.mxu1 %v7126_v25  ;;  %v7196_v25 = vld [vmem:[%s10913_s1 + $0x720] ss:$16 sps:$4 sm:$0xff]  }
  0x4b   :  { %4901 = vmatpush1.bf16.msra.mxu0 %v7121_v26  ;;  %v7201_v26 = vld [vmem:[%s10913_s1 + $0x504] ss:$16 sps:$4 sm:$0xff]  }
  0x4c   :  { %4942 = vmatpush1.bf16.msra.mxu1 %v7124_v27  ;;  %4902 = vmatprep.subr.bf16.mxu0 %v7129_v28  ;;  %v7204_v27 = vld [vmem:[%s10913_s1 + $0x704] ss:$16 sps:$4 sm:$0xff]   ;;  %v7199_v28 = vld [vmem:[%s10913_s1 + $0x500] ss:$16 sps:$4 sm:$0xff]  }
  0x4d   :  { %4943 = vmatprep.subr.bf16.mxu1 %v7132_v29  ;;  %v7202_v29 = vld [vmem:[%s10913_s1 + $0x700] ss:$16 sps:$4 sm:$0xff]  }
  0x4f   :  { %4903 = vmatpush1.bf16.msra.mxu0 %v7127_v30  ;;  %v7208_v30 = vld [vmem:[%s10913_s1 + $0x8e4] ss:$16 sps:$4 sm:$0xff]  }
  0x50   :  { %4944 = vmatpush1.bf16.msra.mxu1 %v7130_v31  ;;  %4904 = vmatprep.subr.bf16.mxu0 %v7135_v32  ;;  %v7211_v31 = vld [vmem:[%s10913_s1 + $0xae4] ss:$16 sps:$4 sm:$0xff]   ;;  %v8690_v32 = vpack.c.bf16 %v8553_v44, %v8553_v44 }
  0x51   :  { %4945 = vmatprep.subr.bf16.mxu1 %v7138_v33  ;;  %v8694_v33 = vpack.c.bf16 %v8564_v50, %v8564_v50 }
  0x53   :  { %4905 = vmatpush1.bf16.msra.mxu0 %v7133_v34  ;;  %v7206_v34 = vld [vmem:[%s10913_s1 + $0x8e0] ss:$16 sps:$4 sm:$0xff]  }
  0x54   :  { %4946 = vmatpush1.bf16.msra.mxu1 %v7136_v35  ;;  %4906 = vmatprep.subr.bf16.mxu0 %v7141_v36  ;;  %v7209_v35 = vld [vmem:[%s10913_s1 + $0xae0] ss:$16 sps:$4 sm:$0xff]   ;;  %v7214_v36 = vld [vmem:[%s10913_s1 + $0x8c4] ss:$16 sps:$4 sm:$0xff]  }
  0x55   :  { %4947 = vmatprep.subr.bf16.mxu1 %v7144_v37  ;;  %v24_v37 = vld [vmem:[%s10912_s0 + $0x10] sm:$0xff] }
  0x57   :  { %4907 = vmatpush1.bf16.msra.mxu0 %v7139_v38  ;;  %v7217_v38 = vld [vmem:[%s10913_s1 + $0xac4] ss:$16 sps:$4 sm:$0xff]  }
  0x58   :  { %4948 = vmatpush1.bf16.msra.mxu1 %v7142_v39  ;;  %4908 = vmatprep.subr.bf16.mxu0 %v7147_v40  ;;  %v8712_v39 = vrot.slane %v24_v37, %v8392_v49  ;;  %v68_v40 = vcombine.high %v24_v37, %v24_v37  ;;  %v7281_v37 = vld [vmem:[%s10913_s1 + $0xb60] ss:$16 sps:$4 sm:$0xff]  }
  0x59   :  { %4949 = vmatprep.subr.bf16.mxu1 %v7150_v41  ;;  %v7212_v41 = vld [vmem:[%s10913_s1 + $0x8c0] ss:$16 sps:$4 sm:$0xff]  }
  0x5a   :  { %v83_v42 = vcombine.high %v8712_v39, %v8712_v39  ;;  %v8722_v44 = vrot.slane %v68_v40, %v8392_v49  ;;  %v7289_v40 = vld [vmem:[%s10913_s1 + $0xb44] ss:$16 sps:$4 sm:$0xff]  }
  0x5b   :  { %4909 = vmatpush1.bf16.msra.mxu0 %v7145_v46  ;;  %v7220_v46 = vld [vmem:[%s10913_s1 + $0x8a4] ss:$16 sps:$4 sm:$0xff]  }
  0x5c   :  { %4950 = vmatpush1.bf16.msra.mxu1 %v7148_v47  ;;  %4910 = vmatprep.subr.bf16.mxu0 %v7153_v51  ;;  %v7223_v47 = vld [vmem:[%s10913_s1 + $0xaa4] ss:$16 sps:$4 sm:$0xff]   ;;  %v8733_v48 = vpack.c.bf16 %v83_v42, %v83_v42  ;;  %v84_v50 = vcombine.high %v8722_v44, %v8722_v44  ;;  %v7218_v51 = vld [vmem:[%s10913_s1 + $0x8a0] ss:$16 sps:$4 sm:$0xff]   ;;  %v25_v42 = vld [vmem:[%s10912_s0 + $0x18] sm:$0xff] }
  0x5d   :  { %4951 = vmatprep.subr.bf16.mxu1 %v7156_v52 }
  0x5e   :  { %v8741_v52 = vpack.c.bf16 %v84_v50, %v84_v50  ;;  %v85_v50 = vcombine.high %v25_v42, %v25_v42 }
  0x5f   :  { %4911 = vmatpush1.bf16.msra.mxu0 %v7151_v55  ;;  %v7226_v55 = vld [vmem:[%s10913_s1 + $0x884] ss:$16 sps:$4 sm:$0xff]  }
  0x60   :  { %4952 = vmatpush1.bf16.msra.mxu1 %v7154_v56  ;;  %4912 = vmatprep.subr.bf16.mxu0 %v7159_v58  ;;  %v7229_v56 = vld [vmem:[%s10913_s1 + $0xa84] ss:$16 sps:$4 sm:$0xff]   ;;  %v7224_v58 = vld [vmem:[%s10913_s1 + $0x880] ss:$16 sps:$4 sm:$0xff]  }
  0x61   :  { %4953 = vmatprep.subr.bf16.mxu1 %v7162_v59  ;;  %v7227_v59 = vld [vmem:[%s10913_s1 + $0xa80] ss:$16 sps:$4 sm:$0xff]  }
  0x63   :  { %4913 = vmatpush2.bf16.msra.mxu0 %v7157_v60  ;;  %v7232_v60 = vld [vmem:[%s10913_s1 + $0x864] ss:$16 sps:$4 sm:$0xff]  }
  0x64   :  { %4954 = vmatpush2.bf16.msra.mxu1 %v7160_v61  ;;  %4914 = vmatprep.subr.bf16.mxu0 %v7165_v63  ;;  %v7235_v61 = vld [vmem:[%s10913_s1 + $0xa64] ss:$16 sps:$4 sm:$0xff]   ;;  %v7230_v63 = vld [vmem:[%s10913_s1 + $0x860] ss:$16 sps:$4 sm:$0xff]  }
  0x65   :  { %4955 = vmatprep.subr.bf16.mxu1 %v7168_v0  ;;  %v7233_v0 = vld [vmem:[%s10913_s1 + $0xa60] ss:$16 sps:$4 sm:$0xff]  }
  0x67   :  { %4915 = vmatpush2.bf16.msra.mxu0 %v7163_v1  ;;  %v7238_v1 = vld [vmem:[%s10913_s1 + $0x844] ss:$16 sps:$4 sm:$0xff]  }
  0x68   :  { %4956 = vmatpush2.bf16.msra.mxu1 %v7166_v2  ;;  %4916 = vmatprep.subr.bf16.mxu0 %v7171_v4  ;;  %v7241_v2 = vld [vmem:[%s10913_s1 + $0xa44] ss:$16 sps:$4 sm:$0xff]   ;;  %v7236_v4 = vld [vmem:[%s10913_s1 + $0x840] ss:$16 sps:$4 sm:$0xff]  }
  0x69   :  { %4957 = vmatprep.subr.bf16.mxu1 %v7174_v5  ;;  %v7239_v5 = vld [vmem:[%s10913_s1 + $0xa40] ss:$16 sps:$4 sm:$0xff]  }
  0x6b   :  { %4917 = vmatpush2.bf16.msra.mxu0 %v7169_v6  ;;  %v7244_v6 = vld [vmem:[%s10913_s1 + $0x824] ss:$16 sps:$4 sm:$0xff]  }
  0x6c   :  { %4958 = vmatpush2.bf16.msra.mxu1 %v7172_v7  ;;  %4918 = vmatprep.subr.bf16.mxu0 %v7177_v8  ;;  %v7247_v7 = vld [vmem:[%s10913_s1 + $0xa24] ss:$16 sps:$4 sm:$0xff]   ;;  %v7242_v8 = vld [vmem:[%s10913_s1 + $0x820] ss:$16 sps:$4 sm:$0xff]  }
  0x6d   :  { %4959 = vmatprep.subr.bf16.mxu1 %v7180_v9  ;;  %v7245_v9 = vld [vmem:[%s10913_s1 + $0xa20] ss:$16 sps:$4 sm:$0xff]  }
  0x6f   :  { %4919 = vmatpush2.bf16.msra.mxu0 %v7175_v10  ;;  %v7250_v10 = vld [vmem:[%s10913_s1 + $0x804] ss:$16 sps:$4 sm:$0xff]  }
  0x70   :  { %4960 = vmatpush2.bf16.msra.mxu1 %v7178_v11  ;;  %4920 = vmatprep.subr.bf16.mxu0 %v7183_v12  ;;  %v7253_v11 = vld [vmem:[%s10913_s1 + $0xa04] ss:$16 sps:$4 sm:$0xff]   ;;  %v7248_v12 = vld [vmem:[%s10913_s1 + $0x800] ss:$16 sps:$4 sm:$0xff]  }
  0x71   :  { %4961 = vmatprep.subr.bf16.mxu1 %v7186_v13  ;;  %v7251_v13 = vld [vmem:[%s10913_s1 + $0xa00] ss:$16 sps:$4 sm:$0xff]  }
  0x73   :  { %4921 = vmatpush2.bf16.msra.mxu0 %v7181_v14  ;;  %v7256_v14 = vld [vmem:[%s10913_s1 + $0x9e4] ss:$16 sps:$4 sm:$0xff]  }
  0x74   :  { %4962 = vmatpush2.bf16.msra.mxu1 %v7184_v15  ;;  %4922 = vmatprep.subr.bf16.mxu0 %v7189_v18  ;;  %v7259_v15 = vld [vmem:[%s10913_s1 + $0xbe4] ss:$16 sps:$4 sm:$0xff]   ;;  %v7254_v18 = vld [vmem:[%s10913_s1 + $0x9e0] ss:$16 sps:$4 sm:$0xff]  }
  0x75   :  { %4963 = vmatprep.subr.bf16.mxu1 %v7192_v19  ;;  %v7257_v19 = vld [vmem:[%s10913_s1 + $0xbe0] ss:$16 sps:$4 sm:$0xff]  }
  0x77   :  { %4923 = vmatpush2.bf16.msra.mxu0 %v7187_v20  ;;  %v7262_v20 = vld [vmem:[%s10913_s1 + $0x9c4] ss:$16 sps:$4 sm:$0xff]  }
  0x78   :  { %4964 = vmatpush2.bf16.msra.mxu1 %v7190_v21  ;;  %4924 = vmatprep.subr.bf16.mxu0 %v7195_v22  ;;  %v7265_v21 = vld [vmem:[%s10913_s1 + $0xbc4] ss:$16 sps:$4 sm:$0xff]   ;;  %v7260_v22 = vld [vmem:[%s10913_s1 + $0x9c0] ss:$16 sps:$4 sm:$0xff]  }
  0x79   :  { %4965 = vmatprep.subr.bf16.mxu1 %v7198_v23  ;;  %v7263_v23 = vld [vmem:[%s10913_s1 + $0xbc0] ss:$16 sps:$4 sm:$0xff]  }
  0x7b   :  { %4925 = vmatpush2.bf16.msra.mxu0 %v7193_v24  ;;  %v7268_v24 = vld [vmem:[%s10913_s1 + $0x9a4] ss:$16 sps:$4 sm:$0xff]  }
  0x7c   :  { %4966 = vmatpush2.bf16.msra.mxu1 %v7196_v25  ;;  %4926 = vmatprep.subr.bf16.mxu0 %v7201_v26  ;;  %v7271_v25 = vld [vmem:[%s10913_s1 + $0xba4] ss:$16 sps:$4 sm:$0xff]   ;;  %v7266_v26 = vld [vmem:[%s10913_s1 + $0x9a0] ss:$16 sps:$4 sm:$0xff]  }
  0x7d   :  { %4967 = vmatprep.subr.bf16.mxu1 %v7204_v27  ;;  %v7269_v27 = vld [vmem:[%s10913_s1 + $0xba0] ss:$16 sps:$4 sm:$0xff]  }
  0x7f   :  { %4927 = vmatpush2.bf16.msra.mxu0 %v7199_v28  ;;  %v7274_v28 = vld [vmem:[%s10913_s1 + $0x984] ss:$16 sps:$4 sm:$0xff]  }
  0x80   :  { %4968 = vmatpush2.bf16.msra.mxu1 %v7202_v29  ;;  %4978 = vmatprep.subr.bf16.mxu0 %v7208_v30  ;;  %v7277_v29 = vld [vmem:[%s10913_s1 + $0xb84] ss:$16 sps:$4 sm:$0xff]   ;;  %v7272_v30 = vld [vmem:[%s10913_s1 + $0x980] ss:$16 sps:$4 sm:$0xff]  }
  0x81   :  { %5019 = vmatprep.subr.bf16.mxu1 %v7211_v31  ;;  %v7275_v31 = vld [vmem:[%s10913_s1 + $0xb80] ss:$16 sps:$4 sm:$0xff]  }
  0x82   :  { %4929 = vmatmul.mubr.bf16.vlgmr.msra.gmra.mxu0 %v8690_v32 }
  0x83   :  { %4970 = vmatmul.mubr.bf16.vlgmr.msra.gmra.mxu1 %v8694_v33  ;;  %4979 = vmatpush1.bf16.msra.mxu0 %v7206_v34  ;;  %v7280_v34 = vld [vmem:[%s10913_s1 + $0x964] ss:$16 sps:$4 sm:$0xff]  }
  0x84   :  { %5020 = vmatpush1.bf16.msra.mxu1 %v7209_v35  ;;  %4980 = vmatprep.subr.bf16.mxu0 %v7214_v36  ;;  %v7283_v35 = vld [vmem:[%s10913_s1 + $0xb64] ss:$16 sps:$4 sm:$0xff]   ;;  %v7278_v36 = vld [vmem:[%s10913_s1 + $0x960] ss:$16 sps:$4 sm:$0xff]  }
  0x85   :  { %5021 = vmatprep.subr.bf16.mxu1 %v7217_v38  ;;  %5010 = vmatprep.mubr.bf16.mxu0 %v8733_v48  ;;  %v7286_v38 = vld [vmem:[%s10913_s1 + $0x944] ss:$16 sps:$4 sm:$0xff]  }
  0x86   :  { %5051 = vmatprep.mubr.bf16.mxu1 %v8741_v52 }
  0x87   :  { %4981 = vmatpush1.bf16.msra.mxu0 %v7212_v41  ;;  %v7284_v41 = vld [vmem:[%s10913_s1 + $0x940] ss:$16 sps:$4 sm:$0xff]  }
  0x88   :  { %5022 = vmatpush1.bf16.msra.mxu1 %v7215_v45  ;;  %4982 = vmatprep.subr.bf16.mxu0 %v7220_v46  ;;  %v7287_v45 = vld [vmem:[%s10913_s1 + $0xb40] ss:$16 sps:$4 sm:$0xff]   ;;  %v7292_v46 = vld [vmem:[%s10913_s1 + $0x924] ss:$16 sps:$4 sm:$0xff]  }
  0x89   :  { %5023 = vmatprep.subr.bf16.mxu1 %v7223_v47  ;;  %v7295_v47 = vld [vmem:[%s10913_s1 + $0xb24] ss:$16 sps:$4 sm:$0xff]  }
  0x8b   :  { %4983 = vmatpush1.bf16.msra.mxu0 %v7218_v51  ;;  %v7290_v51 = vld [vmem:[%s10913_s1 + $0x920] ss:$16 sps:$4 sm:$0xff]  }
  0x8c   :  { %5024 = vmatpush1.bf16.msra.mxu1 %v7221_v54  ;;  %4984 = vmatprep.subr.bf16.mxu0 %v7226_v55  ;;  %v7293_v54 = vld [vmem:[%s10913_s1 + $0xb20] ss:$16 sps:$4 sm:$0xff]   ;;  %v7298_v55 = vld [vmem:[%s10913_s1 + $0x904] ss:$16 sps:$4 sm:$0xff]  }
  0x8d   :  { %5025 = vmatprep.subr.bf16.mxu1 %v7229_v56  ;;  %v7301_v56 = vld [vmem:[%s10913_s1 + $0xb04] ss:$16 sps:$4 sm:$0xff]  }
  0x8f   :  { %4985 = vmatpush1.bf16.msra.mxu0 %v7224_v58  ;;  %v8901_v58 = vrot.slane %v25_v42, %v8392_v49  ;;  %v7356_v42 = vld [vmem:[%s10913_s1 + $0xfe4] ss:$16 sps:$4 sm:$0xff]  }
  0x90   :  { %5026 = vmatpush1.bf16.msra.mxu1 %v7227_v59  ;;  %4986 = vmatprep.subr.bf16.mxu0 %v7232_v60  ;;  %v8904_v59 = vrot.slane %v85_v50, %v8392_v49  ;;  %v7296_v60 = vld [vmem:[%s10913_s1 + $0x900] ss:$16 sps:$4 sm:$0xff]   ;;  %v7362_v50 = vld [vmem:[%s10913_s1 + $0xfc4] ss:$16 sps:$4 sm:$0xff]  }
  0x91   :  { %5027 = vmatprep.subr.bf16.mxu1 %v7235_v61  ;;  %v7299_v61 = vld [vmem:[%s10913_s1 + $0xb00] ss:$16 sps:$4 sm:$0xff]  }
  0x93   :  { %4987 = vmatpush1.bf16.msra.mxu0 %v7230_v63  ;;  %v7305_v63 = vld [vmem:[%s10913_s1 + $0xce4] ss:$16 sps:$4 sm:$0xff]  }
  0x94   :  { %5028 = vmatpush1.bf16.msra.mxu1 %v7233_v0  ;;  %4988 = vmatprep.subr.bf16.mxu0 %v7238_v1  ;;  %v7308_v0 = vld [vmem:[%s10913_s1 + $0xee4] ss:$16 sps:$4 sm:$0xff]   ;;  %v100_v1 = vcombine.high %v8901_v58, %v8901_v58 }
  0x95   :  { %5029 = vmatprep.subr.bf16.mxu1 %v7241_v2  ;;  %v101_v2 = vcombine.high %v8904_v59, %v8904_v59 }
  0x97   :  { %4989 = vmatpush1.bf16.msra.mxu0 %v7236_v4  ;;  %v8924_v4 = vpack.c.bf16 %v8712_v39, %v8712_v39  ;;  %v7311_v39 = vld [vmem:[%s10913_s1 + $0xcc4] ss:$16 sps:$4 sm:$0xff]  }
  0x98   :  { %5030 = vmatpush1.bf16.msra.mxu1 %v7239_v5  ;;  %4990 = vmatprep.subr.bf16.mxu0 %v7244_v6  ;;  %v8928_v5 = vpack.c.bf16 %v8722_v44, %v8722_v44  ;;  %v7303_v6 = vld [vmem:[%s10913_s1 + $0xce0] ss:$16 sps:$4 sm:$0xff]   ;;  %v7314_v44 = vld [vmem:[%s10913_s1 + $0xec4] ss:$16 sps:$4 sm:$0xff]  }
  0x99   :  { %5031 = vmatprep.subr.bf16.mxu1 %v7247_v7  ;;  %v7306_v7 = vld [vmem:[%s10913_s1 + $0xee0] ss:$16 sps:$4 sm:$0xff]  }
  0x9b   :  { %4991 = vmatpush1.bf16.msra.mxu0 %v7242_v8  ;;  %v8942_v8 = vpack.c.bf16 %v100_v1, %v100_v1  ;;  %v7369_v1 = vld [vmem:[%s10913_s1 + $0xd80] ss:$16 sps:$4 sm:$0xff]  }
  0x9c   :  { %5032 = vmatpush1.bf16.msra.mxu1 %v7245_v9  ;;  %4992 = vmatprep.subr.bf16.mxu0 %v7250_v10  ;;  %v8944_v9 = vpack.c.bf16 %v101_v2, %v101_v2  ;;  %v7309_v10 = vld [vmem:[%s10913_s1 + $0xcc0] ss:$16 sps:$4 sm:$0xff]  }
  0x9d   :  { %5033 = vmatprep.subr.bf16.mxu1 %v7253_v11  ;;  %v7312_v11 = vld [vmem:[%s10913_s1 + $0xec0] ss:$16 sps:$4 sm:$0xff]  }
  0x9e   :  { %v7372_v2 = vld [vmem:[%s10913_s1 + $0xf80] ss:$16 sps:$4 sm:$0xff]  }
  0x9f   :  { %4993 = vmatpush1.bf16.msra.mxu0 %v7248_v12  ;;  %v7317_v12 = vld [vmem:[%s10913_s1 + $0xca4] ss:$16 sps:$4 sm:$0xff]  }
  0xa0   :  { %5034 = vmatpush1.bf16.msra.mxu1 %v7251_v13  ;;  %4994 = vmatprep.subr.bf16.mxu0 %v7256_v14  ;;  %v7320_v13 = vld [vmem:[%s10913_s1 + $0xea4] ss:$16 sps:$4 sm:$0xff]   ;;  %v7315_v14 = vld [vmem:[%s10913_s1 + $0xca0] ss:$16 sps:$4 sm:$0xff]  }
  0xa1   :  { %5035 = vmatprep.subr.bf16.mxu1 %v7259_v15  ;;  %v7318_v15 = vld [vmem:[%s10913_s1 + $0xea0] ss:$16 sps:$4 sm:$0xff]  }
  0xa3   :  { %4995 = vmatpush2.bf16.msra.mxu0 %v7254_v18  ;;  %v7323_v18 = vld [vmem:[%s10913_s1 + $0xc84] ss:$16 sps:$4 sm:$0xff]  }
  0xa4   :  { %5036 = vmatpush2.bf16.msra.mxu1 %v7257_v19  ;;  %4996 = vmatprep.subr.bf16.mxu0 %v7262_v20  ;;  %v7326_v19 = vld [vmem:[%s10913_s1 + $0xe84] ss:$16 sps:$4 sm:$0xff]   ;;  %v7321_v20 = vld [vmem:[%s10913_s1 + $0xc80] ss:$16 sps:$4 sm:$0xff]  }
  0xa5   :  { %5037 = vmatprep.subr.bf16.mxu1 %v7265_v21  ;;  %v7324_v21 = vld [vmem:[%s10913_s1 + $0xe80] ss:$16 sps:$4 sm:$0xff]  }
  0xa7   :  { %4997 = vmatpush2.bf16.msra.mxu0 %v7260_v22  ;;  %v7329_v22 = vld [vmem:[%s10913_s1 + $0xc64] ss:$16 sps:$4 sm:$0xff]  }
  0xa8   :  { %5038 = vmatpush2.bf16.msra.mxu1 %v7263_v23  ;;  %4998 = vmatprep.subr.bf16.mxu0 %v7268_v24  ;;  %v7332_v23 = vld [vmem:[%s10913_s1 + $0xe64] ss:$16 sps:$4 sm:$0xff]   ;;  %v7327_v24 = vld [vmem:[%s10913_s1 + $0xc60] ss:$16 sps:$4 sm:$0xff]  }
  0xa9   :  { %5039 = vmatprep.subr.bf16.mxu1 %v7271_v25  ;;  %v7330_v25 = vld [vmem:[%s10913_s1 + $0xe60] ss:$16 sps:$4 sm:$0xff]  }
  0xab   :  { %4999 = vmatpush2.bf16.msra.mxu0 %v7266_v26  ;;  %v7335_v26 = vld [vmem:[%s10913_s1 + $0xc44] ss:$16 sps:$4 sm:$0xff]  }
  0xac   :  { %5040 = vmatpush2.bf16.msra.mxu1 %v7269_v27  ;;  %5000 = vmatprep.subr.bf16.mxu0 %v7274_v28  ;;  %v7338_v27 = vld [vmem:[%s10913_s1 + $0xe44] ss:$16 sps:$4 sm:$0xff]   ;;  %v7333_v28 = vld [vmem:[%s10913_s1 + $0xc40] ss:$16 sps:$4 sm:$0xff]  }
  0xad   :  { %5041 = vmatprep.subr.bf16.mxu1 %v7277_v29  ;;  %v7336_v29 = vld [vmem:[%s10913_s1 + $0xe40] ss:$16 sps:$4 sm:$0xff]  }
  0xaf   :  { %5001 = vmatpush2.bf16.msra.mxu0 %v7272_v30  ;;  %v7341_v30 = vld [vmem:[%s10913_s1 + $0xc24] ss:$16 sps:$4 sm:$0xff]  }
  0xb0   :  { %5042 = vmatpush2.bf16.msra.mxu1 %v7275_v31  ;;  %5002 = vmatprep.subr.bf16.mxu0 %v7280_v34  ;;  %v7344_v31 = vld [vmem:[%s10913_s1 + $0xe24] ss:$16 sps:$4 sm:$0xff]   ;;  %v7339_v34 = vld [vmem:[%s10913_s1 + $0xc20] ss:$16 sps:$4 sm:$0xff]  }
  0xb1   :  { %5043 = vmatprep.subr.bf16.mxu1 %v7283_v35  ;;  %v7342_v35 = vld [vmem:[%s10913_s1 + $0xe20] ss:$16 sps:$4 sm:$0xff]  }
  0xb3   :  { %5003 = vmatpush2.bf16.msra.mxu0 %v7278_v36  ;;  %v7347_v36 = vld [vmem:[%s10913_s1 + $0xc04] ss:$16 sps:$4 sm:$0xff]  }
  0xb4   :  { %5044 = vmatpush2.bf16.msra.mxu1 %v7281_v37  ;;  %5004 = vmatprep.subr.bf16.mxu0 %v7286_v38  ;;  %v7350_v37 = vld [vmem:[%s10913_s1 + $0xe04] ss:$16 sps:$4 sm:$0xff]   ;;  %v7345_v38 = vld [vmem:[%s10913_s1 + $0xc00] ss:$16 sps:$4 sm:$0xff]  }
  0xb5   :  { %5045 = vmatprep.subr.bf16.mxu1 %v7289_v40  ;;  %v7348_v40 = vld [vmem:[%s10913_s1 + $0xe00] ss:$16 sps:$4 sm:$0xff]  }
  0xb7   :  { %5005 = vmatpush2.bf16.msra.mxu0 %v7284_v41  ;;  %v7353_v41 = vld [vmem:[%s10913_s1 + $0xde4] ss:$16 sps:$4 sm:$0xff]  }
  0xb8   :  { %5046 = vmatpush2.bf16.msra.mxu1 %v7287_v45  ;;  %5006 = vmatprep.subr.bf16.mxu0 %v7292_v46  ;;  %v7351_v45 = vld [vmem:[%s10913_s1 + $0xde0] ss:$16 sps:$4 sm:$0xff]  }
  0xb9   :  { %5047 = vmatprep.subr.bf16.mxu1 %v7295_v47  ;;  %v7354_v46 = vld [vmem:[%s10913_s1 + $0xfe0] ss:$16 sps:$4 sm:$0xff]   ;;  %v7359_v47 = vld [vmem:[%s10913_s1 + $0xdc4] ss:$16 sps:$4 sm:$0xff]  }
  0xbb   :  { %5007 = vmatpush2.bf16.msra.mxu0 %v7290_v51  ;;  %v7357_v51 = vld [vmem:[%s10913_s1 + $0xdc0] ss:$16 sps:$4 sm:$0xff]  }
  0xbc   :  { %5048 = vmatpush2.bf16.msra.mxu1 %v7293_v54  ;;  %5008 = vmatprep.subr.bf16.mxu0 %v7298_v55  ;;  %v7360_v54 = vld [vmem:[%s10913_s1 + $0xfc0] ss:$16 sps:$4 sm:$0xff]   ;;  %v7365_v55 = vld [vmem:[%s10913_s1 + $0xda4] ss:$16 sps:$4 sm:$0xff]  }
  0xbd   :  { %5049 = vmatprep.subr.bf16.mxu1 %v7301_v56  ;;  %v7368_v56 = vld [vmem:[%s10913_s1 + $0xfa4] ss:$16 sps:$4 sm:$0xff]  }
  0xbf   :  { %5009 = vmatpush2.bf16.msra.mxu0 %v7296_v60  ;;  %v7363_v60 = vld [vmem:[%s10913_s1 + $0xda0] ss:$16 sps:$4 sm:$0xff]  }
  0xc0   :  { %5050 = vmatpush2.bf16.msra.mxu1 %v7299_v61  ;;  %5060 = vmatprep.subr.bf16.mxu0 %v7305_v63  ;;  %v7366_v61 = vld [vmem:[%s10913_s1 + $0xfa0] ss:$16 sps:$4 sm:$0xff]   ;;  %v7371_v63 = vld [vmem:[%s10913_s1 + $0xd84] ss:$16 sps:$4 sm:$0xff]  }
  0xc1   :  { %5101 = vmatprep.subr.bf16.mxu1 %v7308_v0  ;;  %v7374_v0 = vld [vmem:[%s10913_s1 + $0xf84] ss:$16 sps:$4 sm:$0xff]  }
  0xc2   :  { %5011 = vmatmul.mubr.bf16.vlgmr.msra.gmra.mxu0 %v8924_v4 }
  0xc3   :  { %5052 = vmatmul.mubr.bf16.vlgmr.msra.gmra.mxu1 %v8928_v5  ;;  %5061 = vmatpush1.bf16.msra.mxu0 %v7303_v6  ;;  %v7377_v6 = vld [vmem:[%s10913_s1 + $0xd64] ss:$16 sps:$4 sm:$0xff]  }
  0xc4   :  { %5102 = vmatpush1.bf16.msra.mxu1 %v7306_v7  ;;  %5062 = vmatprep.subr.bf16.mxu0 %v7311_v39  ;;  %v7380_v7 = vld [vmem:[%s10913_s1 + $0xf64] ss:$16 sps:$4 sm:$0xff]   ;;  %v7375_v39 = vld [vmem:[%s10913_s1 + $0xd60] ss:$16 sps:$4 sm:$0xff]  }
  0xc5   :  { %5103 = vmatprep.subr.bf16.mxu1 %v7314_v44  ;;  %5092 = vmatprep.mubr.bf16.mxu0 %v8942_v8  ;;  %v7378_v44 = vld [vmem:[%s10913_s1 + $0xf60] ss:$16 sps:$4 sm:$0xff]  }
  0xc6   :  { %5133 = vmatprep.mubr.bf16.mxu1 %v8944_v9 }
  0xc7   :  { %5063 = vmatpush1.bf16.msra.mxu0 %v7309_v10  ;;  %v7383_v10 = vld [vmem:[%s10913_s1 + $0xd44] ss:$16 sps:$4 sm:$0xff]  }
  0xc8   :  { %5104 = vmatpush1.bf16.msra.mxu1 %v7312_v11  ;;  %5064 = vmatprep.subr.bf16.mxu0 %v7317_v12  ;;  %v7386_v11 = vld [vmem:[%s10913_s1 + $0xf44] ss:$16 sps:$4 sm:$0xff]  }
  0xc9   :  { %5105 = vmatprep.subr.bf16.mxu1 %v7320_v13  ;;  %v26_v12 = vld [vmem:[%s10912_s0 + $0x20] sm:$0xff] }
  0xca   :  { %v7381_v13 = vld [vmem:[%s10913_s1 + $0xd40] ss:$16 sps:$4 sm:$0xff]  }
  0xcb   :  { %5065 = vmatpush1.bf16.msra.mxu0 %v7315_v14  ;;  %v7384_v14 = vld [vmem:[%s10913_s1 + $0xf40] ss:$16 sps:$4 sm:$0xff]  }
  0xcc   :  { %5106 = vmatpush1.bf16.msra.mxu1 %v7318_v15  ;;  %5066 = vmatprep.subr.bf16.mxu0 %v7323_v18  ;;  %v7389_v15 = vld [vmem:[%s10913_s1 + $0xd24] ss:$16 sps:$4 sm:$0xff]  }
  0xcd   :  { %5107 = vmatprep.subr.bf16.mxu1 %v7326_v19  ;;  %v7392_v18 = vld [vmem:[%s10913_s1 + $0xf24] ss:$16 sps:$4 sm:$0xff]   ;;  %v102_v19 = vcombine.high %v26_v12, %v26_v12 }
  0xcf   :  { %5067 = vmatpush1.bf16.msra.mxu0 %v7321_v20  ;;  %v7387_v20 = vld [vmem:[%s10913_s1 + $0xd20] ss:$16 sps:$4 sm:$0xff]  }
  0xd0   :  { %5108 = vmatpush1.bf16.msra.mxu1 %v7324_v21  ;;  %5068 = vmatprep.subr.bf16.mxu0 %v7329_v22  ;;  %v7390_v21 = vld [vmem:[%s10913_s1 + $0xf20] ss:$16 sps:$4 sm:$0xff]   ;;  %v7395_v22 = vld [vmem:[%s10913_s1 + $0xd04] ss:$16 sps:$4 sm:$0xff]  }
  0xd1   :  { %5109 = vmatprep.subr.bf16.mxu1 %v7332_v23  ;;  %v7398_v23 = vld [vmem:[%s10913_s1 + $0xf04] ss:$16 sps:$4 sm:$0xff]  }
  0xd3   :  { %5069 = vmatpush1.bf16.msra.mxu0 %v7327_v24  ;;  %v9122_v24 = vrot.slane %v26_v12, %v8392_v49 }
  0xd4   :  { %5110 = vmatpush1.bf16.msra.mxu1 %v7330_v25  ;;  %5070 = vmatprep.subr.bf16.mxu0 %v7335_v26  ;;  %v9125_v25 = vrot.slane %v102_v19, %v8392_v49  ;;  %v7393_v26 = vld [vmem:[%s10913_s1 + $0xd00] ss:$16 sps:$4 sm:$0xff]   ;;  %v7426_v19 = vld [vmem:[%s10913_s1 + $0x1064] ss:$16 sps:$4 sm:$0xff]  }
  0xd5   :  { %5111 = vmatprep.subr.bf16.mxu1 %v7338_v27  ;;  %v7396_v27 = vld [vmem:[%s10913_s1 + $0xf00] ss:$16 sps:$4 sm:$0xff]  }
  0xd7   :  { %5071 = vmatpush1.bf16.msra.mxu0 %v7333_v28  ;;  %v952_v28 = vld [vmem:[%s10914_s2] sm:$0xf] }
  0xd8   :  { %5112 = vmatpush1.bf16.msra.mxu1 %v7336_v29  ;;  %5072 = vmatprep.subr.bf16.mxu0 %v7341_v30  ;;  %v956_v29 = vsub.s32 0, %v8374_v43  ;;  %v7402_v30 = vld [vmem:[%s10913_s1 + $0x10e4] ss:$16 sps:$4 sm:$0xff]  }
  0xd9   :  { %5113 = vmatprep.subr.bf16.mxu1 %v7344_v31  ;;  %v7405_v31 = vld [vmem:[%s10913_s1 + $0x12e4] ss:$16 sps:$4 sm:$0xff]  }
  0xdb   :  { %5073 = vmatpush1.bf16.msra.mxu0 %v7339_v34  ;;  %v960_v34 = vsub.s32 1, %v8374_v43 }
  0xdc   :  { %5114 = vmatpush1.bf16.msra.mxu1 %v7342_v35  ;;  %5074 = vmatprep.subr.bf16.mxu0 %v7347_v36  ;;  %v117_v35 = vcombine.high %v9122_v24, %v9122_v24  ;;  %v118_v36 = vcombine.high %v9125_v25, %v9125_v25 }
  0xdd   :  { %5115 = vmatprep.subr.bf16.mxu1 %v7350_v37  ;;  %v9150_v37 = vpack.c.bf16 %v8901_v58, %v8901_v58  ;;  %v7408_v58 = vld [vmem:[%s10913_s1 + $0x10c4] ss:$16 sps:$4 sm:$0xff]  }
  0xdf   :  { %5075 = vmatpush1.bf16.msra.mxu0 %v7345_v38  ;;  %v9154_v38 = vpack.c.bf16 %v8904_v59, %v8904_v59  ;;  %v7411_v59 = vld [vmem:[%s10913_s1 + $0x12c4] ss:$16 sps:$4 sm:$0xff]  }
  0xe0   :  { %5116 = vmatpush1.bf16.msra.mxu1 %v7348_v40  ;;  %5076 = vmatprep.subr.bf16.mxu0 %v7353_v41  ;;  %v957_v40 = vrot.slane %v952_v28, %v956_v29  ;;  %v7400_v41 = vld [vmem:[%s10913_s1 + $0x10e0] ss:$16 sps:$4 sm:$0xff]   ;;  %v7438_v29 = vld [vmem:[%s10913_s1 + $0x1024] ss:$16 sps:$4 sm:$0xff]  }
  0xe1   :  { %5117 = vmatprep.subr.bf16.mxu1 %v7356_v42  ;;  %v7403_v42 = vld [vmem:[%s10913_s1 + $0x12e0] ss:$16 sps:$4 sm:$0xff]  }
  0xe3   :  { %5077 = vmatpush2.bf16.msra.mxu0 %v7351_v45  ;;  %v961_v45 = vrot.slane %v952_v28, %v960_v34  ;;  %v7433_v28 = vld [vmem:[%s10913_s1 + $0x1240] ss:$16 sps:$4 sm:$0xff]  }
  0xe4   :  { %5118 = vmatpush2.bf16.msra.mxu1 %v7354_v46  ;;  %5078 = vmatprep.subr.bf16.mxu0 %v7359_v47  ;;  %v9168_v46 = vpack.c.bf16 %v117_v35, %v117_v35  ;;  %v9170_v47 = vpack.c.bf16 %v118_v36, %v118_v36  ;;  %v7439_v34 = vld [vmem:[%s10913_s1 + $0x1220] ss:$16 sps:$4 sm:$0xff]   ;;  %v7444_v35 = vld [vmem:[%s10913_s1 + $0x1004] ss:$16 sps:$4 sm:$0xff]  }
  0xe5   :  { %5119 = vmatprep.subr.bf16.mxu1 %v7362_v50  ;;  %v7447_v36 = vld [vmem:[%s10913_s1 + $0x1204] ss:$16 sps:$4 sm:$0xff]  }
  0xe7   :  { %5079 = vmatpush2.bf16.msra.mxu0 %v7357_v51 }
  0xe8   :  { %5120 = vmatpush2.bf16.msra.mxu1 %v7360_v54  ;;  %5080 = vmatprep.subr.bf16.mxu0 %v7365_v55  ;;  %v7406_v54 = vld [vmem:[%s10913_s1 + $0x10c0] ss:$16 sps:$4 sm:$0xff]  }
  0xe9   :  { %5121 = vmatprep.subr.bf16.mxu1 %v7368_v56  ;;  %v7409_v56 = vld [vmem:[%s10913_s1 + $0x12c0] ss:$16 sps:$4 sm:$0xff]  }
  0xeb   :  { %5081 = vmatpush2.bf16.msra.mxu0 %v7363_v60  ;;  %v7414_v60 = vld [vmem:[%s10913_s1 + $0x10a4] ss:$16 sps:$4 sm:$0xff]  }
  0xec   :  { %5122 = vmatpush2.bf16.msra.mxu1 %v7366_v61  ;;  %5082 = vmatprep.subr.bf16.mxu0 %v7371_v63 }
  0xed   :  { %5123 = vmatprep.subr.bf16.mxu1 %v7374_v0  ;;  %v7417_v0 = vld [vmem:[%s10913_s1 + $0x12a4] ss:$16 sps:$4 sm:$0xff]  }
  0xef   :  { %5083 = vmatpush2.bf16.msra.mxu0 %v7369_v1 }
  0xf0   :  { %5124 = vmatpush2.bf16.msra.mxu1 %v7372_v2  ;;  %5084 = vmatprep.subr.bf16.mxu0 %v7377_v6 }
  0xf1   :  { %5125 = vmatprep.subr.bf16.mxu1 %v7380_v7 }
  0xf3   :  { %5085 = vmatpush2.bf16.msra.mxu0 %v7375_v39  ;;  %v7412_v39 = vld [vmem:[%s10913_s1 + $0x10a0] ss:$16 sps:$4 sm:$0xff]  }
  0xf4   :  { %5126 = vmatpush2.bf16.msra.mxu1 %v7378_v44  ;;  %5086 = vmatprep.subr.bf16.mxu0 %v7383_v10  ;;  %v7415_v44 = vld [vmem:[%s10913_s1 + $0x12a0] ss:$16 sps:$4 sm:$0xff]  }
  0xf5   :  { %5127 = vmatprep.subr.bf16.mxu1 %v7386_v11 }
  0xf7   :  { %5087 = vmatpush2.bf16.msra.mxu0 %v7381_v13  ;;  %v7420_v13 = vld [vmem:[%s10913_s1 + $0x1084] ss:$16 sps:$4 sm:$0xff]  }
  0xf8   :  { %5128 = vmatpush2.bf16.msra.mxu1 %v7384_v14  ;;  %5088 = vmatprep.subr.bf16.mxu0 %v7389_v15  ;;  %v7423_v14 = vld [vmem:[%s10913_s1 + $0x1284] ss:$16 sps:$4 sm:$0xff]   ;;  %v7418_v15 = vld [vmem:[%s10913_s1 + $0x1080] ss:$16 sps:$4 sm:$0xff]  }
  0xf9   :  { %5129 = vmatprep.subr.bf16.mxu1 %v7392_v18  ;;  %v7421_v18 = vld [vmem:[%s10913_s1 + $0x1280] ss:$16 sps:$4 sm:$0xff]  }
  0xfb   :  { %5089 = vmatpush2.bf16.msra.mxu0 %v7387_v20  ;;  %v7429_v20 = vld [vmem:[%s10913_s1 + $0x1264] ss:$16 sps:$4 sm:$0xff]  }
  0xfc   :  { %5130 = vmatpush2.bf16.msra.mxu1 %v7390_v21  ;;  %5090 = vmatprep.subr.bf16.mxu0 %v7395_v22  ;;  %v7424_v21 = vld [vmem:[%s10913_s1 + $0x1060] ss:$16 sps:$4 sm:$0xff]  }
  0xfd   :  { %5131 = vmatprep.subr.bf16.mxu1 %v7398_v23  ;;  %v7427_v22 = vld [vmem:[%s10913_s1 + $0x1260] ss:$16 sps:$4 sm:$0xff]   ;;  %v7432_v23 = vld [vmem:[%s10913_s1 + $0x1044] ss:$16 sps:$4 sm:$0xff]  }
  0xff   :  { %5091 = vmatpush2.bf16.msra.mxu0 %v7393_v26  ;;  %v7435_v26 = vld [vmem:[%s10913_s1 + $0x1244] ss:$16 sps:$4 sm:$0xff]  }
 0x100   :  { %5132 = vmatpush2.bf16.msra.mxu1 %v7396_v27  ;;  %5142 = vmatprep.subr.bf16.mxu0 %v7402_v30  ;;  %v7430_v27 = vld [vmem:[%s10913_s1 + $0x1040] ss:$16 sps:$4 sm:$0xff]   ;;  %v7441_v30 = vld [vmem:[%s10913_s1 + $0x1224] ss:$16 sps:$4 sm:$0xff]  }
 0x101   :  { %5183 = vmatprep.subr.bf16.mxu1 %v7405_v31  ;;  %v7436_v31 = vld [vmem:[%s10913_s1 + $0x1020] ss:$16 sps:$4 sm:$0xff]  }
 0x102   :  { %v4848_v50 = vpop.f32.mrf.mxu0  ;;  %5093 = vmatmul.mubr.bf16.vlgmr.msra.gmra.mxu0 %v9150_v37 }
 0x103   :  { %v4889_v51 = vpop.f32.mrf.mxu1  ;;  %5134 = vmatmul.mubr.bf16.vlgmr.msra.gmra.mxu1 %v9154_v38  ;;  %v4849_v55 = vadd.f32 %v4848_v50, %v957_v40  ;;  %5143 = vmatpush1.bf16.msra.mxu0 %v7400_v41  ;;  %v7442_v40 = vld [vmem:[%s10913_s1 + $0x1000] ss:$16 sps:$4 sm:$0xff]   ;;  %v7456_v50 = vld [vmem:[%s10913_s1 + $0x11c4] ss:$16 sps:$4 sm:$0xff]  }
 0x104   :  { %5184 = vmatpush1.bf16.msra.mxu1 %v7403_v42  ;;  %v4850_v61 = vpop.f32.mrf.mxu0  ;;  %5144 = vmatprep.subr.bf16.mxu0 %v7408_v58  ;;  %v7445_v41 = vld [vmem:[%s10913_s1 + $0x1200] ss:$16 sps:$4 sm:$0xff]   ;;  %v7450_v42 = vld [vmem:[%s10913_s1 + $0x11e4] ss:$16 sps:$4 sm:$0xff]  }
 0x105   :  { %v4891_v63 = vpop.f32.mrf.mxu1  ;;  %5185 = vmatprep.subr.bf16.mxu1 %v7411_v59  ;;  %v9186_v1 = vadd.f32 %v4889_v51, %v4849_v55  ;;  %v4851_v2 = vadd.f32 %v4850_v61, %v961_v45  ;;  %5174 = vmatprep.mubr.bf16.mxu0 %v9168_v46  ;;  %v7453_v58 = vld [vmem:[%s10913_s1 + $0x13e4] ss:$16 sps:$4 sm:$0xff]   ;;  %v7448_v59 = vld [vmem:[%s10913_s1 + $0x11e0] ss:$16 sps:$4 sm:$0xff]  }
 0x106   :  { %5215 = vmatprep.mubr.bf16.mxu1 %v9170_v47  ;;  %v4852_v6 = vpop.f32.mrf.mxu0  ;;  %v7451_v45 = vld [vmem:[%s10913_s1 + $0x13e0] ss:$16 sps:$4 sm:$0xff]   ;;  %v7459_v51 = vld [vmem:[%s10913_s1 + $0x13c4] ss:$16 sps:$4 sm:$0xff]  }
 0x107   :  { %v4893_v7 = vpop.f32.mrf.mxu1  ;;  %v9196_v10 = vadd.f32 %v4891_v63, %v4851_v2  ;;  %5145 = vmatpush1.bf16.msra.mxu0 %v7406_v54  ;;  %v7454_v54 = vld [vmem:[%s10913_s1 + $0x11c0] ss:$16 sps:$4 sm:$0xff]   ;;  %v7471_v2 = vld [vmem:[%s10913_s1 + $0x1384] ss:$16 sps:$4 sm:$0xff]  }
 0x108   :  { %5186 = vmatpush1.bf16.msra.mxu1 %v7409_v56  ;;  %v4853_v11 = vpop.f32.mrf.mxu0  ;;  %5146 = vmatprep.subr.bf16.mxu0 %v7414_v60  ;;  %v7457_v55 = vld [vmem:[%s10913_s1 + $0x13c0] ss:$16 sps:$4 sm:$0xff]   ;;  %v7462_v56 = vld [vmem:[%s10913_s1 + $0x11a4] ss:$16 sps:$4 sm:$0xff]  }
 0x109   :  { %v4894_v12 = vpop.f32.mrf.mxu1  ;;  %5187 = vmatprep.subr.bf16.mxu1 %v7417_v0  ;;  %v7465_v60 = vld [vmem:[%s10913_s1 + $0x13a4] ss:$16 sps:$4 sm:$0xff]   ;;  %v7460_v61 = vld [vmem:[%s10913_s1 + $0x11a0] ss:$16 sps:$4 sm:$0xff]  }
 0x10a   :  { %v7463_v63 = vld [vmem:[%s10913_s1 + $0x13a0] ss:$16 sps:$4 sm:$0xff]   ;;  %v7468_v0 = vld [vmem:[%s10913_s1 + $0x1184] ss:$16 sps:$4 sm:$0xff]  }
 0x10b   :  { %5147 = vmatpush1.bf16.msra.mxu0 %v7412_v39  ;;  %v7466_v6 = vld [vmem:[%s10913_s1 + $0x1180] ss:$16 sps:$4 sm:$0xff]   ;;  %v7474_v39 = vld [vmem:[%s10913_s1 + $0x1164] ss:$16 sps:$4 sm:$0xff]  }
 0x10c   :  { %5188 = vmatpush1.bf16.msra.mxu1 %v7415_v44  ;;  %5148 = vmatprep.subr.bf16.mxu0 %v7420_v13  ;;  %v7469_v7 = vld [vmem:[%s10913_s1 + $0x1380] ss:$16 sps:$4 sm:$0xff]   ;;  %v7477_v44 = vld [vmem:[%s10913_s1 + $0x1364] ss:$16 sps:$4 sm:$0xff]  }
 0x10d   :  { %5189 = vmatprep.subr.bf16.mxu1 %v7423_v14  ;;  %v7472_v11 = vld [vmem:[%s10913_s1 + $0x1160] ss:$16 sps:$4 sm:$0xff]   ;;  %v7480_v13 = vld [vmem:[%s10913_s1 + $0x1144] ss:$16 sps:$4 sm:$0xff]  }
 0x10e   :  { %v7475_v12 = vld [vmem:[%s10913_s1 + $0x1360] ss:$16 sps:$4 sm:$0xff]   ;;  %v7483_v14 = vld [vmem:[%s10913_s1 + $0x1344] ss:$16 sps:$4 sm:$0xff]  }
 0x10f   :  { %5149 = vmatpush1.bf16.msra.mxu0 %v7418_v15  ;;  %v27_v15 = vld [vmem:[%s10912_s0 + $0x28] sm:$0xff] }
 0x110   :  { %5190 = vmatpush1.bf16.msra.mxu1 %v7421_v18  ;;  %5150 = vmatprep.subr.bf16.mxu0 %v7426_v19  ;;  %v7478_v18 = vld [vmem:[%s10913_s1 + $0x1140] ss:$16 sps:$4 sm:$0xff]  }
 0x111   :  { %5191 = vmatprep.subr.bf16.mxu1 %v7429_v20  ;;  %v7481_v19 = vld [vmem:[%s10913_s1 + $0x1340] ss:$16 sps:$4 sm:$0xff]   ;;  %v7486_v20 = vld [vmem:[%s10913_s1 + $0x1124] ss:$16 sps:$4 sm:$0xff]  }
 0x113   :  { %5151 = vmatpush1.bf16.msra.mxu0 %v7424_v21  ;;  %v7489_v21 = vld [vmem:[%s10913_s1 + $0x1324] ss:$16 sps:$4 sm:$0xff]  }
 0x114   :  { %5192 = vmatpush1.bf16.msra.mxu1 %v7427_v22  ;;  %5152 = vmatprep.subr.bf16.mxu0 %v7432_v23  ;;  %v119_v22 = vcombine.high %v27_v15, %v27_v15  ;;  %v7484_v23 = vld [vmem:[%s10913_s1 + $0x1120] ss:$16 sps:$4 sm:$0xff]  }
 0x115   :  { %5193 = vmatprep.subr.bf16.mxu1 %v7435_v26  ;;  %v7487_v26 = vld [vmem:[%s10913_s1 + $0x1320] ss:$16 sps:$4 sm:$0xff]  }
 0x117   :  { %5153 = vmatpush1.bf16.msra.mxu0 %v7430_v27  ;;  %v7492_v27 = vld [vmem:[%s10913_s1 + $0x1104] ss:$16 sps:$4 sm:$0xff]  }
 0x118   :  { %5194 = vmatpush1.bf16.msra.mxu1 %v7433_v28  ;;  %5154 = vmatprep.subr.bf16.mxu0 %v7438_v29  ;;  %v7495_v28 = vld [vmem:[%s10913_s1 + $0x1304] ss:$16 sps:$4 sm:$0xff]   ;;  %v9352_v29 = vrot.slane %v27_v15, %v8392_v49 }
 0x119   :  { %5195 = vmatprep.subr.bf16.mxu1 %v7441_v30  ;;  %v9355_v30 = vrot.slane %v119_v22, %v8392_v49  ;;  %v7502_v49 = vld [vmem:[%s10913_s1 + $0x16e4] ss:$16 sps:$4 sm:$0xff]   ;;  %v7521_v22 = vld [vmem:[%s10913_s1 + $0x1460] ss:$16 sps:$4 sm:$0xff]  }
 0x11a   :  { %v7520_v15 = vld [vmem:[%s10913_s1 + $0x1684] ss:$16 sps:$4 sm:$0xff]  }
 0x11b   :  { %5155 = vmatpush1.bf16.msra.mxu0 %v7436_v31  ;;  %v7490_v31 = vld [vmem:[%s10913_s1 + $0x1100] ss:$16 sps:$4 sm:$0xff]  }
 0x11c   :  { %5196 = vmatpush1.bf16.msra.mxu1 %v7439_v34  ;;  %5156 = vmatprep.subr.bf16.mxu0 %v7444_v35  ;;  %v7493_v34 = vld [vmem:[%s10913_s1 + $0x1300] ss:$16 sps:$4 sm:$0xff]   ;;  %v7499_v35 = vld [vmem:[%s10913_s1 + $0x14e4] ss:$16 sps:$4 sm:$0xff]  }
 0x11d   :  { %5197 = vmatprep.subr.bf16.mxu1 %v7447_v36  ;;  %v7497_v36 = vld [vmem:[%s10913_s1 + $0x14e0] ss:$16 sps:$4 sm:$0xff]  }
 0x11f   :  { %5157 = vmatpush1.bf16.msra.mxu0 %v7442_v40  ;;  %v7500_v40 = vld [vmem:[%s10913_s1 + $0x16e0] ss:$16 sps:$4 sm:$0xff]  }
 0x120   :  { %5198 = vmatpush1.bf16.msra.mxu1 %v7445_v41  ;;  %5158 = vmatprep.subr.bf16.mxu0 %v7450_v42  ;;  %v134_v41 = vcombine.high %v9352_v29, %v9352_v29  ;;  %v135_v42 = vcombine.high %v9355_v30, %v9355_v30 }
 0x121   :  { %5199 = vmatprep.subr.bf16.mxu1 %v7453_v58  ;;  %v9381_v58 = vpack.c.bf16 %v9122_v24, %v9122_v24  ;;  %v7503_v24 = vld [vmem:[%s10913_s1 + $0x14c0] ss:$16 sps:$4 sm:$0xff]  }
 0x123   :  { %5159 = vmatpush2.bf16.msra.mxu0 %v7448_v59  ;;  %v9385_v59 = vpack.c.bf16 %v9125_v25, %v9125_v25  ;;  %v7506_v25 = vld [vmem:[%s10913_s1 + $0x16c0] ss:$16 sps:$4 sm:$0xff]  }
 0x124   :  { %5200 = vmatpush2.bf16.msra.mxu1 %v7451_v45  ;;  %5160 = vmatprep.subr.bf16.mxu0 %v7456_v50  ;;  %v7505_v45 = vld [vmem:[%s10913_s1 + $0x14c4] ss:$16 sps:$4 sm:$0xff]  }
 0x125   :  { %5201 = vmatprep.subr.bf16.mxu1 %v7459_v51  ;;  %v7508_v50 = vld [vmem:[%s10913_s1 + $0x16c4] ss:$16 sps:$4 sm:$0xff]   ;;  %v9399_v51 = vpack.c.bf16 %v134_v41, %v134_v41 }
 0x126   :  { %v7544_v41 = vld [vmem:[%s10913_s1 + $0x1604] ss:$16 sps:$4 sm:$0xff]  }
 0x127   :  { %5161 = vmatpush2.bf16.msra.mxu0 %v7454_v54  ;;  %v9401_v54 = vpack.c.bf16 %v135_v42, %v135_v42  ;;  %v7539_v42 = vld [vmem:[%s10913_s1 + $0x1400] ss:$16 sps:$4 sm:$0xff]  }
 0x128   :  { %5202 = vmatpush2.bf16.msra.mxu1 %v7457_v55  ;;  %5162 = vmatprep.subr.bf16.mxu0 %v7462_v56 }
 0x129   :  { %5203 = vmatprep.subr.bf16.mxu1 %v7465_v60 }
 0x12b   :  { %5163 = vmatpush2.bf16.msra.mxu0 %v7460_v61 }
 0x12c   :  { %5204 = vmatpush2.bf16.msra.mxu1 %v7463_v63  ;;  %5164 = vmatprep.subr.bf16.mxu0 %v7468_v0  ;;  %v7511_v0 = vld [vmem:[%s10913_s1 + $0x14a4] ss:$16 sps:$4 sm:$0xff]  }
 0x12d   :  { %5205 = vmatprep.subr.bf16.mxu1 %v7471_v2  ;;  %v7514_v2 = vld [vmem:[%s10913_s1 + $0x16a4] ss:$16 sps:$4 sm:$0xff]  }
 0x12f   :  { %5165 = vmatpush2.bf16.msra.mxu0 %v7466_v6 }
 0x130   :  { %5206 = vmatpush2.bf16.msra.mxu1 %v7469_v7  ;;  %5166 = vmatprep.subr.bf16.mxu0 %v7474_v39  ;;  %v7512_v39 = vld [vmem:[%s10913_s1 + $0x16a0] ss:$16 sps:$4 sm:$0xff]  }
 0x131   :  { %5207 = vmatprep.subr.bf16.mxu1 %v7477_v44 }
 0x133   :  { %5167 = vmatpush2.bf16.msra.mxu0 %v7472_v11 }
 0x134   :  { %5208 = vmatpush2.bf16.msra.mxu1 %v7475_v12  ;;  %5168 = vmatprep.subr.bf16.mxu0 %v7480_v13 }
 0x135   :  { %5209 = vmatprep.subr.bf16.mxu1 %v7483_v14  ;;  %v7517_v14 = vld [vmem:[%s10913_s1 + $0x1484] ss:$16 sps:$4 sm:$0xff]  }
 0x137   :  { %5169 = vmatpush2.bf16.msra.mxu0 %v7478_v18  ;;  %v7515_v18 = vld [vmem:[%s10913_s1 + $0x1480] ss:$16 sps:$4 sm:$0xff]  }
 0x138   :  { %5210 = vmatpush2.bf16.msra.mxu1 %v7481_v19  ;;  %5170 = vmatprep.subr.bf16.mxu0 %v7486_v20  ;;  %v7518_v19 = vld [vmem:[%s10913_s1 + $0x1680] ss:$16 sps:$4 sm:$0xff]   ;;  %v7523_v20 = vld [vmem:[%s10913_s1 + $0x1464] ss:$16 sps:$4 sm:$0xff]  }
 0x139   :  { %5211 = vmatprep.subr.bf16.mxu1 %v7489_v21  ;;  %v7526_v21 = vld [vmem:[%s10913_s1 + $0x1664] ss:$16 sps:$4 sm:$0xff]  }
 0x13b   :  { %5171 = vmatpush2.bf16.msra.mxu0 %v7484_v23  ;;  %v7524_v23 = vld [vmem:[%s10913_s1 + $0x1660] ss:$16 sps:$4 sm:$0xff]  }
 0x13c   :  { %5212 = vmatpush2.bf16.msra.mxu1 %v7487_v26  ;;  %5172 = vmatprep.subr.bf16.mxu0 %v7492_v27  ;;  %v7529_v26 = vld [vmem:[%s10913_s1 + $0x1444] ss:$16 sps:$4 sm:$0xff]  }
 0x13d   :  { %5213 = vmatprep.subr.bf16.mxu1 %v7495_v28  ;;  %v7532_v27 = vld [vmem:[%s10913_s1 + $0x1644] ss:$16 sps:$4 sm:$0xff]   ;;  %v7527_v28 = vld [vmem:[%s10913_s1 + $0x1440] ss:$16 sps:$4 sm:$0xff]  }
 0x13f   :  { %5173 = vmatpush2.bf16.msra.mxu0 %v7490_v31  ;;  %v7530_v31 = vld [vmem:[%s10913_s1 + $0x1640] ss:$16 sps:$4 sm:$0xff]  }
 0x140   :  { %5214 = vmatpush2.bf16.msra.mxu1 %v7493_v34  ;;  %5224 = vmatprep.subr.bf16.mxu0 %v7499_v35  ;;  %v7535_v34 = vld [vmem:[%s10913_s1 + $0x1424] ss:$16 sps:$4 sm:$0xff]  }
 0x141   :  { %5265 = vmatprep.subr.bf16.mxu1 %v7502_v49  ;;  %v7538_v35 = vld [vmem:[%s10913_s1 + $0x1624] ss:$16 sps:$4 sm:$0xff]   ;;  %v7533_v49 = vld [vmem:[%s10913_s1 + $0x1420] ss:$16 sps:$4 sm:$0xff]  }
 0x142   :  { %v4930_v55 = vpop.f32.mrf.mxu0  ;;  %5175 = vmatmul.mubr.bf16.vlgmr.msra.gmra.mxu0 %v9381_v58 }
 0x143   :  { %v4971_v56 = vpop.f32.mrf.mxu1  ;;  %5216 = vmatmul.mubr.bf16.vlgmr.msra.gmra.mxu1 %v9385_v59  ;;  %v4931_v60 = vadd.f32 %v4930_v55, %v9186_v1  ;;  %5225 = vmatpush1.bf16.msra.mxu0 %v7497_v36  ;;  %v7509_v1 = vld [vmem:[%s10913_s1 + $0x14a0] ss:$16 sps:$4 sm:$0xff]  }
 0x144   :  { %5266 = vmatpush1.bf16.msra.mxu1 %v7500_v40  ;;  %v4932_v61 = vpop.f32.mrf.mxu0  ;;  %5226 = vmatprep.subr.bf16.mxu0 %v7505_v45  ;;  %v7536_v36 = vld [vmem:[%s10913_s1 + $0x1620] ss:$16 sps:$4 sm:$0xff]   ;;  %v7541_v40 = vld [vmem:[%s10913_s1 + $0x1404] ss:$16 sps:$4 sm:$0xff]  }
 0x145   :  { %v4973_v63 = vpop.f32.mrf.mxu1  ;;  %5267 = vmatprep.subr.bf16.mxu1 %v7508_v50  ;;  %v9412_v6 = vadd.f32 %v4971_v56, %v4931_v60  ;;  %v4933_v7 = vadd.f32 %v4932_v61, %v9196_v10  ;;  %5256 = vmatprep.mubr.bf16.mxu0 %v9399_v51  ;;  %v7542_v45 = vld [vmem:[%s10913_s1 + $0x1600] ss:$16 sps:$4 sm:$0xff]   ;;  %v7547_v50 = vld [vmem:[%s10913_s1 + $0x15e4] ss:$16 sps:$4 sm:$0xff]  }
 0x146   :  { %5297 = vmatprep.mubr.bf16.mxu1 %v9401_v54  ;;  %v4934_v44 = vpop.f32.mrf.mxu0  ;;  %v7548_v55 = vld [vmem:[%s10913_s1 + $0x17e0] ss:$16 sps:$4 sm:$0xff]   ;;  %v7553_v56 = vld [vmem:[%s10913_s1 + $0x15c4] ss:$16 sps:$4 sm:$0xff]  }
 0x147   :  { %v4975_v11 = vpop.f32.mrf.mxu1  ;;  %v9423_v12 = vadd.f32 %v4973_v63, %v4933_v7  ;;  %5227 = vmatpush1.bf16.msra.mxu0 %v7503_v24  ;;  %v7550_v24 = vld [vmem:[%s10913_s1 + $0x17e4] ss:$16 sps:$4 sm:$0xff]   ;;  %v7551_v61 = vld [vmem:[%s10913_s1 + $0x15c0] ss:$16 sps:$4 sm:$0xff]  }
 0x148   :  { %5268 = vmatpush1.bf16.msra.mxu1 %v7506_v25  ;;  %v4935_v13 = vpop.f32.mrf.mxu0  ;;  %5228 = vmatprep.subr.bf16.mxu0 %v7511_v0  ;;  %v7545_v25 = vld [vmem:[%s10913_s1 + $0x15e0] ss:$16 sps:$4 sm:$0xff]   ;;  %v7556_v60 = vld [vmem:[%s10913_s1 + $0x17c4] ss:$16 sps:$4 sm:$0xff]  }
 0x149   :  { %v4976_v10 = vpop.f32.mrf.mxu1  ;;  %5269 = vmatprep.subr.bf16.mxu1 %v7514_v2  ;;  %v7554_v63 = vld [vmem:[%s10913_s1 + $0x17c0] ss:$16 sps:$4 sm:$0xff]   ;;  %v7559_v0 = vld [vmem:[%s10913_s1 + $0x15a4] ss:$16 sps:$4 sm:$0xff]  }
 0x14a   :  { %v7562_v2 = vld [vmem:[%s10913_s1 + $0x17a4] ss:$16 sps:$4 sm:$0xff]   ;;  %v7557_v7 = vld [vmem:[%s10913_s1 + $0x15a0] ss:$16 sps:$4 sm:$0xff]  }
 0x14b   :  { %5229 = vmatpush1.bf16.msra.mxu0 %v7509_v1  ;;  %v7560_v1 = vld [vmem:[%s10913_s1 + $0x17a0] ss:$16 sps:$4 sm:$0xff]   ;;  %v7568_v44 = vld [vmem:[%s10913_s1 + $0x1784] ss:$16 sps:$4 sm:$0xff]  }
 0x14c   :  { %5270 = vmatpush1.bf16.msra.mxu1 %v7512_v39  ;;  %5230 = vmatprep.subr.bf16.mxu0 %v7517_v14  ;;  %v7565_v39 = vld [vmem:[%s10913_s1 + $0x1584] ss:$16 sps:$4 sm:$0xff]   ;;  %v7563_v11 = vld [vmem:[%s10913_s1 + $0x1580] ss:$16 sps:$4 sm:$0xff]  }
 0x14d   :  { %5271 = vmatprep.subr.bf16.mxu1 %v7520_v15  ;;  %v7566_v13 = vld [vmem:[%s10913_s1 + $0x1780] ss:$16 sps:$4 sm:$0xff]   ;;  %v7571_v10 = vld [vmem:[%s10913_s1 + $0x1564] ss:$16 sps:$4 sm:$0xff]  }
 0x14e   :  { %v7574_v14 = vld [vmem:[%s10913_s1 + $0x1764] ss:$16 sps:$4 sm:$0xff]   ;;  %v7569_v15 = vld [vmem:[%s10913_s1 + $0x1560] ss:$16 sps:$4 sm:$0xff]  }
 0x14f   :  { %5231 = vmatpush1.bf16.msra.mxu0 %v7515_v18  ;;  %v7572_v18 = vld [vmem:[%s10913_s1 + $0x1760] ss:$16 sps:$4 sm:$0xff]  }
 0x150   :  { %5272 = vmatpush1.bf16.msra.mxu1 %v7518_v19  ;;  %5232 = vmatprep.subr.bf16.mxu0 %v7523_v20  ;;  %v7577_v19 = vld [vmem:[%s10913_s1 + $0x1544] ss:$16 sps:$4 sm:$0xff]  }
 0x151   :  { %5273 = vmatprep.subr.bf16.mxu1 %v7526_v21  ;;  %v7580_v20 = vld [vmem:[%s10913_s1 + $0x1744] ss:$16 sps:$4 sm:$0xff]   ;;  %v7575_v21 = vld [vmem:[%s10913_s1 + $0x1540] ss:$16 sps:$4 sm:$0xff]  }
 0x153   :  { %5233 = vmatpush1.bf16.msra.mxu0 %v7521_v22  ;;  %v7578_v22 = vld [vmem:[%s10913_s1 + $0x1740] ss:$16 sps:$4 sm:$0xff]  }
 0x154   :  { %5274 = vmatpush1.bf16.msra.mxu1 %v7524_v23  ;;  %5234 = vmatprep.subr.bf16.mxu0 %v7529_v26  ;;  %v7583_v23 = vld [vmem:[%s10913_s1 + $0x1524] ss:$16 sps:$4 sm:$0xff]  }
 0x155   :  { %5275 = vmatprep.subr.bf16.mxu1 %v7532_v27  ;;  %v7586_v26 = vld [vmem:[%s10913_s1 + $0x1724] ss:$16 sps:$4 sm:$0xff]   ;;  %v7581_v27 = vld [vmem:[%s10913_s1 + $0x1520] ss:$16 sps:$4 sm:$0xff]  }
 0x157   :  { %5235 = vmatpush1.bf16.msra.mxu0 %v7527_v28  ;;  %v7584_v28 = vld [vmem:[%s10913_s1 + $0x1720] ss:$16 sps:$4 sm:$0xff]  }
 0x158   :  { %5276 = vmatpush1.bf16.msra.mxu1 %v7530_v31  ;;  %5236 = vmatprep.subr.bf16.mxu0 %v7535_v34  ;;  %v7589_v31 = vld [vmem:[%s10913_s1 + $0x1504] ss:$16 sps:$4 sm:$0xff]  }
 0x159   :  { %5277 = vmatprep.subr.bf16.mxu1 %v7538_v35  ;;  %v7592_v34 = vld [vmem:[%s10913_s1 + $0x1704] ss:$16 sps:$4 sm:$0xff]   ;;  %v7587_v35 = vld [vmem:[%s10913_s1 + $0x1500] ss:$16 sps:$4 sm:$0xff]  }
 0x15b   :  { %5237 = vmatpush1.bf16.msra.mxu0 %v7533_v49  ;;  %v7590_v49 = vld [vmem:[%s10913_s1 + $0x1700] ss:$16 sps:$4 sm:$0xff]  }
 0x15c   :  { %5278 = vmatpush1.bf16.msra.mxu1 %v7536_v36  ;;  %5238 = vmatprep.subr.bf16.mxu0 %v7541_v40  ;;  %v7596_v36 = vld [vmem:[%s10913_s1 + $0xec] ss:$16 sps:$4 sm:$0xff]  }
 0x15d   :  { %5279 = vmatprep.subr.bf16.mxu1 %v7544_v41  ;;  %v7599_v40 = vld [vmem:[%s10913_s1 + $0x2ec] ss:$16 sps:$4 sm:$0xff]   ;;  %v7594_v41 = vld [vmem:[%s10913_s1 + $0xe8] ss:$16 sps:$4 sm:$0xff]  }
 0x15f   :  { %5239 = vmatpush1.bf16.msra.mxu0 %v7539_v42  ;;  %v7597_v42 = vld [vmem:[%s10913_s1 + $0x2e8] ss:$16 sps:$4 sm:$0xff]  }
 0x160   :  { %5280 = vmatpush1.bf16.msra.mxu1 %v7542_v45  ;;  %5240 = vmatprep.subr.bf16.mxu0 %v7547_v50  ;;  %v9595_v45 = vpack.c.bf16 %v9352_v29, %v9352_v29  ;;  %v9599_v50 = vpack.c.bf16 %v9355_v30, %v9355_v30  ;;  %v7600_v29 = vld [vmem:[%s10913_s1 + $0xc8] ss:$16 sps:$4 sm:$0xff]  }
 0x161   :  { %5281 = vmatprep.subr.bf16.mxu1 %v7550_v24  ;;  %v7602_v24 = vld [vmem:[%s10913_s1 + $0xcc] ss:$16 sps:$4 sm:$0xff]   ;;  %v7603_v30 = vld [vmem:[%s10913_s1 + $0x2c8] ss:$16 sps:$4 sm:$0xff]  }
 0x163   :  { %5241 = vmatpush2.bf16.msra.mxu0 %v7545_v25  ;;  %v7605_v25 = vld [vmem:[%s10913_s1 + $0x2cc] ss:$16 sps:$4 sm:$0xff]  }
 0x164   :  { %5282 = vmatpush2.bf16.msra.mxu1 %v7548_v55  ;;  %5242 = vmatprep.subr.bf16.mxu0 %v7553_v56 }
 0x165   :  { %5283 = vmatprep.subr.bf16.mxu1 %v7556_v60 }
 0x167   :  { %5243 = vmatpush2.bf16.msra.mxu0 %v7551_v61 }
 0x168   :  { %5284 = vmatpush2.bf16.msra.mxu1 %v7554_v63  ;;  %5244 = vmatprep.subr.bf16.mxu0 %v7559_v0  ;;  %v7608_v0 = vld [vmem:[%s10913_s1 + $0xac] ss:$16 sps:$4 sm:$0xff]  }
 0x169   :  { %5285 = vmatprep.subr.bf16.mxu1 %v7562_v2  ;;  %v7611_v2 = vld [vmem:[%s10913_s1 + $0x2ac] ss:$16 sps:$4 sm:$0xff]  }
 0x16b   :  { %5245 = vmatpush2.bf16.msra.mxu0 %v7557_v7 }
 0x16c   :  { %5286 = vmatpush2.bf16.msra.mxu1 %v7560_v1  ;;  %5246 = vmatprep.subr.bf16.mxu0 %v7565_v39  ;;  %v7609_v39 = vld [vmem:[%s10913_s1 + $0x2a8] ss:$16 sps:$4 sm:$0xff]  }
 0x16d   :  { %5287 = vmatprep.subr.bf16.mxu1 %v7568_v44 }
 0x16f   :  { %5247 = vmatpush2.bf16.msra.mxu0 %v7563_v11 }
 0x170   :  { %5288 = vmatpush2.bf16.msra.mxu1 %v7566_v13  ;;  %5248 = vmatprep.subr.bf16.mxu0 %v7571_v10 }
 0x171   :  { %5289 = vmatprep.subr.bf16.mxu1 %v7574_v14  ;;  %v7614_v14 = vld [vmem:[%s10913_s1 + $0x8c] ss:$16 sps:$4 sm:$0xff]  }
 0x173   :  { %5249 = vmatpush2.bf16.msra.mxu0 %v7569_v15  ;;  %v7615_v15 = vld [vmem:[%s10913_s1 + $0x288] ss:$16 sps:$4 sm:$0xff]  }
 0x174   :  { %5290 = vmatpush2.bf16.msra.mxu1 %v7572_v18  ;;  %5250 = vmatprep.subr.bf16.mxu0 %v7577_v19  ;;  %v7620_v18 = vld [vmem:[%s10913_s1 + $0x6c] ss:$16 sps:$4 sm:$0xff]  }
 0x175   :  { %5291 = vmatprep.subr.bf16.mxu1 %v7580_v20  ;;  %v7623_v19 = vld [vmem:[%s10913_s1 + $0x26c] ss:$16 sps:$4 sm:$0xff]   ;;  %v7618_v20 = vld [vmem:[%s10913_s1 + $0x68] ss:$16 sps:$4 sm:$0xff]  }
 0x177   :  { %5251 = vmatpush2.bf16.msra.mxu0 %v7575_v21  ;;  %v7621_v21 = vld [vmem:[%s10913_s1 + $0x268] ss:$16 sps:$4 sm:$0xff]  }
 0x178   :  { %5292 = vmatpush2.bf16.msra.mxu1 %v7578_v22  ;;  %5252 = vmatprep.subr.bf16.mxu0 %v7583_v23  ;;  %v7626_v22 = vld [vmem:[%s10913_s1 + $0x4c] ss:$16 sps:$4 sm:$0xff]  }
 0x179   :  { %5293 = vmatprep.subr.bf16.mxu1 %v7586_v26  ;;  %v7629_v23 = vld [vmem:[%s10913_s1 + $0x24c] ss:$16 sps:$4 sm:$0xff]   ;;  %v7624_v26 = vld [vmem:[%s10913_s1 + $0x48] ss:$16 sps:$4 sm:$0xff]  }
 0x17b   :  { %5253 = vmatpush2.bf16.msra.mxu0 %v7581_v27  ;;  %v7627_v27 = vld [vmem:[%s10913_s1 + $0x248] ss:$16 sps:$4 sm:$0xff]  }
 0x17c   :  { %5294 = vmatpush2.bf16.msra.mxu1 %v7584_v28  ;;  %5254 = vmatprep.subr.bf16.mxu0 %v7589_v31  ;;  %v7632_v28 = vld [vmem:[%s10913_s1 + $0x2c] ss:$16 sps:$4 sm:$0xff]  }
 0x17d   :  { %5295 = vmatprep.subr.bf16.mxu1 %v7592_v34  ;;  %v7635_v31 = vld [vmem:[%s10913_s1 + $0x22c] ss:$16 sps:$4 sm:$0xff]   ;;  %v7630_v34 = vld [vmem:[%s10913_s1 + $0x28] ss:$16 sps:$4 sm:$0xff]  }
 0x17f   :  { %5255 = vmatpush2.bf16.msra.mxu0 %v7587_v35  ;;  %v7633_v35 = vld [vmem:[%s10913_s1 + $0x228] ss:$16 sps:$4 sm:$0xff]  }
 0x180   :  { %5296 = vmatpush2.bf16.msra.mxu1 %v7590_v49  ;;  %5306 = vmatprep.subr.bf16.mxu0 %v7596_v36  ;;  %v7638_v49 = vld [vmem:[%s10913_s1 + $0xc] ss:$16 sps:$4 sm:$0xff]  }
 0x181   :  { %5347 = vmatprep.subr.bf16.mxu1 %v7599_v40  ;;  %v7641_v36 = vld [vmem:[%s10913_s1 + $0x20c] ss:$16 sps:$4 sm:$0xff]   ;;  %v7636_v40 = vld [vmem:[%s10913_s1 + $0x8] ss:$16 sps:$4 sm:$0xff]  }
 0x182   :  { %v5012_v55 = vpop.f32.mrf.mxu0  ;;  %5257 = vmatmul.mubr.bf16.vlgmr.msra.gmra.mxu0 %v9595_v45 }
 0x183   :  { %v5053_v56 = vpop.f32.mrf.mxu1  ;;  %5298 = vmatmul.mubr.bf16.vlgmr.msra.gmra.mxu1 %v9599_v50  ;;  %v5013_v60 = vadd.f32 %v5012_v55, %v9412_v6  ;;  %5307 = vmatpush1.bf16.msra.mxu0 %v7594_v41  ;;  %v7606_v6 = vld [vmem:[%s10913_s1 + $0xa8] ss:$16 sps:$4 sm:$0xff]   ;;  %v7653_v55 = vld [vmem:[%s10913_s1 + $0x3cc] ss:$16 sps:$4 sm:$0xff]  }
 0x184   :  { %5348 = vmatpush1.bf16.msra.mxu1 %v7597_v42  ;;  %v5014_v61 = vpop.f32.mrf.mxu0  ;;  %5308 = vmatprep.subr.bf16.mxu0 %v7602_v24  ;;  %v7639_v41 = vld [vmem:[%s10913_s1 + $0x208] ss:$16 sps:$4 sm:$0xff]   ;;  %v7644_v42 = vld [vmem:[%s10913_s1 + $0x1ec] ss:$16 sps:$4 sm:$0xff]  }
 0x185   :  { %v5055_v63 = vpop.f32.mrf.mxu1  ;;  %5349 = vmatprep.subr.bf16.mxu1 %v7605_v25  ;;  %v9622_v7 = vadd.f32 %v5053_v56, %v5013_v60  ;;  %v5015_v1 = vadd.f32 %v5014_v61, %v9423_v12  ;;  %5338 = vmatprep.mubr.bf16.mxu0 %v8420_v62  ;;  %v7617_v62 = vld [vmem:[%s10913_s1 + $0x28c] ss:$16 sps:$4 sm:$0xff]   ;;  %v7642_v25 = vld [vmem:[%s10913_s1 + $0x1e8] ss:$16 sps:$4 sm:$0xff]  }
 0x186   :  { %5379 = vmatprep.mubr.bf16.mxu1 %v8431_v3  ;;  %v5016_v44 = vpop.f32.mrf.mxu0  ;;  %v7612_v3 = vld [vmem:[%s10913_s1 + $0x88] ss:$16 sps:$4 sm:$0xff]   ;;  %v7647_v24 = vld [vmem:[%s10913_s1 + $0x3ec] ss:$16 sps:$4 sm:$0xff]  }
 0x187   :  { %v5057_v11 = vpop.f32.mrf.mxu1  ;;  %v9633_v13 = vadd.f32 %v5055_v63, %v5015_v1  ;;  %5309 = vmatpush1.bf16.msra.mxu0 %v7600_v29  ;;  %v7645_v29 = vld [vmem:[%s10913_s1 + $0x3e8] ss:$16 sps:$4 sm:$0xff]   ;;  %v7656_v61 = vld [vmem:[%s10913_s1 + $0x1ac] ss:$16 sps:$4 sm:$0xff]  }
 0x188   :  { %5350 = vmatpush1.bf16.msra.mxu1 %v7603_v30  ;;  %v5017_v10 = vpop.f32.mrf.mxu0  ;;  %5310 = vmatprep.subr.bf16.mxu0 %v7608_v0  ;;  %v7650_v30 = vld [vmem:[%s10913_s1 + $0x1cc] ss:$16 sps:$4 sm:$0xff]   ;;  %v7648_v56 = vld [vmem:[%s10913_s1 + $0x1c8] ss:$16 sps:$4 sm:$0xff]  }
 0x189   :  { %v5058_v12 = vpop.f32.mrf.mxu1  ;;  %5351 = vmatprep.subr.bf16.mxu1 %v7611_v2  ;;  %v7651_v60 = vld [vmem:[%s10913_s1 + $0x3c8] ss:$16 sps:$4 sm:$0xff]   ;;  %v7659_v63 = vld [vmem:[%s10913_s1 + $0x3ac] ss:$16 sps:$4 sm:$0xff]  }
 0x18a   :  { %v7654_v0 = vld [vmem:[%s10913_s1 + $0x1a8] ss:$16 sps:$4 sm:$0xff]   ;;  %v7662_v1 = vld [vmem:[%s10913_s1 + $0x18c] ss:$16 sps:$4 sm:$0xff]  }
 0x18b   :  { %5311 = vmatpush1.bf16.msra.mxu0 %v7606_v6  ;;  %v7657_v2 = vld [vmem:[%s10913_s1 + $0x3a8] ss:$16 sps:$4 sm:$0xff]   ;;  %v7665_v6 = vld [vmem:[%s10913_s1 + $0x38c] ss:$16 sps:$4 sm:$0xff]  }
 0x18c   :  { %5352 = vmatpush1.bf16.msra.mxu1 %v7609_v39  ;;  %5312 = vmatprep.subr.bf16.mxu0 %v7614_v14  ;;  %v7660_v39 = vld [vmem:[%s10913_s1 + $0x188] ss:$16 sps:$4 sm:$0xff]   ;;  %v7668_v11 = vld [vmem:[%s10913_s1 + $0x16c] ss:$16 sps:$4 sm:$0xff]  }
 0x18d   :  { %5353 = vmatprep.subr.bf16.mxu1 %v7617_v62  ;;  %v7663_v44 = vld [vmem:[%s10913_s1 + $0x388] ss:$16 sps:$4 sm:$0xff]   ;;  %v7671_v10 = vld [vmem:[%s10913_s1 + $0x36c] ss:$16 sps:$4 sm:$0xff]  }
 0x18e   :  { %v7666_v12 = vld [vmem:[%s10913_s1 + $0x168] ss:$16 sps:$4 sm:$0xff]   ;;  %v7674_v62 = vld [vmem:[%s10913_s1 + $0x14c] ss:$16 sps:$4 sm:$0xff]  }
 0x18f   :  { %5313 = vmatpush1.bf16.msra.mxu0 %v7612_v3  ;;  %v7669_v14 = vld [vmem:[%s10913_s1 + $0x368] ss:$16 sps:$4 sm:$0xff]   ;;  %v7677_v3 = vld [vmem:[%s10913_s1 + $0x34c] ss:$16 sps:$4 sm:$0xff]  }
 0x190   :  { %5354 = vmatpush1.bf16.msra.mxu1 %v7615_v15  ;;  %5314 = vmatprep.subr.bf16.mxu0 %v7620_v18  ;;  %v7672_v15 = vld [vmem:[%s10913_s1 + $0x148] ss:$16 sps:$4 sm:$0xff]  }
 0x191   :  { %5355 = vmatprep.subr.bf16.mxu1 %v7623_v19  ;;  %v7675_v18 = vld [vmem:[%s10913_s1 + $0x348] ss:$16 sps:$4 sm:$0xff]   ;;  %v7680_v19 = vld [vmem:[%s10913_s1 + $0x12c] ss:$16 sps:$4 sm:$0xff]  }
 0x193   :  { %5315 = vmatpush1.bf16.msra.mxu0 %v7618_v20  ;;  %v7683_v20 = vld [vmem:[%s10913_s1 + $0x32c] ss:$16 sps:$4 sm:$0xff]  }
 0x194   :  { %5356 = vmatpush1.bf16.msra.mxu1 %v7621_v21  ;;  %5316 = vmatprep.subr.bf16.mxu0 %v7626_v22  ;;  %v7678_v21 = vld [vmem:[%s10913_s1 + $0x128] ss:$16 sps:$4 sm:$0xff]  }
 0x195   :  { %5357 = vmatprep.subr.bf16.mxu1 %v7629_v23  ;;  %v7681_v22 = vld [vmem:[%s10913_s1 + $0x328] ss:$16 sps:$4 sm:$0xff]   ;;  %v7686_v23 = vld [vmem:[%s10913_s1 + $0x10c] ss:$16 sps:$4 sm:$0xff]  }
 0x197   :  { %5317 = vmatpush1.bf16.msra.mxu0 %v7624_v26  ;;  %v7689_v26 = vld [vmem:[%s10913_s1 + $0x30c] ss:$16 sps:$4 sm:$0xff]  }
 0x198   :  { %5358 = vmatpush1.bf16.msra.mxu1 %v7627_v27  ;;  %5318 = vmatprep.subr.bf16.mxu0 %v7632_v28  ;;  %v7684_v27 = vld [vmem:[%s10913_s1 + $0x108] ss:$16 sps:$4 sm:$0xff]  }
 0x199   :  { %5359 = vmatprep.subr.bf16.mxu1 %v7635_v31  ;;  %v7687_v28 = vld [vmem:[%s10913_s1 + $0x308] ss:$16 sps:$4 sm:$0xff]   ;;  %v7692_v31 = vld [vmem:[%s10913_s1 + $0x4ec] ss:$16 sps:$4 sm:$0xff]  }
 0x19b   :  { %5319 = vmatpush1.bf16.msra.mxu0 %v7630_v34  ;;  %v7695_v34 = vld [vmem:[%s10913_s1 + $0x6ec] ss:$16 sps:$4 sm:$0xff]  }
 0x19c   :  { %5360 = vmatpush1.bf16.msra.mxu1 %v7633_v35  ;;  %5320 = vmatprep.subr.bf16.mxu0 %v7638_v49  ;;  %v7690_v35 = vld [vmem:[%s10913_s1 + $0x4e8] ss:$16 sps:$4 sm:$0xff]  }
 0x19d   :  { %5361 = vmatprep.subr.bf16.mxu1 %v7641_v36  ;;  %v7693_v49 = vld [vmem:[%s10913_s1 + $0x6e8] ss:$16 sps:$4 sm:$0xff]   ;;  %v7698_v36 = vld [vmem:[%s10913_s1 + $0x4cc] ss:$16 sps:$4 sm:$0xff]  }
 0x19f   :  { %5321 = vmatpush1.bf16.msra.mxu0 %v7636_v40  ;;  %v7701_v40 = vld [vmem:[%s10913_s1 + $0x6cc] ss:$16 sps:$4 sm:$0xff]  }
 0x1a0   :  { %5362 = vmatpush1.bf16.msra.mxu1 %v7639_v41  ;;  %5322 = vmatprep.subr.bf16.mxu0 %v7644_v42  ;;  %v7696_v41 = vld [vmem:[%s10913_s1 + $0x4c8] ss:$16 sps:$4 sm:$0xff]  }
 0x1a1   :  { %5363 = vmatprep.subr.bf16.mxu1 %v7647_v24  ;;  %v7699_v42 = vld [vmem:[%s10913_s1 + $0x6c8] ss:$16 sps:$4 sm:$0xff]  }
 0x1a3   :  { %5323 = vmatpush2.bf16.msra.mxu0 %v7642_v25 }
 0x1a4   :  { %5364 = vmatpush2.bf16.msra.mxu1 %v7645_v29  ;;  %5324 = vmatprep.subr.bf16.mxu0 %v7650_v30 }
 0x1a5   :  { %5365 = vmatprep.subr.bf16.mxu1 %v7653_v55 }
 0x1a7   :  { %5325 = vmatpush2.bf16.msra.mxu0 %v7648_v56  ;;  %v7704_v56 = vld [vmem:[%s10913_s1 + $0x4ac] ss:$16 sps:$4 sm:$0xff]  }
 0x1a8   :  { %5366 = vmatpush2.bf16.msra.mxu1 %v7651_v60  ;;  %5326 = vmatprep.subr.bf16.mxu0 %v7656_v61  ;;  %v7707_v60 = vld [vmem:[%s10913_s1 + $0x6ac] ss:$16 sps:$4 sm:$0xff]  }
 0x1a9   :  { %5367 = vmatprep.subr.bf16.mxu1 %v7659_v63 }
 0x1ab   :  { %5327 = vmatpush2.bf16.msra.mxu0 %v7654_v0 }
 0x1ac   :  { %5368 = vmatpush2.bf16.msra.mxu1 %v7657_v2  ;;  %5328 = vmatprep.subr.bf16.mxu0 %v7662_v1 }
 0x1ad   :  { %5369 = vmatprep.subr.bf16.mxu1 %v7665_v6  ;;  %v7710_v6 = vld [vmem:[%s10913_s1 + $0x48c] ss:$16 sps:$4 sm:$0xff]  }
 0x1af   :  { %5329 = vmatpush2.bf16.msra.mxu0 %v7660_v39  ;;  %v7711_v39 = vld [vmem:[%s10913_s1 + $0x688] ss:$16 sps:$4 sm:$0xff]  }
 0x1b0   :  { %5370 = vmatpush2.bf16.msra.mxu1 %v7663_v44  ;;  %5330 = vmatprep.subr.bf16.mxu0 %v7668_v11  ;;  %v7716_v44 = vld [vmem:[%s10913_s1 + $0x46c] ss:$16 sps:$4 sm:$0xff]  }
 0x1b1   :  { %5371 = vmatprep.subr.bf16.mxu1 %v7671_v10  ;;  %v7719_v11 = vld [vmem:[%s10913_s1 + $0x66c] ss:$16 sps:$4 sm:$0xff]   ;;  %v7714_v10 = vld [vmem:[%s10913_s1 + $0x468] ss:$16 sps:$4 sm:$0xff]  }
 0x1b3   :  { %5331 = vmatpush2.bf16.msra.mxu0 %v7666_v12  ;;  %v7717_v12 = vld [vmem:[%s10913_s1 + $0x668] ss:$16 sps:$4 sm:$0xff]  }
 0x1b4   :  { %5372 = vmatpush2.bf16.msra.mxu1 %v7669_v14  ;;  %5332 = vmatprep.subr.bf16.mxu0 %v7674_v62  ;;  %v7722_v14 = vld [vmem:[%s10913_s1 + $0x44c] ss:$16 sps:$4 sm:$0xff]  }
 0x1b5   :  { %5373 = vmatprep.subr.bf16.mxu1 %v7677_v3  ;;  %v7725_v62 = vld [vmem:[%s10913_s1 + $0x64c] ss:$16 sps:$4 sm:$0xff]   ;;  %v7720_v3 = vld [vmem:[%s10913_s1 + $0x448] ss:$16 sps:$4 sm:$0xff]  }
 0x1b7   :  { %5333 = vmatpush2.bf16.msra.mxu0 %v7672_v15  ;;  %v7723_v15 = vld [vmem:[%s10913_s1 + $0x648] ss:$16 sps:$4 sm:$0xff]  }
 0x1b8   :  { %5374 = vmatpush2.bf16.msra.mxu1 %v7675_v18  ;;  %5334 = vmatprep.subr.bf16.mxu0 %v7680_v19  ;;  %v7728_v18 = vld [vmem:[%s10913_s1 + $0x42c] ss:$16 sps:$4 sm:$0xff]  }
 0x1b9   :  { %5375 = vmatprep.subr.bf16.mxu1 %v7683_v20  ;;  %v7731_v19 = vld [vmem:[%s10913_s1 + $0x62c] ss:$16 sps:$4 sm:$0xff]   ;;  %v7726_v20 = vld [vmem:[%s10913_s1 + $0x428] ss:$16 sps:$4 sm:$0xff]  }
 0x1bb   :  { %5335 = vmatpush2.bf16.msra.mxu0 %v7678_v21  ;;  %v7729_v21 = vld [vmem:[%s10913_s1 + $0x628] ss:$16 sps:$4 sm:$0xff]  }
 0x1bc   :  { %5376 = vmatpush2.bf16.msra.mxu1 %v7681_v22  ;;  %5336 = vmatprep.subr.bf16.mxu0 %v7686_v23  ;;  %v7734_v22 = vld [vmem:[%s10913_s1 + $0x40c] ss:$16 sps:$4 sm:$0xff]  }
 0x1bd   :  { %5377 = vmatprep.subr.bf16.mxu1 %v7689_v26  ;;  %v7737_v23 = vld [vmem:[%s10913_s1 + $0x60c] ss:$16 sps:$4 sm:$0xff]   ;;  %v7732_v26 = vld [vmem:[%s10913_s1 + $0x408] ss:$16 sps:$4 sm:$0xff]  }
 0x1bf   :  { %5337 = vmatpush2.bf16.msra.mxu0 %v7684_v27  ;;  %v7735_v27 = vld [vmem:[%s10913_s1 + $0x608] ss:$16 sps:$4 sm:$0xff]  }
 0x1c0   :  { %5378 = vmatpush2.bf16.msra.mxu1 %v7687_v28  ;;  %5388 = vmatprep.subr.bf16.mxu0 %v7692_v31  ;;  %v7740_v28 = vld [vmem:[%s10913_s1 + $0x5ec] ss:$16 sps:$4 sm:$0xff]  }
 0x1c1   :  { %5429 = vmatprep.subr.bf16.mxu1 %v7695_v34  ;;  %v7743_v31 = vld [vmem:[%s10913_s1 + $0x7ec] ss:$16 sps:$4 sm:$0xff]   ;;  %v7738_v34 = vld [vmem:[%s10913_s1 + $0x5e8] ss:$16 sps:$4 sm:$0xff]  }
 0x1c2   :  { %v5094_v24 = vpop.f32.mrf.mxu0  ;;  %5339 = vmatmul.mubr.bf16.vlgmr.msra.gmra.mxu0 %v8471_v16 }
 0x1c3   :  { %v5135_v25 = vpop.f32.mrf.mxu1  ;;  %5380 = vmatmul.mubr.bf16.vlgmr.msra.gmra.mxu1 %v8473_v17  ;;  %v5095_v29 = vadd.f32 %v5094_v24, %v9622_v7  ;;  %5389 = vmatpush1.bf16.msra.mxu0 %v7690_v35  ;;  %v7702_v17 = vld [vmem:[%s10913_s1 + $0x4a8] ss:$16 sps:$4 sm:$0xff]  }
 0x1c4   :  { %5430 = vmatpush1.bf16.msra.mxu1 %v7693_v49  ;;  %v5096_v30 = vpop.f32.mrf.mxu0  ;;  %5390 = vmatprep.subr.bf16.mxu0 %v7698_v36  ;;  %v7705_v7 = vld [vmem:[%s10913_s1 + $0x6a8] ss:$16 sps:$4 sm:$0xff]   ;;  %v7746_v49 = vld [vmem:[%s10913_s1 + $0x5cc] ss:$16 sps:$4 sm:$0xff]  }
 0x1c5   :  { %v5137_v55 = vpop.f32.mrf.mxu1  ;;  %5431 = vmatprep.subr.bf16.mxu1 %v7701_v40  ;;  %v9824_v61 = vadd.f32 %v5135_v25, %v5095_v29  ;;  %v5097_v16 = vadd.f32 %v5096_v30, %v9633_v13  ;;  %5420 = vmatprep.mubr.bf16.mxu0 %v8572_v53  ;;  %v7713_v53 = vld [vmem:[%s10913_s1 + $0x68c] ss:$16 sps:$4 sm:$0xff]   ;;  %v7741_v35 = vld [vmem:[%s10913_s1 + $0x7e8] ss:$16 sps:$4 sm:$0xff]  }
 0x1c6   :  { %5461 = vmatprep.mubr.bf16.mxu1 %v8582_v57  ;;  %v5098_v63 = vpop.f32.mrf.mxu0  ;;  %v7708_v57 = vld [vmem:[%s10913_s1 + $0x488] ss:$16 sps:$4 sm:$0xff]   ;;  %v7749_v36 = vld [vmem:[%s10913_s1 + $0x7cc] ss:$16 sps:$4 sm:$0xff]  }
 0x1c7   :  { %v5139_v0 = vpop.f32.mrf.mxu1  ;;  %v9835_v2 = vadd.f32 %v5137_v55, %v5097_v16  ;;  %5391 = vmatpush1.bf16.msra.mxu0 %v7696_v41 }
 0x1c8   :  { %5432 = vmatpush1.bf16.msra.mxu1 %v7699_v42  ;;  %v5099_v1 = vpop.f32.mrf.mxu0  ;;  %5392 = vmatprep.subr.bf16.mxu0 %v7704_v56 }
 0x1c9   :  { %v5140_v13 = vpop.f32.mrf.mxu1  ;;  %5433 = vmatprep.subr.bf16.mxu1 %v7707_v60 }
 0x1cb   :  { %5393 = vmatpush1.bf16.msra.mxu0 %v7702_v17 }
 0x1cc   :  { %5434 = vmatpush1.bf16.msra.mxu1 %v7705_v7  ;;  %5394 = vmatprep.subr.bf16.mxu0 %v7710_v6 }
 0x1cd   :  { %5435 = vmatprep.subr.bf16.mxu1 %v7713_v53 }
 0x1cf   :  { %5395 = vmatpush1.bf16.msra.mxu0 %v7708_v57 }
 0x1d0   :  { %5436 = vmatpush1.bf16.msra.mxu1 %v7711_v39  ;;  %5396 = vmatprep.subr.bf16.mxu0 %v7716_v44 }
 0x1d1   :  { %5437 = vmatprep.subr.bf16.mxu1 %v7719_v11 }
 0x1d3   :  { %5397 = vmatpush1.bf16.msra.mxu0 %v7714_v10 }
 0x1d4   :  { %5438 = vmatpush1.bf16.msra.mxu1 %v7717_v12  ;;  %5398 = vmatprep.subr.bf16.mxu0 %v7722_v14 }
 0x1d5   :  { %5439 = vmatprep.subr.bf16.mxu1 %v7725_v62 }
 0x1d7   :  { %5399 = vmatpush1.bf16.msra.mxu0 %v7720_v3 }
 0x1d8   :  { %5440 = vmatpush1.bf16.msra.mxu1 %v7723_v15  ;;  %5400 = vmatprep.subr.bf16.mxu0 %v7728_v18 }
 0x1d9   :  { %5441 = vmatprep.subr.bf16.mxu1 %v7731_v19 }
 0x1db   :  { %5401 = vmatpush1.bf16.msra.mxu0 %v7726_v20 }
 0x1dc   :  { %5442 = vmatpush1.bf16.msra.mxu1 %v7729_v21  ;;  %5402 = vmatprep.subr.bf16.mxu0 %v7734_v22 }
 0x1dd   :  { %5443 = vmatprep.subr.bf16.mxu1 %v7737_v23 }
 0x1df   :  { %5403 = vmatpush1.bf16.msra.mxu0 %v7732_v26 }
 0x1e0   :  { %5444 = vmatpush1.bf16.msra.mxu1 %v7735_v27  ;;  %5404 = vmatprep.subr.bf16.mxu0 %v7740_v28 }
 0x1e1   :  { %5445 = vmatprep.subr.bf16.mxu1 %v7743_v31 }
 0x1e2   :  { %10 = vsyncpa [#allocation3], 0  ;;  %v7744_v40 = vld [vmem:[%s10913_s1 + $0x5c8] ss:$16 sps:$4 sm:$0xff]   ;;  %v7752_v42 = vld [vmem:[%s10913_s1 + $0x5ac] ss:$16 sps:$4 sm:$0xff]  }
 0x1e3   :  { %5405 = vmatpush2.bf16.msra.mxu0 %v7738_v34  ;;  %v7747_v41 = vld [vmem:[%s10913_s1 + $0x7c8] ss:$16 sps:$4 sm:$0xff]   ;;  %v7755_v24 = vld [vmem:[%s10913_s1 + $0x7ac] ss:$16 sps:$4 sm:$0xff]   ;;  %s8226_s8 = smov [#allocation2]   ;;  %vm6149_vm0 = vcmask 99328  }
 0x1e4   :  { %5446 = vmatpush2.bf16.msra.mxu1 %v7741_v35  ;;  %5406 = vmatprep.subr.bf16.mxu0 %v7746_v49  ;;  %v7750_v25 = vld [vmem:[%s10913_s1 + $0x5a8] ss:$16 sps:$4 sm:$0xff]   ;;  %v7758_v30 = vld [vmem:[%s10913_s1 + $0x58c] ss:$16 sps:$4 sm:$0xff]   ;;  %s6157_s9 = sshll.u32 %s8226_s8, 4  ;;  %s6158_s9 = int_to_ptr.vmem [resolvable:$true] %s6157_s9 }
 0x1e5   :  { %5447 = vmatprep.subr.bf16.mxu1 %v7749_v36  ;;  %v7753_v29 = vld [vmem:[%s10913_s1 + $0x7a8] ss:$16 sps:$4 sm:$0xff]   ;;  %v7761_v55 = vld [vmem:[%s10913_s1 + $0x78c] ss:$16 sps:$4 sm:$0xff]   ;;  %s8203_s0 = scalar_lea.vmem %s6158_s9, 32  ;;  %p8208_p1 = scmp.lt.s32.totalorder %s6158_s9, %s6158_s9 }
 0x1e6   :  { %v7756_v56 = vld [vmem:[%s10913_s1 + $0x588] ss:$16 sps:$4 sm:$0xff]   ;;  %v7764_v16 = vld [vmem:[%s10913_s1 + $0x56c] ss:$16 sps:$4 sm:$0xff]   ;;  %p8204_p0 = scmp.ne.s32.totalorder %s6158_s9, %s8203_s0  ;;  %p8209_p2 = scmp.lt.s32.totalorder %s8203_s0, %s8203_s0 }
 0x1e7   :  { %5407 = vmatpush2.bf16.msra.mxu0 %v7744_v40  ;;  %v7759_v60 = vld [vmem:[%s10913_s1 + $0x788] ss:$16 sps:$4 sm:$0xff]   ;;  %v7767_v17 = vld [vmem:[%s10913_s1 + $0x76c] ss:$16 sps:$4 sm:$0xff]  }
 0x1e8   :  { %5448 = vmatpush2.bf16.msra.mxu1 %v7747_v41  ;;  %5408 = vmatprep.subr.bf16.mxu0 %v7752_v42  ;;  %v7762_v7 = vld [vmem:[%s10913_s1 + $0x568] ss:$16 sps:$4 sm:$0xff]   ;;  %v7770_v0 = vld [vmem:[%s10913_s1 + $0x54c] ss:$16 sps:$4 sm:$0xff]   ;;  %p8210_p3 = por %p8209_p2, %p8208_p1 }
 0x1e9   :  { %5449 = vmatprep.subr.bf16.mxu1 %v7755_v24  ;;  %v7765_v63 = vld [vmem:[%s10913_s1 + $0x768] ss:$16 sps:$4 sm:$0xff]   ;;  %v7773_v1 = vld [vmem:[%s10913_s1 + $0x74c] ss:$16 sps:$4 sm:$0xff]  }
 0x1ea   :  { %v7768_v13 = vld [vmem:[%s10913_s1 + $0x548] ss:$16 sps:$4 sm:$0xff]   ;;  %v7776_v53 = vld [vmem:[%s10913_s1 + $0x52c] ss:$16 sps:$4 sm:$0xff]   ;;  %p8211_p4 = pnand %p8210_p3, %p8204_p0 }
 0x1eb   :  { %5409 = vmatpush2.bf16.msra.mxu0 %v7750_v25  ;;  %v7771_v6 = vld [vmem:[%s10913_s1 + $0x748] ss:$16 sps:$4 sm:$0xff]   ;;  %v7779_v57 = vld [vmem:[%s10913_s1 + $0x72c] ss:$16 sps:$4 sm:$0xff]  }
 0x1ec   :  { %5450 = vmatpush2.bf16.msra.mxu1 %v7753_v29  ;;  %5410 = vmatprep.subr.bf16.mxu0 %v7758_v30  ;;  %v7774_v39 = vld [vmem:[%s10913_s1 + $0x528] ss:$16 sps:$4 sm:$0xff]   ;;  %v7782_v11 = vld [vmem:[%s10913_s1 + $0x50c] ss:$16 sps:$4 sm:$0xff]  }
 0x1ed   :  { %5451 = vmatprep.subr.bf16.mxu1 %v7761_v55  ;;  %v7777_v44 = vld [vmem:[%s10913_s1 + $0x728] ss:$16 sps:$4 sm:$0xff]   ;;  %v7785_v10 = vld [vmem:[%s10913_s1 + $0x70c] ss:$16 sps:$4 sm:$0xff]  }
 0x1ee   :  { %v7780_v12 = vld [vmem:[%s10913_s1 + $0x508] ss:$16 sps:$4 sm:$0xff]   ;;  %v7788_v62 = vld [vmem:[%s10913_s1 + $0x8ec] ss:$16 sps:$4 sm:$0xff]  }
 0x1ef   :  { %5411 = vmatpush2.bf16.msra.mxu0 %v7756_v56  ;;  %v7783_v14 = vld [vmem:[%s10913_s1 + $0x708] ss:$16 sps:$4 sm:$0xff]   ;;  %v7791_v3 = vld [vmem:[%s10913_s1 + $0xaec] ss:$16 sps:$4 sm:$0xff]  }
 0x1f0   :  { %5452 = vmatpush2.bf16.msra.mxu1 %v7759_v60  ;;  %5412 = vmatprep.subr.bf16.mxu0 %v7764_v16  ;;  %v7786_v15 = vld [vmem:[%s10913_s1 + $0x8e8] ss:$16 sps:$4 sm:$0xff]   ;;  %v7794_v19 = vld [vmem:[%s10913_s1 + $0x8cc] ss:$16 sps:$4 sm:$0xff]  }
 0x1f1   :  { %5453 = vmatprep.subr.bf16.mxu1 %v7767_v17  ;;  %v7789_v18 = vld [vmem:[%s10913_s1 + $0xae8] ss:$16 sps:$4 sm:$0xff]   ;;  %v7797_v20 = vld [vmem:[%s10913_s1 + $0xacc] ss:$16 sps:$4 sm:$0xff]  }
 0x1f2   :  { %v7792_v26 = vld [vmem:[%s10913_s1 + $0x8c8] ss:$16 sps:$4 sm:$0xff]   ;;  %v7812_v29 = vld [vmem:[%s10913_s1 + $0x86c] ss:$16 sps:$4 sm:$0xff]  }
 0x1f3   :  { %5413 = vmatpush2.bf16.msra.mxu0 %v7762_v7  ;;  %v7795_v27 = vld [vmem:[%s10913_s1 + $0xac8] ss:$16 sps:$4 sm:$0xff]   ;;  %v7815_v30 = vld [vmem:[%s10913_s1 + $0xa6c] ss:$16 sps:$4 sm:$0xff]  }
 0x1f4   :  { %5454 = vmatpush2.bf16.msra.mxu1 %v7765_v63  ;;  %5414 = vmatprep.subr.bf16.mxu0 %v7770_v0  ;;  %v7798_v40 = vld [vmem:[%s10913_s1 + $0x8a8] ss:$16 sps:$4 sm:$0xff]   ;;  %v7818_v60 = vld [vmem:[%s10913_s1 + $0x84c] ss:$16 sps:$4 sm:$0xff]  }
 0x1f5   :  { %5455 = vmatprep.subr.bf16.mxu1 %v7773_v1  ;;  %v7801_v41 = vld [vmem:[%s10913_s1 + $0xaa8] ss:$16 sps:$4 sm:$0xff]   ;;  %v7821_v16 = vld [vmem:[%s10913_s1 + $0xa4c] ss:$16 sps:$4 sm:$0xff]  }
 0x1f6   :  { %v7804_v24 = vld [vmem:[%s10913_s1 + $0x888] ss:$16 sps:$4 sm:$0xff]   ;;  %v7824_v63 = vld [vmem:[%s10913_s1 + $0x82c] ss:$16 sps:$4 sm:$0xff]  }
 0x1f7   :  { %5415 = vmatpush2.bf16.msra.mxu0 %v7768_v13  ;;  %v7807_v25 = vld [vmem:[%s10913_s1 + $0xa88] ss:$16 sps:$4 sm:$0xff]   ;;  %v7827_v0 = vld [vmem:[%s10913_s1 + $0xa2c] ss:$16 sps:$4 sm:$0xff]  }
 0x1f8   :  { %5456 = vmatpush2.bf16.msra.mxu1 %v7771_v6  ;;  %5416 = vmatprep.subr.bf16.mxu0 %v7776_v53  ;;  %v7810_v55 = vld [vmem:[%s10913_s1 + $0x868] ss:$16 sps:$4 sm:$0xff]   ;;  %v7830_v6 = vld [vmem:[%s10913_s1 + $0x80c] ss:$16 sps:$4 sm:$0xff]  }
 0x1f9   :  { %5457 = vmatprep.subr.bf16.mxu1 %v7779_v57  ;;  %v7813_v56 = vld [vmem:[%s10913_s1 + $0xa68] ss:$16 sps:$4 sm:$0xff]   ;;  %v7833_v53 = vld [vmem:[%s10913_s1 + $0xa0c] ss:$16 sps:$4 sm:$0xff]  }
 0x1fa   :  { %v7816_v17 = vld [vmem:[%s10913_s1 + $0x848] ss:$16 sps:$4 sm:$0xff]  }
 0x1fb   :  { %5417 = vmatpush2.bf16.msra.mxu0 %v7774_v39  ;;  %v7819_v7 = vld [vmem:[%s10913_s1 + $0xa48] ss:$16 sps:$4 sm:$0xff]  }
 0x1fc   :  { %5458 = vmatpush2.bf16.msra.mxu1 %v7777_v44  ;;  %5418 = vmatprep.subr.bf16.mxu0 %v7782_v11  ;;  %v7822_v1 = vld [vmem:[%s10913_s1 + $0x828] ss:$16 sps:$4 sm:$0xff]   ;;  %v7836_v44 = vld [vmem:[%s10913_s1 + $0x9ec] ss:$16 sps:$4 sm:$0xff]  }
 0x1fd   :  { %5459 = vmatprep.subr.bf16.mxu1 %v7785_v10  ;;  %v7825_v13 = vld [vmem:[%s10913_s1 + $0xa28] ss:$16 sps:$4 sm:$0xff]   ;;  %v7839_v11 = vld [vmem:[%s10913_s1 + $0xbec] ss:$16 sps:$4 sm:$0xff]  }
 0x1fe   :  { %v7828_v57 = vld [vmem:[%s10913_s1 + $0x808] ss:$16 sps:$4 sm:$0xff]  }
 0x1ff   :  { %5419 = vmatpush2.bf16.msra.mxu0 %v7780_v12  ;;  %v7831_v39 = vld [vmem:[%s10913_s1 + $0xa08] ss:$16 sps:$4 sm:$0xff]  }
 0x200   :  { %5460 = vmatpush2.bf16.msra.mxu1 %v7783_v14  ;;  %5470 = vmatprep.subr.bf16.mxu0 %v7788_v62  ;;  %v7834_v10 = vld [vmem:[%s10913_s1 + $0x9e8] ss:$16 sps:$4 sm:$0xff]   ;;  %v7842_v14 = vld [vmem:[%s10913_s1 + $0x9cc] ss:$16 sps:$4 sm:$0xff]  }
 0x201   :  { %5511 = vmatprep.subr.bf16.mxu1 %v7791_v3  ;;  %v7837_v12 = vld [vmem:[%s10913_s1 + $0xbe8] ss:$16 sps:$4 sm:$0xff]   ;;  %v7845_v62 = vld [vmem:[%s10913_s1 + $0xbcc] ss:$16 sps:$4 sm:$0xff]  }
 0x202   :  { %v5176_v21 = vpop.f32.mrf.mxu0  ;;  %5421 = vmatmul.mubr.bf16.vlgmr.msra.gmra.mxu0 %v8690_v32  ;;  %v7800_v32 = vld [vmem:[%s10913_s1 + $0x8ac] ss:$16 sps:$4 sm:$0xff]   ;;  %v7840_v3 = vld [vmem:[%s10913_s1 + $0x9c8] ss:$16 sps:$4 sm:$0xff]  }
 0x203   :  { %v5217_v22 = vpop.f32.mrf.mxu1  ;;  %5462 = vmatmul.mubr.bf16.vlgmr.msra.gmra.mxu1 %v8694_v33  ;;  %v5177_v23 = vadd.f32 %v5176_v21, %v9824_v61  ;;  %5471 = vmatpush1.bf16.msra.mxu0 %v7786_v15  ;;  %v7803_v33 = vld [vmem:[%s10913_s1 + $0xaac] ss:$16 sps:$4 sm:$0xff]   ;;  %v7843_v15 = vld [vmem:[%s10913_s1 + $0xbc8] ss:$16 sps:$4 sm:$0xff]  }
 0x204   :  { %5512 = vmatpush1.bf16.msra.mxu1 %v7789_v18  ;;  %v5178_v28 = vpop.f32.mrf.mxu0  ;;  %5472 = vmatprep.subr.bf16.mxu0 %v7794_v19  ;;  %v7848_v18 = vld [vmem:[%s10913_s1 + $0x9ac] ss:$16 sps:$4 sm:$0xff]   ;;  %v7849_v21 = vld [vmem:[%s10913_s1 + $0xba8] ss:$16 sps:$4 sm:$0xff]  }
 0x205   :  { %v5219_v31 = vpop.f32.mrf.mxu1  ;;  %5513 = vmatprep.subr.bf16.mxu1 %v7797_v20  ;;  %v10026_v61 = vadd.f32 %v5217_v22, %v5177_v23  ;;  %v5179_v34 = vadd.f32 %v5178_v28, %v9835_v2  ;;  %5502 = vmatprep.mubr.bf16.mxu0 %v8733_v48  ;;  %v7806_v48 = vld [vmem:[%s10913_s1 + $0x88c] ss:$16 sps:$4 sm:$0xff]   ;;  %v7846_v20 = vld [vmem:[%s10913_s1 + $0x9a8] ss:$16 sps:$4 sm:$0xff]  }
 0x206   :  { %5543 = vmatprep.mubr.bf16.mxu1 %v8741_v52  ;;  %v5180_v35 = vpop.f32.mrf.mxu0  ;;  %v7809_v52 = vld [vmem:[%s10913_s1 + $0xa8c] ss:$16 sps:$4 sm:$0xff]  }
 0x207   :  { %v5221_v49 = vpop.f32.mrf.mxu1  ;;  %v10031_v36 = vadd.f32 %v5219_v31, %v5179_v34  ;;  %5473 = vmatpush1.bf16.msra.mxu0 %v7792_v26  ;;  %v7851_v19 = vld [vmem:[%s10913_s1 + $0xbac] ss:$16 sps:$4 sm:$0xff]   ;;  %v7852_v26 = vld [vmem:[%s10913_s1 + $0x988] ss:$16 sps:$4 sm:$0xff]  }
 0x208   :  { %5514 = vmatpush1.bf16.msra.mxu1 %v7795_v27  ;;  %v5181_v42 = vpop.f32.mrf.mxu0  ;;  %5474 = vmatprep.subr.bf16.mxu0 %v7800_v32  ;;  %v7854_v22 = vld [vmem:[%s10913_s1 + $0x98c] ss:$16 sps:$4 sm:$0xff]   ;;  %v7855_v27 = vld [vmem:[%s10913_s1 + $0xb88] ss:$16 sps:$4 sm:$0xff]  }
 0x209   :  { %v5222_v2 = vpop.f32.mrf.mxu1  ;;  %5515 = vmatprep.subr.bf16.mxu1 %v7803_v33  ;;  %v7857_v23 = vld [vmem:[%s10913_s1 + $0xb8c] ss:$16 sps:$4 sm:$0xff]   ;;  %v7858_v32 = vld [vmem:[%s10913_s1 + $0x968] ss:$16 sps:$4 sm:$0xff]  }
 0x20a   :  { %v7860_v28 = vld [vmem:[%s10913_s1 + $0x96c] ss:$16 sps:$4 sm:$0xff]   ;;  %v7861_v33 = vld [vmem:[%s10913_s1 + $0xb68] ss:$16 sps:$4 sm:$0xff]  }
 0x20b   :  { %5475 = vmatpush1.bf16.msra.mxu0 %v7798_v40  ;;  %v7863_v31 = vld [vmem:[%s10913_s1 + $0xb6c] ss:$16 sps:$4 sm:$0xff]   ;;  %v7864_v49 = vld [vmem:[%s10913_s1 + $0x948] ss:$16 sps:$4 sm:$0xff]  }
 0x20c   :  { %5516 = vmatpush1.bf16.msra.mxu1 %v7801_v41  ;;  %5476 = vmatprep.subr.bf16.mxu0 %v7806_v48  ;;  %v7866_v34 = vld [vmem:[%s10913_s1 + $0x94c] ss:$16 sps:$4 sm:$0xff]   ;;  %v7867_v40 = vld [vmem:[%s10913_s1 + $0xb48] ss:$16 sps:$4 sm:$0xff]  }
 0x20d   :  { %5517 = vmatprep.subr.bf16.mxu1 %v7809_v52  ;;  %v7869_v35 = vld [vmem:[%s10913_s1 + $0xb4c] ss:$16 sps:$4 sm:$0xff]   ;;  %v7870_v2 = vld [vmem:[%s10913_s1 + $0x928] ss:$16 sps:$4 sm:$0xff]  }
 0x20e   :  { %v7872_v41 = vld [vmem:[%s10913_s1 + $0x92c] ss:$16 sps:$4 sm:$0xff]   ;;  %v7873_v48 = vld [vmem:[%s10913_s1 + $0xb28] ss:$16 sps:$4 sm:$0xff]  }
 0x20f   :  { %5477 = vmatpush1.bf16.msra.mxu0 %v7804_v24  ;;  %v7875_v42 = vld [vmem:[%s10913_s1 + $0xb2c] ss:$16 sps:$4 sm:$0xff]  }
 0x210   :  { %5518 = vmatpush1.bf16.msra.mxu1 %v7807_v25  ;;  %5478 = vmatprep.subr.bf16.mxu0 %v7812_v29  ;;  %v7878_v52 = vld [vmem:[%s10913_s1 + $0x90c] ss:$16 sps:$4 sm:$0xff]   ;;  %v7876_v25 = vld [vmem:[%s10913_s1 + $0x908] ss:$16 sps:$4 sm:$0xff]  }
 0x211   :  { %5519 = vmatprep.subr.bf16.mxu1 %v7815_v30  ;;  %v7881_v24 = vld [vmem:[%s10913_s1 + $0xb0c] ss:$16 sps:$4 sm:$0xff]   ;;  %v7879_v29 = vld [vmem:[%s10913_s1 + $0xb08] ss:$16 sps:$4 sm:$0xff]  }
 0x212   :  { %v7884_v30 = vld [vmem:[%s10913_s1 + $0xcec] ss:$16 sps:$4 sm:$0xff]  }
 0x213   :  { %5479 = vmatpush1.bf16.msra.mxu0 %v7810_v55  ;;  %v7887_v55 = vld [vmem:[%s10913_s1 + $0xeec] ss:$16 sps:$4 sm:$0xff]  }
 0x214   :  { %5520 = vmatpush1.bf16.msra.mxu1 %v7813_v56  ;;  %5480 = vmatprep.subr.bf16.mxu0 %v7818_v60  ;;  %v7882_v56 = vld [vmem:[%s10913_s1 + $0xce8] ss:$16 sps:$4 sm:$0xff]  }
 0x215   :  { %5521 = vmatprep.subr.bf16.mxu1 %v7821_v16  ;;  %v7885_v60 = vld [vmem:[%s10913_s1 + $0xee8] ss:$16 sps:$4 sm:$0xff]   ;;  %v7890_v16 = vld [vmem:[%s10913_s1 + $0xccc] ss:$16 sps:$4 sm:$0xff]  }
 0x217   :  { %5481 = vmatpush1.bf16.msra.mxu0 %v7816_v17  ;;  %v7893_v17 = vld [vmem:[%s10913_s1 + $0xecc] ss:$16 sps:$4 sm:$0xff]  }
 0x218   :  { %5522 = vmatpush1.bf16.msra.mxu1 %v7819_v7  ;;  %5482 = vmatprep.subr.bf16.mxu0 %v7824_v63 }
 0x219   :  { %5523 = vmatprep.subr.bf16.mxu1 %v7827_v0 }
 0x21b   :  { %5483 = vmatpush1.bf16.msra.mxu0 %v7822_v1  ;;  %v7888_v1 = vld [vmem:[%s10913_s1 + $0xcc8] ss:$16 sps:$4 sm:$0xff]  }
 0x21c   :  { %5524 = vmatpush1.bf16.msra.mxu1 %v7825_v13  ;;  %5484 = vmatprep.subr.bf16.mxu0 %v7830_v6  ;;  %v7891_v13 = vld [vmem:[%s10913_s1 + $0xec8] ss:$16 sps:$4 sm:$0xff]  }
 0x21d   :  { %5525 = vmatprep.subr.bf16.mxu1 %v7833_v53 }
 0x21f   :  { %5485 = vmatpush1.bf16.msra.mxu0 %v7828_v57 }
 0x220   :  { %5526 = vmatpush1.bf16.msra.mxu1 %v7831_v39  ;;  %5486 = vmatprep.subr.bf16.mxu0 %v7836_v44 }
 0x221   :  { %5527 = vmatprep.subr.bf16.mxu1 %v7839_v11 }
 0x223   :  { %5487 = vmatpush2.bf16.msra.mxu0 %v7834_v10  ;;  %v7894_v10 = vld [vmem:[%s10913_s1 + $0xca8] ss:$16 sps:$4 sm:$0xff]  }
 0x224   :  { %5528 = vmatpush2.bf16.msra.mxu1 %v7837_v12  ;;  %5488 = vmatprep.subr.bf16.mxu0 %v7842_v14  ;;  %v7897_v12 = vld [vmem:[%s10913_s1 + $0xea8] ss:$16 sps:$4 sm:$0xff]  }
 0x225   :  { %5529 = vmatprep.subr.bf16.mxu1 %v7845_v62  ;;  %v7900_v62 = vld [vmem:[%s10913_s1 + $0xc88] ss:$16 sps:$4 sm:$0xff]  }
 0x227   :  { %5489 = vmatpush2.bf16.msra.mxu0 %v7840_v3  ;;  %v7903_v3 = vld [vmem:[%s10913_s1 + $0xe88] ss:$16 sps:$4 sm:$0xff]  }
 0x228   :  { %5530 = vmatpush2.bf16.msra.mxu1 %v7843_v15  ;;  %5490 = vmatprep.subr.bf16.mxu0 %v7848_v18  ;;  %v7908_v15 = vld [vmem:[%s10913_s1 + $0xc6c] ss:$16 sps:$4 sm:$0xff]  }
 0x229   :  { %5531 = vmatprep.subr.bf16.mxu1 %v7851_v19  ;;  %v7911_v18 = vld [vmem:[%s10913_s1 + $0xe6c] ss:$16 sps:$4 sm:$0xff]   ;;  %v7906_v19 = vld [vmem:[%s10913_s1 + $0xc68] ss:$16 sps:$4 sm:$0xff]  }
 0x22b   :  { %5491 = vmatpush2.bf16.msra.mxu0 %v7846_v20  ;;  %v7909_v20 = vld [vmem:[%s10913_s1 + $0xe68] ss:$16 sps:$4 sm:$0xff]  }
 0x22c   :  { %5532 = vmatpush2.bf16.msra.mxu1 %v7849_v21  ;;  %5492 = vmatprep.subr.bf16.mxu0 %v7854_v22  ;;  %v7914_v21 = vld [vmem:[%s10913_s1 + $0xc4c] ss:$16 sps:$4 sm:$0xff]  }
 0x22d   :  { %5533 = vmatprep.subr.bf16.mxu1 %v7857_v23  ;;  %v7917_v22 = vld [vmem:[%s10913_s1 + $0xe4c] ss:$16 sps:$4 sm:$0xff]   ;;  %v7912_v23 = vld [vmem:[%s10913_s1 + $0xc48] ss:$16 sps:$4 sm:$0xff]  }
 0x22f   :  { %5493 = vmatpush2.bf16.msra.mxu0 %v7852_v26  ;;  %v7915_v26 = vld [vmem:[%s10913_s1 + $0xe48] ss:$16 sps:$4 sm:$0xff]  }
 0x230   :  { %5534 = vmatpush2.bf16.msra.mxu1 %v7855_v27  ;;  %5494 = vmatprep.subr.bf16.mxu0 %v7860_v28  ;;  %v7920_v27 = vld [vmem:[%s10913_s1 + $0xc2c] ss:$16 sps:$4 sm:$0xff]  }
 0x231   :  { %5535 = vmatprep.subr.bf16.mxu1 %v7863_v31  ;;  %v7923_v28 = vld [vmem:[%s10913_s1 + $0xe2c] ss:$16 sps:$4 sm:$0xff]   ;;  %v7918_v31 = vld [vmem:[%s10913_s1 + $0xc28] ss:$16 sps:$4 sm:$0xff]  }
 0x233   :  { %5495 = vmatpush2.bf16.msra.mxu0 %v7858_v32  ;;  %v7921_v32 = vld [vmem:[%s10913_s1 + $0xe28] ss:$16 sps:$4 sm:$0xff]  }
 0x234   :  { %5536 = vmatpush2.bf16.msra.mxu1 %v7861_v33  ;;  %5496 = vmatprep.subr.bf16.mxu0 %v7866_v34  ;;  %v7926_v33 = vld [vmem:[%s10913_s1 + $0xc0c] ss:$16 sps:$4 sm:$0xff]  }
 0x235   :  { %5537 = vmatprep.subr.bf16.mxu1 %v7869_v35  ;;  %v7929_v34 = vld [vmem:[%s10913_s1 + $0xe0c] ss:$16 sps:$4 sm:$0xff]   ;;  %v7924_v35 = vld [vmem:[%s10913_s1 + $0xc08] ss:$16 sps:$4 sm:$0xff]  }
 0x237   :  { %5497 = vmatpush2.bf16.msra.mxu0 %v7864_v49  ;;  %v7927_v49 = vld [vmem:[%s10913_s1 + $0xe08] ss:$16 sps:$4 sm:$0xff]  }
 0x238   :  { %5538 = vmatpush2.bf16.msra.mxu1 %v7867_v40  ;;  %5498 = vmatprep.subr.bf16.mxu0 %v7872_v41  ;;  %v7932_v40 = vld [vmem:[%s10913_s1 + $0xdec] ss:$16 sps:$4 sm:$0xff]  }
 0x239   :  { %5539 = vmatprep.subr.bf16.mxu1 %v7875_v42  ;;  %v7935_v41 = vld [vmem:[%s10913_s1 + $0xfec] ss:$16 sps:$4 sm:$0xff]   ;;  %v7930_v42 = vld [vmem:[%s10913_s1 + $0xde8] ss:$16 sps:$4 sm:$0xff]  }
 0x23b   :  { %5499 = vmatpush2.bf16.msra.mxu0 %v7870_v2  ;;  %v7933_v2 = vld [vmem:[%s10913_s1 + $0xfe8] ss:$16 sps:$4 sm:$0xff]  }
 0x23c   :  { %5540 = vmatpush2.bf16.msra.mxu1 %v7873_v48  ;;  %5500 = vmatprep.subr.bf16.mxu0 %v7878_v52  ;;  %v7938_v48 = vld [vmem:[%s10913_s1 + $0xdcc] ss:$16 sps:$4 sm:$0xff]  }
 0x23d   :  { %5541 = vmatprep.subr.bf16.mxu1 %v7881_v24  ;;  %v7941_v52 = vld [vmem:[%s10913_s1 + $0xfcc] ss:$16 sps:$4 sm:$0xff]   ;;  %v7936_v24 = vld [vmem:[%s10913_s1 + $0xdc8] ss:$16 sps:$4 sm:$0xff]  }
 0x23f   :  { %5501 = vmatpush2.bf16.msra.mxu0 %v7876_v25  ;;  %v7939_v25 = vld [vmem:[%s10913_s1 + $0xfc8] ss:$16 sps:$4 sm:$0xff]  }
 0x240   :  { %5542 = vmatpush2.bf16.msra.mxu1 %v7879_v29  ;;  %5552 = vmatprep.subr.bf16.mxu0 %v7884_v30  ;;  %v7944_v29 = vld [vmem:[%s10913_s1 + $0xdac] ss:$16 sps:$4 sm:$0xff]  }
 0x241   :  { %5593 = vmatprep.subr.bf16.mxu1 %v7887_v55  ;;  %v7947_v30 = vld [vmem:[%s10913_s1 + $0xfac] ss:$16 sps:$4 sm:$0xff]   ;;  %v7942_v55 = vld [vmem:[%s10913_s1 + $0xda8] ss:$16 sps:$4 sm:$0xff]  }
 0x242   :  { %v5258_v7 = vpop.f32.mrf.mxu0  ;;  %5503 = vmatmul.mubr.bf16.vlgmr.msra.gmra.mxu0 %v8924_v4  ;;  %v7896_v4 = vld [vmem:[%s10913_s1 + $0xcac] ss:$16 sps:$4 sm:$0xff]  }
 0x243   :  { %v5299_v63 = vpop.f32.mrf.mxu1  ;;  %5544 = vmatmul.mubr.bf16.vlgmr.msra.gmra.mxu1 %v8928_v5  ;;  %v5259_v0 = vadd.f32 %v5258_v7, %v10026_v61  ;;  %5553 = vmatpush1.bf16.msra.mxu0 %v7882_v56  ;;  %v7899_v5 = vld [vmem:[%s10913_s1 + $0xeac] ss:$16 sps:$4 sm:$0xff]   ;;  %v7945_v56 = vld [vmem:[%s10913_s1 + $0xfa8] ss:$16 sps:$4 sm:$0xff]  }
 0x244   :  { %5594 = vmatpush1.bf16.msra.mxu1 %v7885_v60  ;;  %v5260_v6 = vpop.f32.mrf.mxu0  ;;  %5554 = vmatprep.subr.bf16.mxu0 %v7890_v16  ;;  %v7950_v60 = vld [vmem:[%s10913_s1 + $0xd8c] ss:$16 sps:$4 sm:$0xff]   ;;  %v7951_v7 = vld [vmem:[%s10913_s1 + $0xf88] ss:$16 sps:$4 sm:$0xff]  }
 0x245   :  { %v5301_v53 = vpop.f32.mrf.mxu1  ;;  %5595 = vmatprep.subr.bf16.mxu1 %v7893_v17  ;;  %v10228_v61 = vadd.f32 %v5299_v63, %v5259_v0  ;;  %v5261_v57 = vadd.f32 %v5260_v6, %v10031_v36  ;;  %5584 = vmatprep.mubr.bf16.mxu0 %v8942_v8  ;;  %v7902_v8 = vld [vmem:[%s10913_s1 + $0xc8c] ss:$16 sps:$4 sm:$0xff]   ;;  %v7948_v17 = vld [vmem:[%s10913_s1 + $0xd88] ss:$16 sps:$4 sm:$0xff]  }
 0x246   :  { %5625 = vmatprep.mubr.bf16.mxu1 %v8944_v9  ;;  %v5262_v39 = vpop.f32.mrf.mxu0  ;;  %v7905_v9 = vld [vmem:[%s10913_s1 + $0xe8c] ss:$16 sps:$4 sm:$0xff]  }
 0x247   :  { %v5303_v44 = vpop.f32.mrf.mxu1  ;;  %v10233_v11 = vadd.f32 %v5301_v53, %v5261_v57  ;;  %5555 = vmatpush1.bf16.msra.mxu0 %v7888_v1  ;;  %v7953_v16 = vld [vmem:[%s10913_s1 + $0xf8c] ss:$16 sps:$4 sm:$0xff]   ;;  %v7954_v1 = vld [vmem:[%s10913_s1 + $0xd68] ss:$16 sps:$4 sm:$0xff]  }
 0x248   :  { %5596 = vmatpush1.bf16.msra.mxu1 %v7891_v13  ;;  %v5263_v14 = vpop.f32.mrf.mxu0  ;;  %5556 = vmatprep.subr.bf16.mxu0 %v7896_v4  ;;  %v7956_v63 = vld [vmem:[%s10913_s1 + $0xd6c] ss:$16 sps:$4 sm:$0xff]   ;;  %v7957_v13 = vld [vmem:[%s10913_s1 + $0xf68] ss:$16 sps:$4 sm:$0xff]  }
 0x249   :  { %v5304_v36 = vpop.f32.mrf.mxu1  ;;  %5597 = vmatprep.subr.bf16.mxu1 %v7899_v5  ;;  %v7959_v0 = vld [vmem:[%s10913_s1 + $0xf6c] ss:$16 sps:$4 sm:$0xff]   ;;  %v7960_v4 = vld [vmem:[%s10913_s1 + $0xd48] ss:$16 sps:$4 sm:$0xff]  }
 0x24a   :  { %v7962_v6 = vld [vmem:[%s10913_s1 + $0xd4c] ss:$16 sps:$4 sm:$0xff]   ;;  %v7963_v5 = vld [vmem:[%s10913_s1 + $0xf48] ss:$16 sps:$4 sm:$0xff]  }
 0x24b   :  { %5557 = vmatpush1.bf16.msra.mxu0 %v7894_v10  ;;  %v7965_v53 = vld [vmem:[%s10913_s1 + $0xf4c] ss:$16 sps:$4 sm:$0xff]   ;;  %v7966_v44 = vld [vmem:[%s10913_s1 + $0xd28] ss:$16 sps:$4 sm:$0xff]  }
 0x24c   :  { %5598 = vmatpush1.bf16.msra.mxu1 %v7897_v12  ;;  %5558 = vmatprep.subr.bf16.mxu0 %v7902_v8  ;;  %v7968_v57 = vld [vmem:[%s10913_s1 + $0xd2c] ss:$16 sps:$4 sm:$0xff]   ;;  %v7969_v10 = vld [vmem:[%s10913_s1 + $0xf28] ss:$16 sps:$4 sm:$0xff]  }
 0x24d   :  { %5599 = vmatprep.subr.bf16.mxu1 %v7905_v9  ;;  %v7971_v39 = vld [vmem:[%s10913_s1 + $0xf2c] ss:$16 sps:$4 sm:$0xff]   ;;  %v7972_v36 = vld [vmem:[%s10913_s1 + $0xd08] ss:$16 sps:$4 sm:$0xff]   ;;  %v964_v9 = vsub.s32 2, %v8374_v43 }
 0x24e   :  { %v7974_v12 = vld [vmem:[%s10913_s1 + $0xd0c] ss:$16 sps:$4 sm:$0xff]   ;;  %v7975_v8 = vld [vmem:[%s10913_s1 + $0xf08] ss:$16 sps:$4 sm:$0xff]  }
 0x24f   :  { %5559 = vmatpush1.bf16.msra.mxu0 %v7900_v62  ;;  %v7977_v14 = vld [vmem:[%s10913_s1 + $0xf0c] ss:$16 sps:$4 sm:$0xff]  }
 0x250   :  { %5600 = vmatpush1.bf16.msra.mxu1 %v7903_v3  ;;  %5560 = vmatprep.subr.bf16.mxu0 %v7908_v15  ;;  %v7980_v62 = vld [vmem:[%s10913_s1 + $0x10ec] ss:$16 sps:$4 sm:$0xff]   ;;  %v968_v15 = vsub.s32 3, %v8374_v43 }
 0x251   :  { %5601 = vmatprep.subr.bf16.mxu1 %v7911_v18  ;;  %v7983_v3 = vld [vmem:[%s10913_s1 + $0x12ec] ss:$16 sps:$4 sm:$0xff]   ;;  %v8202_v18 = vld [vmem:[%s10914_s2] sm:$0xf] }
 0x252   :  { %v7986_v43 = vld [vmem:[%s10913_s1 + $0x10cc] ss:$16 sps:$4 sm:$0xff]  }
 0x253   :  { %5561 = vmatpush1.bf16.msra.mxu0 %v7906_v19  ;;  %v965_v19 = vrot.slane %v8202_v18, %v964_v9  ;;  %v8035_v9 = vld [vmem:[%s10913_s1 + $0x13c8] ss:$16 sps:$4 sm:$0xff]  }
 0x254   :  { %5602 = vmatpush1.bf16.msra.mxu1 %v7909_v20  ;;  %5562 = vmatprep.subr.bf16.mxu0 %v7914_v21  ;;  %v7978_v20 = vld [vmem:[%s10913_s1 + $0x10e8] ss:$16 sps:$4 sm:$0xff]  }
 0x255   :  { %5603 = vmatprep.subr.bf16.mxu1 %v7917_v22  ;;  %v7981_v21 = vld [vmem:[%s10913_s1 + $0x12e8] ss:$16 sps:$4 sm:$0xff]   ;;  %v7989_v22 = vld [vmem:[%s10913_s1 + $0x12cc] ss:$16 sps:$4 sm:$0xff]  }
 0x257   :  { %5563 = vmatpush1.bf16.msra.mxu0 %v7912_v23  ;;  %v969_v23 = vrot.slane %v8202_v18, %v968_v15  ;;  %v8038_v15 = vld [vmem:[%s10913_s1 + $0x11a8] ss:$16 sps:$4 sm:$0xff]  }
 0x258   :  { %5604 = vmatpush1.bf16.msra.mxu1 %v7915_v26  ;;  %5564 = vmatprep.subr.bf16.mxu0 %v7920_v27  ;;  %v8041_v18 = vld [vmem:[%s10913_s1 + $0x13a8] ss:$16 sps:$4 sm:$0xff]  }
 0x259   :  { %5605 = vmatprep.subr.bf16.mxu1 %v7923_v28 }
 0x25b   :  { %5565 = vmatpush1.bf16.msra.mxu0 %v7918_v31  ;;  %v7984_v31 = vld [vmem:[%s10913_s1 + $0x10c8] ss:$16 sps:$4 sm:$0xff]  }
 0x25c   :  { %5606 = vmatpush1.bf16.msra.mxu1 %v7921_v32  ;;  %5566 = vmatprep.subr.bf16.mxu0 %v7926_v33  ;;  %v7987_v32 = vld [vmem:[%s10913_s1 + $0x12c8] ss:$16 sps:$4 sm:$0xff]  }
 0x25d   :  { %5607 = vmatprep.subr.bf16.mxu1 %v7929_v34 }
 0x25f   :  { %5567 = vmatpush1.bf16.msra.mxu0 %v7924_v35 }
 0x260   :  { %5608 = vmatpush1.bf16.msra.mxu1 %v7927_v49  ;;  %5568 = vmatprep.subr.bf16.mxu0 %v7932_v40 }
 0x261   :  { %5609 = vmatprep.subr.bf16.mxu1 %v7935_v41 }
 0x263   :  { %5569 = vmatpush2.bf16.msra.mxu0 %v7930_v42 }
 0x264   :  { %5610 = vmatpush2.bf16.msra.mxu1 %v7933_v2  ;;  %5570 = vmatprep.subr.bf16.mxu0 %v7938_v48  ;;  %v7990_v2 = vld [vmem:[%s10913_s1 + $0x10a8] ss:$16 sps:$4 sm:$0xff]  }
 0x265   :  { %5611 = vmatprep.subr.bf16.mxu1 %v7941_v52  ;;  %v7993_v48 = vld [vmem:[%s10913_s1 + $0x12a8] ss:$16 sps:$4 sm:$0xff]  }
 0x267   :  { %5571 = vmatpush2.bf16.msra.mxu0 %v7936_v24 }
 0x268   :  { %5612 = vmatpush2.bf16.msra.mxu1 %v7939_v25  ;;  %5572 = vmatprep.subr.bf16.mxu0 %v7944_v29  ;;  %v7996_v25 = vld [vmem:[%s10913_s1 + $0x1088] ss:$16 sps:$4 sm:$0xff]  }
 0x269   :  { %5613 = vmatprep.subr.bf16.mxu1 %v7947_v30  ;;  %v7999_v29 = vld [vmem:[%s10913_s1 + $0x1288] ss:$16 sps:$4 sm:$0xff]   ;;  %v8004_v30 = vld [vmem:[%s10913_s1 + $0x106c] ss:$16 sps:$4 sm:$0xff]  }
 0x26b   :  { %5573 = vmatpush2.bf16.msra.mxu0 %v7942_v55  ;;  %v8007_v55 = vld [vmem:[%s10913_s1 + $0x126c] ss:$16 sps:$4 sm:$0xff]  }
 0x26c   :  { %5614 = vmatpush2.bf16.msra.mxu1 %v7945_v56  ;;  %5574 = vmatprep.subr.bf16.mxu0 %v7950_v60  ;;  %v8002_v56 = vld [vmem:[%s10913_s1 + $0x1068] ss:$16 sps:$4 sm:$0xff]  }
 0x26d   :  { %5615 = vmatprep.subr.bf16.mxu1 %v7953_v16  ;;  %v8005_v60 = vld [vmem:[%s10913_s1 + $0x1268] ss:$16 sps:$4 sm:$0xff]   ;;  %v8010_v16 = vld [vmem:[%s10913_s1 + $0x104c] ss:$16 sps:$4 sm:$0xff]  }
 0x26f   :  { %5575 = vmatpush2.bf16.msra.mxu0 %v7948_v17  ;;  %v8013_v17 = vld [vmem:[%s10913_s1 + $0x124c] ss:$16 sps:$4 sm:$0xff]  }
 0x270   :  { %5616 = vmatpush2.bf16.msra.mxu1 %v7951_v7  ;;  %5576 = vmatprep.subr.bf16.mxu0 %v7956_v63  ;;  %v8008_v7 = vld [vmem:[%s10913_s1 + $0x1048] ss:$16 sps:$4 sm:$0xff]  }
 0x271   :  { %5617 = vmatprep.subr.bf16.mxu1 %v7959_v0  ;;  %v8011_v63 = vld [vmem:[%s10913_s1 + $0x1248] ss:$16 sps:$4 sm:$0xff]   ;;  %v8016_v0 = vld [vmem:[%s10913_s1 + $0x102c] ss:$16 sps:$4 sm:$0xff]  }
 0x273   :  { %5577 = vmatpush2.bf16.msra.mxu0 %v7954_v1  ;;  %v8019_v1 = vld [vmem:[%s10913_s1 + $0x122c] ss:$16 sps:$4 sm:$0xff]  }
 0x274   :  { %5618 = vmatpush2.bf16.msra.mxu1 %v7957_v13  ;;  %5578 = vmatprep.subr.bf16.mxu0 %v7962_v6  ;;  %v8014_v13 = vld [vmem:[%s10913_s1 + $0x1028] ss:$16 sps:$4 sm:$0xff]  }
 0x275   :  { %5619 = vmatprep.subr.bf16.mxu1 %v7965_v53  ;;  %v8017_v6 = vld [vmem:[%s10913_s1 + $0x1228] ss:$16 sps:$4 sm:$0xff]   ;;  %v8022_v53 = vld [vmem:[%s10913_s1 + $0x100c] ss:$16 sps:$4 sm:$0xff]  }
 0x277   :  { %5579 = vmatpush2.bf16.msra.mxu0 %v7960_v4  ;;  %v8025_v4 = vld [vmem:[%s10913_s1 + $0x120c] ss:$16 sps:$4 sm:$0xff]  }
 0x278   :  { %5620 = vmatpush2.bf16.msra.mxu1 %v7963_v5  ;;  %5580 = vmatprep.subr.bf16.mxu0 %v7968_v57  ;;  %v8020_v5 = vld [vmem:[%s10913_s1 + $0x1008] ss:$16 sps:$4 sm:$0xff]  }
 0x279   :  { %5621 = vmatprep.subr.bf16.mxu1 %v7971_v39  ;;  %v8023_v57 = vld [vmem:[%s10913_s1 + $0x1208] ss:$16 sps:$4 sm:$0xff]   ;;  %v8028_v39 = vld [vmem:[%s10913_s1 + $0x11ec] ss:$16 sps:$4 sm:$0xff]  }
 0x27b   :  { %5581 = vmatpush2.bf16.msra.mxu0 %v7966_v44  ;;  %v8031_v44 = vld [vmem:[%s10913_s1 + $0x13ec] ss:$16 sps:$4 sm:$0xff]  }
 0x27c   :  { %5622 = vmatpush2.bf16.msra.mxu1 %v7969_v10  ;;  %5582 = vmatprep.subr.bf16.mxu0 %v7974_v12  ;;  %v8026_v10 = vld [vmem:[%s10913_s1 + $0x11e8] ss:$16 sps:$4 sm:$0xff]  }
 0x27d   :  { %5623 = vmatprep.subr.bf16.mxu1 %v7977_v14  ;;  %v8029_v12 = vld [vmem:[%s10913_s1 + $0x13e8] ss:$16 sps:$4 sm:$0xff]   ;;  %v8034_v14 = vld [vmem:[%s10913_s1 + $0x11cc] ss:$16 sps:$4 sm:$0xff]  }
 0x27f   :  { %5583 = vmatpush2.bf16.msra.mxu0 %v7972_v36  ;;  %v8037_v36 = vld [vmem:[%s10913_s1 + $0x13cc] ss:$16 sps:$4 sm:$0xff]  }
 0x280   :  { %5624 = vmatpush2.bf16.msra.mxu1 %v7975_v8  ;;  %5634 = vmatprep.subr.bf16.mxu0 %v7980_v62  ;;  %v8032_v8 = vld [vmem:[%s10913_s1 + $0x11c8] ss:$16 sps:$4 sm:$0xff]   ;;  %v8040_v62 = vld [vmem:[%s10913_s1 + $0x11ac] ss:$16 sps:$4 sm:$0xff]  }
 0x281   :  { %5675 = vmatprep.subr.bf16.mxu1 %v7983_v3  ;;  %v8043_v3 = vld [vmem:[%s10913_s1 + $0x13ac] ss:$16 sps:$4 sm:$0xff]  }
 0x282   :  { %v5340_v26 = vpop.f32.mrf.mxu0  ;;  %5585 = vmatmul.mubr.bf16.vlgmr.msra.gmra.mxu0 %v9150_v37  ;;  %v7992_v37 = vld [vmem:[%s10913_s1 + $0x10ac] ss:$16 sps:$4 sm:$0xff]  }
 0x283   :  { %v5381_v27 = vpop.f32.mrf.mxu1  ;;  %5626 = vmatmul.mubr.bf16.vlgmr.msra.gmra.mxu1 %v9154_v38  ;;  %v5341_v28 = vadd.f32 %v5340_v26, %v965_v19  ;;  %5635 = vmatpush1.bf16.msra.mxu0 %v7978_v20  ;;  %v7995_v38 = vld [vmem:[%s10913_s1 + $0x12ac] ss:$16 sps:$4 sm:$0xff]   ;;  %v8050_v26 = vld [vmem:[%s10913_s1 + $0x1168] ss:$16 sps:$4 sm:$0xff]  }
 0x284   :  { %5676 = vmatpush1.bf16.msra.mxu1 %v7981_v21  ;;  %v5342_v33 = vpop.f32.mrf.mxu0  ;;  %5636 = vmatprep.subr.bf16.mxu0 %v7986_v43  ;;  %v8046_v19 = vld [vmem:[%s10913_s1 + $0x118c] ss:$16 sps:$4 sm:$0xff]   ;;  %v8044_v21 = vld [vmem:[%s10913_s1 + $0x1188] ss:$16 sps:$4 sm:$0xff]  }
 0x285   :  { %v5383_v34 = vpop.f32.mrf.mxu1  ;;  %5677 = vmatprep.subr.bf16.mxu1 %v7989_v22  ;;  %v10434_v35 = vadd.f32 %v5381_v27, %v5341_v28  ;;  %v5343_v49 = vadd.f32 %v5342_v33, %v969_v23  ;;  %5666 = vmatprep.mubr.bf16.mxu0 %v9168_v46  ;;  %v7998_v46 = vld [vmem:[%s10913_s1 + $0x108c] ss:$16 sps:$4 sm:$0xff]   ;;  %v8047_v43 = vld [vmem:[%s10913_s1 + $0x1388] ss:$16 sps:$4 sm:$0xff]  }
 0x286   :  { %5707 = vmatprep.mubr.bf16.mxu1 %v9170_v47  ;;  %v5344_v40 = vpop.f32.mrf.mxu0  ;;  %v8001_v47 = vld [vmem:[%s10913_s1 + $0x128c] ss:$16 sps:$4 sm:$0xff]   ;;  %v8053_v27 = vld [vmem:[%s10913_s1 + $0x1368] ss:$16 sps:$4 sm:$0xff]  }
 0x287   :  { %v5385_v41 = vpop.f32.mrf.mxu1  ;;  %v10438_v42 = vadd.f32 %v5383_v34, %v5343_v49  ;;  %5637 = vmatpush1.bf16.msra.mxu0 %v7984_v31  ;;  %v8049_v20 = vld [vmem:[%s10913_s1 + $0x138c] ss:$16 sps:$4 sm:$0xff]   ;;  %v8059_v33 = vld [vmem:[%s10913_s1 + $0x1348] ss:$16 sps:$4 sm:$0xff]  }
 0x288   :  { %5678 = vmatpush1.bf16.msra.mxu1 %v7987_v32  ;;  %v5345_v52 = vpop.f32.mrf.mxu0  ;;  %5638 = vmatprep.subr.bf16.mxu0 %v7992_v37  ;;  %v8052_v22 = vld [vmem:[%s10913_s1 + $0x116c] ss:$16 sps:$4 sm:$0xff]   ;;  %v8056_v32 = vld [vmem:[%s10913_s1 + $0x1148] ss:$16 sps:$4 sm:$0xff]  }
 0x289   :  { %v5386_v24 = vpop.f32.mrf.mxu1  ;;  %5679 = vmatprep.subr.bf16.mxu1 %v7995_v38  ;;  %v8055_v23 = vld [vmem:[%s10913_s1 + $0x136c] ss:$16 sps:$4 sm:$0xff]   ;;  %v8062_v38 = vld [vmem:[%s10913_s1 + $0x1128] ss:$16 sps:$4 sm:$0xff]  }
 0x28a   :  { %v8058_v28 = vld [vmem:[%s10913_s1 + $0x114c] ss:$16 sps:$4 sm:$0xff]   ;;  %v8065_v49 = vld [vmem:[%s10913_s1 + $0x1328] ss:$16 sps:$4 sm:$0xff]  }
 0x28b   :  { %5639 = vmatpush1.bf16.msra.mxu0 %v7990_v2  ;;  %v8061_v31 = vld [vmem:[%s10913_s1 + $0x134c] ss:$16 sps:$4 sm:$0xff]   ;;  %v8068_v2 = vld [vmem:[%s10913_s1 + $0x1108] ss:$16 sps:$4 sm:$0xff]  }
 0x28c   :  { %5680 = vmatpush1.bf16.msra.mxu1 %v7993_v48  ;;  %5640 = vmatprep.subr.bf16.mxu0 %v7998_v46  ;;  %v8064_v34 = vld [vmem:[%s10913_s1 + $0x112c] ss:$16 sps:$4 sm:$0xff]   ;;  %v8071_v48 = vld [vmem:[%s10913_s1 + $0x1308] ss:$16 sps:$4 sm:$0xff]  }
 0x28d   :  { %5681 = vmatprep.subr.bf16.mxu1 %v8001_v47  ;;  %v8067_v37 = vld [vmem:[%s10913_s1 + $0x132c] ss:$16 sps:$4 sm:$0xff]   ;;  %v8074_v46 = vld [vmem:[%s10913_s1 + $0x14e8] ss:$16 sps:$4 sm:$0xff]  }
 0x28e   :  { %v8070_v40 = vld [vmem:[%s10913_s1 + $0x110c] ss:$16 sps:$4 sm:$0xff]   ;;  %v8077_v47 = vld [vmem:[%s10913_s1 + $0x16e8] ss:$16 sps:$4 sm:$0xff]  }
 0x28f   :  { %5641 = vmatpush1.bf16.msra.mxu0 %v7996_v25  ;;  %v8073_v41 = vld [vmem:[%s10913_s1 + $0x130c] ss:$16 sps:$4 sm:$0xff]  }
 0x290   :  { %5682 = vmatpush1.bf16.msra.mxu1 %v7999_v29  ;;  %5642 = vmatprep.subr.bf16.mxu0 %v8004_v30  ;;  %v8076_v52 = vld [vmem:[%s10913_s1 + $0x14ec] ss:$16 sps:$4 sm:$0xff]  }
 0x291   :  { %5683 = vmatprep.subr.bf16.mxu1 %v8007_v55  ;;  %v8079_v24 = vld [vmem:[%s10913_s1 + $0x16ec] ss:$16 sps:$4 sm:$0xff]  }
 0x292   :  { %v8082_v25 = vld [vmem:[%s10913_s1 + $0x14cc] ss:$16 sps:$4 sm:$0xff]  }
 0x293   :  { %5643 = vmatpush1.bf16.msra.mxu0 %v8002_v56  ;;  %v8085_v29 = vld [vmem:[%s10913_s1 + $0x16cc] ss:$16 sps:$4 sm:$0xff]  }
 0x294   :  { %5684 = vmatpush1.bf16.msra.mxu1 %v8005_v60  ;;  %5644 = vmatprep.subr.bf16.mxu0 %v8010_v16  ;;  %v8080_v60 = vld [vmem:[%s10913_s1 + $0x14c8] ss:$16 sps:$4 sm:$0xff]  }
 0x295   :  { %5685 = vmatprep.subr.bf16.mxu1 %v8013_v17  ;;  %v8083_v16 = vld [vmem:[%s10913_s1 + $0x16c8] ss:$16 sps:$4 sm:$0xff]  }
 0x297   :  { %5645 = vmatpush1.bf16.msra.mxu0 %v8008_v7 }
 0x298   :  { %5686 = vmatpush1.bf16.msra.mxu1 %v8011_v63  ;;  %5646 = vmatprep.subr.bf16.mxu0 %v8016_v0 }
 0x299   :  { %5687 = vmatprep.subr.bf16.mxu1 %v8019_v1 }
 0x29b   :  { %5647 = vmatpush1.bf16.msra.mxu0 %v8014_v13 }
 0x29c   :  { %5688 = vmatpush1.bf16.msra.mxu1 %v8017_v6  ;;  %5648 = vmatprep.subr.bf16.mxu0 %v8022_v53  ;;  %v8086_v6 = vld [vmem:[%s10913_s1 + $0x14a8] ss:$16 sps:$4 sm:$0xff]  }
 0x29d   :  { %5689 = vmatprep.subr.bf16.mxu1 %v8025_v4  ;;  %v8089_v53 = vld [vmem:[%s10913_s1 + $0x16a8] ss:$16 sps:$4 sm:$0xff]  }
 0x29f   :  { %5649 = vmatpush1.bf16.msra.mxu0 %v8020_v5  ;;  %v8092_v5 = vld [vmem:[%s10913_s1 + $0x1488] ss:$16 sps:$4 sm:$0xff]  }
 0x2a0   :  { %5690 = vmatpush1.bf16.msra.mxu1 %v8023_v57  ;;  %5650 = vmatprep.subr.bf16.mxu0 %v8028_v39  ;;  %v8095_v57 = vld [vmem:[%s10913_s1 + $0x1688] ss:$16 sps:$4 sm:$0xff]   ;;  %v8100_v39 = vld [vmem:[%s10913_s1 + $0x146c] ss:$16 sps:$4 sm:$0xff]  }
 0x2a1   :  { %5691 = vmatprep.subr.bf16.mxu1 %v8031_v44  ;;  %v8103_v44 = vld [vmem:[%s10913_s1 + $0x166c] ss:$16 sps:$4 sm:$0xff]  }
 0x2a3   :  { %5651 = vmatpush2.bf16.msra.mxu0 %v8026_v10  ;;  %v8098_v10 = vld [vmem:[%s10913_s1 + $0x1468] ss:$16 sps:$4 sm:$0xff]  }
 0x2a4   :  { %5692 = vmatpush2.bf16.msra.mxu1 %v8029_v12  ;;  %5652 = vmatprep.subr.bf16.mxu0 %v8034_v14  ;;  %v8101_v12 = vld [vmem:[%s10913_s1 + $0x1668] ss:$16 sps:$4 sm:$0xff]   ;;  %v8106_v14 = vld [vmem:[%s10913_s1 + $0x144c] ss:$16 sps:$4 sm:$0xff]  }
 0x2a5   :  { %5693 = vmatprep.subr.bf16.mxu1 %v8037_v36  ;;  %v8109_v36 = vld [vmem:[%s10913_s1 + $0x164c] ss:$16 sps:$4 sm:$0xff]  }
 0x2a7   :  { %5653 = vmatpush2.bf16.msra.mxu0 %v8032_v8  ;;  %v8104_v8 = vld [vmem:[%s10913_s1 + $0x1448] ss:$16 sps:$4 sm:$0xff]  }
 0x2a8   :  { %5694 = vmatpush2.bf16.msra.mxu1 %v8035_v9  ;;  %5654 = vmatprep.subr.bf16.mxu0 %v8040_v62  ;;  %v8107_v9 = vld [vmem:[%s10913_s1 + $0x1648] ss:$16 sps:$4 sm:$0xff]   ;;  %v8112_v62 = vld [vmem:[%s10913_s1 + $0x142c] ss:$16 sps:$4 sm:$0xff]  }
 0x2a9   :  { %5695 = vmatprep.subr.bf16.mxu1 %v8043_v3  ;;  %v8115_v3 = vld [vmem:[%s10913_s1 + $0x162c] ss:$16 sps:$4 sm:$0xff]  }
 0x2ab   :  { %5655 = vmatpush2.bf16.msra.mxu0 %v8038_v15  ;;  %v8110_v15 = vld [vmem:[%s10913_s1 + $0x1428] ss:$16 sps:$4 sm:$0xff]  }
 0x2ac   :  { %5696 = vmatpush2.bf16.msra.mxu1 %v8041_v18  ;;  %5656 = vmatprep.subr.bf16.mxu0 %v8046_v19  ;;  %v8113_v18 = vld [vmem:[%s10913_s1 + $0x1628] ss:$16 sps:$4 sm:$0xff]   ;;  %v8118_v19 = vld [vmem:[%s10913_s1 + $0x140c] ss:$16 sps:$4 sm:$0xff]  }
 0x2ad   :  { %5697 = vmatprep.subr.bf16.mxu1 %v8049_v20  ;;  %v8121_v20 = vld [vmem:[%s10913_s1 + $0x160c] ss:$16 sps:$4 sm:$0xff]  }
 0x2af   :  { %5657 = vmatpush2.bf16.msra.mxu0 %v8044_v21  ;;  %v8116_v21 = vld [vmem:[%s10913_s1 + $0x1408] ss:$16 sps:$4 sm:$0xff]  }
 0x2b0   :  { %5698 = vmatpush2.bf16.msra.mxu1 %v8047_v43  ;;  %5658 = vmatprep.subr.bf16.mxu0 %v8052_v22  ;;  %v8119_v43 = vld [vmem:[%s10913_s1 + $0x1608] ss:$16 sps:$4 sm:$0xff]   ;;  %v8124_v22 = vld [vmem:[%s10913_s1 + $0x15ec] ss:$16 sps:$4 sm:$0xff]  }
 0x2b1   :  { %5699 = vmatprep.subr.bf16.mxu1 %v8055_v23  ;;  %v8127_v23 = vld [vmem:[%s10913_s1 + $0x17ec] ss:$16 sps:$4 sm:$0xff]  }
 0x2b3   :  { %5659 = vmatpush2.bf16.msra.mxu0 %v8050_v26  ;;  %v8122_v26 = vld [vmem:[%s10913_s1 + $0x15e8] ss:$16 sps:$4 sm:$0xff]  }
 0x2b4   :  { %5700 = vmatpush2.bf16.msra.mxu1 %v8053_v27  ;;  %5660 = vmatprep.subr.bf16.mxu0 %v8058_v28  ;;  %v8125_v27 = vld [vmem:[%s10913_s1 + $0x17e8] ss:$16 sps:$4 sm:$0xff]   ;;  %v8130_v28 = vld [vmem:[%s10913_s1 + $0x15cc] ss:$16 sps:$4 sm:$0xff]  }
 0x2b5   :  { %5701 = vmatprep.subr.bf16.mxu1 %v8061_v31  ;;  %v8133_v31 = vld [vmem:[%s10913_s1 + $0x17cc] ss:$16 sps:$4 sm:$0xff]  }
 0x2b7   :  { %5661 = vmatpush2.bf16.msra.mxu0 %v8056_v32  ;;  %v8128_v32 = vld [vmem:[%s10913_s1 + $0x15c8] ss:$16 sps:$4 sm:$0xff]  }
 0x2b8   :  { %5702 = vmatpush2.bf16.msra.mxu1 %v8059_v33  ;;  %5662 = vmatprep.subr.bf16.mxu0 %v8064_v34  ;;  %v8131_v33 = vld [vmem:[%s10913_s1 + $0x17c8] ss:$16 sps:$4 sm:$0xff]   ;;  %v8136_v34 = vld [vmem:[%s10913_s1 + $0x15ac] ss:$16 sps:$4 sm:$0xff]  }
 0x2b9   :  { %5703 = vmatprep.subr.bf16.mxu1 %v8067_v37  ;;  %v8139_v37 = vld [vmem:[%s10913_s1 + $0x17ac] ss:$16 sps:$4 sm:$0xff]  }
 0x2bb   :  { %5663 = vmatpush2.bf16.msra.mxu0 %v8062_v38  ;;  %v8134_v38 = vld [vmem:[%s10913_s1 + $0x15a8] ss:$16 sps:$4 sm:$0xff]  }
 0x2bc   :  { %5704 = vmatpush2.bf16.msra.mxu1 %v8065_v49  ;;  %5664 = vmatprep.subr.bf16.mxu0 %v8070_v40  ;;  %v8137_v49 = vld [vmem:[%s10913_s1 + $0x17a8] ss:$16 sps:$4 sm:$0xff]   ;;  %v8142_v40 = vld [vmem:[%s10913_s1 + $0x158c] ss:$16 sps:$4 sm:$0xff]  }
 0x2bd   :  { %5705 = vmatprep.subr.bf16.mxu1 %v8073_v41  ;;  %v8145_v41 = vld [vmem:[%s10913_s1 + $0x178c] ss:$16 sps:$4 sm:$0xff]  }
 0x2bf   :  { %5665 = vmatpush2.bf16.msra.mxu0 %v8068_v2  ;;  %v8140_v2 = vld [vmem:[%s10913_s1 + $0x1588] ss:$16 sps:$4 sm:$0xff]  }
 0x2c0   :  { %5706 = vmatpush2.bf16.msra.mxu1 %v8071_v48  ;;  %5716 = vmatprep.subr.bf16.mxu0 %v8076_v52  ;;  %v8143_v48 = vld [vmem:[%s10913_s1 + $0x1788] ss:$16 sps:$4 sm:$0xff]   ;;  %v8148_v52 = vld [vmem:[%s10913_s1 + $0x156c] ss:$16 sps:$4 sm:$0xff]  }
 0x2c1   :  { %5757 = vmatprep.subr.bf16.mxu1 %v8079_v24  ;;  %v8151_v24 = vld [vmem:[%s10913_s1 + $0x176c] ss:$16 sps:$4 sm:$0xff]  }
 0x2c2   :  { %v5422_v30 = vpop.f32.mrf.mxu0  ;;  %5667 = vmatmul.mubr.bf16.vlgmr.msra.gmra.mxu0 %v9381_v58  ;;  %v8088_v58 = vld [vmem:[%s10913_s1 + $0x14ac] ss:$16 sps:$4 sm:$0xff]  }
 0x2c3   :  { %v5463_v55 = vpop.f32.mrf.mxu1  ;;  %5708 = vmatmul.mubr.bf16.vlgmr.msra.gmra.mxu1 %v9385_v59  ;;  %v5423_v56 = vadd.f32 %v5422_v30, %v10434_v35  ;;  %5717 = vmatpush1.bf16.msra.mxu0 %v8074_v46  ;;  %v8091_v59 = vld [vmem:[%s10913_s1 + $0x16ac] ss:$16 sps:$4 sm:$0xff]   ;;  %v8146_v46 = vld [vmem:[%s10913_s1 + $0x1568] ss:$16 sps:$4 sm:$0xff]  }
 0x2c4   :  { %5758 = vmatpush1.bf16.msra.mxu1 %v8077_v47  ;;  %v5424_v17 = vpop.f32.mrf.mxu0  ;;  %5718 = vmatprep.subr.bf16.mxu0 %v8082_v25  ;;  %v8149_v47 = vld [vmem:[%s10913_s1 + $0x1768] ss:$16 sps:$4 sm:$0xff]   ;;  %v8154_v25 = vld [vmem:[%s10913_s1 + $0x154c] ss:$16 sps:$4 sm:$0xff]  }
 0x2c5   :  { %v5465_v7 = vpop.f32.mrf.mxu1  ;;  %5759 = vmatprep.subr.bf16.mxu1 %v8085_v29  ;;  %v10635_v35 = vadd.f32 %v5463_v55, %v5423_v56  ;;  %v5425_v63 = vadd.f32 %v5424_v17, %v10438_v42  ;;  %5748 = vmatprep.mubr.bf16.mxu0 %v9399_v51  ;;  %v8094_v51 = vld [vmem:[%s10913_s1 + $0x148c] ss:$16 sps:$4 sm:$0xff]   ;;  %v8152_v30 = vld [vmem:[%s10913_s1 + $0x1548] ss:$16 sps:$4 sm:$0xff]  }
 0x2c6   :  { %5789 = vmatprep.mubr.bf16.mxu1 %v9401_v54  ;;  %v5426_v0 = vpop.f32.mrf.mxu0  ;;  %v8097_v54 = vld [vmem:[%s10913_s1 + $0x168c] ss:$16 sps:$4 sm:$0xff]   ;;  %v8155_v55 = vld [vmem:[%s10913_s1 + $0x1748] ss:$16 sps:$4 sm:$0xff]  }
 0x2c7   :  { %v5467_v1 = vpop.f32.mrf.mxu1  ;;  %v10640_v13 = vadd.f32 %v5465_v7, %v5425_v63  ;;  %5719 = vmatpush1.bf16.msra.mxu0 %v8080_v60  ;;  %v8157_v29 = vld [vmem:[%s10913_s1 + $0x174c] ss:$16 sps:$4 sm:$0xff]   ;;  %v8161_v17 = vld [vmem:[%s10913_s1 + $0x1728] ss:$16 sps:$4 sm:$0xff]  }
 0x2c8   :  { %5760 = vmatpush1.bf16.msra.mxu1 %v8083_v16  ;;  %v5427_v4 = vpop.f32.mrf.mxu0  ;;  %5720 = vmatprep.subr.bf16.mxu0 %v8088_v58  ;;  %v8160_v56 = vld [vmem:[%s10913_s1 + $0x152c] ss:$16 sps:$4 sm:$0xff]   ;;  %v8158_v16 = vld [vmem:[%s10913_s1 + $0x1528] ss:$16 sps:$4 sm:$0xff]   ;;  %v5799_v1 = vmax.f32 %v10233_v11, 0.0 }
 0x2c9   :  { %v5468_v42 = vpop.f32.mrf.mxu1  ;;  %5761 = vmatprep.subr.bf16.mxu1 %v8091_v59  ;;  %v8163_v60 = vld [vmem:[%s10913_s1 + $0x172c] ss:$16 sps:$4 sm:$0xff]   ;;  %v8164_v59 = vld [vmem:[%s10913_s1 + $0x1508] ss:$16 sps:$4 sm:$0xff]  }
 0x2ca   :  { %v8166_v7 = vld [vmem:[%s10913_s1 + $0x150c] ss:$16 sps:$4 sm:$0xff]   ;;  %v8167_v63 = vld [vmem:[%s10913_s1 + $0x1708] ss:$16 sps:$4 sm:$0xff]   ;;  %v5803_v4 = vpack.c.bf16 %v5799_v1, %v5799_v1 }
 0x2cb   :  { %5721 = vmatpush1.bf16.msra.mxu0 %v8086_v6  ;;  %v8169_v58 = vld [vmem:[%s10913_s1 + $0x170c] ss:$16 sps:$4 sm:$0xff]  }
 0x2cc   :  { %5762 = vmatpush1.bf16.msra.mxu1 %v8089_v53  ;;  %5722 = vmatprep.subr.bf16.mxu0 %v8094_v51  ;;  %v8170_v0 = vld [vmem:[%s10915_s3 + $0x78] sm:$0xff]   ;;  %v8172_v53 = vld [vmem:[%s10915_s3 + $0x70] sm:$0xff]  }
 0x2cd   :  { %5763 = vmatprep.subr.bf16.mxu1 %v8097_v54  ;;  %v8171_v6 = vld [vmem:[%s10915_s3 + $0x38] sm:$0xff]   ;;  %v8173_v54 = vld [vmem:[%s10915_s3 + $0x30] sm:$0xff]  }
 0x2cf   :  { %5723 = vmatpush1.bf16.msra.mxu0 %v8092_v5 }
 0x2d0   :  { %5764 = vmatpush1.bf16.msra.mxu1 %v8095_v57  ;;  %5724 = vmatprep.subr.bf16.mxu0 %v8100_v39  ;;  %v8174_v39 = vld [vmem:[%s10915_s3 + $0x68] sm:$0xff]  }
 0x2d1   :  { %5765 = vmatprep.subr.bf16.mxu1 %v8103_v44 }
 0x2d3   :  { %5725 = vmatpush1.bf16.msra.mxu0 %v8098_v10 }
 0x2d4   :  { %5766 = vmatpush1.bf16.msra.mxu1 %v8101_v12  ;;  %5726 = vmatprep.subr.bf16.mxu0 %v8106_v14  ;;  %v8176_v14 = vld [vmem:[%s10915_s3 + $0x60] sm:$0xff]  }
 0x2d5   :  { %5767 = vmatprep.subr.bf16.mxu1 %v8109_v36 }
 0x2d7   :  { %5727 = vmatpush1.bf16.msra.mxu0 %v8104_v8 }
 0x2d8   :  { %5768 = vmatpush1.bf16.msra.mxu1 %v8107_v9  ;;  %5728 = vmatprep.subr.bf16.mxu0 %v8112_v62  ;;  %v8186_v9 = vld [vmem:[%s10915_s3 + $0xf8] sm:$0xff]   ;;  %v8188_v62 = vld [vmem:[%s10915_s3 + $0xf0] sm:$0xff]  }
 0x2d9   :  { %5769 = vmatprep.subr.bf16.mxu1 %v8115_v3  ;;  %v8177_v3 = vld [vmem:[%s10915_s3 + $0x20] sm:$0xff]  }
 0x2db   :  { %5729 = vmatpush1.bf16.msra.mxu0 %v8110_v15  ;;  %v8189_v15 = vld [vmem:[%s10915_s3 + $0xb0] sm:$0xff]  }
 0x2dc   :  { %5770 = vmatpush1.bf16.msra.mxu1 %v8113_v18  ;;  %5730 = vmatprep.subr.bf16.mxu0 %v8118_v19  ;;  %v8178_v18 = vld [vmem:[%s10915_s3 + $0x58] sm:$0xff]   ;;  %v8190_v19 = vld [vmem:[%s10915_s3 + $0xe8] sm:$0xff]  }
 0x2dd   :  { %5771 = vmatprep.subr.bf16.mxu1 %v8121_v20  ;;  %v8179_v20 = vld [vmem:[%s10915_s3 + $0x18] sm:$0xff]  }
 0x2df   :  { %5731 = vmatpush1.bf16.msra.mxu0 %v8116_v21  ;;  %v8191_v21 = vld [vmem:[%s10915_s3 + $0xa8] sm:$0xff]  }
 0x2e0   :  { %5772 = vmatpush1.bf16.msra.mxu1 %v8119_v43  ;;  %5732 = vmatprep.subr.bf16.mxu0 %v8124_v22  ;;  %v8180_v43 = vld [vmem:[%s10915_s3 + $0x50] sm:$0xff]   ;;  %v8192_v22 = vld [vmem:[%s10915_s3 + $0xe0] sm:$0xff]  }
 0x2e1   :  { %5773 = vmatprep.subr.bf16.mxu1 %v8127_v23  ;;  %v8181_v23 = vld [vmem:[%s10915_s3 + $0x10] sm:$0xff]  }
 0x2e3   :  { %5733 = vmatpush2.bf16.msra.mxu0 %v8122_v26  ;;  %v8193_v26 = vld [vmem:[%s10915_s3 + $0xa0] sm:$0xff]  }
 0x2e4   :  { %5774 = vmatpush2.bf16.msra.mxu1 %v8125_v27  ;;  %5734 = vmatprep.subr.bf16.mxu0 %v8130_v28  ;;  %v8182_v27 = vld [vmem:[%s10915_s3 + $0x48] sm:$0xff]   ;;  %v8194_v28 = vld [vmem:[%s10915_s3 + $0xd8] sm:$0xff]  }
 0x2e5   :  { %5775 = vmatprep.subr.bf16.mxu1 %v8133_v31  ;;  %v8183_v31 = vld [vmem:[%s10915_s3 + $0x8] sm:$0xff]  }
 0x2e7   :  { %5735 = vmatpush2.bf16.msra.mxu0 %v8128_v32  ;;  %v8195_v32 = vld [vmem:[%s10915_s3 + $0x98] sm:$0xff]  }
 0x2e8   :  { %5776 = vmatpush2.bf16.msra.mxu1 %v8131_v33  ;;  %5736 = vmatprep.subr.bf16.mxu0 %v8136_v34  ;;  %v8184_v33 = vld [vmem:[%s10915_s3 + $0x40] sm:$0xff]  }
 0x2e9   :  { %5777 = vmatprep.subr.bf16.mxu1 %v8139_v37  ;;  %v8185_v34 = vld [vmem:[%s10915_s3] sm:$0xff]   ;;  %v5798_v37 = vmax.f32 %v10228_v61, 0.0  ;;  %v8198_v61 = vld [vmem:[%s10915_s3 + $0xc8] sm:$0xff]  }
 0x2eb   :  { %5737 = vmatpush2.bf16.msra.mxu0 %v8134_v38  ;;  %v5802_v38 = vpack.c.bf16 %v5798_v37, %v5798_v37 }
 0x2ec   :  { %5778 = vmatpush2.bf16.msra.mxu1 %v8137_v49  ;;  %5738 = vmatprep.subr.bf16.mxu0 %v8142_v40  ;;  %v8196_v49 = vld [vmem:[%s10915_s3 + $0xd0] sm:$0xff]  }
 0x2ed   :  { %5779 = vmatprep.subr.bf16.mxu1 %v8145_v41  ;;  %v8197_v40 = vld [vmem:[%s10915_s3 + $0x90] sm:$0xff]  }
 0x2ef   :  { %5739 = vmatpush2.bf16.msra.mxu0 %v8140_v2 }
 0x2f0   :  { %5780 = vmatpush2.bf16.msra.mxu1 %v8143_v48  ;;  %5740 = vmatprep.subr.bf16.mxu0 %v8148_v52 }
 0x2f1   :  { %5781 = vmatprep.subr.bf16.mxu1 %v8151_v24 }
 0x2f3   :  { %5741 = vmatpush2.bf16.msra.mxu0 %v8146_v46 }
 0x2f4   :  { %5782 = vmatpush2.bf16.msra.mxu1 %v8149_v47  ;;  %5742 = vmatprep.subr.bf16.mxu0 %v8154_v25  ;;  %v8199_v25 = vld [vmem:[%s10915_s3 + $0x88] sm:$0xff]  }
 0x2f5   :  { %5783 = vmatprep.subr.bf16.mxu1 %v8157_v29 }
 0x2f7   :  { %5743 = vmatpush2.bf16.msra.mxu0 %v8152_v30 }
 0x2f8   :  { %5784 = vmatpush2.bf16.msra.mxu1 %v8155_v55  ;;  %5744 = vmatprep.subr.bf16.mxu0 %v8160_v56 }
 0x2f9   :  { %5785 = vmatprep.subr.bf16.mxu1 %v8163_v60 }
 0x2fb   :  { %5745 = vmatpush2.bf16.msra.mxu0 %v8158_v16  ;;  %v8200_v16 = vld [vmem:[%s10915_s3 + $0xc0] sm:$0xff]  }
 0x2fc   :  { %5786 = vmatpush2.bf16.msra.mxu1 %v8161_v17  ;;  %5746 = vmatprep.subr.bf16.mxu0 %v8166_v7  ;;  %v8201_v17 = vld [vmem:[%s10915_s3 + $0x80] sm:$0xff]  }
 0x2fd   :  { %5787 = vmatprep.subr.bf16.mxu1 %v8169_v58 }
 0x2ff   :  { %5747 = vmatpush2.bf16.msra.mxu0 %v8164_v59 }
 0x300   :  { %5788 = vmatpush2.bf16.msra.mxu1 %v8167_v63  ;;  %6966 = vmatprep.subr.bf16.mxu0 %v8170_v0 }
 0x301   :  { %6988 = vmatprep.subr.bf16.mxu1 %v8186_v9 }
 0x302   :  { %v5504_v42 = vpop.f32.mrf.mxu0  ;;  %5749 = vmatmul.mubr.bf16.vlgmr.msra.gmra.mxu0 %v9595_v45 }
 0x303   :  { %v5545_v51 = vpop.f32.mrf.mxu1  ;;  %5790 = vmatmul.mubr.bf16.vlgmr.msra.gmra.mxu1 %v9599_v50  ;;  %v5505_v11 = vadd.f32 %v5504_v42, %v10635_v35  ;;  %6967 = vmatpush3.bf16.msra.mxu0 %v8171_v6  ;;  %v8175_v35 = vld [vmem:[%s10915_s3 + $0x28] sm:$0xff]  }
 0x304   :  { %6101 = vmatprep.mubr.bf16.mxu0 %v5803_v4  ;;  %v5506_v5 = vpop.f32.mrf.mxu0  ;;  %6968 = vmatprep.subr.bf16.mxu0 %v8172_v53 }
 0x305   :  { %v5547_v57 = vpop.f32.mrf.mxu1  ;;  %v5546_v44 = vadd.f32 %v5545_v51, %v5505_v11  ;;  %v5507_v45 = vadd.f32 %v5506_v5, %v10640_v13  ;;  %v8187_v13 = vld [vmem:[%s10915_s3 + $0xb8] sm:$0xff]  }
 0x306   :  { %v5508_v10 = vpop.f32.mrf.mxu0  ;;  %6989 = vmatpush3.bf16.msra.mxu1 %v8187_v13 }
 0x307   :  { %v5549_v50 = vpop.f32.mrf.mxu1  ;;  %v5548_v12 = vadd.f32 %v5547_v57, %v5507_v45  ;;  %6969 = vmatpush3.bf16.msra.mxu0 %v8173_v54  ;;  %6990 = vmatprep.subr.bf16.mxu1 %v8188_v62 }
 0x308   :  { %v5509_v36 = vpop.f32.mrf.mxu0  ;;  %6970 = vmatprep.subr.bf16.mxu0 %v8174_v39 }
 0x309   :  { %v5550_v8 = vpop.f32.mrf.mxu1 }
 0x30a   :  { %6991 = vmatpush3.bf16.msra.mxu1 %v8189_v15 }
 0x30b   :  { %6971 = vmatpush3.bf16.msra.mxu0 %v8175_v35  ;;  %6992 = vmatprep.subr.bf16.mxu1 %v8190_v19 }
 0x30c   :  { %6972 = vmatprep.subr.bf16.mxu0 %v8176_v14 }
 0x30e   :  { %6993 = vmatpush3.bf16.msra.mxu1 %v8191_v21  ;;  %v6933_v21 = vld [vmem:[%s10916_s4] ss:$0 sm:$0xff] }
 0x30f   :  { %6973 = vmatpush3.bf16.msra.mxu0 %v8177_v3  ;;  %6994 = vmatprep.subr.bf16.mxu1 %v8192_v22 }
 0x310   :  { %6974 = vmatprep.subr.bf16.mxu0 %v8178_v18 }
 0x312   :  { %6995 = vmatpush3.bf16.msra.mxu1 %v8193_v26 }
 0x313   :  { %6975 = vmatpush3.bf16.msra.mxu0 %v8179_v20  ;;  %6996 = vmatprep.subr.bf16.mxu1 %v8194_v28 }
 0x314   :  { %6976 = vmatprep.subr.bf16.mxu0 %v8180_v43 }
 0x316   :  { %6997 = vmatpush3.bf16.msra.mxu1 %v8195_v32 }
 0x317   :  { %6977 = vmatpush3.bf16.msra.mxu0 %v8181_v23  ;;  %6998 = vmatprep.subr.bf16.mxu1 %v8196_v49 }
 0x318   :  { %6978 = vmatprep.subr.bf16.mxu0 %v8182_v27 }
 0x31a   :  { %6999 = vmatpush3.bf16.msra.mxu1 %v8197_v40 }
 0x31b   :  { %6979 = vmatpush3.bf16.msra.mxu0 %v8183_v31  ;;  %7000 = vmatprep.subr.bf16.mxu1 %v8198_v61 }
 0x31c   :  { %6980 = vmatprep.subr.bf16.mxu0 %v8184_v33 }
 0x31e   :  { %7001 = vmatpush3.bf16.msra.mxu1 %v8199_v25 }
 0x31f   :  { %6981 = vmatpush3.bf16.msra.mxu0 %v8185_v34  ;;  %7002 = vmatprep.subr.bf16.mxu1 %v8200_v16 }
 0x322   :  { %6102 = vmatmul.mubr.bf16.vlgmr.msra.gmra.mxu0 %v5802_v38  ;;  %7003 = vmatpush3.bf16.msra.mxu1 %v8201_v17 }
 0x342   :  { %v5586_v41 = vpop.f32.mrf.mxu0 }
 0x343   :  { %v5627_v2 = vpop.f32.mrf.mxu1  ;;  %v5587_v48 = vadd.f32 %v5586_v41, %v5546_v44 }
 0x344   :  { %v5588_v52 = vpop.f32.mrf.mxu0 }
 0x345   :  { %v5629_v24 = vpop.f32.mrf.mxu1  ;;  %v5628_v46 = vadd.f32 %v5627_v2, %v5587_v48  ;;  %v5589_v47 = vadd.f32 %v5588_v52, %v5548_v12 }
 0x346   :  { %v5590_v29 = vpop.f32.mrf.mxu0 }
 0x347   :  { %v5631_v30 = vpop.f32.mrf.mxu1  ;;  %v5630_v55 = vadd.f32 %v5629_v24, %v5589_v47 }
 0x348   :  { %v5591_v56 = vpop.f32.mrf.mxu0 }
 0x349   :  { %v5632_v60 = vpop.f32.mrf.mxu1 }
 0x382   :  { %v5668_v7 = vpop.f32.mrf.mxu0 }
 0x383   :  { %v5709_v58 = vpop.f32.mrf.mxu1  ;;  %v5669_v59 = vadd.f32 %v5668_v7, %v5628_v46 }
 0x384   :  { %v5670_v63 = vpop.f32.mrf.mxu0 }
 0x385   :  { %v5711_v0 = vpop.f32.mrf.mxu1  ;;  %v5710_v1 = vadd.f32 %v5709_v58, %v5669_v59  ;;  %v5671_v51 = vadd.f32 %v5670_v63, %v5630_v55 }
 0x386   :  { %v5672_v6 = vpop.f32.mrf.mxu0 }
 0x387   :  { %v5713_v53 = vpop.f32.mrf.mxu1  ;;  %v5712_v5 = vadd.f32 %v5711_v0, %v5671_v51 }
 0x388   :  { %v5673_v4 = vpop.f32.mrf.mxu0 }
 0x389   :  { %v5714_v42 = vpop.f32.mrf.mxu1 }
 0x3c2   :  { %v5750_v11 = vpop.f32.mrf.mxu0 }
 0x3c3   :  { %v5791_v54 = vpop.f32.mrf.mxu1  ;;  %v5751_v57 = vadd.f32 %v5750_v11, %v5710_v1 }
 0x3c4   :  { %v5752_v39 = vpop.f32.mrf.mxu0 }
 0x3c5   :  { %v5793_v44 = vpop.f32.mrf.mxu1  ;;  %v5792_v45 = vadd.f32 %v5791_v54, %v5751_v57  ;;  %v5753_v10 = vadd.f32 %v5752_v39, %v5712_v5 }
 0x3c6   :  { %v5754_v50 = vpop.f32.mrf.mxu0 }
 0x3c7   :  { %v5795_v12 = vpop.f32.mrf.mxu1  ;;  %v5794_v35 = vadd.f32 %v5793_v44, %v5753_v10  ;;  %v5800_v14 = vmax.f32 %v5792_v45, 0.0 }
 0x3c8   :  { %v5755_v36 = vpop.f32.mrf.mxu0 }
 0x3c9   :  { %v5796_v8 = vpop.f32.mrf.mxu1  ;;  %v5801_v9 = vmax.f32 %v5794_v35, 0.0  ;;  %v5804_v62 = vpack.c.bf16 %v5800_v14, %v5800_v14 }
 0x3cb   :  { %v5805_v13 = vpack.c.bf16 %v5801_v9, %v5801_v9 }
 0x3cd   :  { %6141 = vmatprep.mubr.bf16.mxu1 %v5805_v13 }
 0x3ce   :  { %6142 = vmatmul.mubr.bf16.vlgmr.msra.gmra.mxu1 %v5804_v62 }
 0x3e2   :  { %v6982_v3 = vpop.f32.mrf.mxu0 }
 0x3e4   :  { %v6983_v15 = vpop.f32.mrf.mxu0 }
 0x3e5   :  { %v6984_v18 = vadd.f32 %v6983_v15, %v6982_v3 }
 0x3e6   :  { %v6985_v19 = vpop.f32.mrf.mxu0 }
 0x3e7   :  { %v6104_v23 = vadd.f32 %v6984_v18, %v6933_v21 }
 0x3e8   :  { %v6986_v20 = vpop.f32.mrf.mxu0 }
 0x48e   :  { %v7004_v43 = vpop.f32.mrf.mxu1 }
 0x490   :  { %v7005_v22 = vpop.f32.mrf.mxu1 }
 0x491   :  { %v7006_v26 = vadd.f32 %v7005_v22, %v7004_v43 }
 0x492   :  { %v7007_v27 = vpop.f32.mrf.mxu1 }
 0x493   :  { %v6144_v28 = vadd.f32 %v7006_v26, %v6104_v23 }
 0x494   :  { %v7008_v31 = vpop.f32.mrf.mxu1 }
 0x495   :  { %6150 = vst.msk [vmem:[#allocation2] sm:$0x3] %vm6149_vm0, %v6144_v28 }
 0x496   :  { %8214 = shalt.err (!%p8211_p4)
}
 0x497   :  { %6160 = dma.vmem_to_hbm [thread:$0]  %s6158_s9, 32, %s10917_s5, [#allocation3]  }
 0x498   :  { %8223 = dma.done.wait [#allocation3], 32  }
 0x499   :  { %8224 = vsyncadd [#allocation3], 4294967264 }
 0x49a   :  { %6164 = vsyncpa [#allocation3], 1 }

</bundles_post_ra>
